<compile_context>
chip_gen: v5e
topology: v5e:2x2
jax: 0.10.0
libtpu: 0.0.40
codegen_flags: <defaults>
</compile_context>

<pallas_src>
import numpy as np

import jax
import jax.numpy as jnp
from jax.experimental import pallas as pl
from jax.experimental.pallas import tpu as pltpu

BN_EPS = 1e-5

# Stage-1 spatial grid: 32x32 flat; the 28x28 image is embedded at offset
# (1, 1) so conv1 outputs land at flat positions i*32 + j, i,j in [0, 28).
_L1 = 32 * 32            # 1024
_IN1 = _L1 + 128         # tail zeros so every 3x3 tap slice stays in range
# Stage-2 spatial grid: 16x16 flat; the pooled 14x14 map is embedded at (1, 1).
_L2 = 16 * 16            # 256
_IN2 = _L2 + 2 * 16 + 2  # 290: conv2 tap slices read up to +34 lanes


def _build_consts():
    # pool1[p, r]: avg-pool(2) of the 28x28 conv1 output *and* zero padding of
    # the pooled 14x14 map into the 16x16 stage-2 grid, as one matrix.
    pool1 = np.zeros((_L1, _IN2), np.float32)
    for a in range(1, 15):
        for b in range(1, 15):
            r = a * 16 + b
            for i in (2 * (a - 1), 2 * (a - 1) + 1):
                for j in (2 * (b - 1), 2 * (b - 1) + 1):
                    pool1[i * 32 + j, r] = 0.25
    # Valid-position masks for the BN batch statistics (exclude border junk).
    m1 = np.zeros((1, 1, _L1), np.float32)
    for i in range(28):
        m1[0, 0, i * 32:i * 32 + 28] = 1.0
    m2 = np.zeros((1, 1, _L2), np.float32)
    for u in range(14):
        m2[0, 0, u * 16:u * 16 + 14] = 1.0
    # p2[q, s*7+t]: avg-pool(2) of the 14x14 conv2 output to the 7x7 map.
    p2 = np.zeros((_L2, 49), np.float32)
    for s in range(7):
        for t in range(7):
            for du in (0, 1):
                for dv in (0, 1):
                    p2[(2 * s + du) * 16 + (2 * t + dv), s * 7 + t] = 0.25
    return pool1, m1, m2, p2


_POOL1, _M1, _M2, _P2 = _build_consts()


# ---------------------------------------------------------------------------
# Pallas kernel (whole network, single invocation)
# ---------------------------------------------------------------------------
def _bmm(a, b):
    """(B, M, K) @ (B, K, N) -> (B, M, N), f32 accumulation."""
    return jax.lax.dot_general(
        a, b,
        dimension_numbers=(((2,), (1,)), ((0,), (0,))),
        preferred_element_type=jnp.float32)


def lenet5_bn_kernel(x_ref, w1_ref, g1_ref, b1_ref, m1_ref, pool1_ref,
                     w2_ref, g2_ref, b2_ref, m2_ref,
                     gfc1_ref, bfc1_ref, wfc2_ref, bfc2_ref,
                     wfc3_ref, bfc3_ref, o_ref):
    B = x_ref.shape[0]
    f32 = jnp.float32

    # ---- Conv1 (1->6, 3x3, pad 1): 9 shifted taps on the flat 32x32 grid ----
    # Cin == 1, so each tap is a broadcast multiply-accumulate (pure VPU).
    out1 = jnp.zeros((B, 6, _L1), f32)
    for dy in range(3):
        for dx in range(3):
            off = dy * 32 + dx
            patch = x_ref[:, :, off:off + _L1]            # (B, 1, L1)
            out1 = out1 + w1_ref[dy * 3 + dx] * patch      # (6,1)*(B,1,L1)

    # ---- BatchNorm(6), training-mode stats over the valid 28x28 area --------
    # (conv bias omitted: cancelled exactly by the mean subtraction)
    msk1 = m1_ref[...]                                     # (1, 1, L1)
    inv_n1 = 1.0 / float(B * 28 * 28)
    s = jnp.sum(out1 * msk1, axis=2, keepdims=True)        # (B, 6, 1)
    mean1 = jnp.sum(s, axis=0, keepdims=True) * inv_n1     # (1, 6, 1)
    d = (out1 - mean1) * msk1
    v = jnp.sum(d * d, axis=2, keepdims=True)
    var1 = jnp.sum(v, axis=0, keepdims=True) * inv_n1      # biased variance
    h1 = (out1 - mean1) * jax.lax.rsqrt(var1 + BN_EPS)
    h1 = jnp.maximum(h1 * g1_ref[...] + b1_ref[...], 0.0)  # (B, 6, L1)

    # ---- AvgPool(2) fused with conv2's zero padding: one batched matmul -----
    pool1 = jnp.broadcast_to(pool1_ref[...], (B, _L1, _IN2))
    in2 = _bmm(h1, pool1)                                  # (B, 6, 290)

    # ---- Conv2 (6->16, 3x3, pad 1): 9 shifted-tap batched matmuls (MXU) -----
    out2 = jnp.zeros((B, 16, _L2), f32)
    for dy in range(3):
        for dx in range(3):
            off = dy * 16 + dx
            patch = in2[:, :, off:off + _L2]               # (B, 6, L2)
            wt = jnp.broadcast_to(w2_ref[dy * 3 + dx], (B, 16, 6))
            out2 = out2 + _bmm(wt, patch)                  # (B, 16, L2)

    # ---- BatchNorm(16), training-mode stats over the valid 14x14 area -------
    msk2 = m2_ref[...]
    inv_n2 = 1.0 / float(B * 14 * 14)
    s = jnp.sum(out2 * msk2, axis=2, keepdims=True)
    mean2 = jnp.sum(s, axis=0, keepdims=True) * inv_n2
    d = (out2 - mean2) * msk2
    v = jnp.sum(d * d, axis=2, keepdims=True)
    var2 = jnp.sum(v, axis=0, keepdims=True) * inv_n2
    h2 = (out2 - mean2) * jax.lax.rsqrt(var2 + BN_EPS)
    h2 = jnp.maximum(h2 * g2_ref[...] + b2_ref[...], 0.0)  # (B, 16, L2)

    # ---- AvgPool(2) + NCHW flatten + fc1 folded into G (per input channel) --
    hf = jnp.zeros((B, 1, 120), f32)
    for c in range(16):
        gc = jnp.broadcast_to(gfc1_ref[c], (B, _L2, 120))  # (B, 256, 120)
        hf = hf + _bmm(h2[:, c:c + 1, :], gc)              # (B, 1, 120)
    hf = jnp.maximum(hf + bfc1_ref[...], 0.0)

    # ---- fc2 + ReLU, fc3 (intermediates never leave VMEM) -------------------
    w2fc = jnp.broadcast_to(wfc2_ref[...], (B, 120, 84))
    hf = jnp.maximum(_bmm(hf, w2fc) + bfc2_ref[...], 0.0)  # (B, 1, 84)
    ncls = o_ref.shape[2]
    w3fc = jnp.broadcast_to(wfc3_ref[...], (B, 84, ncls))
    o_ref[...] = _bmm(hf, w3fc) + bfc3_ref[...]            # (B, 1, ncls)


# ---------------------------------------------------------------------------
# Wrapper: trace-time weight re-layouts + one pallas_call
# ---------------------------------------------------------------------------
def _full(shape):
    zeros = (0,) * len(shape)
    return pl.BlockSpec(shape, lambda i: zeros)


def lenet5_bn_forward(params, x_nchw):
    f32 = jnp.float32
    N = x_nchw.shape[0]
    ncls = params["fc3_w"].shape[0]

    # Input NCHW (N,1,28,28) -> flat padded 32x32 grid (+ tail zeros).
    x = x_nchw.astype(f32)[:, 0]                           # (N, 28, 28)
    xg = jnp.pad(x, ((0, 0), (1, 3), (1, 3)))              # (N, 32, 32)
    x_flat = jnp.pad(xg.reshape(N, 1, _L1),
                     ((0, 0), (0, 0), (0, _IN1 - _L1)))    # (N, 1, 1152)

    # Conv weights -> per-tap matrices [kh*3+kw, Cout, Cin].  Conv biases are
    # intentionally dropped (training-mode BN mean subtraction cancels them).
    w1t = jnp.transpose(params["conv1_w"], (2, 3, 0, 1)).reshape(9, 6, 1)
    w2t = jnp.transpose(params["conv2_w"], (2, 3, 0, 1)).reshape(9, 16, 6)

    g1 = params["bn1_g"].reshape(1, 6, 1)
    b1 = params["bn1_b"].reshape(1, 6, 1)
    g2 = params["bn2_g"].reshape(1, 16, 1)
    b2 = params["bn2_b"].reshape(1, 16, 1)

    # Fold AvgPool(2) + PyTorch NCHW flatten into fc1's weight (trace-time):
    #   G[c, q, k] = sum_{s,t} P2[q, s*7+t] * fc1_w[k, c*49 + s*7 + t]
    w1fc = params["fc1_w"].reshape(120, 16, 49)
    G = jnp.einsum("qs,kcs->cqk", jnp.asarray(_P2), w1fc)  # (16, 256, 120)

    bfc1 = params["fc1_b"].reshape(1, 1, 120)
    wfc2 = params["fc2_w"].T                               # (120, 84)
    bfc2 = params["fc2_b"].reshape(1, 1, 84)
    wfc3 = params["fc3_w"].T                               # (84, ncls)
    bfc3 = params["fc3_b"].reshape(1, 1, ncls)

    operands = (
        x_flat, w1t, g1, b1, jnp.asarray(_M1), jnp.asarray(_POOL1),
        w2t, g2, b2, jnp.asarray(_M2),
        G, bfc1, wfc2, bfc2, wfc3, bfc3,
    )

    out = pl.pallas_call(
        lenet5_bn_kernel,
        out_shape=jax.ShapeDtypeStruct((N, 1, ncls), f32),
        grid=(1,),
        in_specs=[_full(op.shape) for op in operands],
        out_specs=_full((N, 1, ncls)),
        compiler_params=pltpu.CompilerParams(
            dimension_semantics=("arbitrary",),
            vmem_limit_bytes=32 * 1024 * 1024),
    )(*operands)

    return out[:, 0, :]                                    # (N, ncls)


# ---------------------------------------------------------------------------
# Parameters (PyTorch-like layout)
# ---------------------------------------------------------------------------
def init_params(key, output_classes=10):
    ks = jax.random.split(key, 10)
    s = 0.1

    def rnd(k, shape):
        return s * jax.random.normal(k, shape, jnp.float32)

    return {
        "conv1_w": rnd(ks[0], (6, 1, 3, 3)),
        "conv1_b": rnd(ks[1], (6,)),      # unused: cancelled by train-mode BN
        "bn1_g": jnp.ones((6,), jnp.float32),
        "bn1_b": jnp.zeros((6,), jnp.float32),
        "conv2_w": rnd(ks[2], (16, 6, 3, 3)),
        "conv2_b": rnd(ks[3], (16,)),     # unused: cancelled by train-mode BN
        "bn2_g": jnp.ones((16,), jnp.float32),
        "bn2_b": jnp.zeros((16,), jnp.float32),
        "fc1_w": rnd(ks[4], (120, 16 * 7 * 7)),   # PyTorch (out, in)
        "fc1_b": rnd(ks[5], (120,)),
        "fc2_w": rnd(ks[6], (84, 120)),
        "fc2_b": rnd(ks[7], (84,)),
        "fc3_w": rnd(ks[8], (output_classes, 84)),
        "fc3_b": rnd(ks[9], (output_classes,)),
    }


if __name__ == "__main__":
    # Spatial size must be 28 (fc1 expects 16 * 7 * 7 inputs); small batch of 2.
    x = jax.random.normal(jax.random.PRNGKey(0), (2, 1, 28, 28), jnp.float32)
    params = init_params(jax.random.PRNGKey(1), output_classes=10)

    out = jax.jit(lenet5_bn_forward)(params, x)
    jax.block_until_ready(out)
    assert out.shape == (2, 10) and out.dtype == jnp.float32
    assert bool(jnp.all(jnp.isfinite(out)))
    print("KERNEL_OK")
</pallas_src>

<mosaic_0001>
module attributes {stable_mosaic.version = 11 : i64} {
  func.func @lenet5_bn_kernel(%arg0: i32, %arg1: memref<2x1x1152xf32, #tpu.memory_space<vmem>>, %arg2: memref<9x6x1xf32, #tpu.memory_space<vmem>>, %arg3: memref<1x6x1xf32, #tpu.memory_space<vmem>>, %arg4: memref<1x6x1xf32, #tpu.memory_space<vmem>>, %arg5: memref<1x1x1024xf32, #tpu.memory_space<vmem>>, %arg6: memref<1024x290xf32, #tpu.memory_space<vmem>>, %arg7: memref<9x16x6xf32, #tpu.memory_space<vmem>>, %arg8: memref<1x16x1xf32, #tpu.memory_space<vmem>>, %arg9: memref<1x16x1xf32, #tpu.memory_space<vmem>>, %arg10: memref<1x1x256xf32, #tpu.memory_space<vmem>>, %arg11: memref<16x256x120xf32, #tpu.memory_space<vmem>>, %arg12: memref<1x1x120xf32, #tpu.memory_space<vmem>>, %arg13: memref<120x84xf32, #tpu.memory_space<vmem>>, %arg14: memref<1x1x84xf32, #tpu.memory_space<vmem>>, %arg15: memref<84x10xf32, #tpu.memory_space<vmem>>, %arg16: memref<1x1x10xf32, #tpu.memory_space<vmem>>, %arg17: memref<2x1x10xf32, #tpu.memory_space<vmem>>) attributes {dimension_semantics = [#tpu.dimension_semantics<arbitrary>], iteration_bounds = array<i64: 1>, scalar_prefetch = 0 : i64, scratch_operands = 0 : i64, tpu.core_type = #tpu.core_type<tc>, window_params = [{pipeline_mode = #tpu.pipeline_mode<synchronous>, transform_indices = @transform_0, window_bounds = array<i64: 2, 1, 1152>}, {pipeline_mode = #tpu.pipeline_mode<synchronous>, transform_indices = @transform_1, window_bounds = array<i64: 9, 6, 1>}, {pipeline_mode = #tpu.pipeline_mode<synchronous>, transform_indices = @transform_2, window_bounds = array<i64: 1, 6, 1>}, {pipeline_mode = #tpu.pipeline_mode<synchronous>, transform_indices = @transform_3, window_bounds = array<i64: 1, 6, 1>}, {pipeline_mode = #tpu.pipeline_mode<synchronous>, transform_indices = @transform_4, window_bounds = array<i64: 1, 1, 1024>}, {pipeline_mode = #tpu.pipeline_mode<synchronous>, transform_indices = @transform_5, window_bounds = array<i64: 1024, 290>}, {pipeline_mode = #tpu.pipeline_mode<synchronous>, transform_indices = @transform_6, window_bounds = array<i64: 9, 16, 6>}, {pipeline_mode = #tpu.pipeline_mode<synchronous>, transform_indices = @transform_7, window_bounds = array<i64: 1, 16, 1>}, {pipeline_mode = #tpu.pipeline_mode<synchronous>, transform_indices = @transform_8, window_bounds = array<i64: 1, 16, 1>}, {pipeline_mode = #tpu.pipeline_mode<synchronous>, transform_indices = @transform_9, window_bounds = array<i64: 1, 1, 256>}, {pipeline_mode = #tpu.pipeline_mode<synchronous>, transform_indices = @transform_10, window_bounds = array<i64: 16, 256, 120>}, {pipeline_mode = #tpu.pipeline_mode<synchronous>, transform_indices = @transform_11, window_bounds = array<i64: 1, 1, 120>}, {pipeline_mode = #tpu.pipeline_mode<synchronous>, transform_indices = @transform_12, window_bounds = array<i64: 120, 84>}, {pipeline_mode = #tpu.pipeline_mode<synchronous>, transform_indices = @transform_13, window_bounds = array<i64: 1, 1, 84>}, {pipeline_mode = #tpu.pipeline_mode<synchronous>, transform_indices = @transform_14, window_bounds = array<i64: 84, 10>}, {pipeline_mode = #tpu.pipeline_mode<synchronous>, transform_indices = @transform_15, window_bounds = array<i64: 1, 1, 10>}, {pipeline_mode = #tpu.pipeline_mode<synchronous>, transform_indices = @transform_16, window_bounds = array<i64: 2, 1, 10>}]} {
    %cst = arith.constant 0.000000e+00 : f32
    %0 = vector.broadcast %cst : f32 to vector<2x6x1024xf32>
    %c0 = arith.constant 0 : index
    %c0_0 = arith.constant 0 : index
    %c0_1 = arith.constant 0 : index
    %1 = vector.load %arg1[%c0, %c0_0, %c0_1] : memref<2x1x1152xf32, #tpu.memory_space<vmem>>, vector<2x1x1024xf32>
    %c0_2 = arith.constant 0 : index
    %c0_3 = arith.constant 0 : index
    %c0_4 = arith.constant 0 : index
    %2 = vector.load %arg2[%c0_2, %c0_3, %c0_4] : memref<9x6x1xf32, #tpu.memory_space<vmem>>, vector<1x6x1xf32>
    %3 = vector.shape_cast %2 : vector<1x6x1xf32> to vector<6x1xf32>
    %4 = vector.shape_cast %3 : vector<6x1xf32> to vector<1x6x1xf32>
    %5 = vector.broadcast %4 : vector<1x6x1xf32> to vector<2x6x1024xf32>
    %6 = vector.broadcast %1 : vector<2x1x1024xf32> to vector<2x6x1024xf32>
    %7 = arith.mulf %5, %6 : vector<2x6x1024xf32>
    %8 = arith.addf %0, %7 : vector<2x6x1024xf32>
    %c0_5 = arith.constant 0 : index
    %c0_6 = arith.constant 0 : index
    %c1 = arith.constant 1 : index
    %9 = vector.load %arg1[%c0_5, %c0_6, %c1] : memref<2x1x1152xf32, #tpu.memory_space<vmem>>, vector<2x1x1024xf32>
    %c1_7 = arith.constant 1 : index
    %c0_8 = arith.constant 0 : index
    %c0_9 = arith.constant 0 : index
    %10 = vector.load %arg2[%c1_7, %c0_8, %c0_9] : memref<9x6x1xf32, #tpu.memory_space<vmem>>, vector<1x6x1xf32>
    %11 = vector.shape_cast %10 : vector<1x6x1xf32> to vector<6x1xf32>
    %12 = vector.shape_cast %11 : vector<6x1xf32> to vector<1x6x1xf32>
    %13 = vector.broadcast %12 : vector<1x6x1xf32> to vector<2x6x1024xf32>
    %14 = vector.broadcast %9 : vector<2x1x1024xf32> to vector<2x6x1024xf32>
    %15 = arith.mulf %13, %14 : vector<2x6x1024xf32>
    %16 = arith.addf %8, %15 : vector<2x6x1024xf32>
    %c0_10 = arith.constant 0 : index
    %c0_11 = arith.constant 0 : index
    %c2 = arith.constant 2 : index
    %17 = vector.load %arg1[%c0_10, %c0_11, %c2] : memref<2x1x1152xf32, #tpu.memory_space<vmem>>, vector<2x1x1024xf32>
    %c2_12 = arith.constant 2 : index
    %c0_13 = arith.constant 0 : index
    %c0_14 = arith.constant 0 : index
    %18 = vector.load %arg2[%c2_12, %c0_13, %c0_14] : memref<9x6x1xf32, #tpu.memory_space<vmem>>, vector<1x6x1xf32>
    %19 = vector.shape_cast %18 : vector<1x6x1xf32> to vector<6x1xf32>
    %20 = vector.shape_cast %19 : vector<6x1xf32> to vector<1x6x1xf32>
    %21 = vector.broadcast %20 : vector<1x6x1xf32> to vector<2x6x1024xf32>
    %22 = vector.broadcast %17 : vector<2x1x1024xf32> to vector<2x6x1024xf32>
    %23 = arith.mulf %21, %22 : vector<2x6x1024xf32>
    %24 = arith.addf %16, %23 : vector<2x6x1024xf32>
    %c0_15 = arith.constant 0 : index
    %c0_16 = arith.constant 0 : index
    %c32 = arith.constant 32 : index
    %25 = vector.load %arg1[%c0_15, %c0_16, %c32] : memref<2x1x1152xf32, #tpu.memory_space<vmem>>, vector<2x1x1024xf32>
    %c3 = arith.constant 3 : index
    %c0_17 = arith.constant 0 : index
    %c0_18 = arith.constant 0 : index
    %26 = vector.load %arg2[%c3, %c0_17, %c0_18] : memref<9x6x1xf32, #tpu.memory_space<vmem>>, vector<1x6x1xf32>
    %27 = vector.shape_cast %26 : vector<1x6x1xf32> to vector<6x1xf32>
    %28 = vector.shape_cast %27 : vector<6x1xf32> to vector<1x6x1xf32>
    %29 = vector.broadcast %28 : vector<1x6x1xf32> to vector<2x6x1024xf32>
    %30 = vector.broadcast %25 : vector<2x1x1024xf32> to vector<2x6x1024xf32>
    %31 = arith.mulf %29, %30 : vector<2x6x1024xf32>
    %32 = arith.addf %24, %31 : vector<2x6x1024xf32>
    %c0_19 = arith.constant 0 : index
    %c0_20 = arith.constant 0 : index
    %c33 = arith.constant 33 : index
    %33 = vector.load %arg1[%c0_19, %c0_20, %c33] : memref<2x1x1152xf32, #tpu.memory_space<vmem>>, vector<2x1x1024xf32>
    %c4 = arith.constant 4 : index
    %c0_21 = arith.constant 0 : index
    %c0_22 = arith.constant 0 : index
    %34 = vector.load %arg2[%c4, %c0_21, %c0_22] : memref<9x6x1xf32, #tpu.memory_space<vmem>>, vector<1x6x1xf32>
    %35 = vector.shape_cast %34 : vector<1x6x1xf32> to vector<6x1xf32>
    %36 = vector.shape_cast %35 : vector<6x1xf32> to vector<1x6x1xf32>
    %37 = vector.broadcast %36 : vector<1x6x1xf32> to vector<2x6x1024xf32>
    %38 = vector.broadcast %33 : vector<2x1x1024xf32> to vector<2x6x1024xf32>
    %39 = arith.mulf %37, %38 : vector<2x6x1024xf32>
    %40 = arith.addf %32, %39 : vector<2x6x1024xf32>
    %c0_23 = arith.constant 0 : index
    %c0_24 = arith.constant 0 : index
    %c34 = arith.constant 34 : index
    %41 = vector.load %arg1[%c0_23, %c0_24, %c34] : memref<2x1x1152xf32, #tpu.memory_space<vmem>>, vector<2x1x1024xf32>
    %c5 = arith.constant 5 : index
    %c0_25 = arith.constant 0 : index
    %c0_26 = arith.constant 0 : index
    %42 = vector.load %arg2[%c5, %c0_25, %c0_26] : memref<9x6x1xf32, #tpu.memory_space<vmem>>, vector<1x6x1xf32>
    %43 = vector.shape_cast %42 : vector<1x6x1xf32> to vector<6x1xf32>
    %44 = vector.shape_cast %43 : vector<6x1xf32> to vector<1x6x1xf32>
    %45 = vector.broadcast %44 : vector<1x6x1xf32> to vector<2x6x1024xf32>
    %46 = vector.broadcast %41 : vector<2x1x1024xf32> to vector<2x6x1024xf32>
    %47 = arith.mulf %45, %46 : vector<2x6x1024xf32>
    %48 = arith.addf %40, %47 : vector<2x6x1024xf32>
    %c0_27 = arith.constant 0 : index
    %c0_28 = arith.constant 0 : index
    %c64 = arith.constant 64 : index
    %49 = vector.load %arg1[%c0_27, %c0_28, %c64] : memref<2x1x1152xf32, #tpu.memory_space<vmem>>, vector<2x1x1024xf32>
    %c6 = arith.constant 6 : index
    %c0_29 = arith.constant 0 : index
    %c0_30 = arith.constant 0 : index
    %50 = vector.load %arg2[%c6, %c0_29, %c0_30] : memref<9x6x1xf32, #tpu.memory_space<vmem>>, vector<1x6x1xf32>
    %51 = vector.shape_cast %50 : vector<1x6x1xf32> to vector<6x1xf32>
    %52 = vector.shape_cast %51 : vector<6x1xf32> to vector<1x6x1xf32>
    %53 = vector.broadcast %52 : vector<1x6x1xf32> to vector<2x6x1024xf32>
    %54 = vector.broadcast %49 : vector<2x1x1024xf32> to vector<2x6x1024xf32>
    %55 = arith.mulf %53, %54 : vector<2x6x1024xf32>
    %56 = arith.addf %48, %55 : vector<2x6x1024xf32>
    %c0_31 = arith.constant 0 : index
    %c0_32 = arith.constant 0 : index
    %c65 = arith.constant 65 : index
    %57 = vector.load %arg1[%c0_31, %c0_32, %c65] : memref<2x1x1152xf32, #tpu.memory_space<vmem>>, vector<2x1x1024xf32>
    %c7 = arith.constant 7 : index
    %c0_33 = arith.constant 0 : index
    %c0_34 = arith.constant 0 : index
    %58 = vector.load %arg2[%c7, %c0_33, %c0_34] : memref<9x6x1xf32, #tpu.memory_space<vmem>>, vector<1x6x1xf32>
    %59 = vector.shape_cast %58 : vector<1x6x1xf32> to vector<6x1xf32>
    %60 = vector.shape_cast %59 : vector<6x1xf32> to vector<1x6x1xf32>
    %61 = vector.broadcast %60 : vector<1x6x1xf32> to vector<2x6x1024xf32>
    %62 = vector.broadcast %57 : vector<2x1x1024xf32> to vector<2x6x1024xf32>
    %63 = arith.mulf %61, %62 : vector<2x6x1024xf32>
    %64 = arith.addf %56, %63 : vector<2x6x1024xf32>
    %c0_35 = arith.constant 0 : index
    %c0_36 = arith.constant 0 : index
    %c66 = arith.constant 66 : index
    %65 = vector.load %arg1[%c0_35, %c0_36, %c66] : memref<2x1x1152xf32, #tpu.memory_space<vmem>>, vector<2x1x1024xf32>
    %c8 = arith.constant 8 : index
    %c0_37 = arith.constant 0 : index
    %c0_38 = arith.constant 0 : index
    %66 = vector.load %arg2[%c8, %c0_37, %c0_38] : memref<9x6x1xf32, #tpu.memory_space<vmem>>, vector<1x6x1xf32>
    %67 = vector.shape_cast %66 : vector<1x6x1xf32> to vector<6x1xf32>
    %68 = vector.shape_cast %67 : vector<6x1xf32> to vector<1x6x1xf32>
    %69 = vector.broadcast %68 : vector<1x6x1xf32> to vector<2x6x1024xf32>
    %70 = vector.broadcast %65 : vector<2x1x1024xf32> to vector<2x6x1024xf32>
    %71 = arith.mulf %69, %70 : vector<2x6x1024xf32>
    %72 = arith.addf %64, %71 : vector<2x6x1024xf32>
    %c0_39 = arith.constant 0 : index
    %c0_40 = arith.constant 0 : index
    %c0_41 = arith.constant 0 : index
    %73 = vector.load %arg5[%c0_39, %c0_40, %c0_41] : memref<1x1x1024xf32, #tpu.memory_space<vmem>>, vector<1x1x1024xf32>
    %74 = vector.broadcast %73 : vector<1x1x1024xf32> to vector<2x6x1024xf32>
    %75 = arith.mulf %72, %74 : vector<2x6x1024xf32>
    %cst_42 = arith.constant dense<0.000000e+00> : vector<2x6xf32>
    %76 = vector.multi_reduction <add>, %75, %cst_42 [2] : vector<2x6x1024xf32> to vector<2x6xf32>
    %77 = vector.shape_cast %76 : vector<2x6xf32> to vector<2x6x1xf32>
    %cst_43 = arith.constant dense<0.000000e+00> : vector<6x1xf32>
    %78 = vector.multi_reduction <add>, %77, %cst_43 [0] : vector<2x6x1xf32> to vector<6x1xf32>
    %79 = vector.shape_cast %78 : vector<6x1xf32> to vector<1x6x1xf32>
    %cst_44 = arith.constant 6.37755089E-4 : f32
    %80 = vector.broadcast %cst_44 : f32 to vector<1x6x1xf32>
    %81 = arith.mulf %79, %80 : vector<1x6x1xf32>
    %82 = vector.broadcast %81 : vector<1x6x1xf32> to vector<2x6x1024xf32>
    %83 = arith.subf %72, %82 : vector<2x6x1024xf32>
    %84 = vector.broadcast %73 : vector<1x1x1024xf32> to vector<2x6x1024xf32>
    %85 = arith.mulf %83, %84 : vector<2x6x1024xf32>
    %86 = arith.mulf %85, %85 : vector<2x6x1024xf32>
    %cst_45 = arith.constant dense<0.000000e+00> : vector<2x6xf32>
    %87 = vector.multi_reduction <add>, %86, %cst_45 [2] : vector<2x6x1024xf32> to vector<2x6xf32>
    %88 = vector.shape_cast %87 : vector<2x6xf32> to vector<2x6x1xf32>
    %cst_46 = arith.constant dense<0.000000e+00> : vector<6x1xf32>
    %89 = vector.multi_reduction <add>, %88, %cst_46 [0] : vector<2x6x1xf32> to vector<6x1xf32>
    %90 = vector.shape_cast %89 : vector<6x1xf32> to vector<1x6x1xf32>
    %cst_47 = arith.constant 6.37755089E-4 : f32
    %91 = vector.broadcast %cst_47 : f32 to vector<1x6x1xf32>
    %92 = arith.mulf %90, %91 : vector<1x6x1xf32>
    %93 = vector.broadcast %81 : vector<1x6x1xf32> to vector<2x6x1024xf32>
    %94 = arith.subf %72, %93 : vector<2x6x1024xf32>
    %cst_48 = arith.constant 9.99999974E-6 : f32
    %95 = vector.broadcast %cst_48 : f32 to vector<1x6x1xf32>
    %96 = arith.addf %92, %95 : vector<1x6x1xf32>
    %97 = math.rsqrt %96 : vector<1x6x1xf32>
    %98 = vector.broadcast %97 : vector<1x6x1xf32> to vector<2x6x1024xf32>
    %99 = arith.mulf %94, %98 : vector<2x6x1024xf32>
    %c0_49 = arith.constant 0 : index
    %c0_50 = arith.constant 0 : index
    %c0_51 = arith.constant 0 : index
    %100 = vector.load %arg3[%c0_49, %c0_50, %c0_51] : memref<1x6x1xf32, #tpu.memory_space<vmem>>, vector<1x6x1xf32>
    %101 = vector.broadcast %100 : vector<1x6x1xf32> to vector<2x6x1024xf32>
    %102 = arith.mulf %99, %101 : vector<2x6x1024xf32>
    %c0_52 = arith.constant 0 : index
    %c0_53 = arith.constant 0 : index
    %c0_54 = arith.constant 0 : index
    %103 = vector.load %arg4[%c0_52, %c0_53, %c0_54] : memref<1x6x1xf32, #tpu.memory_space<vmem>>, vector<1x6x1xf32>
    %104 = vector.broadcast %103 : vector<1x6x1xf32> to vector<2x6x1024xf32>
    %105 = arith.addf %102, %104 : vector<2x6x1024xf32>
    %cst_55 = arith.constant 0.000000e+00 : f32
    %106 = vector.broadcast %cst_55 : f32 to vector<2x6x1024xf32>
    %107 = arith.maximumf %105, %106 : vector<2x6x1024xf32>
    %c0_56 = arith.constant 0 : index
    %c0_57 = arith.constant 0 : index
    %108 = vector.load %arg6[%c0_56, %c0_57] : memref<1024x290xf32, #tpu.memory_space<vmem>>, vector<1024x290xf32>
    %109 = vector.shape_cast %108 : vector<1024x290xf32> to vector<1x1024x290xf32>
    %110 = vector.broadcast %109 : vector<1x1024x290xf32> to vector<2x1024x290xf32>
    %cst_58 = arith.constant dense<0.000000e+00> : vector<2x6x290xf32>
    %111 = tpu.matmul %107, %110, %cst_58 {dimension_numbers = #tpu.dot_dimension_numbers<[2], [1], [1], [2], [0, 0, 0, 1, 1, 2], [0], [0]>} : vector<2x6x1024xf32>, vector<2x1024x290xf32>, vector<2x6x290xf32> -> vector<2x6x290xf32>
    %cst_59 = arith.constant 0.000000e+00 : f32
    %112 = vector.broadcast %cst_59 : f32 to vector<2x16x256xf32>
    %113 = vector.extract_strided_slice %111 {offsets = [0, 0, 0], sizes = [2, 6, 256], strides = [1, 1, 1]} : vector<2x6x290xf32> to vector<2x6x256xf32>
    %c0_60 = arith.constant 0 : index
    %c0_61 = arith.constant 0 : index
    %c0_62 = arith.constant 0 : index
    %114 = vector.load %arg7[%c0_60, %c0_61, %c0_62] : memref<9x16x6xf32, #tpu.memory_space<vmem>>, vector<1x16x6xf32>
    %115 = vector.shape_cast %114 : vector<1x16x6xf32> to vector<16x6xf32>
    %116 = vector.shape_cast %115 : vector<16x6xf32> to vector<1x16x6xf32>
    %117 = vector.broadcast %116 : vector<1x16x6xf32> to vector<2x16x6xf32>
    %cst_63 = arith.constant dense<0.000000e+00> : vector<2x16x256xf32>
    %118 = tpu.matmul %117, %113, %cst_63 {dimension_numbers = #tpu.dot_dimension_numbers<[2], [1], [1], [2], [0, 0, 0, 1, 1, 2], [0], [0]>} : vector<2x16x6xf32>, vector<2x6x256xf32>, vector<2x16x256xf32> -> vector<2x16x256xf32>
    %119 = arith.addf %112, %118 : vector<2x16x256xf32>
    %120 = vector.extract_strided_slice %111 {offsets = [0, 0, 1], sizes = [2, 6, 256], strides = [1, 1, 1]} : vector<2x6x290xf32> to vector<2x6x256xf32>
    %c1_64 = arith.constant 1 : index
    %c0_65 = arith.constant 0 : index
    %c0_66 = arith.constant 0 : index
    %121 = vector.load %arg7[%c1_64, %c0_65, %c0_66] : memref<9x16x6xf32, #tpu.memory_space<vmem>>, vector<1x16x6xf32>
    %122 = vector.shape_cast %121 : vector<1x16x6xf32> to vector<16x6xf32>
    %123 = vector.shape_cast %122 : vector<16x6xf32> to vector<1x16x6xf32>
    %124 = vector.broadcast %123 : vector<1x16x6xf32> to vector<2x16x6xf32>
    %cst_67 = arith.constant dense<0.000000e+00> : vector<2x16x256xf32>
    %125 = tpu.matmul %124, %120, %cst_67 {dimension_numbers = #tpu.dot_dimension_numbers<[2], [1], [1], [2], [0, 0, 0, 1, 1, 2], [0], [0]>} : vector<2x16x6xf32>, vector<2x6x256xf32>, vector<2x16x256xf32> -> vector<2x16x256xf32>
    %126 = arith.addf %119, %125 : vector<2x16x256xf32>
    %127 = vector.extract_strided_slice %111 {offsets = [0, 0, 2], sizes = [2, 6, 256], strides = [1, 1, 1]} : vector<2x6x290xf32> to vector<2x6x256xf32>
    %c2_68 = arith.constant 2 : index
    %c0_69 = arith.constant 0 : index
    %c0_70 = arith.constant 0 : index
    %128 = vector.load %arg7[%c2_68, %c0_69, %c0_70] : memref<9x16x6xf32, #tpu.memory_space<vmem>>, vector<1x16x6xf32>
    %129 = vector.shape_cast %128 : vector<1x16x6xf32> to vector<16x6xf32>
    %130 = vector.shape_cast %129 : vector<16x6xf32> to vector<1x16x6xf32>
    %131 = vector.broadcast %130 : vector<1x16x6xf32> to vector<2x16x6xf32>
    %cst_71 = arith.constant dense<0.000000e+00> : vector<2x16x256xf32>
    %132 = tpu.matmul %131, %127, %cst_71 {dimension_numbers = #tpu.dot_dimension_numbers<[2], [1], [1], [2], [0, 0, 0, 1, 1, 2], [0], [0]>} : vector<2x16x6xf32>, vector<2x6x256xf32>, vector<2x16x256xf32> -> vector<2x16x256xf32>
    %133 = arith.addf %126, %132 : vector<2x16x256xf32>
    %134 = vector.extract_strided_slice %111 {offsets = [0, 0, 16], sizes = [2, 6, 256], strides = [1, 1, 1]} : vector<2x6x290xf32> to vector<2x6x256xf32>
    %c3_72 = arith.constant 3 : index
    %c0_73 = arith.constant 0 : index
    %c0_74 = arith.constant 0 : index
    %135 = vector.load %arg7[%c3_72, %c0_73, %c0_74] : memref<9x16x6xf32, #tpu.memory_space<vmem>>, vector<1x16x6xf32>
    %136 = vector.shape_cast %135 : vector<1x16x6xf32> to vector<16x6xf32>
    %137 = vector.shape_cast %136 : vector<16x6xf32> to vector<1x16x6xf32>
    %138 = vector.broadcast %137 : vector<1x16x6xf32> to vector<2x16x6xf32>
    %cst_75 = arith.constant dense<0.000000e+00> : vector<2x16x256xf32>
    %139 = tpu.matmul %138, %134, %cst_75 {dimension_numbers = #tpu.dot_dimension_numbers<[2], [1], [1], [2], [0, 0, 0, 1, 1, 2], [0], [0]>} : vector<2x16x6xf32>, vector<2x6x256xf32>, vector<2x16x256xf32> -> vector<2x16x256xf32>
    %140 = arith.addf %133, %139 : vector<2x16x256xf32>
    %141 = vector.extract_strided_slice %111 {offsets = [0, 0, 17], sizes = [2, 6, 256], strides = [1, 1, 1]} : vector<2x6x290xf32> to vector<2x6x256xf32>
    %c4_76 = arith.constant 4 : index
    %c0_77 = arith.constant 0 : index
    %c0_78 = arith.constant 0 : index
    %142 = vector.load %arg7[%c4_76, %c0_77, %c0_78] : memref<9x16x6xf32, #tpu.memory_space<vmem>>, vector<1x16x6xf32>
    %143 = vector.shape_cast %142 : vector<1x16x6xf32> to vector<16x6xf32>
    %144 = vector.shape_cast %143 : vector<16x6xf32> to vector<1x16x6xf32>
    %145 = vector.broadcast %144 : vector<1x16x6xf32> to vector<2x16x6xf32>
    %cst_79 = arith.constant dense<0.000000e+00> : vector<2x16x256xf32>
    %146 = tpu.matmul %145, %141, %cst_79 {dimension_numbers = #tpu.dot_dimension_numbers<[2], [1], [1], [2], [0, 0, 0, 1, 1, 2], [0], [0]>} : vector<2x16x6xf32>, vector<2x6x256xf32>, vector<2x16x256xf32> -> vector<2x16x256xf32>
    %147 = arith.addf %140, %146 : vector<2x16x256xf32>
    %148 = vector.extract_strided_slice %111 {offsets = [0, 0, 18], sizes = [2, 6, 256], strides = [1, 1, 1]} : vector<2x6x290xf32> to vector<2x6x256xf32>
    %c5_80 = arith.constant 5 : index
    %c0_81 = arith.constant 0 : index
    %c0_82 = arith.constant 0 : index
    %149 = vector.load %arg7[%c5_80, %c0_81, %c0_82] : memref<9x16x6xf32, #tpu.memory_space<vmem>>, vector<1x16x6xf32>
    %150 = vector.shape_cast %149 : vector<1x16x6xf32> to vector<16x6xf32>
    %151 = vector.shape_cast %150 : vector<16x6xf32> to vector<1x16x6xf32>
    %152 = vector.broadcast %151 : vector<1x16x6xf32> to vector<2x16x6xf32>
    %cst_83 = arith.constant dense<0.000000e+00> : vector<2x16x256xf32>
    %153 = tpu.matmul %152, %148, %cst_83 {dimension_numbers = #tpu.dot_dimension_numbers<[2], [1], [1], [2], [0, 0, 0, 1, 1, 2], [0], [0]>} : vector<2x16x6xf32>, vector<2x6x256xf32>, vector<2x16x256xf32> -> vector<2x16x256xf32>
    %154 = arith.addf %147, %153 : vector<2x16x256xf32>
    %155 = vector.extract_strided_slice %111 {offsets = [0, 0, 32], sizes = [2, 6, 256], strides = [1, 1, 1]} : vector<2x6x290xf32> to vector<2x6x256xf32>
    %c6_84 = arith.constant 6 : index
    %c0_85 = arith.constant 0 : index
    %c0_86 = arith.constant 0 : index
    %156 = vector.load %arg7[%c6_84, %c0_85, %c0_86] : memref<9x16x6xf32, #tpu.memory_space<vmem>>, vector<1x16x6xf32>
    %157 = vector.shape_cast %156 : vector<1x16x6xf32> to vector<16x6xf32>
    %158 = vector.shape_cast %157 : vector<16x6xf32> to vector<1x16x6xf32>
    %159 = vector.broadcast %158 : vector<1x16x6xf32> to vector<2x16x6xf32>
    %cst_87 = arith.constant dense<0.000000e+00> : vector<2x16x256xf32>
    %160 = tpu.matmul %159, %155, %cst_87 {dimension_numbers = #tpu.dot_dimension_numbers<[2], [1], [1], [2], [0, 0, 0, 1, 1, 2], [0], [0]>} : vector<2x16x6xf32>, vector<2x6x256xf32>, vector<2x16x256xf32> -> vector<2x16x256xf32>
    %161 = arith.addf %154, %160 : vector<2x16x256xf32>
    %162 = vector.extract_strided_slice %111 {offsets = [0, 0, 33], sizes = [2, 6, 256], strides = [1, 1, 1]} : vector<2x6x290xf32> to vector<2x6x256xf32>
    %c7_88 = arith.constant 7 : index
    %c0_89 = arith.constant 0 : index
    %c0_90 = arith.constant 0 : index
    %163 = vector.load %arg7[%c7_88, %c0_89, %c0_90] : memref<9x16x6xf32, #tpu.memory_space<vmem>>, vector<1x16x6xf32>
    %164 = vector.shape_cast %163 : vector<1x16x6xf32> to vector<16x6xf32>
    %165 = vector.shape_cast %164 : vector<16x6xf32> to vector<1x16x6xf32>
    %166 = vector.broadcast %165 : vector<1x16x6xf32> to vector<2x16x6xf32>
    %cst_91 = arith.constant dense<0.000000e+00> : vector<2x16x256xf32>
    %167 = tpu.matmul %166, %162, %cst_91 {dimension_numbers = #tpu.dot_dimension_numbers<[2], [1], [1], [2], [0, 0, 0, 1, 1, 2], [0], [0]>} : vector<2x16x6xf32>, vector<2x6x256xf32>, vector<2x16x256xf32> -> vector<2x16x256xf32>
    %168 = arith.addf %161, %167 : vector<2x16x256xf32>
    %169 = vector.extract_strided_slice %111 {offsets = [0, 0, 34], sizes = [2, 6, 256], strides = [1, 1, 1]} : vector<2x6x290xf32> to vector<2x6x256xf32>
    %c8_92 = arith.constant 8 : index
    %c0_93 = arith.constant 0 : index
    %c0_94 = arith.constant 0 : index
    %170 = vector.load %arg7[%c8_92, %c0_93, %c0_94] : memref<9x16x6xf32, #tpu.memory_space<vmem>>, vector<1x16x6xf32>
    %171 = vector.shape_cast %170 : vector<1x16x6xf32> to vector<16x6xf32>
    %172 = vector.shape_cast %171 : vector<16x6xf32> to vector<1x16x6xf32>
    %173 = vector.broadcast %172 : vector<1x16x6xf32> to vector<2x16x6xf32>
    %cst_95 = arith.constant dense<0.000000e+00> : vector<2x16x256xf32>
    %174 = tpu.matmul %173, %169, %cst_95 {dimension_numbers = #tpu.dot_dimension_numbers<[2], [1], [1], [2], [0, 0, 0, 1, 1, 2], [0], [0]>} : vector<2x16x6xf32>, vector<2x6x256xf32>, vector<2x16x256xf32> -> vector<2x16x256xf32>
    %175 = arith.addf %168, %174 : vector<2x16x256xf32>
    %c0_96 = arith.constant 0 : index
    %c0_97 = arith.constant 0 : index
    %c0_98 = arith.constant 0 : index
    %176 = vector.load %arg10[%c0_96, %c0_97, %c0_98] : memref<1x1x256xf32, #tpu.memory_space<vmem>>, vector<1x1x256xf32>
    %177 = vector.broadcast %176 : vector<1x1x256xf32> to vector<2x16x256xf32>
    %178 = arith.mulf %175, %177 : vector<2x16x256xf32>
    %cst_99 = arith.constant dense<0.000000e+00> : vector<2x16xf32>
    %179 = vector.multi_reduction <add>, %178, %cst_99 [2] : vector<2x16x256xf32> to vector<2x16xf32>
    %180 = vector.shape_cast %179 : vector<2x16xf32> to vector<2x16x1xf32>
    %cst_100 = arith.constant dense<0.000000e+00> : vector<16x1xf32>
    %181 = vector.multi_reduction <add>, %180, %cst_100 [0] : vector<2x16x1xf32> to vector<16x1xf32>
    %182 = vector.shape_cast %181 : vector<16x1xf32> to vector<1x16x1xf32>
    %cst_101 = arith.constant 0.00255102036 : f32
    %183 = vector.broadcast %cst_101 : f32 to vector<1x16x1xf32>
    %184 = arith.mulf %182, %183 : vector<1x16x1xf32>
    %185 = vector.broadcast %184 : vector<1x16x1xf32> to vector<2x16x256xf32>
    %186 = arith.subf %175, %185 : vector<2x16x256xf32>
    %187 = vector.broadcast %176 : vector<1x1x256xf32> to vector<2x16x256xf32>
    %188 = arith.mulf %186, %187 : vector<2x16x256xf32>
    %189 = arith.mulf %188, %188 : vector<2x16x256xf32>
    %cst_102 = arith.constant dense<0.000000e+00> : vector<2x16xf32>
    %190 = vector.multi_reduction <add>, %189, %cst_102 [2] : vector<2x16x256xf32> to vector<2x16xf32>
    %191 = vector.shape_cast %190 : vector<2x16xf32> to vector<2x16x1xf32>
    %cst_103 = arith.constant dense<0.000000e+00> : vector<16x1xf32>
    %192 = vector.multi_reduction <add>, %191, %cst_103 [0] : vector<2x16x1xf32> to vector<16x1xf32>
    %193 = vector.shape_cast %192 : vector<16x1xf32> to vector<1x16x1xf32>
    %cst_104 = arith.constant 0.00255102036 : f32
    %194 = vector.broadcast %cst_104 : f32 to vector<1x16x1xf32>
    %195 = arith.mulf %193, %194 : vector<1x16x1xf32>
    %196 = vector.broadcast %184 : vector<1x16x1xf32> to vector<2x16x256xf32>
    %197 = arith.subf %175, %196 : vector<2x16x256xf32>
    %cst_105 = arith.constant 9.99999974E-6 : f32
    %198 = vector.broadcast %cst_105 : f32 to vector<1x16x1xf32>
    %199 = arith.addf %195, %198 : vector<1x16x1xf32>
    %200 = math.rsqrt %199 : vector<1x16x1xf32>
    %201 = vector.broadcast %200 : vector<1x16x1xf32> to vector<2x16x256xf32>
    %202 = arith.mulf %197, %201 : vector<2x16x256xf32>
    %c0_106 = arith.constant 0 : index
    %c0_107 = arith.constant 0 : index
    %c0_108 = arith.constant 0 : index
    %203 = vector.load %arg8[%c0_106, %c0_107, %c0_108] : memref<1x16x1xf32, #tpu.memory_space<vmem>>, vector<1x16x1xf32>
    %204 = vector.broadcast %203 : vector<1x16x1xf32> to vector<2x16x256xf32>
    %205 = arith.mulf %202, %204 : vector<2x16x256xf32>
    %c0_109 = arith.constant 0 : index
    %c0_110 = arith.constant 0 : index
    %c0_111 = arith.constant 0 : index
    %206 = vector.load %arg9[%c0_109, %c0_110, %c0_111] : memref<1x16x1xf32, #tpu.memory_space<vmem>>, vector<1x16x1xf32>
    %207 = vector.broadcast %206 : vector<1x16x1xf32> to vector<2x16x256xf32>
    %208 = arith.addf %205, %207 : vector<2x16x256xf32>
    %cst_112 = arith.constant 0.000000e+00 : f32
    %209 = vector.broadcast %cst_112 : f32 to vector<2x16x256xf32>
    %210 = arith.maximumf %208, %209 : vector<2x16x256xf32>
    %cst_113 = arith.constant 0.000000e+00 : f32
    %211 = vector.broadcast %cst_113 : f32 to vector<2x1x120xf32>
    %c0_114 = arith.constant 0 : index
    %c0_115 = arith.constant 0 : index
    %c0_116 = arith.constant 0 : index
    %212 = vector.load %arg11[%c0_114, %c0_115, %c0_116] : memref<16x256x120xf32, #tpu.memory_space<vmem>>, vector<1x256x120xf32>
    %213 = vector.shape_cast %212 : vector<1x256x120xf32> to vector<256x120xf32>
    %214 = vector.shape_cast %213 : vector<256x120xf32> to vector<1x256x120xf32>
    %215 = vector.broadcast %214 : vector<1x256x120xf32> to vector<2x256x120xf32>
    %216 = vector.extract_strided_slice %210 {offsets = [0, 0, 0], sizes = [2, 1, 256], strides = [1, 1, 1]} : vector<2x16x256xf32> to vector<2x1x256xf32>
    %cst_117 = arith.constant dense<0.000000e+00> : vector<2x1x120xf32>
    %217 = tpu.matmul %216, %215, %cst_117 {dimension_numbers = #tpu.dot_dimension_numbers<[2], [1], [1], [2], [0, 0, 0, 1, 1, 2], [0], [0]>} : vector<2x1x256xf32>, vector<2x256x120xf32>, vector<2x1x120xf32> -> vector<2x1x120xf32>
    %218 = arith.addf %211, %217 : vector<2x1x120xf32>
    %c1_118 = arith.constant 1 : index
    %c0_119 = arith.constant 0 : index
    %c0_120 = arith.constant 0 : index
    %219 = vector.load %arg11[%c1_118, %c0_119, %c0_120] : memref<16x256x120xf32, #tpu.memory_space<vmem>>, vector<1x256x120xf32>
    %220 = vector.shape_cast %219 : vector<1x256x120xf32> to vector<256x120xf32>
    %221 = vector.shape_cast %220 : vector<256x120xf32> to vector<1x256x120xf32>
    %222 = vector.broadcast %221 : vector<1x256x120xf32> to vector<2x256x120xf32>
    %223 = vector.extract_strided_slice %210 {offsets = [0, 1, 0], sizes = [2, 1, 256], strides = [1, 1, 1]} : vector<2x16x256xf32> to vector<2x1x256xf32>
    %cst_121 = arith.constant dense<0.000000e+00> : vector<2x1x120xf32>
    %224 = tpu.matmul %223, %222, %cst_121 {dimension_numbers = #tpu.dot_dimension_numbers<[2], [1], [1], [2], [0, 0, 0, 1, 1, 2], [0], [0]>} : vector<2x1x256xf32>, vector<2x256x120xf32>, vector<2x1x120xf32> -> vector<2x1x120xf32>
    %225 = arith.addf %218, %224 : vector<2x1x120xf32>
    %c2_122 = arith.constant 2 : index
    %c0_123 = arith.constant 0 : index
    %c0_124 = arith.constant 0 : index
    %226 = vector.load %arg11[%c2_122, %c0_123, %c0_124] : memref<16x256x120xf32, #tpu.memory_space<vmem>>, vector<1x256x120xf32>
    %227 = vector.shape_cast %226 : vector<1x256x120xf32> to vector<256x120xf32>
    %228 = vector.shape_cast %227 : vector<256x120xf32> to vector<1x256x120xf32>
    %229 = vector.broadcast %228 : vector<1x256x120xf32> to vector<2x256x120xf32>
    %230 = vector.extract_strided_slice %210 {offsets = [0, 2, 0], sizes = [2, 1, 256], strides = [1, 1, 1]} : vector<2x16x256xf32> to vector<2x1x256xf32>
    %cst_125 = arith.constant dense<0.000000e+00> : vector<2x1x120xf32>
    %231 = tpu.matmul %230, %229, %cst_125 {dimension_numbers = #tpu.dot_dimension_numbers<[2], [1], [1], [2], [0, 0, 0, 1, 1, 2], [0], [0]>} : vector<2x1x256xf32>, vector<2x256x120xf32>, vector<2x1x120xf32> -> vector<2x1x120xf32>
    %232 = arith.addf %225, %231 : vector<2x1x120xf32>
    %c3_126 = arith.constant 3 : index
    %c0_127 = arith.constant 0 : index
    %c0_128 = arith.constant 0 : index
    %233 = vector.load %arg11[%c3_126, %c0_127, %c0_128] : memref<16x256x120xf32, #tpu.memory_space<vmem>>, vector<1x256x120xf32>
    %234 = vector.shape_cast %233 : vector<1x256x120xf32> to vector<256x120xf32>
    %235 = vector.shape_cast %234 : vector<256x120xf32> to vector<1x256x120xf32>
    %236 = vector.broadcast %235 : vector<1x256x120xf32> to vector<2x256x120xf32>
    %237 = vector.extract_strided_slice %210 {offsets = [0, 3, 0], sizes = [2, 1, 256], strides = [1, 1, 1]} : vector<2x16x256xf32> to vector<2x1x256xf32>
    %cst_129 = arith.constant dense<0.000000e+00> : vector<2x1x120xf32>
    %238 = tpu.matmul %237, %236, %cst_129 {dimension_numbers = #tpu.dot_dimension_numbers<[2], [1], [1], [2], [0, 0, 0, 1, 1, 2], [0], [0]>} : vector<2x1x256xf32>, vector<2x256x120xf32>, vector<2x1x120xf32> -> vector<2x1x120xf32>
    %239 = arith.addf %232, %238 : vector<2x1x120xf32>
    %c4_130 = arith.constant 4 : index
    %c0_131 = arith.constant 0 : index
    %c0_132 = arith.constant 0 : index
    %240 = vector.load %arg11[%c4_130, %c0_131, %c0_132] : memref<16x256x120xf32, #tpu.memory_space<vmem>>, vector<1x256x120xf32>
    %241 = vector.shape_cast %240 : vector<1x256x120xf32> to vector<256x120xf32>
    %242 = vector.shape_cast %241 : vector<256x120xf32> to vector<1x256x120xf32>
    %243 = vector.broadcast %242 : vector<1x256x120xf32> to vector<2x256x120xf32>
    %244 = vector.extract_strided_slice %210 {offsets = [0, 4, 0], sizes = [2, 1, 256], strides = [1, 1, 1]} : vector<2x16x256xf32> to vector<2x1x256xf32>
    %cst_133 = arith.constant dense<0.000000e+00> : vector<2x1x120xf32>
    %245 = tpu.matmul %244, %243, %cst_133 {dimension_numbers = #tpu.dot_dimension_numbers<[2], [1], [1], [2], [0, 0, 0, 1, 1, 2], [0], [0]>} : vector<2x1x256xf32>, vector<2x256x120xf32>, vector<2x1x120xf32> -> vector<2x1x120xf32>
    %246 = arith.addf %239, %245 : vector<2x1x120xf32>
    %c5_134 = arith.constant 5 : index
    %c0_135 = arith.constant 0 : index
    %c0_136 = arith.constant 0 : index
    %247 = vector.load %arg11[%c5_134, %c0_135, %c0_136] : memref<16x256x120xf32, #tpu.memory_space<vmem>>, vector<1x256x120xf32>
    %248 = vector.shape_cast %247 : vector<1x256x120xf32> to vector<256x120xf32>
    %249 = vector.shape_cast %248 : vector<256x120xf32> to vector<1x256x120xf32>
    %250 = vector.broadcast %249 : vector<1x256x120xf32> to vector<2x256x120xf32>
    %251 = vector.extract_strided_slice %210 {offsets = [0, 5, 0], sizes = [2, 1, 256], strides = [1, 1, 1]} : vector<2x16x256xf32> to vector<2x1x256xf32>
    %cst_137 = arith.constant dense<0.000000e+00> : vector<2x1x120xf32>
    %252 = tpu.matmul %251, %250, %cst_137 {dimension_numbers = #tpu.dot_dimension_numbers<[2], [1], [1], [2], [0, 0, 0, 1, 1, 2], [0], [0]>} : vector<2x1x256xf32>, vector<2x256x120xf32>, vector<2x1x120xf32> -> vector<2x1x120xf32>
    %253 = arith.addf %246, %252 : vector<2x1x120xf32>
    %c6_138 = arith.constant 6 : index
    %c0_139 = arith.constant 0 : index
    %c0_140 = arith.constant 0 : index
    %254 = vector.load %arg11[%c6_138, %c0_139, %c0_140] : memref<16x256x120xf32, #tpu.memory_space<vmem>>, vector<1x256x120xf32>
    %255 = vector.shape_cast %254 : vector<1x256x120xf32> to vector<256x120xf32>
    %256 = vector.shape_cast %255 : vector<256x120xf32> to vector<1x256x120xf32>
    %257 = vector.broadcast %256 : vector<1x256x120xf32> to vector<2x256x120xf32>
    %258 = vector.extract_strided_slice %210 {offsets = [0, 6, 0], sizes = [2, 1, 256], strides = [1, 1, 1]} : vector<2x16x256xf32> to vector<2x1x256xf32>
    %cst_141 = arith.constant dense<0.000000e+00> : vector<2x1x120xf32>
    %259 = tpu.matmul %258, %257, %cst_141 {dimension_numbers = #tpu.dot_dimension_numbers<[2], [1], [1], [2], [0, 0, 0, 1, 1, 2], [0], [0]>} : vector<2x1x256xf32>, vector<2x256x120xf32>, vector<2x1x120xf32> -> vector<2x1x120xf32>
    %260 = arith.addf %253, %259 : vector<2x1x120xf32>
    %c7_142 = arith.constant 7 : index
    %c0_143 = arith.constant 0 : index
    %c0_144 = arith.constant 0 : index
    %261 = vector.load %arg11[%c7_142, %c0_143, %c0_144] : memref<16x256x120xf32, #tpu.memory_space<vmem>>, vector<1x256x120xf32>
    %262 = vector.shape_cast %261 : vector<1x256x120xf32> to vector<256x120xf32>
    %263 = vector.shape_cast %262 : vector<256x120xf32> to vector<1x256x120xf32>
    %264 = vector.broadcast %263 : vector<1x256x120xf32> to vector<2x256x120xf32>
    %265 = vector.extract_strided_slice %210 {offsets = [0, 7, 0], sizes = [2, 1, 256], strides = [1, 1, 1]} : vector<2x16x256xf32> to vector<2x1x256xf32>
    %cst_145 = arith.constant dense<0.000000e+00> : vector<2x1x120xf32>
    %266 = tpu.matmul %265, %264, %cst_145 {dimension_numbers = #tpu.dot_dimension_numbers<[2], [1], [1], [2], [0, 0, 0, 1, 1, 2], [0], [0]>} : vector<2x1x256xf32>, vector<2x256x120xf32>, vector<2x1x120xf32> -> vector<2x1x120xf32>
    %267 = arith.addf %260, %266 : vector<2x1x120xf32>
    %c8_146 = arith.constant 8 : index
    %c0_147 = arith.constant 0 : index
    %c0_148 = arith.constant 0 : index
    %268 = vector.load %arg11[%c8_146, %c0_147, %c0_148] : memref<16x256x120xf32, #tpu.memory_space<vmem>>, vector<1x256x120xf32>
    %269 = vector.shape_cast %268 : vector<1x256x120xf32> to vector<256x120xf32>
    %270 = vector.shape_cast %269 : vector<256x120xf32> to vector<1x256x120xf32>
    %271 = vector.broadcast %270 : vector<1x256x120xf32> to vector<2x256x120xf32>
    %272 = vector.extract_strided_slice %210 {offsets = [0, 8, 0], sizes = [2, 1, 256], strides = [1, 1, 1]} : vector<2x16x256xf32> to vector<2x1x256xf32>
    %cst_149 = arith.constant dense<0.000000e+00> : vector<2x1x120xf32>
    %273 = tpu.matmul %272, %271, %cst_149 {dimension_numbers = #tpu.dot_dimension_numbers<[2], [1], [1], [2], [0, 0, 0, 1, 1, 2], [0], [0]>} : vector<2x1x256xf32>, vector<2x256x120xf32>, vector<2x1x120xf32> -> vector<2x1x120xf32>
    %274 = arith.addf %267, %273 : vector<2x1x120xf32>
    %c9 = arith.constant 9 : index
    %c0_150 = arith.constant 0 : index
    %c0_151 = arith.constant 0 : index
    %275 = vector.load %arg11[%c9, %c0_150, %c0_151] : memref<16x256x120xf32, #tpu.memory_space<vmem>>, vector<1x256x120xf32>
    %276 = vector.shape_cast %275 : vector<1x256x120xf32> to vector<256x120xf32>
    %277 = vector.shape_cast %276 : vector<256x120xf32> to vector<1x256x120xf32>
    %278 = vector.broadcast %277 : vector<1x256x120xf32> to vector<2x256x120xf32>
    %279 = vector.extract_strided_slice %210 {offsets = [0, 9, 0], sizes = [2, 1, 256], strides = [1, 1, 1]} : vector<2x16x256xf32> to vector<2x1x256xf32>
    %cst_152 = arith.constant dense<0.000000e+00> : vector<2x1x120xf32>
    %280 = tpu.matmul %279, %278, %cst_152 {dimension_numbers = #tpu.dot_dimension_numbers<[2], [1], [1], [2], [0, 0, 0, 1, 1, 2], [0], [0]>} : vector<2x1x256xf32>, vector<2x256x120xf32>, vector<2x1x120xf32> -> vector<2x1x120xf32>
    %281 = arith.addf %274, %280 : vector<2x1x120xf32>
    %c10 = arith.constant 10 : index
    %c0_153 = arith.constant 0 : index
    %c0_154 = arith.constant 0 : index
    %282 = vector.load %arg11[%c10, %c0_153, %c0_154] : memref<16x256x120xf32, #tpu.memory_space<vmem>>, vector<1x256x120xf32>
    %283 = vector.shape_cast %282 : vector<1x256x120xf32> to vector<256x120xf32>
    %284 = vector.shape_cast %283 : vector<256x120xf32> to vector<1x256x120xf32>
    %285 = vector.broadcast %284 : vector<1x256x120xf32> to vector<2x256x120xf32>
    %286 = vector.extract_strided_slice %210 {offsets = [0, 10, 0], sizes = [2, 1, 256], strides = [1, 1, 1]} : vector<2x16x256xf32> to vector<2x1x256xf32>
    %cst_155 = arith.constant dense<0.000000e+00> : vector<2x1x120xf32>
    %287 = tpu.matmul %286, %285, %cst_155 {dimension_numbers = #tpu.dot_dimension_numbers<[2], [1], [1], [2], [0, 0, 0, 1, 1, 2], [0], [0]>} : vector<2x1x256xf32>, vector<2x256x120xf32>, vector<2x1x120xf32> -> vector<2x1x120xf32>
    %288 = arith.addf %281, %287 : vector<2x1x120xf32>
    %c11 = arith.constant 11 : index
    %c0_156 = arith.constant 0 : index
    %c0_157 = arith.constant 0 : index
    %289 = vector.load %arg11[%c11, %c0_156, %c0_157] : memref<16x256x120xf32, #tpu.memory_space<vmem>>, vector<1x256x120xf32>
    %290 = vector.shape_cast %289 : vector<1x256x120xf32> to vector<256x120xf32>
    %291 = vector.shape_cast %290 : vector<256x120xf32> to vector<1x256x120xf32>
    %292 = vector.broadcast %291 : vector<1x256x120xf32> to vector<2x256x120xf32>
    %293 = vector.extract_strided_slice %210 {offsets = [0, 11, 0], sizes = [2, 1, 256], strides = [1, 1, 1]} : vector<2x16x256xf32> to vector<2x1x256xf32>
    %cst_158 = arith.constant dense<0.000000e+00> : vector<2x1x120xf32>
    %294 = tpu.matmul %293, %292, %cst_158 {dimension_numbers = #tpu.dot_dimension_numbers<[2], [1], [1], [2], [0, 0, 0, 1, 1, 2], [0], [0]>} : vector<2x1x256xf32>, vector<2x256x120xf32>, vector<2x1x120xf32> -> vector<2x1x120xf32>
    %295 = arith.addf %288, %294 : vector<2x1x120xf32>
    %c12 = arith.constant 12 : index
    %c0_159 = arith.constant 0 : index
    %c0_160 = arith.constant 0 : index
    %296 = vector.load %arg11[%c12, %c0_159, %c0_160] : memref<16x256x120xf32, #tpu.memory_space<vmem>>, vector<1x256x120xf32>
    %297 = vector.shape_cast %296 : vector<1x256x120xf32> to vector<256x120xf32>
    %298 = vector.shape_cast %297 : vector<256x120xf32> to vector<1x256x120xf32>
    %299 = vector.broadcast %298 : vector<1x256x120xf32> to vector<2x256x120xf32>
    %300 = vector.extract_strided_slice %210 {offsets = [0, 12, 0], sizes = [2, 1, 256], strides = [1, 1, 1]} : vector<2x16x256xf32> to vector<2x1x256xf32>
    %cst_161 = arith.constant dense<0.000000e+00> : vector<2x1x120xf32>
    %301 = tpu.matmul %300, %299, %cst_161 {dimension_numbers = #tpu.dot_dimension_numbers<[2], [1], [1], [2], [0, 0, 0, 1, 1, 2], [0], [0]>} : vector<2x1x256xf32>, vector<2x256x120xf32>, vector<2x1x120xf32> -> vector<2x1x120xf32>
    %302 = arith.addf %295, %301 : vector<2x1x120xf32>
    %c13 = arith.constant 13 : index
    %c0_162 = arith.constant 0 : index
    %c0_163 = arith.constant 0 : index
    %303 = vector.load %arg11[%c13, %c0_162, %c0_163] : memref<16x256x120xf32, #tpu.memory_space<vmem>>, vector<1x256x120xf32>
    %304 = vector.shape_cast %303 : vector<1x256x120xf32> to vector<256x120xf32>
    %305 = vector.shape_cast %304 : vector<256x120xf32> to vector<1x256x120xf32>
    %306 = vector.broadcast %305 : vector<1x256x120xf32> to vector<2x256x120xf32>
    %307 = vector.extract_strided_slice %210 {offsets = [0, 13, 0], sizes = [2, 1, 256], strides = [1, 1, 1]} : vector<2x16x256xf32> to vector<2x1x256xf32>
    %cst_164 = arith.constant dense<0.000000e+00> : vector<2x1x120xf32>
    %308 = tpu.matmul %307, %306, %cst_164 {dimension_numbers = #tpu.dot_dimension_numbers<[2], [1], [1], [2], [0, 0, 0, 1, 1, 2], [0], [0]>} : vector<2x1x256xf32>, vector<2x256x120xf32>, vector<2x1x120xf32> -> vector<2x1x120xf32>
    %309 = arith.addf %302, %308 : vector<2x1x120xf32>
    %c14 = arith.constant 14 : index
    %c0_165 = arith.constant 0 : index
    %c0_166 = arith.constant 0 : index
    %310 = vector.load %arg11[%c14, %c0_165, %c0_166] : memref<16x256x120xf32, #tpu.memory_space<vmem>>, vector<1x256x120xf32>
    %311 = vector.shape_cast %310 : vector<1x256x120xf32> to vector<256x120xf32>
    %312 = vector.shape_cast %311 : vector<256x120xf32> to vector<1x256x120xf32>
    %313 = vector.broadcast %312 : vector<1x256x120xf32> to vector<2x256x120xf32>
    %314 = vector.extract_strided_slice %210 {offsets = [0, 14, 0], sizes = [2, 1, 256], strides = [1, 1, 1]} : vector<2x16x256xf32> to vector<2x1x256xf32>
    %cst_167 = arith.constant dense<0.000000e+00> : vector<2x1x120xf32>
    %315 = tpu.matmul %314, %313, %cst_167 {dimension_numbers = #tpu.dot_dimension_numbers<[2], [1], [1], [2], [0, 0, 0, 1, 1, 2], [0], [0]>} : vector<2x1x256xf32>, vector<2x256x120xf32>, vector<2x1x120xf32> -> vector<2x1x120xf32>
    %316 = arith.addf %309, %315 : vector<2x1x120xf32>
    %c15 = arith.constant 15 : index
    %c0_168 = arith.constant 0 : index
    %c0_169 = arith.constant 0 : index
    %317 = vector.load %arg11[%c15, %c0_168, %c0_169] : memref<16x256x120xf32, #tpu.memory_space<vmem>>, vector<1x256x120xf32>
    %318 = vector.shape_cast %317 : vector<1x256x120xf32> to vector<256x120xf32>
    %319 = vector.shape_cast %318 : vector<256x120xf32> to vector<1x256x120xf32>
    %320 = vector.broadcast %319 : vector<1x256x120xf32> to vector<2x256x120xf32>
    %321 = vector.extract_strided_slice %210 {offsets = [0, 15, 0], sizes = [2, 1, 256], strides = [1, 1, 1]} : vector<2x16x256xf32> to vector<2x1x256xf32>
    %cst_170 = arith.constant dense<0.000000e+00> : vector<2x1x120xf32>
    %322 = tpu.matmul %321, %320, %cst_170 {dimension_numbers = #tpu.dot_dimension_numbers<[2], [1], [1], [2], [0, 0, 0, 1, 1, 2], [0], [0]>} : vector<2x1x256xf32>, vector<2x256x120xf32>, vector<2x1x120xf32> -> vector<2x1x120xf32>
    %323 = arith.addf %316, %322 : vector<2x1x120xf32>
    %c0_171 = arith.constant 0 : index
    %c0_172 = arith.constant 0 : index
    %c0_173 = arith.constant 0 : index
    %324 = vector.load %arg12[%c0_171, %c0_172, %c0_173] : memref<1x1x120xf32, #tpu.memory_space<vmem>>, vector<1x1x120xf32>
    %325 = vector.broadcast %324 : vector<1x1x120xf32> to vector<2x1x120xf32>
    %326 = arith.addf %323, %325 : vector<2x1x120xf32>
    %cst_174 = arith.constant 0.000000e+00 : f32
    %327 = vector.broadcast %cst_174 : f32 to vector<2x1x120xf32>
    %328 = arith.maximumf %326, %327 : vector<2x1x120xf32>
    %c0_175 = arith.constant 0 : index
    %c0_176 = arith.constant 0 : index
    %329 = vector.load %arg13[%c0_175, %c0_176] : memref<120x84xf32, #tpu.memory_space<vmem>>, vector<120x84xf32>
    %330 = vector.shape_cast %329 : vector<120x84xf32> to vector<1x120x84xf32>
    %331 = vector.broadcast %330 : vector<1x120x84xf32> to vector<2x120x84xf32>
    %cst_177 = arith.constant dense<0.000000e+00> : vector<2x1x84xf32>
    %332 = tpu.matmul %328, %331, %cst_177 {dimension_numbers = #tpu.dot_dimension_numbers<[2], [1], [1], [2], [0, 0, 0, 1, 1, 2], [0], [0]>} : vector<2x1x120xf32>, vector<2x120x84xf32>, vector<2x1x84xf32> -> vector<2x1x84xf32>
    %c0_178 = arith.constant 0 : index
    %c0_179 = arith.constant 0 : index
    %c0_180 = arith.constant 0 : index
    %333 = vector.load %arg14[%c0_178, %c0_179, %c0_180] : memref<1x1x84xf32, #tpu.memory_space<vmem>>, vector<1x1x84xf32>
    %334 = vector.broadcast %333 : vector<1x1x84xf32> to vector<2x1x84xf32>
    %335 = arith.addf %332, %334 : vector<2x1x84xf32>
    %cst_181 = arith.constant 0.000000e+00 : f32
    %336 = vector.broadcast %cst_181 : f32 to vector<2x1x84xf32>
    %337 = arith.maximumf %335, %336 : vector<2x1x84xf32>
    %c0_182 = arith.constant 0 : index
    %c0_183 = arith.constant 0 : index
    %338 = vector.load %arg15[%c0_182, %c0_183] : memref<84x10xf32, #tpu.memory_space<vmem>>, vector<84x10xf32>
    %339 = vector.shape_cast %338 : vector<84x10xf32> to vector<1x84x10xf32>
    %340 = vector.broadcast %339 : vector<1x84x10xf32> to vector<2x84x10xf32>
    %cst_184 = arith.constant dense<0.000000e+00> : vector<2x1x10xf32>
    %341 = tpu.matmul %337, %340, %cst_184 {dimension_numbers = #tpu.dot_dimension_numbers<[2], [1], [1], [2], [0, 0, 0, 1, 1, 2], [0], [0]>} : vector<2x1x84xf32>, vector<2x84x10xf32>, vector<2x1x10xf32> -> vector<2x1x10xf32>
    %c0_185 = arith.constant 0 : index
    %c0_186 = arith.constant 0 : index
    %c0_187 = arith.constant 0 : index
    %342 = vector.load %arg16[%c0_185, %c0_186, %c0_187] : memref<1x1x10xf32, #tpu.memory_space<vmem>>, vector<1x1x10xf32>
    %343 = vector.broadcast %342 : vector<1x1x10xf32> to vector<2x1x10xf32>
    %344 = arith.addf %341, %343 : vector<2x1x10xf32>
    %c0_188 = arith.constant 0 : index
    %c0_189 = arith.constant 0 : index
    %c0_190 = arith.constant 0 : index
    %345 = vector.load %arg17[%c0_188, %c0_189, %c0_190] : memref<2x1x10xf32, #tpu.memory_space<vmem>>, vector<2x1x10xf32>
    tpu.vector_store %arg17[%c0_188, %c0_189, %c0_190], %344 {strides = array<i32>} : memref<2x1x10xf32, #tpu.memory_space<vmem>>, vector<2x1x10xf32>,
    return
  }
  func.func @transform_0(%arg0: i32) -> (i32, i32, i32) {
    %c0_i32 = arith.constant 0 : i32
    %c0_i32_0 = arith.constant 0 : i32
    %c0_i32_1 = arith.constant 0 : i32
    %c0_i32_2 = arith.constant 0 : i32
    return %c0_i32, %c0_i32_0, %c0_i32_1 : i32, i32, i32
  }
  func.func @transform_1(%arg0: i32) -> (i32, i32, i32) {
    %c0_i32 = arith.constant 0 : i32
    %c0_i32_0 = arith.constant 0 : i32
    %c0_i32_1 = arith.constant 0 : i32
    %c0_i32_2 = arith.constant 0 : i32
    return %c0_i32, %c0_i32_0, %c0_i32_1 : i32, i32, i32
  }
  func.func @transform_2(%arg0: i32) -> (i32, i32, i32) {
    %c0_i32 = arith.constant 0 : i32
    %c0_i32_0 = arith.constant 0 : i32
    %c0_i32_1 = arith.constant 0 : i32
    %c0_i32_2 = arith.constant 0 : i32
    return %c0_i32, %c0_i32_0, %c0_i32_1 : i32, i32, i32
  }
  func.func @transform_3(%arg0: i32) -> (i32, i32, i32) {
    %c0_i32 = arith.constant 0 : i32
    %c0_i32_0 = arith.constant 0 : i32
    %c0_i32_1 = arith.constant 0 : i32
    %c0_i32_2 = arith.constant 0 : i32
    return %c0_i32, %c0_i32_0, %c0_i32_1 : i32, i32, i32
  }
  func.func @transform_4(%arg0: i32) -> (i32, i32, i32) {
    %c0_i32 = arith.constant 0 : i32
    %c0_i32_0 = arith.constant 0 : i32
    %c0_i32_1 = arith.constant 0 : i32
    %c0_i32_2 = arith.constant 0 : i32
    return %c0_i32, %c0_i32_0, %c0_i32_1 : i32, i32, i32
  }
  func.func @transform_5(%arg0: i32) -> (i32, i32) {
    %c0_i32 = arith.constant 0 : i32
    %c0_i32_0 = arith.constant 0 : i32
    %c0_i32_1 = arith.constant 0 : i32
    return %c0_i32, %c0_i32_0 : i32, i32
  }
  func.func @transform_6(%arg0: i32) -> (i32, i32, i32) {
    %c0_i32 = arith.constant 0 : i32
    %c0_i32_0 = arith.constant 0 : i32
    %c0_i32_1 = arith.constant 0 : i32
    %c0_i32_2 = arith.constant 0 : i32
    return %c0_i32, %c0_i32_0, %c0_i32_1 : i32, i32, i32
  }
  func.func @transform_7(%arg0: i32) -> (i32, i32, i32) {
    %c0_i32 = arith.constant 0 : i32
    %c0_i32_0 = arith.constant 0 : i32
    %c0_i32_1 = arith.constant 0 : i32
    %c0_i32_2 = arith.constant 0 : i32
    return %c0_i32, %c0_i32_0, %c0_i32_1 : i32, i32, i32
  }
  func.func @transform_8(%arg0: i32) -> (i32, i32, i32) {
    %c0_i32 = arith.constant 0 : i32
    %c0_i32_0 = arith.constant 0 : i32
    %c0_i32_1 = arith.constant 0 : i32
    %c0_i32_2 = arith.constant 0 : i32
    return %c0_i32, %c0_i32_0, %c0_i32_1 : i32, i32, i32
  }
  func.func @transform_9(%arg0: i32) -> (i32, i32, i32) {
    %c0_i32 = arith.constant 0 : i32
    %c0_i32_0 = arith.constant 0 : i32
    %c0_i32_1 = arith.constant 0 : i32
    %c0_i32_2 = arith.constant 0 : i32
    return %c0_i32, %c0_i32_0, %c0_i32_1 : i32, i32, i32
  }
  func.func @transform_10(%arg0: i32) -> (i32, i32, i32) {
    %c0_i32 = arith.constant 0 : i32
    %c0_i32_0 = arith.constant 0 : i32
    %c0_i32_1 = arith.constant 0 : i32
    %c0_i32_2 = arith.constant 0 : i32
    return %c0_i32, %c0_i32_0, %c0_i32_1 : i32, i32, i32
  }
  func.func @transform_11(%arg0: i32) -> (i32, i32, i32) {
    %c0_i32 = arith.constant 0 : i32
    %c0_i32_0 = arith.constant 0 : i32
    %c0_i32_1 = arith.constant 0 : i32
    %c0_i32_2 = arith.constant 0 : i32
    return %c0_i32, %c0_i32_0, %c0_i32_1 : i32, i32, i32
  }
  func.func @transform_12(%arg0: i32) -> (i32, i32) {
    %c0_i32 = arith.constant 0 : i32
    %c0_i32_0 = arith.constant 0 : i32
    %c0_i32_1 = arith.constant 0 : i32
    return %c0_i32, %c0_i32_0 : i32, i32
  }
  func.func @transform_13(%arg0: i32) -> (i32, i32, i32) {
    %c0_i32 = arith.constant 0 : i32
    %c0_i32_0 = arith.constant 0 : i32
    %c0_i32_1 = arith.constant 0 : i32
    %c0_i32_2 = arith.constant 0 : i32
    return %c0_i32, %c0_i32_0, %c0_i32_1 : i32, i32, i32
  }
  func.func @transform_14(%arg0: i32) -> (i32, i32) {
    %c0_i32 = arith.constant 0 : i32
    %c0_i32_0 = arith.constant 0 : i32
    %c0_i32_1 = arith.constant 0 : i32
    return %c0_i32, %c0_i32_0 : i32, i32
  }
  func.func @transform_15(%arg0: i32) -> (i32, i32, i32) {
    %c0_i32 = arith.constant 0 : i32
    %c0_i32_0 = arith.constant 0 : i32
    %c0_i32_1 = arith.constant 0 : i32
    %c0_i32_2 = arith.constant 0 : i32
    return %c0_i32, %c0_i32_0, %c0_i32_1 : i32, i32, i32
  }
  func.func @transform_16(%arg0: i32) -> (i32, i32, i32) {
    %c0_i32 = arith.constant 0 : i32
    %c0_i32_0 = arith.constant 0 : i32
    %c0_i32_1 = arith.constant 0 : i32
    %c0_i32_2 = arith.constant 0 : i32
    return %c0_i32, %c0_i32_0, %c0_i32_1 : i32, i32, i32
  }
}

</mosaic_0001>

<bundles_post_ra>
// kernel: lenet5_bn_forward.1
= control target key start
LH: loop header
LB: loop body
LE: loop exit
PB: predicated region body
PF: predicated region fallthrough
CT: control target
= control target key end

     0   :  { %s13750_s0 = inlined_call_operand.vmem [shape: f32[2,1,1152], index: 0, kind: input, shape index: {}]   ;;  %s13751_s1 = inlined_call_operand.vmem [shape: f32[9,6,1], index: 1, kind: input, shape index: {}]   ;;  %s13752_s2 = inlined_call_operand.vmem [shape: f32[1,6,1], index: 2, kind: input, shape index: {}]   ;;  %s13753_s3 = inlined_call_operand.vmem [shape: f32[1,6,1], index: 3, kind: input, shape index: {}]   ;;  %s13754_s4 = inlined_call_operand.vmem [shape: f32[1,1,1024], index: 4, kind: input, shape index: {}]   ;;  %s13755_s5 = inlined_call_operand.vmem [shape: f32[1024,290], index: 5, kind: input, shape index: {}]   ;;  %s13756_s6 = inlined_call_operand.vmem [shape: f32[9,16,6], index: 6, kind: input, shape index: {}]   ;;  %s13757_s7 = inlined_call_operand.vmem [shape: f32[1,16,1], index: 7, kind: input, shape index: {}]   ;;  %s13758_s8 = inlined_call_operand.vmem [shape: f32[1,16,1], index: 8, kind: input, shape index: {}]   ;;  %s13759_s9 = inlined_call_operand.vmem [shape: f32[1,1,256], index: 9, kind: input, shape index: {}]   ;;  %s13760_s10 = inlined_call_operand.vmem [shape: f32[16,256,120], index: 10, kind: input, shape index: {}]   ;;  %s13761_s11 = inlined_call_operand.vmem [shape: f32[1,1,120], index: 11, kind: input, shape index: {}]   ;;  %s13762_s12 = inlined_call_operand.vmem [shape: f32[120,84], index: 12, kind: input, shape index: {}]   ;;  %s13763_s13 = inlined_call_operand.vmem [shape: f32[1,1,84], index: 13, kind: input, shape index: {}]   ;;  %s13764_s14 = inlined_call_operand.vmem [shape: f32[84,10], index: 14, kind: input, shape index: {}]   ;;  %s13765_s15 = inlined_call_operand.vmem [shape: f32[1,1,10], index: 15, kind: input, shape index: {}]   ;;  %s13766_s16 = inlined_call_operand.hbm [shape: f32[2,1,10], index: 16, kind: output, shape index: {}]  }
   0x1   :  { %13820 = sst [smem:[#allocation58_spill]] %s13750_s0 }
   0x2   :  { %v6217_v0 = vld [vmem:[%s13751_s1 + $0x8] sm:$0x3f]  ;;  %v7227_v1 = vmov 0   ;;  %v6219_v2 = vld [vmem:[%s13751_s1 + $0x18] sm:$0x3f] }
   0x3   :  { %6850 = vset.pattern.permute.xlu0 %v7227_v1  ;;  %6851 = vset.pattern.permute.xlu1 %v7227_v1  ;;  %v6221_v3 = vld [vmem:[%s13751_s1 + $0x28] sm:$0x3f] }
   0x4   :  { %136 = vperm.xlu0 %6850, %v6217_v0   ;;  %432 = vperm.xlu1 %6851, %v6219_v2  }
   0x5   :  { %6852 = vset.pattern.permute.xlu2 %v7227_v1 }
   0x6   :  { %688 = vperm.xlu2 %6852, %v6221_v3  }
   0x7   :  { %21 = vsyncpa [#allocation3], 0  ;;  %v6218_v4 = vld [vmem:[%s13751_s1 + $0x10] sm:$0x3f]  ;;  %v6220_v5 = vld [vmem:[%s13751_s1 + $0x20] sm:$0x3f] }
   0x8   :  { %v6222_v6 = vld [vmem:[%s13751_s1 + $0x30] sm:$0x3f]  ;;  %v6223_v7 = vld [vmem:[%s13751_s1 + $0x38] sm:$0x3f]  ;;  %v6224_v8 = vld [vmem:[%s13751_s1 + $0x40] sm:$0x3f] }
   0x9   :  { %v56_v9 = vld [vmem:[%s13751_s1] sm:$0x3f]  ;;  %s13821_s26 = sld [smem:[#allocation58_spill]]  ;;  %s7228_s28 = smov 127   ;;  %vm891_vm0 = vcmask 523264   ;;  %vm251_vm1 = vcmask 1039360  }
   0xa   :  { %s7229_s29 = smov 126   ;;  %s7230_s30 = smov 96   ;;  %vm379_vm2 = vcmask 1031168   ;;  %vm507_vm3 = vcmask 785408   ;;  %vm635_vm4 = vcmask 777216   ;;  %vm763_vm5 = vcmask 769024  }
   0xb   :  { %s7231_s0 = smov 95   ;;  %s7232_s17 = smov 94   ;;  %vm1019_vm6 = vcmask 515072   ;;  %vm1147_vm7 = vcmask 506880   ;;  %vm1230_vm8 = vcmask 1045504   ;;  %vm2802_vm12 = vcmask 48128  }
   0xc   :  { %304 = vperm.xlu0 %6850, %v6218_v4   ;;  %560 = vperm.xlu1 %6851, %v6220_v5   ;;  %s7233_s18 = smov 64   ;;  %s7234_s23 = smov 63   ;;  %vm3168_vm13 = vcmask 916480   ;;  %vm3302_vm14 = vcmask 908288   ;;  %vm3436_vm15 = vcmask 900096  }
   0xd   :  { %s7235_s24 = smov 62   ;;  %s6205_s21 = sshll.u32 %s13766_s16, 4  ;;  %s6206_s21 = int_to_ptr.hbm [resolvable:$true] %s6205_s21 }
   0xe   :  { %816 = vperm.xlu2 %6852, %v6222_v6   ;;  %s7241_s22 = smov 1  }
   0xf   :  { %v7357_v10 = vld [vmem:[%s13821_s26] sm:$0xff]  ;;  %v7379_v18 = vld [vmem:[%s13821_s26 + $0x9] sm:$0xff] }
  0x10   :  { %v7360_v11 = vperm.slane %v7357_v10, 1  ;;  %v7363_v12 = vperm.slane %v7357_v10, 0  ;;  %v7366_v13 = vperm.slane %v7357_v10, 2  ;;  %v7385_v19 = vperm.slane %v7379_v18, 1 }
  0x11   :  { %v7388_v20 = vperm.slane %v7379_v18, 0  ;;  %v7391_v21 = vperm.slane %v7379_v18, 2  ;;  %v7403_v25 = vperm.slane %v7379_v18, 3  ;;  %v7406_v26 = vperm.slane %v7357_v10, 3 }
  0x12   :  { %13822 = vst [vmem:[#allocation5_spill] sm:$0xff] %v7366_v13  ;;  %v7429_v34 = vperm.slane %v7357_v10, 4  ;;  %v7441_v38 = vperm.slane %v7379_v18, 4  ;;  %v7473_v49 = vperm.slane %v7379_v18, 5  ;;  %v7476_v50 = vperm.slane %v7357_v10, 5 }
  0x13   :  { %13823 = vst [vmem:[#allocation6_spill] sm:$0xff] %v7391_v21  ;;  %v7523_v3 = vperm.slane %v7379_v18, 6  ;;  %v7526_v4 = vperm.slane %v7357_v10, 6 }
  0x14   :  { %944 = vperm.xlu0 %6850, %v6223_v7   ;;  %1072 = vperm.xlu1 %6851, %v6224_v8   ;;  %13824 = vst [vmem:[#allocation7_spill] sm:$0xff] %v7403_v25 }
  0x15   :  { %13825 = vst [vmem:[#allocation8_spill] sm:$0xff] %v7406_v26 }
  0x16   :  { %59 = vperm.xlu2 %6852, %v56_v9  }
  0x60   :  { %v7478_v51 = vpop.permute.xlu2 %688 }
  0x68   :  { %v7495_v58 = vpop.permute.xlu2 %816 }
  0x70   :  { %v7511_v63 = vpop.permute.xlu2 %59 }
  0x76   :  { %v7368_v14 = vpop.permute.xlu0 %136  ;;  %v7452_v42 = vpop.permute.xlu1 %432 }
  0x77   :  { %v180_v15 = vmul.f32 %v7360_v11, %v7368_v14  ;;  %v179_v16 = vmul.f32 %v7363_v12, %v7368_v14  ;;  %v181_v17 = vmul.f32 %v7366_v13, %v7368_v14  ;;  %v189_v22 = vmul.f32 %v7385_v19, %v7368_v14 }
  0x78   :  { %v188_v23 = vmul.f32 %v7388_v20, %v7368_v14  ;;  %v190_v24 = vmul.f32 %v7391_v21, %v7368_v14  ;;  %v191_v28 = vmul.f32 %v7403_v25, %v7368_v14  ;;  %v182_v29 = vmul.f32 %v7406_v26, %v7368_v14 }
  0x79   :  { %217 = vrot.lane.b32.xlu1 %v180_v15, %s7228_s28  ;;  %215 = vrot.lane.b32.xlu0 %v179_v16, %s7228_s28  ;;  %v183_v37 = vmul.f32 %v7429_v34, %v7368_v14  ;;  %v192_v40 = vmul.f32 %v7441_v38, %v7368_v14  ;;  %v436_v43 = vmul.f32 %v7452_v42, %v7360_v11 }
  0x7a   :  { %219 = vrot.lane.b32.xlu2 %v181_v17, %s7228_s28  ;;  %v435_v44 = vmul.f32 %v7452_v42, %v7363_v12  ;;  %v437_v45 = vmul.f32 %v7452_v42, %v7366_v13  ;;  %v445_v46 = vmul.f32 %v7452_v42, %v7385_v19  ;;  %v444_v47 = vmul.f32 %v7452_v42, %v7388_v20 }
  0x7b   :  { %v446_v48 = vmul.f32 %v7452_v42, %v7391_v21  ;;  %v193_v52 = vmul.f32 %v7473_v49, %v7368_v14  ;;  %v184_v53 = vmul.f32 %v7476_v50, %v7368_v14  ;;  %v438_v55 = vmul.f32 %v7452_v42, %v7406_v26 }
  0x7c   :  { %v447_v57 = vmul.f32 %v7452_v42, %v7403_v25  ;;  %v194_v6 = vmul.f32 %v7523_v3, %v7368_v14  ;;  %v185_v7 = vmul.f32 %v7526_v4, %v7368_v14  ;;  %v439_v15 = vmul.f32 %v7452_v42, %v7429_v34 }
  0x7d   :  { %v448_v17 = vmul.f32 %v7452_v42, %v7441_v38 }
  0x7e   :  { %v7408_v27 = vpop.permute.xlu0 %304  ;;  %v7500_v59 = vpop.permute.xlu1 %560 }
  0x7f   :  { %v307_v30 = vmul.f32 %v7408_v27, %v7363_v12  ;;  %v309_v31 = vmul.f32 %v7408_v27, %v7366_v13  ;;  %v308_v32 = vmul.f32 %v7408_v27, %v7360_v11  ;;  %v316_v33 = vmul.f32 %v7408_v27, %v7388_v20 }
  0x80   :  { %v318_v35 = vmul.f32 %v7408_v27, %v7391_v21  ;;  %v317_v36 = vmul.f32 %v7408_v27, %v7385_v19  ;;  %v310_v39 = vmul.f32 %v7408_v27, %v7406_v26  ;;  %v319_v41 = vmul.f32 %v7408_v27, %v7403_v25 }
  0x81   :  { %235 = vrot.lane.b32.xlu1 %v189_v22, %s7228_s28  ;;  %233 = vrot.lane.b32.xlu0 %v188_v23, %s7228_s28  ;;  %v311_v54 = vmul.f32 %v7408_v27, %v7429_v34  ;;  %v320_v56 = vmul.f32 %v7408_v27, %v7441_v38  ;;  %v564_v60 = vmul.f32 %v7500_v59, %v7360_v11 }
  0x82   :  { %237 = vrot.lane.b32.xlu2 %v190_v24, %s7228_s28  ;;  %v563_v61 = vmul.f32 %v7500_v59, %v7363_v12  ;;  %v565_v62 = vmul.f32 %v7500_v59, %v7366_v13  ;;  %v573_v0 = vmul.f32 %v7500_v59, %v7385_v19  ;;  %v572_v1 = vmul.f32 %v7500_v59, %v7388_v20 }
  0x83   :  { %v574_v2 = vmul.f32 %v7500_v59, %v7391_v21  ;;  %v312_v8 = vmul.f32 %v7408_v27, %v7476_v50  ;;  %v321_v16 = vmul.f32 %v7408_v27, %v7473_v49 }
  0x86   :  { %v7550_v22 = vpop.permute.xlu0 %944  ;;  %v7552_v23 = vpop.permute.xlu1 %1072 }
  0x89   :  { %239 = vrot.lane.b32.xlu1 %v191_v28, %s7228_s28  ;;  %221 = vrot.lane.b32.xlu0 %v182_v29, %s7228_s28  ;;  %v575_v28 = vmul.f32 %v7500_v59, %v7403_v25  ;;  %v566_v29 = vmul.f32 %v7500_v59, %v7406_v26 }
  0x8a   :  { %343 = vrot.lane.b32.xlu2 %v307_v30, %s7229_s29  ;;  %v691_v30 = vmul.f32 %v7478_v51, %v7363_v12 }
  0x91   :  { %347 = vrot.lane.b32.xlu1 %v309_v31, %s7229_s29  ;;  %345 = vrot.lane.b32.xlu0 %v308_v32, %s7229_s29 }
  0x92   :  { %361 = vrot.lane.b32.xlu2 %v316_v33, %s7229_s29 }
  0x99   :  { %365 = vrot.lane.b32.xlu1 %v318_v35, %s7229_s29  ;;  %363 = vrot.lane.b32.xlu0 %v317_v36, %s7229_s29  ;;  %v693_v35 = vmul.f32 %v7478_v51, %v7366_v13  ;;  %v692_v36 = vmul.f32 %v7478_v51, %v7360_v11 }
  0x9a   :  { %223 = vrot.lane.b32.xlu2 %v183_v37, %s7228_s28  ;;  %v700_v37 = vmul.f32 %v7478_v51, %v7388_v20 }
  0xa1   :  { %349 = vrot.lane.b32.xlu1 %v310_v39, %s7229_s29  ;;  %241 = vrot.lane.b32.xlu0 %v192_v40, %s7228_s28 }
  0xa2   :  { %367 = vrot.lane.b32.xlu2 %v319_v41, %s7229_s29 }
  0xa9   :  { %473 = vrot.lane.b32.xlu1 %v436_v43, %s7230_s30  ;;  %471 = vrot.lane.b32.xlu0 %v435_v44, %s7230_s30  ;;  %v7587_v43 = vperm.slane %v7357_v10, 7  ;;  %v702_v44 = vmul.f32 %v7478_v51, %v7391_v21  ;;  %v7603_v10 = vperm.slane %v7379_v18, 7 }
  0xaa   :  { %475 = vrot.lane.b32.xlu2 %v437_v45, %s7230_s30  ;;  %v701_v45 = vmul.f32 %v7478_v51, %v7385_v19 }
  0xab   :  { %13828 = vst [vmem:[#allocation11_spill] sm:$0xff] %v7587_v43 }
  0xb1   :  { %491 = vrot.lane.b32.xlu1 %v445_v46, %s7230_s30  ;;  %489 = vrot.lane.b32.xlu0 %v444_v47, %s7230_s30  ;;  %v186_v46 = vmul.f32 %v7587_v43, %v7368_v14 }
  0xb2   :  { %493 = vrot.lane.b32.xlu2 %v446_v48, %s7230_s30 }
  0xb9   :  { %243 = vrot.lane.b32.xlu1 %v193_v52, %s7228_s28  ;;  %225 = vrot.lane.b32.xlu0 %v184_v53, %s7228_s28  ;;  %v313_v53 = vmul.f32 %v7408_v27, %v7526_v4 }
  0xba   :  { %351 = vrot.lane.b32.xlu2 %v311_v54, %s7229_s29  ;;  %v195_v54 = vmul.f32 %v7603_v10, %v7368_v14 }
  0xc1   :  { %477 = vrot.lane.b32.xlu1 %v438_v55, %s7230_s30  ;;  %369 = vrot.lane.b32.xlu0 %v320_v56, %s7229_s29  ;;  %v322_v55 = vmul.f32 %v7408_v27, %v7523_v3 }
  0xc2   :  { %495 = vrot.lane.b32.xlu2 %v447_v57, %s7230_s30 }
  0xc9   :  { %601 = vrot.lane.b32.xlu1 %v564_v60, %s7231_s0  ;;  %599 = vrot.lane.b32.xlu0 %v563_v61, %s7231_s0  ;;  %v449_v60 = vmul.f32 %v7452_v42, %v7473_v49  ;;  %v440_v61 = vmul.f32 %v7452_v42, %v7476_v50 }
  0xca   :  { %603 = vrot.lane.b32.xlu2 %v565_v62, %s7231_s0  ;;  %v567_v62 = vmul.f32 %v7500_v59, %v7429_v34 }
  0xd1   :  { %619 = vrot.lane.b32.xlu1 %v573_v0, %s7231_s0  ;;  %617 = vrot.lane.b32.xlu0 %v572_v1, %s7231_s0 }
  0xd2   :  { %621 = vrot.lane.b32.xlu2 %v574_v2, %s7231_s0 }
  0xd4   :  { %v7528_v5 = vpop.permute.xlu2 %219 }
  0xd5   :  { %13826 = vst [vmem:[#allocation9_spill] sm:$0xff] %v7528_v5 }
  0xd9   :  { %245 = vrot.lane.b32.xlu1 %v194_v6, %s7228_s28  ;;  %227 = vrot.lane.b32.xlu0 %v185_v7, %s7228_s28  ;;  %v694_v6 = vmul.f32 %v7478_v51, %v7406_v26  ;;  %v576_v7 = vmul.f32 %v7500_v59, %v7441_v38 }
  0xda   :  { %353 = vrot.lane.b32.xlu2 %v312_v8, %s7229_s29  ;;  %v703_v8 = vmul.f32 %v7478_v51, %v7403_v25 }
  0xdc   :  { %v7539_v9 = vpop.permute.xlu2 %237 }
  0xe1   :  { %479 = vrot.lane.b32.xlu1 %v439_v15, %s7230_s30  ;;  %371 = vrot.lane.b32.xlu0 %v321_v16, %s7229_s29 }
  0xe2   :  { %497 = vrot.lane.b32.xlu2 %v448_v17, %s7230_s30 }
  0xe4   :  { %v7554_v24 = vpop.permute.xlu2 %343 }
  0xe9   :  { %623 = vrot.lane.b32.xlu1 %v575_v28, %s7231_s0  ;;  %605 = vrot.lane.b32.xlu0 %v566_v29, %s7231_s0  ;;  %v820_v28 = vmul.f32 %v7495_v58, %v7360_v11  ;;  %v819_v29 = vmul.f32 %v7495_v58, %v7363_v12 }
  0xea   :  { %727 = vrot.lane.b32.xlu2 %v691_v30, %s7232_s17  ;;  %v821_v30 = vmul.f32 %v7495_v58, %v7366_v13 }
  0xeb   :  { %v7565_v31 = vpop.permute.xlu1 %217  ;;  %v7567_v32 = vpop.permute.xlu0 %215 }
  0xec   :  { %v7569_v33 = vpop.permute.xlu2 %361 }
  0xf1   :  { %731 = vrot.lane.b32.xlu1 %v693_v35, %s7232_s17  ;;  %729 = vrot.lane.b32.xlu0 %v692_v36, %s7232_s17 }
  0xf2   :  { %745 = vrot.lane.b32.xlu2 %v700_v37, %s7232_s17 }
  0xf3   :  { %v7580_v39 = vpop.permute.xlu1 %235  ;;  %v7582_v40 = vpop.permute.xlu0 %233 }
  0xf4   :  { %v7584_v41 = vpop.permute.xlu2 %223 }
  0xf5   :  { %13827 = vst [vmem:[#allocation10_spill] sm:$0xff] %v7584_v41  ;;  %v949_v41 = vmul.f32 %v7550_v22, %v7366_v13 }
  0xf9   :  { %749 = vrot.lane.b32.xlu1 %v702_v44, %s7232_s17  ;;  %747 = vrot.lane.b32.xlu0 %v701_v45, %s7232_s17  ;;  %v829_v44 = vmul.f32 %v7495_v58, %v7385_v19  ;;  %v828_v45 = vmul.f32 %v7495_v58, %v7388_v20 }
  0xfa   :  { %229 = vrot.lane.b32.xlu2 %v186_v46, %s7228_s28  ;;  %v830_v46 = vmul.f32 %v7495_v58, %v7391_v21 }
  0xfb   :  { %v7598_v47 = vpop.permute.xlu1 %239  ;;  %v7600_v48 = vpop.permute.xlu0 %221 }
  0xfc   :  { %13829 = vst [vmem:[#allocation12_spill] sm:$0xff] %v7598_v47  ;;  %v7605_v52 = vpop.permute.xlu2 %367  ;;  %v1077_v47 = vmul.f32 %v7552_v23, %v7366_v13  ;;  %v1086_v13 = vmul.f32 %v7552_v23, %v7391_v21 }
  0xfd   :  { %13830 = vst [vmem:[#allocation13_spill] sm:$0xff] %v7600_v48  ;;  %v947_v48 = vmul.f32 %v7550_v22, %v7363_v12 }
  0xfe   :  { %13831 = vst [vmem:[#allocation14_spill] sm:$0xff] %v7605_v52  ;;  %v1075_v52 = vmul.f32 %v7552_v23, %v7363_v12 }
 0x101   :  { %355 = vrot.lane.b32.xlu1 %v313_v53, %s7229_s29  ;;  %247 = vrot.lane.b32.xlu0 %v195_v54, %s7228_s28 }
 0x102   :  { %373 = vrot.lane.b32.xlu2 %v322_v55, %s7229_s29  ;;  %v7683_v55 = vld [vmem:[%s13821_s26 + $0x11] ss:$0 sm:$0xff] }
 0x103   :  { %v7616_v56 = vpop.permute.xlu1 %347  ;;  %v7618_v18 = vpop.permute.xlu0 %345 }
 0x104   :  { %13832 = vst [vmem:[#allocation15_spill] sm:$0xff] %v7616_v56  ;;  %v7620_v57 = vpop.permute.xlu2 %475 }
 0x109   :  { %499 = vrot.lane.b32.xlu1 %v449_v60, %s7230_s30  ;;  %481 = vrot.lane.b32.xlu0 %v440_v61, %s7230_s30  ;;  %v7688_v60 = vld [vmem:[%s13821_s26 + $0x8] ss:$0 sm:$0xff] }
 0x10a   :  { %607 = vrot.lane.b32.xlu2 %v567_v62, %s7231_s0  ;;  %v196_v62 = vmul.f32 %v7683_v55, %v7368_v14 }
 0x10b   :  { %v7631_v0 = vpop.permute.xlu1 %365  ;;  %v7633_v1 = vpop.permute.xlu0 %363 }
 0x10c   :  { %v7635_v2 = vpop.permute.xlu2 %493 }
 0x111   :  { %733 = vrot.lane.b32.xlu1 %v694_v6, %s7232_s17  ;;  %625 = vrot.lane.b32.xlu0 %v576_v7, %s7231_s0  ;;  %v187_v6 = vmul.f32 %v7688_v60, %v7368_v14  ;;  %v314_v7 = vmul.f32 %v7408_v27, %v7587_v43  ;;  %v323_v14 = vmul.f32 %v7408_v27, %v7603_v10 }
 0x112   :  { %751 = vrot.lane.b32.xlu2 %v703_v8, %s7232_s17 }
 0x113   :  { %v7646_v15 = vpop.permute.xlu1 %349  ;;  %v7648_v16 = vpop.permute.xlu0 %241 }
 0x114   :  { %13833 = vst [vmem:[#allocation16_spill] sm:$0xff] %v7646_v15  ;;  %v7650_v17 = vpop.permute.xlu2 %351  ;;  %v695_v15 = vmul.f32 %v7478_v51, %v7429_v34 }
 0x115   :  { %13834 = vst [vmem:[#allocation17_spill] sm:$0xff] %v7648_v16  ;;  %v957_v16 = vmul.f32 %v7550_v22, %v7385_v19 }
 0x116   :  { %13835 = vst [vmem:[#allocation18_spill] sm:$0xff] %v7650_v17  ;;  %v831_v17 = vmul.f32 %v7495_v58, %v7403_v25 }
 0x119   :  { %857 = vrot.lane.b32.xlu1 %v820_v28, %s7233_s18  ;;  %855 = vrot.lane.b32.xlu0 %v819_v29, %s7233_s18 }
 0x11a   :  { %859 = vrot.lane.b32.xlu2 %v821_v30, %s7233_s18  ;;  %v441_v30 = vmul.f32 %v7452_v42, %v7526_v4 }
 0x11b   :  { %v7661_v35 = vpop.permute.xlu1 %473  ;;  %v7663_v36 = vpop.permute.xlu0 %471 }
 0x11c   :  { %v7665_v37 = vpop.permute.xlu2 %495 }
 0x11d   :  { %13836 = vst [vmem:[#allocation19_spill] sm:$0xff] %v7665_v37  ;;  %v959_v37 = vmul.f32 %v7550_v22, %v7403_v25 }
 0x121   :  { %875 = vrot.lane.b32.xlu1 %v829_v44, %s7233_s18  ;;  %873 = vrot.lane.b32.xlu0 %v828_v45, %s7233_s18  ;;  %v450_v44 = vmul.f32 %v7452_v42, %v7523_v3 }
 0x122   :  { %877 = vrot.lane.b32.xlu2 %v830_v46, %s7233_s18 }
 0x123   :  { %v7676_v53 = vpop.permute.xlu1 %491  ;;  %v7678_v54 = vpop.permute.xlu0 %489 }
 0x124   :  { %v7690_v61 = vpop.permute.xlu2 %603 }
 0x129   :  { %249 = vrot.lane.b32.xlu1 %v196_v62, %s7228_s28  ;;  %231 = vrot.lane.b32.xlu0 %v187_v6, %s7228_s28  ;;  %v577_v6 = vmul.f32 %v7500_v59, %v7473_v49 }
 0x12a   :  { %357 = vrot.lane.b32.xlu2 %v314_v7, %s7229_s29  ;;  %v568_v7 = vmul.f32 %v7500_v59, %v7476_v50 }
 0x12b   :  { %v7701_v8 = vpop.permute.xlu1 %243  ;;  %v7703_v28 = vpop.permute.xlu0 %225 }
 0x12c   :  { %13837 = vst [vmem:[#allocation20_spill] sm:$0xff] %v7701_v8  ;;  %v7705_v29 = vpop.permute.xlu2 %621  ;;  %v956_v8 = vmul.f32 %v7550_v22, %v7388_v20 }
 0x12d   :  { %13838 = vst [vmem:[#allocation21_spill] sm:$0xff] %v7703_v28  ;;  %v315_v28 = vmul.f32 %v7688_v60, %v7408_v27 }
 0x131   :  { %483 = vrot.lane.b32.xlu1 %v441_v30, %s7230_s30  ;;  %375 = vrot.lane.b32.xlu0 %v323_v14, %s7229_s29 }
 0x132   :  { %501 = vrot.lane.b32.xlu2 %v450_v44, %s7230_s30 }
 0x133   :  { %v7716_v45 = vpop.permute.xlu1 %477  ;;  %v7718_v46 = vpop.permute.xlu0 %369 }
 0x134   :  { %13839 = vst [vmem:[#allocation22_spill] sm:$0xff] %v7716_v45  ;;  %v7720_v62 = vpop.permute.xlu2 %353  ;;  %v822_v45 = vmul.f32 %v7495_v58, %v7406_v26 }
 0x135   :  { %13840 = vst [vmem:[#allocation23_spill] sm:$0xff] %v7718_v46  ;;  %v704_v46 = vmul.f32 %v7478_v51, %v7441_v38 }
 0x136   :  { %13841 = vst [vmem:[#allocation24_spill] sm:$0xff] %v7720_v62  ;;  %v958_v62 = vmul.f32 %v7550_v22, %v7391_v21  ;;  %v570_v21 = vmul.f32 %v7500_v59, %v7587_v43 }
 0x139   :  { %627 = vrot.lane.b32.xlu1 %v577_v6, %s7231_s0  ;;  %609 = vrot.lane.b32.xlu0 %v568_v7, %s7231_s0 }
 0x13a   :  { %735 = vrot.lane.b32.xlu2 %v695_v15, %s7232_s17 }
 0x13b   :  { %v7731_v30 = vpop.permute.xlu1 %601  ;;  %v7733_v14 = vpop.permute.xlu0 %599 }
 0x13c   :  { %v7735_v44 = vpop.permute.xlu2 %497 }
 0x13d   :  { %13842 = vst [vmem:[#allocation25_spill] sm:$0xff] %v7735_v44  ;;  %v948_v44 = vmul.f32 %v7550_v22, %v7360_v11 }
 0x141   :  { %861 = vrot.lane.b32.xlu1 %v822_v45, %s7233_s18  ;;  %753 = vrot.lane.b32.xlu0 %v704_v46, %s7232_s17 }
 0x142   :  { %879 = vrot.lane.b32.xlu2 %v831_v17, %s7233_s18 }
 0x143   :  { %v7746_v15 = vpop.permute.xlu1 %619  ;;  %v7748_v6 = vpop.permute.xlu0 %617 }
 0x144   :  { %v7750_v7 = vpop.permute.xlu2 %727 }
 0x149   :  { %985 = vrot.lane.b32.xlu1 %v948_v44, %s7234_s23  ;;  %983 = vrot.lane.b32.xlu0 %v947_v48, %s7234_s23 }
 0x14a   :  { %987 = vrot.lane.b32.xlu2 %v949_v41, %s7234_s23 }
 0x14b   :  { %v7761_v17 = vpop.permute.xlu1 %245  ;;  %v7763_v45 = vpop.permute.xlu0 %227 }
 0x14c   :  { %13843 = vst [vmem:[#allocation26_spill] sm:$0xff] %v7761_v17  ;;  %v7765_v46 = vpop.permute.xlu2 %745  ;;  %v324_v17 = vmul.f32 %v7683_v55, %v7408_v27  ;;  %v451_v27 = vmul.f32 %v7452_v42, %v7603_v10 }
 0x14d   :  { %13844 = vst [vmem:[#allocation27_spill] sm:$0xff] %v7763_v45  ;;  %v442_v45 = vmul.f32 %v7452_v42, %v7587_v43 }
 0x151   :  { %1003 = vrot.lane.b32.xlu1 %v957_v16, %s7234_s23  ;;  %1001 = vrot.lane.b32.xlu0 %v956_v8, %s7234_s23 }
 0x152   :  { %1005 = vrot.lane.b32.xlu2 %v958_v62, %s7234_s23 }
 0x153   :  { %v7776_v41 = vpop.permute.xlu1 %479  ;;  %v7778_v48 = vpop.permute.xlu0 %371 }
 0x154   :  { %13845 = vst [vmem:[#allocation28_spill] sm:$0xff] %v7776_v41  ;;  %v7780_v44 = vpop.permute.xlu2 %229  ;;  %v578_v41 = vmul.f32 %v7500_v59, %v7523_v3 }
 0x155   :  { %13846 = vst [vmem:[#allocation29_spill] sm:$0xff] %v7778_v48  ;;  %v696_v48 = vmul.f32 %v7478_v51, %v7476_v50 }
 0x156   :  { %13847 = vst [vmem:[#allocation30_spill] sm:$0xff] %v7780_v44  ;;  %v569_v44 = vmul.f32 %v7500_v59, %v7526_v4 }
 0x159   :  { %377 = vrot.lane.b32.xlu1 %v324_v17, %s7229_s29  ;;  %359 = vrot.lane.b32.xlu0 %v315_v28, %s7229_s29 }
 0x15a   :  { %485 = vrot.lane.b32.xlu2 %v442_v45, %s7230_s30 }
 0x15b   :  { %v7791_v16 = vpop.permute.xlu1 %623  ;;  %v7793_v8 = vpop.permute.xlu0 %605 }
 0x15c   :  { %13848 = vst [vmem:[#allocation31_spill] sm:$0xff] %v7791_v16  ;;  %v7795_v62 = vpop.permute.xlu2 %373  ;;  %v832_v16 = vmul.f32 %v7495_v58, %v7441_v38 }
 0x15d   :  { %13849 = vst [vmem:[#allocation32_spill] sm:$0xff] %v7793_v8  ;;  %v705_v8 = vmul.f32 %v7478_v51, %v7473_v49 }
 0x15e   :  { %13850 = vst [vmem:[#allocation33_spill] sm:$0xff] %v7795_v62  ;;  %v823_v62 = vmul.f32 %v7495_v58, %v7429_v34 }
 0x161   :  { %611 = vrot.lane.b32.xlu1 %v569_v44, %s7231_s0  ;;  %503 = vrot.lane.b32.xlu0 %v451_v27, %s7230_s30 }
 0x162   :  { %629 = vrot.lane.b32.xlu2 %v578_v41, %s7231_s0 }
 0x163   :  { %v7806_v28 = vpop.permute.xlu1 %731  ;;  %v7808_v17 = vpop.permute.xlu0 %729 }
 0x164   :  { %v7810_v45 = vpop.permute.xlu2 %607 }
 0x165   :  { %13851 = vst [vmem:[#allocation34_spill] sm:$0xff] %v7810_v45  ;;  %v950_v45 = vmul.f32 %v7550_v22, %v7406_v26 }
 0x169   :  { %755 = vrot.lane.b32.xlu1 %v705_v8, %s7232_s17  ;;  %737 = vrot.lane.b32.xlu0 %v696_v48, %s7232_s17 }
 0x16a   :  { %863 = vrot.lane.b32.xlu2 %v823_v62, %s7233_s18 }
 0x16b   :  { %v7821_v41 = vpop.permute.xlu1 %749  ;;  %v7823_v44 = vpop.permute.xlu0 %747 }
 0x16c   :  { %13852 = vst [vmem:[#allocation35_spill] sm:$0xff] %v7821_v41  ;;  %v7825_v27 = vpop.permute.xlu2 %751  ;;  %v833_v41 = vmul.f32 %v7495_v58, %v7473_v49 }
 0x16d   :  { %13853 = vst [vmem:[#allocation36_spill] sm:$0xff] %v7825_v27  ;;  %v1076_v27 = vmul.f32 %v7552_v23, %v7360_v11 }
 0x171   :  { %989 = vrot.lane.b32.xlu1 %v950_v45, %s7234_s23  ;;  %881 = vrot.lane.b32.xlu0 %v832_v16, %s7233_s18 }
 0x172   :  { %1007 = vrot.lane.b32.xlu2 %v959_v37, %s7234_s23 }
 0x173   :  { %v7836_v48 = vpop.permute.xlu1 %355  ;;  %v7838_v8 = vpop.permute.xlu0 %247 }
 0x174   :  { %13854 = vst [vmem:[#allocation37_spill] sm:$0xff] %v7836_v48  ;;  %v7840_v62 = vpop.permute.xlu2 %859  ;;  %v1085_v48 = vmul.f32 %v7552_v23, %v7385_v19 }
 0x175   :  { %13855 = vst [vmem:[#allocation38_spill] sm:$0xff] %v7838_v8  ;;  %v1084_v8 = vmul.f32 %v7552_v23, %v7388_v20 }
 0x179   :  { %1113 = vrot.lane.b32.xlu1 %v1076_v27, %s7235_s24  ;;  %1111 = vrot.lane.b32.xlu0 %v1075_v52, %s7235_s24 }
 0x17a   :  { %1115 = vrot.lane.b32.xlu2 %v1077_v47, %s7235_s24 }
 0x17b   :  { %v7851_v37 = vpop.permute.xlu1 %499  ;;  %v7853_v16 = vpop.permute.xlu0 %481 }
 0x17c   :  { %13856 = vst [vmem:[#allocation39_spill] sm:$0xff] %v7851_v37  ;;  %v7855_v45 = vpop.permute.xlu2 %877  ;;  %v452_v37 = vmul.f32 %v7683_v55, %v7452_v42 }
 0x17d   :  { %13857 = vst [vmem:[#allocation40_spill] sm:$0xff] %v7853_v16  ;;  %v443_v16 = vmul.f32 %v7688_v60, %v7452_v42 }
 0x17e   :  { %13858 = vst [vmem:[#allocation41_spill] sm:$0xff] %v7855_v45 }
 0x181   :  { %1131 = vrot.lane.b32.xlu1 %v1085_v48, %s7235_s24  ;;  %1129 = vrot.lane.b32.xlu0 %v1084_v8, %s7235_s24 }
 0x182   :  { %1133 = vrot.lane.b32.xlu2 %v1086_v13, %s7235_s24 }
 0x183   :  { %v7866_v47 = vpop.permute.xlu1 %733  ;;  %v7868_v52 = vpop.permute.xlu0 %625 }
 0x184   :  { %13859 = vst [vmem:[#allocation42_spill] sm:$0xff] %v7866_v47  ;;  %v7870_v27 = vpop.permute.xlu2 %357 }
 0x185   :  { %13860 = vst [vmem:[#allocation43_spill] sm:$0xff] %v7868_v52 }
 0x186   :  { %13861 = vst [vmem:[#allocation44_spill] sm:$0xff] %v7870_v27  ;;  %v697_v27 = vmul.f32 %v7478_v51, %v7526_v4 }
 0x189   :  { %505 = vrot.lane.b32.xlu1 %v452_v37, %s7230_s30  ;;  %487 = vrot.lane.b32.xlu0 %v443_v16, %s7230_s30  ;;  %v579_v37 = vmul.f32 %v7500_v59, %v7603_v10 }
 0x18a   :  { %613 = vrot.lane.b32.xlu2 %v570_v21, %s7231_s0  ;;  %v706_v21 = vmul.f32 %v7478_v51, %v7523_v3 }
 0x18b   :  { %v7881_v13 = vpop.permute.xlu1 %857  ;;  %v7883_v48 = vpop.permute.xlu0 %855 }
 0x18c   :  { %v7888_v8 = vsel %vm891_vm0, %v7881_v13, %v7840_v62  ;;  %v7890_v42 = vpop.permute.xlu2 %501 }
 0x18d   :  { %13862 = vst [vmem:[#allocation45_spill] sm:$0xff] %v7890_v42 }
 0x191   :  { %739 = vrot.lane.b32.xlu1 %v697_v27, %s7232_s17  ;;  %631 = vrot.lane.b32.xlu0 %v579_v37, %s7231_s0  ;;  %v824_v27 = vmul.f32 %v7495_v58, %v7476_v50  ;;  %v951_v37 = vmul.f32 %v7550_v22, %v7429_v34 }
 0x192   :  { %757 = vrot.lane.b32.xlu2 %v706_v21, %s7232_s17 }
 0x193   :  { %v7901_v16 = vpop.permute.xlu1 %875  ;;  %v7903_v47 = vpop.permute.xlu0 %873 }
 0x194   :  { %13863 = vst [vmem:[#allocation46_spill] sm:$0xff] %v7901_v16  ;;  %v7908_v52 = vsel %vm891_vm0, %v7901_v16, %v7855_v45  ;;  %v7910_v42 = vpop.permute.xlu2 %735  ;;  %v1087_v16 = vmul.f32 %v7552_v23, %v7403_v25  ;;  %v698_v25 = vmul.f32 %v7478_v51, %v7587_v43 }
 0x195   :  { %13864 = vst [vmem:[#allocation47_spill] sm:$0xff] %v7903_v47  ;;  %v960_v47 = vmul.f32 %v7550_v22, %v7441_v38 }
 0x196   :  { %13865 = vst [vmem:[#allocation48_spill] sm:$0xff] %v7908_v52  ;;  %v1078_v52 = vmul.f32 %v7552_v23, %v7406_v26  ;;  %v571_v26 = vmul.f32 %v7688_v60, %v7500_v59 }
 0x197   :  { %13866 = vst [vmem:[#allocation49_spill] sm:$0xff] %v7910_v42 }
 0x199   :  { %883 = vrot.lane.b32.xlu1 %v833_v41, %s7233_s18  ;;  %865 = vrot.lane.b32.xlu0 %v824_v27, %s7233_s18 }
 0x19a   :  { %991 = vrot.lane.b32.xlu2 %v951_v37, %s7234_s23 }
 0x19b   :  { %v7921_v21 = vpop.permute.xlu1 %249  ;;  %v7923_v45 = vpop.permute.xlu0 %231 }
 0x19c   :  { %13867 = vst [vmem:[#allocation50_spill] sm:$0xff] %v7923_v45  ;;  %v7925_v42 = vpop.permute.xlu2 %879  ;;  %v580_v45 = vmul.f32 %v7683_v55, %v7500_v59  ;;  %v97_v59 = vmul.f32 %v7360_v11, %v7511_v63  ;;  %v380_v11 = vsel %vm379_vm2, %v7554_v24, %v7618_v18  ;;  %v508_v24 = vsel %vm507_vm3, %v7663_v36, %v7661_v35 }
 0x1a1   :  { %1117 = vrot.lane.b32.xlu1 %v1078_v52, %s7235_s24  ;;  %1009 = vrot.lane.b32.xlu0 %v960_v47, %s7234_s23 }
 0x1a2   :  { %1135 = vrot.lane.b32.xlu2 %v1087_v16, %s7235_s24 }
 0x1a3   :  { %v7936_v41 = vpop.permute.xlu1 %483  ;;  %v7938_v27 = vpop.permute.xlu0 %375 }
 0x1a4   :  { %13868 = vst [vmem:[#allocation51_spill] sm:$0xff] %v7936_v41  ;;  %v7940_v37 = vpop.permute.xlu2 %987  ;;  %v253_v41 = vsel %vm251_vm1, %v7565_v31, %v7528_v5  ;;  %v509_v5 = vsel %vm507_vm3, %v7661_v35, %v7620_v57 }
 0x1a9   :  { %633 = vrot.lane.b32.xlu1 %v580_v45, %s7231_s0  ;;  %615 = vrot.lane.b32.xlu0 %v571_v26, %s7231_s0  ;;  %v252_v26 = vsel %vm251_vm1, %v7567_v32, %v7565_v31  ;;  %v825_v45 = vmul.f32 %v7495_v58, %v7526_v4  ;;  %v834_v31 = vmul.f32 %v7495_v58, %v7523_v3 }
 0x1aa   :  { %741 = vrot.lane.b32.xlu2 %v698_v25, %s7232_s17  ;;  %v96_v25 = vmul.f32 %v7363_v12, %v7511_v63  ;;  %v285_v32 = vadd.f32 %v253_v41, %v97_v59 }
 0x1ab   :  { %v7951_v47 = vpop.permute.xlu1 %627  ;;  %v7953_v52 = vpop.permute.xlu0 %609 }
 0x1ac   :  { %13869 = vst [vmem:[#allocation52_spill] sm:$0xff] %v7951_v47  ;;  %v7955_v16 = vpop.permute.xlu2 %1005  ;;  %v707_v47 = vmul.f32 %v7478_v51, %v7603_v10  ;;  %v284_v12 = vadd.f32 %v252_v26, %v96_v25  ;;  %v636_v26 = vsel %vm635_vm4, %v7733_v14, %v7731_v30  ;;  %v261_v25 = vsel %vm251_vm1, %v7580_v39, %v7539_v9 }
 0x1ad   :  { %13870 = vst [vmem:[#allocation53_spill] sm:$0xff] %v7953_v52  ;;  %v381_v52 = vsel %vm379_vm2, %v7618_v18, %v7616_v56  ;;  %v260_v14 = vsel %vm251_vm1, %v7582_v40, %v7580_v39  ;;  %v388_v39 = vsel %vm379_vm2, %v7569_v33, %v7633_v1  ;;  %v389_v40 = vsel %vm379_vm2, %v7633_v1, %v7631_v0 }
 0x1ae   :  { %v412_v18 = vadd.f32 %v380_v11, %v284_v12  ;;  %v413_v56 = vadd.f32 %v381_v52, %v285_v32  ;;  %v961_v52 = vmul.f32 %v7550_v22, %v7473_v49  ;;  %v765_v32 = vsel %vm763_vm5, %v7808_v17, %v7806_v28 }
 0x1af   :  { %v517_v33 = vsel %vm507_vm3, %v7676_v53, %v7635_v2  ;;  %v516_v1 = vsel %vm507_vm3, %v7678_v54, %v7676_v53 }
 0x1b0   :  { %v540_v11 = vadd.f32 %v508_v24, %v412_v18 }
 0x1b1   :  { %867 = vrot.lane.b32.xlu1 %v825_v45, %s7233_s18  ;;  %759 = vrot.lane.b32.xlu0 %v707_v47, %s7232_s17  ;;  %v637_v47 = vsel %vm635_vm4, %v7731_v30, %v7690_v61  ;;  %v541_v45 = vadd.f32 %v509_v5, %v413_v56  ;;  %v105_v30 = vmul.f32 %v7385_v19, %v7511_v63 }
 0x1b2   :  { %885 = vrot.lane.b32.xlu2 %v834_v31, %s7233_s18  ;;  %v952_v31 = vmul.f32 %v7550_v22, %v7476_v50  ;;  %v104_v5 = vmul.f32 %v7388_v20, %v7511_v63  ;;  %v668_v12 = vadd.f32 %v636_v26, %v540_v11  ;;  %v1079_v19 = vmul.f32 %v7552_v23, %v7429_v34 }
 0x1b3   :  { %v7988_v41 = vpop.permute.xlu1 %861  ;;  %v7990_v59 = vpop.permute.xlu0 %753  ;;  %v669_v56 = vadd.f32 %v637_v47, %v541_v45  ;;  %v293_v24 = vadd.f32 %v261_v25, %v105_v30  ;;  %v645_v45 = vsel %vm635_vm4, %v7746_v15, %v7705_v29  ;;  %v644_v11 = vsel %vm635_vm4, %v7748_v6, %v7746_v15 }
 0x1b4   :  { %13871 = vst [vmem:[#allocation54_spill] sm:$0xff] %v7988_v41  ;;  %v8001_v35 = vsel %vm891_vm0, %v7840_v62, %v7988_v41  ;;  %v8003_v36 = vpop.permute.xlu2 %485  ;;  %v764_v62 = vsel %vm763_vm5, %v7750_v7, %v7808_v17  ;;  %v892_v7 = vsel %vm891_vm0, %v7883_v48, %v7881_v13  ;;  %v292_v17 = vadd.f32 %v260_v14, %v104_v5  ;;  %v13875_v5 = vld [vmem:[#allocation35_spill] sm:$0xff] }
 0x1b5   :  { %v796_v20 = vadd.f32 %v764_v62, %v668_v12  ;;  %v797_v18 = vadd.f32 %v765_v32, %v669_v56  ;;  %v421_v13 = vadd.f32 %v389_v40, %v293_v24  ;;  %v772_v32 = vsel %vm763_vm5, %v7765_v46, %v7823_v44  ;;  %v13876_v56 = vld [vmem:[#allocation12_spill] sm:$0xff]  ;;  %v13877_v40 = vld [vmem:[#allocation6_spill] sm:$0xff] }
 0x1b6   :  { %v420_v47 = vadd.f32 %v388_v39, %v292_v17  ;;  %v773_v15 = vsel %vm763_vm5, %v7823_v44, %v13875_v5  ;;  %v1088_v6 = vmul.f32 %v7552_v23, %v7441_v38  ;;  %v262_v12 = vsel %vm251_vm1, %v7539_v9, %v13876_v56  ;;  %v13878_v46 = vld [vmem:[#allocation46_spill] sm:$0xff]  ;;  %v13879_v17 = vld [vmem:[#allocation47_spill] sm:$0xff] }
 0x1b7   :  { %v925_v48 = vadd.f32 %v7888_v8, %v797_v18  ;;  %v924_v26 = vadd.f32 %v892_v7, %v796_v20  ;;  %v549_v30 = vadd.f32 %v517_v33, %v421_v13  ;;  %v699_v39 = vmul.f32 %v7688_v60, %v7478_v51  ;;  %v13880_v18 = vld [vmem:[#allocation14_spill] sm:$0xff]  ;;  %v13881_v13 = vld [vmem:[#allocation19_spill] sm:$0xff] }
 0x1b8   :  { %v548_v8 = vadd.f32 %v516_v1, %v420_v47  ;;  %v106_v7 = vmul.f32 %v13877_v40, %v7511_v63  ;;  %v900_v20 = vsel %vm891_vm0, %v13879_v17, %v13878_v46  ;;  %v708_v44 = vmul.f32 %v7683_v55, %v7478_v51  ;;  %v13888_v40 = vld [vmem:[#allocation38_spill] sm:$0xff]  ;;  %v13889_v17 = vld [vmem:[#allocation41_spill] sm:$0xff] }
 0x1b9   :  { %1011 = vrot.lane.b32.xlu1 %v961_v52, %s7234_s23  ;;  %993 = vrot.lane.b32.xlu0 %v952_v31, %s7234_s23  ;;  %v390_v33 = vsel %vm379_vm2, %v7631_v0, %v13880_v18  ;;  %v111_v46 = vmul.f32 %v7603_v10, %v7511_v63 }
 0x1ba   :  { %1119 = vrot.lane.b32.xlu2 %v1079_v19, %s7235_s24  ;;  %v677_v19 = vadd.f32 %v645_v45, %v549_v30  ;;  %v676_v24 = vadd.f32 %v644_v11, %v548_v8  ;;  %v294_v47 = vadd.f32 %v262_v12, %v106_v7  ;;  %v13884_v30 = vld [vmem:[#allocation31_spill] sm:$0xff]  ;;  %v953_v7 = vmul.f32 %v7550_v22, %v7526_v4 }
 0x1bb   :  { %v986_v25 = vpop.permute.xlu1 %985  ;;  %v984_v52 = vpop.permute.xlu0 %983  ;;  %v646_v8 = vsel %vm635_vm4, %v7705_v29, %v13884_v30  ;;  %v267_v29 = vsel %vm251_vm1, %v13888_v40, %v7921_v21 }
 0x1bc   :  { %v1021_v53 = vsel %vm1019_vm6, %v986_v25, %v7940_v37  ;;  %v1020_v54 = vsel %vm1019_vm6, %v984_v52, %v986_v25  ;;  %v8055_v31 = vpop.permute.xlu2 %629  ;;  %v804_v9 = vadd.f32 %v772_v32, %v676_v24  ;;  %v805_v1 = vadd.f32 %v773_v15, %v677_v19 }
 0x1bd   :  { %13872 = vst [vmem:[#allocation55_spill] sm:$0xff] %v8055_v31  ;;  %v8057_v14 = vadd.f32 %v1021_v53, %v925_v48  ;;  %v8059_v62 = vadd.f32 %v1020_v54, %v924_v26  ;;  %v518_v48 = vsel %vm507_vm3, %v7635_v2, %v13881_v13  ;;  %v13882_v26 = vld [vmem:[#allocation48_spill] sm:$0xff]  ;;  %v422_v11 = vadd.f32 %v390_v33, %v294_v47  ;;  %v13919_v31 = vld [vmem:[#allocation39_spill] sm:$0xff] }
 0x1be   :  { %v933_v25 = vadd.f32 %v13882_v26, %v805_v1  ;;  %v932_v51 = vadd.f32 %v900_v20, %v804_v9  ;;  %v835_v19 = vmul.f32 %v7495_v58, %v7603_v10  ;;  %v826_v24 = vmul.f32 %v7495_v58, %v7587_v43  ;;  %v13891_v9 = vld [vmem:[#allocation27_spill] sm:$0xff]  ;;  %v13892_v1 = vld [vmem:[#allocation21_spill] sm:$0xff] }
 0x1bf   :  { %13873 = vst [vmem:[#allocation56_spill] sm:$0xff] %v8057_v14  ;;  %v550_v15 = vadd.f32 %v518_v48, %v422_v11  ;;  %v257_v47 = vsel %vm251_vm1, %v13892_v1, %v13891_v9  ;;  %v13895_v11 = vld [vmem:[#allocation37_spill] sm:$0xff] }
 0x1c0   :  { %13874 = vst [vmem:[#allocation57_spill] sm:$0xff] %v8059_v62  ;;  %v13918_v62 = vld [vmem:[#allocation15_spill] sm:$0xff] }
 0x1c1   :  { %743 = vrot.lane.b32.xlu1 %v699_v39, %s7232_s17  ;;  %1137 = vrot.lane.b32.xlu0 %v1088_v6, %s7235_s24  ;;  %v13887_v6 = vld [vmem:[#allocation36_spill] sm:$0xff]  ;;  %v678_v39 = vadd.f32 %v646_v8, %v550_v15  ;;  %v13897_v8 = vld [vmem:[#allocation26_spill] sm:$0xff] }
 0x1c2   :  { %761 = vrot.lane.b32.xlu2 %v708_v44, %s7232_s17  ;;  %v774_v12 = vsel %vm763_vm5, %v13875_v5, %v13887_v6  ;;  %v902_v5 = vsel %vm891_vm0, %v13889_v17, %v7925_v42  ;;  %v299_v44 = vadd.f32 %v267_v29, %v111_v46  ;;  %v266_v15 = vsel %vm251_vm1, %v13897_v8, %v13888_v40  ;;  %v13899_v29 = vld [vmem:[#allocation51_spill] sm:$0xff]  ;;  %v13901_v17 = vld [vmem:[#allocation33_spill] sm:$0xff] }
 0x1c3   :  { %v1004_v52 = vpop.permute.xlu1 %1003  ;;  %v1002_v45 = vpop.permute.xlu0 %1001  ;;  %v806_v20 = vadd.f32 %v774_v12, %v678_v39  ;;  %v1080_v39 = vmul.f32 %v7552_v23, %v7476_v50  ;;  %v394_v40 = vsel %vm379_vm2, %v13901_v17, %v7938_v27 }
 0x1c4   :  { %v1029_v0 = vsel %vm1019_vm6, %v1004_v52, %v7955_v16  ;;  %v1028_v53 = vsel %vm1019_vm6, %v1002_v45, %v1004_v52  ;;  %v8094_v54 = vpop.permute.xlu2 %863 }
 0x1c5   :  { %13883 = vst [vmem:[#allocation35_spill] sm:$0xff] %v8094_v54  ;;  %v8099_v32 = vadd.f32 %v1029_v0, %v933_v25  ;;  %v8101_v2 = vadd.f32 %v1028_v53, %v932_v51  ;;  %v934_v48 = vadd.f32 %v902_v5, %v806_v20  ;;  %v101_v51 = vmul.f32 %v7476_v50, %v7511_v63  ;;  %v13896_v0 = vld [vmem:[#allocation24_spill] sm:$0xff] }
 0x1c6   :  { %v385_v53 = vsel %vm379_vm2, %v13896_v0, %v13895_v11  ;;  %v1089_v5 = vmul.f32 %v7552_v23, %v7473_v49  ;;  %v954_v20 = vmul.f32 %v7550_v22, %v7587_v43 }
 0x1c7   :  { %13885 = vst [vmem:[#allocation12_spill] sm:$0xff] %v8099_v32  ;;  %v13913_v32 = vld [vmem:[#allocation53_spill] sm:$0xff] }
 0x1c8   :  { %13886 = vst [vmem:[#allocation6_spill] sm:$0xff] %v8101_v2  ;;  %v13912_v2 = vld [vmem:[#allocation23_spill] sm:$0xff] }
 0x1c9   :  { %887 = vrot.lane.b32.xlu1 %v835_v19, %s7233_s18  ;;  %869 = vrot.lane.b32.xlu0 %v826_v24, %s7233_s18  ;;  %v289_v19 = vadd.f32 %v257_v47, %v101_v51  ;;  %v110_v24 = vmul.f32 %v7523_v3, %v7511_v63  ;;  %v13904_v51 = vld [vmem:[#allocation20_spill] sm:$0xff] }
 0x1ca   :  { %995 = vrot.lane.b32.xlu2 %v953_v7, %s7234_s23  ;;  %v13900_v7 = vld [vmem:[#allocation40_spill] sm:$0xff] }
 0x1cb   :  { %v378_v33 = vpop.permute.xlu1 %377  ;;  %v8123_v21 = vpop.permute.xlu0 %359  ;;  %v513_v46 = vsel %vm507_vm3, %v13900_v7, %v13899_v29  ;;  %v298_v47 = vadd.f32 %v266_v15, %v110_v24  ;;  %v13908_v15 = vld [vmem:[#allocation9_spill] sm:$0xff]  ;;  %v100_v24 = vmul.f32 %v7429_v34, %v7511_v63 }
 0x1cc   :  { %13890 = vst [vmem:[#allocation46_spill] sm:$0xff] %v8123_v21  ;;  %v395_v26 = vsel %vm379_vm2, %v7938_v27, %v378_v33  ;;  %v8130_v25 = vpop.permute.xlu2 %1007  ;;  %v417_v33 = vadd.f32 %v385_v53, %v289_v19  ;;  %v108_v27 = vmul.f32 %v7441_v38, %v7511_v63  ;;  %v13907_v53 = vld [vmem:[#allocation13_spill] sm:$0xff] }
 0x1cd   :  { %13893 = vst [vmem:[#allocation47_spill] sm:$0xff] %v8130_v25  ;;  %v8134_v52 = vadd.f32 %v395_v26, %v299_v44  ;;  %v1030_v45 = vsel %vm1019_vm6, %v7955_v16, %v8130_v25  ;;  %v962_v16 = vmul.f32 %v7550_v22, %v7523_v3  ;;  %v13902_v44 = vld [vmem:[#allocation5_spill] sm:$0xff]  ;;  %v254_v19 = vsel %vm251_vm1, %v13908_v15, %v13907_v53  ;;  %v13921_v53 = vld [vmem:[#allocation28_spill] sm:$0xff] }
 0x1ce   :  { %v8145_v12 = vadd.f32 %v1030_v45, %v934_v48  ;;  %v98_v50 = vmul.f32 %v13902_v44, %v7511_v63  ;;  %v13903_v48 = vld [vmem:[#allocation7_spill] sm:$0xff]  ;;  %v13905_v45 = vld [vmem:[#allocation17_spill] sm:$0xff] }
 0x1cf   :  { %13894 = vst [vmem:[#allocation14_spill] sm:$0xff] %v8134_v52  ;;  %v107_v26 = vmul.f32 %v13903_v48, %v7511_v63  ;;  %v264_v25 = vsel %vm251_vm1, %v13905_v45, %v13904_v51  ;;  %v13910_v52 = vld [vmem:[#allocation18_spill] sm:$0xff]  ;;  %v13914_v34 = vld [vmem:[#allocation45_spill] sm:$0xff] }
 0x1d0   :  { %13898 = vst [vmem:[#allocation19_spill] sm:$0xff] %v8145_v12  ;;  %v13906_v12 = vld [vmem:[#allocation10_spill] sm:$0xff]  ;;  %v384_v21 = vsel %vm379_vm2, %v13910_v52, %v13896_v0  ;;  %v13917_v0 = vld [vmem:[#allocation16_spill] sm:$0xff]  ;;  %v13920_v52 = vld [vmem:[#allocation25_spill] sm:$0xff] }
 0x1d1   :  { %1121 = vrot.lane.b32.xlu1 %v1080_v39, %s7235_s24  ;;  %1013 = vrot.lane.b32.xlu0 %v962_v16, %s7234_s23  ;;  %v256_v44 = vsel %vm251_vm1, %v13906_v12, %v13892_v1  ;;  %v545_v39 = vadd.f32 %v513_v46, %v417_v33  ;;  %v426_v16 = vadd.f32 %v394_v40, %v298_v47  ;;  %v13911_v1 = vld [vmem:[#allocation29_spill] sm:$0xff] }
 0x1d2   :  { %1139 = vrot.lane.b32.xlu2 %v1089_v5, %s7235_s24  ;;  %v392_v5 = vsel %vm379_vm2, %v13912_v2, %v13911_v1  ;;  %v296_v33 = vadd.f32 %v264_v25, %v108_v27  ;;  %v288_v47 = vadd.f32 %v256_v44, %v100_v24  ;;  %v382_v14 = vsel %vm379_vm2, %v13918_v62, %v13917_v0 }
 0x1d3   :  { %v8183_v38 = vpop.permute.xlu1 %611  ;;  %v8185_v48 = vpop.permute.xlu0 %503  ;;  %v520_v43 = vsel %vm507_vm3, %v13920_v52, %v13919_v31  ;;  %v836_v25 = vmul.f32 %v7683_v55, %v7495_v58  ;;  %v286_v27 = vadd.f32 %v254_v19, %v98_v50  ;;  %v263_v62 = vsel %vm251_vm1, %v13876_v56, %v13905_v45 }
 0x1d4   :  { %13909 = vst [vmem:[#allocation48_spill] sm:$0xff] %v8185_v48  ;;  %v641_v15 = vsel %vm635_vm4, %v13913_v32, %v8183_v38  ;;  %v522_v46 = vsel %vm507_vm3, %v13914_v34, %v8185_v48  ;;  %v8199_v40 = vpop.permute.xlu2 %1115  ;;  %v512_v48 = vsel %vm507_vm3, %v13921_v53, %v13900_v7  ;;  %v416_v44 = vadd.f32 %v384_v21, %v288_v47 }
 0x1d5   :  { %v8201_v41 = vadd.f32 %v641_v15, %v545_v39  ;;  %v8203_v54 = vadd.f32 %v522_v46, %v426_v16  ;;  %v424_v24 = vadd.f32 %v392_v5, %v296_v33  ;;  %v827_v39 = vmul.f32 %v7688_v60, %v7495_v58  ;;  %v13922_v16 = vld [vmem:[#allocation22_spill] sm:$0xff]  ;;  %v13923_v46 = vld [vmem:[#allocation52_spill] sm:$0xff] }
 0x1d6   :  { %v510_v15 = vsel %vm507_vm3, %v7620_v57, %v13922_v16  ;;  %v414_v50 = vadd.f32 %v382_v14, %v286_v27  ;;  %v544_v5 = vadd.f32 %v512_v48, %v416_v44  ;;  %v391_v58 = vsel %vm379_vm2, %v13880_v18, %v13912_v2  ;;  %v13926_v14 = vld [vmem:[#allocation32_spill] sm:$0xff]  ;;  %v13927_v2 = vld [vmem:[#allocation49_spill] sm:$0xff]  ;;  %v13928_v27 = vld [vmem:[#allocation30_spill] sm:$0xff] }
 0x1d7   :  { %13915 = vst [vmem:[#allocation31_spill] sm:$0xff] %v8201_v41  ;;  %v13925_v41 = vld [vmem:[#allocation34_spill] sm:$0xff]  ;;  %v552_v19 = vadd.f32 %v520_v43, %v424_v24  ;;  %v295_v57 = vadd.f32 %v263_v62, %v107_v26  ;;  %v519_v43 = vsel %vm507_vm3, %v13881_v13, %v13920_v52  ;;  %v638_v48 = vsel %vm635_vm4, %v7690_v61, %v13926_v14 }
 0x1d8   :  { %13916 = vst [vmem:[#allocation36_spill] sm:$0xff] %v8203_v54  ;;  %v13924_v54 = vld [vmem:[#allocation43_spill] sm:$0xff]  ;;  %v640_v21 = vsel %vm635_vm4, %v13925_v41, %v13913_v32  ;;  %v542_v56 = vadd.f32 %v510_v15, %v414_v50  ;;  %v258_v44 = vsel %vm251_vm1, %v13891_v9, %v13928_v27  ;;  %v102_v61 = vmul.f32 %v7526_v4, %v7511_v63  ;;  %v13929_v24 = vld [vmem:[#allocation42_spill] sm:$0xff] }
 0x1d9   :  { %v648_v7 = vsel %vm635_vm4, %v13924_v54, %v13923_v46  ;;  %889 = vrot.lane.b32.xlu1 %v836_v25, %s7233_s18  ;;  %871 = vrot.lane.b32.xlu0 %v827_v39, %s7233_s18  ;;  %v672_v33 = vadd.f32 %v640_v21, %v544_v5  ;;  %v423_v25 = vadd.f32 %v391_v58, %v295_v57  ;;  %v13930_v21 = vld [vmem:[#allocation44_spill] sm:$0xff] }
 0x1da   :  { %997 = vrot.lane.b32.xlu2 %v954_v20, %s7234_s23  ;;  %v680_v45 = vadd.f32 %v648_v7, %v552_v19  ;;  %v766_v39 = vsel %vm763_vm5, %v7806_v28, %v13929_v24  ;;  %v647_v62 = vsel %vm635_vm4, %v13884_v30, %v13924_v54  ;;  %v1081_v15 = vmul.f32 %v7552_v23, %v7526_v4 }
 0x1db   :  { %v8236_v47 = vpop.permute.xlu1 %755  ;;  %v8238_v32 = vpop.permute.xlu0 %737  ;;  %v551_v7 = vadd.f32 %v519_v43, %v423_v25  ;;  %v670_v9 = vadd.f32 %v638_v48, %v542_v56  ;;  %v386_v50 = vsel %vm379_vm2, %v13895_v11, %v13930_v21  ;;  %v963_v19 = vmul.f32 %v7550_v22, %v7603_v10 }
 0x1dc   :  { %v776_v18 = vsel %vm763_vm5, %v7990_v59, %v8236_v47  ;;  %v768_v20 = vsel %vm763_vm5, %v13927_v2, %v8238_v32  ;;  %v8252_v26 = vpop.permute.xlu2 %1133  ;;  %v290_v5 = vadd.f32 %v258_v44, %v102_v61  ;;  %v775_v28 = vsel %vm763_vm5, %v13887_v6, %v7990_v59  ;;  %v13932_v44 = vld [vmem:[#allocation8_spill] sm:$0xff] }
 0x1dd   :  { %v8257_v13 = vadd.f32 %v776_v18, %v680_v45  ;;  %v8259_v52 = vadd.f32 %v768_v20, %v672_v33  ;;  %v1090_v54 = vmul.f32 %v7552_v23, %v7523_v3  ;;  %v798_v30 = vadd.f32 %v766_v39, %v670_v9  ;;  %v13931_v20 = vld [vmem:[#allocation13_spill] sm:$0xff]  ;;  %v13933_v39 = vld [vmem:[#allocation11_spill] sm:$0xff] }
 0x1de   :  { %v679_v58 = vadd.f32 %v647_v62, %v551_v7  ;;  %v514_v4 = vsel %vm507_vm3, %v13899_v29, %v8003_v36  ;;  %v418_v11 = vadd.f32 %v386_v50, %v290_v5  ;;  %v265_v59 = vsel %vm251_vm1, %v13904_v51, %v13897_v8  ;;  %v13935_v7 = vld [vmem:[#allocation55_spill] sm:$0xff] }
 0x1df   :  { %v926_v6 = vadd.f32 %v8001_v35, %v798_v30  ;;  %v109_v29 = vmul.f32 %v7473_v49, %v7511_v63  ;;  %v393_v35 = vsel %vm379_vm2, %v13911_v1, %v13901_v17  ;;  %v521_v25 = vsel %vm507_vm3, %v13919_v31, %v13914_v34 }
 0x1e0   :  { %v807_v3 = vadd.f32 %v775_v28, %v679_v58  ;;  %v546_v45 = vadd.f32 %v514_v4, %v418_v11  ;;  %v964_v17 = vmul.f32 %v7683_v55, %v7550_v22  ;;  %v955_v1 = vmul.f32 %v7688_v60, %v7550_v22  ;;  %v13936_v58 = vld [vmem:[#allocation56_spill] sm:$0xff]  ;;  %v13937_v11 = vld [vmem:[#allocation57_spill] sm:$0xff] }
 0x1e1   :  { %1123 = vrot.lane.b32.xlu1 %v1081_v15, %s7235_s24  ;;  %1015 = vrot.lane.b32.xlu0 %v963_v19, %s7234_s23  ;;  %v297_v18 = vadd.f32 %v265_v59, %v109_v29  ;;  %v1082_v62 = vmul.f32 %v7552_v23, %v13933_v39  ;;  %v13934_v15 = vld [vmem:[#allocation18_spill] sm:$0xff]  ;;  %v649_v31 = vsel %vm635_vm4, %v13923_v46, %v13935_v7 }
 0x1e2   :  { %1141 = vrot.lane.b32.xlu2 %v1090_v54, %s7235_s24  ;;  %v511_v9 = vsel %vm507_vm3, %v13922_v16, %v13921_v53  ;;  %v639_v30 = vsel %vm635_vm4, %v13926_v14, %v13925_v41  ;;  %v1083_v29 = vmul.f32 %v7688_v60, %v7552_v23  ;;  %v1091_v41 = vmul.f32 %v7552_v23, %v7603_v10 }
 0x1e3   :  { %v990_v57 = vpop.permute.xlu1 %989  ;;  %v8291_v56 = vpop.permute.xlu0 %881  ;;  %v425_v61 = vadd.f32 %v393_v35, %v297_v18 }
 0x1e4   :  { %v1022_v33 = vsel %vm1019_vm6, %v7940_v37, %v990_v57  ;;  %v903_v43 = vsel %vm891_vm0, %v7925_v42, %v8291_v56  ;;  %v8300_v48 = vpop.permute.xlu2 %613  ;;  %v255_v42 = vsel %vm251_vm1, %v13931_v20, %v13906_v12  ;;  %v383_v12 = vsel %vm379_vm2, %v13917_v0, %v13934_v15  ;;  %v13941_v20 = vld [vmem:[#allocation6_spill] sm:$0xff] }
 0x1e5   :  { %v8305_v8 = vadd.f32 %v1022_v33, %v926_v6  ;;  %v8307_v51 = vadd.f32 %v903_v43, %v807_v3  ;;  %v642_v49 = vsel %vm635_vm4, %v8183_v38, %v8300_v48  ;;  %v99_v38 = vmul.f32 %v13932_v44, %v7511_v63  ;;  %v13938_v33 = vld [vmem:[#allocation35_spill] sm:$0xff]  ;;  %v13939_v43 = vld [vmem:[#allocation54_spill] sm:$0xff] }
 0x1e6   :  { %v8312_v37 = vadd.f32 %v642_v49, %v546_v45  ;;  %v553_v34 = vadd.f32 %v521_v25, %v425_v61  ;;  %v767_v3 = vsel %vm763_vm5, %v13929_v24, %v13927_v2  ;;  %v1092_v45 = vmul.f32 %v7683_v55, %v7552_v23  ;;  %v13940_v55 = vld [vmem:[#allocation12_spill] sm:$0xff]  ;;  %v13943_v61 = vld [vmem:[#allocation46_spill] sm:$0xff] }
 0x1e7   :  { %v287_v22 = vadd.f32 %v255_v42, %v99_v38  ;;  %v103_v38 = vmul.f32 %v13933_v39, %v7511_v63  ;;  %v13946_v39 = vld [vmem:[#allocation19_spill] sm:$0xff] }
 0x1e8   :  { %v681_v5 = vadd.f32 %v649_v31, %v553_v34  ;;  %v13944_v34 = vld [vmem:[#allocation48_spill] sm:$0xff] }
 0x1e9   :  { %1017 = vrot.lane.b32.xlu1 %v964_v17, %s7234_s23  ;;  %999 = vrot.lane.b32.xlu0 %v955_v1, %s7234_s23  ;;  %v415_v0 = vadd.f32 %v383_v12, %v287_v22  ;;  %v13942_v17 = vld [vmem:[#allocation50_spill] sm:$0xff]  ;;  %s7237_s23 = smov 111  }
 0x1ea   :  { %1125 = vrot.lane.b32.xlu2 %v1082_v62, %s7235_s24  ;;  %v259_v1 = vsel %vm251_vm1, %v13928_v27, %v13942_v17  ;;  %v387_v62 = vsel %vm379_vm2, %v13930_v21, %v13943_v61  ;;  %v13945_v27 = vld [vmem:[#allocation14_spill] sm:$0xff] }
 0x1eb   :  { %v1114_v50 = vpop.permute.xlu1 %1113  ;;  %v1112_v19 = vpop.permute.xlu0 %1111  ;;  %v543_v59 = vadd.f32 %v511_v9, %v415_v0  ;;  %v291_v15 = vadd.f32 %v259_v1, %v103_v38 }
 0x1ec   :  { %v1149_v46 = vsel %vm1147_vm7, %v1114_v50, %v8199_v40  ;;  %v1148_v28 = vsel %vm1147_vm7, %v1112_v19, %v1114_v50  ;;  %v8343_v54 = vpop.permute.xlu2 %757 }
 0x1ed   :  { %v8349_v4 = vadd.f32 %v1149_v46, %v13936_v58  ;;  %v8352_v53 = vadd.f32 %v1148_v28, %v13937_v11  ;;  %v777_v16 = vsel %vm763_vm5, %v8236_v47, %v8343_v54  ;;  %v671_v14 = vadd.f32 %v639_v30, %v543_v59 }
 0x1ee   :  { %v809_v6 = vadd.f32 %v777_v16, %v681_v5  ;;  %v895_v47 = vsel %vm891_vm0, %v13939_v43, %v13938_v33  ;;  %v419_v12 = vadd.f32 %v387_v62, %v291_v15  ;;  %v13948_v16 = vld [vmem:[#allocation36_spill] sm:$0xff] }
 0x1ef   :  { %v799_v35 = vadd.f32 %v767_v3, %v671_v14 }
 0x1f1   :  { %1127 = vrot.lane.b32.xlu1 %v1083_v29, %s7235_s24  ;;  %1143 = vrot.lane.b32.xlu0 %v1091_v41, %s7235_s24  ;;  %v927_v24 = vadd.f32 %v895_v47, %v799_v35 }
 0x1f2   :  { %1145 = vrot.lane.b32.xlu2 %v1092_v45, %s7235_s24  ;;  %s7238_s24 = smov 110  }
 0x1f3   :  { %v1132_v2 = vpop.permute.xlu1 %1131  ;;  %v1130_v60 = vpop.permute.xlu0 %1129 }
 0x1f4   :  { %v1157_v10 = vsel %vm1147_vm7, %v1132_v2, %v8252_v26  ;;  %v1156_v49 = vsel %vm1147_vm7, %v1130_v60, %v1132_v2  ;;  %v8375_v23 = vpop.permute.xlu2 %991 }
 0x1f5   :  { %v8378_v18 = vadd.f32 %v1157_v10, %v13940_v55  ;;  %v8381_v42 = vadd.f32 %v1156_v49, %v13941_v20  ;;  %v1023_v25 = vsel %vm1019_vm6, %v990_v57, %v8375_v23 }
 0x1f6   :  { %v1055_v44 = vadd.f32 %v1023_v25, %v927_v24 }
 0x1fb   :  { %v506_v31 = vpop.permute.xlu1 %505  ;;  %v488_v22 = vpop.permute.xlu0 %487 }
 0x1fc   :  { %v523_v9 = vsel %vm507_vm3, %v13944_v34, %v506_v31  ;;  %v515_v57 = vsel %vm507_vm3, %v8003_v36, %v488_v22  ;;  %v1136_v50 = vpop.permute.xlu2 %1135  ;;  %v13947_v36 = vld [vmem:[#allocation31_spill] sm:$0xff] }
 0x1fd   :  { %v555_v19 = vadd.f32 %v523_v9, %v13945_v27  ;;  %v547_v0 = vadd.f32 %v515_v57, %v419_v12  ;;  %v1158_v63 = vsel %vm1147_vm7, %v8252_v26, %v1136_v50 }
 0x1fe   :  { %v8401_v5 = vadd.f32 %v1158_v63, %v13946_v39 }
 0x203   :  { %v740_v21 = vpop.permute.xlu1 %739  ;;  %v632_v46 = vpop.permute.xlu0 %631 }
 0x204   :  { %v769_v28 = vsel %vm763_vm5, %v8238_v32, %v740_v21  ;;  %v650_v30 = vsel %vm635_vm4, %v13935_v7, %v632_v46  ;;  %v742_v58 = vpop.permute.xlu2 %741 }
 0x205   :  { %v801_v11 = vadd.f32 %v769_v28, %v13947_v36  ;;  %v682_v59 = vadd.f32 %v650_v30, %v13948_v16  ;;  %v770_v3 = vsel %vm763_vm5, %v740_v21, %v742_v58 }
 0x206   :  { %v8411_v26 = vadd.f32 %v770_v3, %v8312_v37 }
 0x20b   :  { %v884_v29 = vpop.permute.xlu1 %883  ;;  %v866_v41 = vpop.permute.xlu0 %865 }
 0x20c   :  { %v904_v14 = vsel %vm891_vm0, %v8291_v56, %v884_v29  ;;  %v896_v32 = vsel %vm891_vm0, %v13938_v33, %v866_v41  ;;  %v8417_v45 = vpop.permute.xlu2 %885  ;;  %v13949_v56 = vld [vmem:[#allocation47_spill] sm:$0xff] }
 0x20d   :  { %v936_v7 = vadd.f32 %v904_v14, %v8257_v13  ;;  %v928_v43 = vadd.f32 %v896_v32, %v8259_v52  ;;  %v905_v47 = vsel %vm891_vm0, %v884_v29, %v8417_v45 }
 0x20e   :  { %v8423_v35 = vadd.f32 %v905_v47, %v809_v6 }
 0x213   :  { %v1118_v37 = vpop.permute.xlu1 %1117  ;;  %v1010_v2 = vpop.permute.xlu0 %1009 }
 0x214   :  { %v1150_v60 = vsel %vm1147_vm7, %v8199_v40, %v1118_v37  ;;  %v1031_v24 = vsel %vm1019_vm6, %v13949_v56, %v1010_v2  ;;  %v1120_v33 = vpop.permute.xlu2 %1119 }
 0x215   :  { %v8430_v10 = vadd.f32 %v1150_v60, %v8305_v8  ;;  %v1063_v13 = vadd.f32 %v1031_v24, %v8307_v51  ;;  %v1151_v52 = vsel %vm1147_vm7, %v1118_v37, %v1120_v33 }
 0x216   :  { %v8434_v49 = vadd.f32 %v1151_v52, %v1055_v44 }
 0x21b   :  { %v634_v6 = vpop.permute.xlu1 %633  ;;  %v616_v55 = vpop.permute.xlu0 %615 }
 0x21c   :  { %v651_v20 = vsel %vm635_vm4, %v632_v46, %v634_v6  ;;  %v643_v40 = vsel %vm635_vm4, %v8300_v48, %v616_v55  ;;  %v8449_v62 = vpop.permute.xlu2 %761 }
 0x21d   :  { %v8439_v25 = vadd.f32 %v651_v20, %v555_v19  ;;  %v675_v17 = vadd.f32 %v643_v40, %v547_v0 }
 0x223   :  { %v868_v1 = vpop.permute.xlu1 %867  ;;  %v8441_v38 = vpop.permute.xlu0 %759 }
 0x224   :  { %v897_v8 = vsel %vm891_vm0, %v866_v41, %v868_v1  ;;  %v778_v51 = vsel %vm763_vm5, %v8343_v54, %v8441_v38  ;;  %v8454_v9 = vpop.permute.xlu2 %995 }
 0x225   :  { %v929_v44 = vadd.f32 %v897_v8, %v801_v11  ;;  %v8447_v61 = vadd.f32 %v778_v51, %v682_v59 }
 0x22b   :  { %v1012_v15 = vpop.permute.xlu1 %1011  ;;  %v994_v12 = vpop.permute.xlu0 %993 }
 0x22c   :  { %v1032_v48 = vsel %vm1019_vm6, %v1010_v2, %v1012_v15  ;;  %v1024_v31 = vsel %vm1019_vm6, %v8375_v23, %v994_v12  ;;  %v1140_v39 = vpop.permute.xlu2 %1139  ;;  %v1025_v24 = vsel %vm1019_vm6, %v994_v12, %v8454_v9 }
 0x22d   :  { %v1064_v22 = vadd.f32 %v1032_v48, %v936_v7  ;;  %v1056_v34 = vadd.f32 %v1024_v31, %v928_v43  ;;  %v1057_v12 = vadd.f32 %v1025_v24, %v929_v44 }
 0x233   :  { %v744_v57 = vpop.permute.xlu1 %743  ;;  %v1138_v27 = vpop.permute.xlu0 %1137 }
 0x234   :  { %v771_v54 = vsel %vm763_vm5, %v742_v58, %v744_v57  ;;  %v1159_v19 = vsel %vm1147_vm7, %v1136_v50, %v1138_v27  ;;  %v8468_v30 = vpop.permute.xlu2 %997  ;;  %v8473_v58 = vld [vmem:[%s13754_s4] sm:$0xff]  ;;  %v1160_v48 = vsel %vm1147_vm7, %v1138_v27, %v1140_v39 }
 0x235   :  { %v8458_v0 = vadd.f32 %v771_v54, %v675_v17  ;;  %v8460_v63 = vadd.f32 %v1159_v19, %v1063_v13  ;;  %v8476_v50 = vperm.slane %v8473_v58, 1  ;;  %v8479_v36 = vperm.slane %v8473_v58, 0 }
 0x236   :  { %v8488_v41 = vperm.slane %v8473_v58, 2  ;;  %v8499_v37 = vperm.slane %v8473_v58, 3  ;;  %v8528_v44 = vadd.f32 %v1160_v48, %v1064_v22  ;;  %v1026_v22 = vsel %vm1019_vm6, %v8454_v9, %v8468_v30 }
 0x237   :  { %v1215_v59 = vmul.f32 %v8476_v50, %v8349_v4  ;;  %v1214_v3 = vmul.f32 %v8479_v36, %v8352_v53  ;;  %v1223_v14 = vmul.f32 %v8476_v50, %v8378_v18  ;;  %v1222_v32 = vmul.f32 %v8479_v36, %v8381_v42 }
 0x238   :  { %v1216_v7 = vmul.f32 %v8488_v41, %v8430_v10  ;;  %v1224_v2 = vmul.f32 %v8488_v41, %v8401_v5  ;;  %v1217_v40 = vmul.f32 %v8499_v37, %v8434_v49  ;;  %v1225_v27 = vmul.f32 %v8499_v37, %v8460_v63 }
 0x239   :  { %v1232_v43 = vsel %vm1230_vm8, %v1215_v59, 0.0  ;;  %v1231_v47 = vsel %vm1230_vm8, %v1214_v3, 0.0  ;;  %v1249_v6 = vsel %vm1230_vm8, %v1223_v14, 0.0  ;;  %v1248_v55 = vsel %vm1230_vm8, %v1222_v32, 0.0 }
 0x23a   :  { %v1233_v52 = vadd.f32 %v1232_v43, %v1231_v47  ;;  %v1234_v20 = vsel %vm1230_vm8, %v1216_v7, 0.0  ;;  %v1250_v57 = vadd.f32 %v1249_v6, %v1248_v55  ;;  %v8521_v59 = vperm.slane %v8473_v58, 4 }
 0x23b   :  { %v8462_v21 = vpop.permute.xlu1 %887  ;;  %v8464_v46 = vpop.permute.xlu0 %869  ;;  %v1236_v14 = vsel %vm1230_vm8, %v1217_v40, 0.0  ;;  %v1253_v6 = vsel %vm1230_vm8, %v1225_v27, 0.0  ;;  %v8563_v55 = vperm.slane %v8473_v58, 6 }
 0x23c   :  { %v8485_v29 = vpop.permute.xlu2 %1141  ;;  %v898_v17 = vsel %vm891_vm0, %v868_v1, %v8464_v46  ;;  %v1235_v54 = vadd.f32 %v1234_v20, %v1233_v52  ;;  %v1226_v9 = vmul.f32 %v8521_v59, %v8528_v44 }
 0x23d   :  { %v930_v1 = vadd.f32 %v898_v17, %v8411_v26  ;;  %v8538_v26 = vperm.slane %v8473_v58, 5  ;;  %v1161_v47 = vsel %vm1147_vm7, %v1140_v39, %v8485_v29 }
 0x23e   :  { %v1237_v43 = vadd.f32 %v1236_v14, %v1235_v54 }
 0x23f   :  { %v1058_v24 = vadd.f32 %v1026_v22, %v930_v1 }
 0x243   :  { %v1122_v23 = vpop.permute.xlu1 %1121  ;;  %v8466_v28 = vpop.permute.xlu0 %1013 }
 0x244   :  { %v1152_v13 = vsel %vm1147_vm7, %v1120_v33, %v1122_v23  ;;  %v1033_v8 = vsel %vm1019_vm6, %v1012_v15, %v8466_v28  ;;  %v1251_v33 = vsel %vm1230_vm8, %v1224_v2, 0.0  ;;  %v1126_v19 = vpop.permute.xlu2 %1125 }
 0x245   :  { %v8518_v31 = vadd.f32 %v1152_v13, %v1056_v34  ;;  %v1065_v3 = vadd.f32 %v1033_v8, %v8423_v35  ;;  %v779_v34 = vsel %vm763_vm5, %v8441_v38, %v8449_v62  ;;  %v906_v62 = vsel %vm891_vm0, %v8417_v45, %v8462_v21 }
 0x246   :  { %v811_v52 = vadd.f32 %v779_v34, %v8439_v25  ;;  %v938_v25 = vadd.f32 %v906_v62, %v8447_v61 }
 0x247   :  { %v1218_v32 = vmul.f32 %v8521_v59, %v8518_v31  ;;  %v8549_v2 = vadd.f32 %v1161_v47, %v1065_v3 }
 0x249   :  { %v1238_v45 = vsel %vm1230_vm8, %v1218_v32, 0.0 }
 0x24a   :  { %v1239_v61 = vadd.f32 %v1238_v45, %v1237_v43 }
 0x24b   :  { %v890_v11 = vpop.permute.xlu1 %889  ;;  %v872_v16 = vpop.permute.xlu0 %871 }
 0x24c   :  { %v907_v39 = vsel %vm891_vm0, %v8462_v21, %v890_v11 }
 0x24d   :  { %v939_v11 = vadd.f32 %v907_v39, %v811_v52  ;;  %v1382_v39 = vld [vmem:[%s13752_s2] sm:$0x3f] }
 0x253   :  { %v1124_v60 = vpop.permute.xlu1 %1123  ;;  %v1016_v56 = vpop.permute.xlu0 %1015 }
 0x254   :  { %v1153_v51 = vsel %vm1147_vm7, %v1122_v23, %v1124_v60  ;;  %v1252_v23 = vadd.f32 %v1251_v33, %v1250_v57  ;;  %v1154_v38 = vsel %vm1147_vm7, %v1124_v60, %v1126_v19  ;;  %v899_v60 = vsel %vm891_vm0, %v8464_v46, %v872_v16 }
 0x255   :  { %v8525_v15 = vadd.f32 %v1153_v51, %v1057_v12  ;;  %v8565_v20 = vadd.f32 %v1154_v38, %v1058_v24  ;;  %v1034_v40 = vsel %vm1019_vm6, %v8466_v28, %v1016_v56  ;;  %v1227_v46 = vmul.f32 %v8538_v26, %v8549_v2  ;;  %v1146_v12 = vpop.permute.xlu2 %1145 }
 0x256   :  { %v931_v16 = vadd.f32 %v899_v60, %v8458_v0  ;;  %v1254_v51 = vadd.f32 %v1253_v6, %v1252_v23  ;;  %v1255_v33 = vsel %vm1230_vm8, %v1226_v9, 0.0  ;;  %v8579_v28 = vperm.slane %v8473_v58, 7  ;;  %v1404_v60 = vld [vmem:[%s13753_s3] sm:$0x3f] }
 0x257   :  { %v1219_v13 = vmul.f32 %v8538_v26, %v8525_v15  ;;  %v1257_v34 = vsel %vm1230_vm8, %v1227_v46, 0.0  ;;  %v1487_v46 = vld [vmem:[%s13755_s5 + $0x168] sm:$0xff] }
 0x258   :  { %1826 = vmatpush.msra.mxu0 %v1487_v46 }
 0x259   :  { %v1240_v8 = vsel %vm1230_vm8, %v1219_v13, 0.0 }
 0x25a   :  { %v1241_v3 = vadd.f32 %v1240_v8, %v1239_v61  ;;  %v1631_v8 = vld [vmem:[%s13755_s5 + $0x5e8] sm:$0xff] }
 0x25b   :  { %v1018_v35 = vpop.permute.xlu1 %1017  ;;  %v1000_v7 = vpop.permute.xlu0 %999  ;;  %1886 = vmatpush.msra.mxu3 %v1631_v8 }
 0x25c   :  { %v1035_v17 = vsel %vm1019_vm6, %v1016_v56, %v1018_v35  ;;  %v1027_v21 = vsel %vm1019_vm6, %v8468_v30, %v1000_v7  ;;  %v1220_v56 = vmul.f32 %v8563_v55, %v8565_v20  ;;  %v1066_v30 = vadd.f32 %v1034_v40, %v938_v25 }
 0x25d   :  { %v1067_v48 = vadd.f32 %v1035_v17, %v939_v11  ;;  %v1059_v57 = vadd.f32 %v1027_v21, %v931_v16  ;;  %v1256_v35 = vadd.f32 %v1255_v33, %v1254_v51  ;;  %v1535_v11 = vld [vmem:[%s13755_s5 + $0x2e8] sm:$0xff]  ;;  %v1484_v51 = vld [vmem:[%s13755_s5 + $0x150] sm:$0xff]  ;;  %vm6149_vm6 = vcmask 1043456  }
 0x25e   :  { %v1242_v7 = vsel %vm1230_vm8, %v1220_v56, 0.0  ;;  %v1583_v16 = vld [vmem:[%s13755_s5 + $0x468] sm:$0xff]  ;;  %1846 = vmatpush.msra.mxu1 %v1535_v11  ;;  %1827 = vmatpush.msra.mxu0 %v1484_v51 }
 0x25f   :  { %v1243_v22 = vadd.f32 %v1242_v7, %v1241_v3  ;;  %v1258_v47 = vadd.f32 %v1257_v34, %v1256_v35  ;;  %1866 = vmatpush.msra.mxu2 %v1583_v16  ;;  %v1481_v3 = vld [vmem:[%s13755_s5 + $0x138] sm:$0xff] }
 0x260   :  { %v1625_v35 = vld [vmem:[%s13755_s5 + $0x5b8] sm:$0xff]  ;;  %1828 = vmatpush.msra.mxu0 %v1481_v3 }
 0x263   :  { %v1128_v54 = vpop.permute.xlu1 %1127  ;;  %v1144_v1 = vpop.permute.xlu0 %1143 }
 0x264   :  { %v1155_v0 = vsel %vm1147_vm7, %v1126_v19, %v1128_v54  ;;  %v1162_v23 = vsel %vm1147_vm7, %v8485_v29, %v1144_v1  ;;  %v1163_v14 = vsel %vm1147_vm7, %v1144_v1, %v1146_v12  ;;  %vm6084_vm7 = vcmask 982016  }
 0x265   :  { %v1187_v58 = vadd.f32 %v1155_v0, %v1059_v57  ;;  %v8588_v27 = vadd.f32 %v1162_v23, %v1066_v30  ;;  %v8590_v32 = vadd.f32 %v1163_v14, %v1067_v48  ;;  %v1532_v30 = vld [vmem:[%s13755_s5 + $0x2d0] sm:$0xff]  ;;  %v1529_v0 = vld [vmem:[%s13755_s5 + $0x2b8] sm:$0xff] }
 0x266   :  { %1847 = vmatpush.msra.mxu1 %v1532_v30 }
 0x267   :  { %v1221_v43 = vmul.f32 %v8579_v28, %v1187_v58  ;;  %v1228_v19 = vmul.f32 %v8563_v55, %v8588_v27  ;;  %v1229_v29 = vmul.f32 %v8579_v28, %v8590_v32 }
 0x268   :  { %1848 = vmatpush.msra.mxu1 %v1529_v0 }
 0x269   :  { %v1259_v38 = vsel %vm1230_vm8, %v1228_v19, 0.0  ;;  %v1244_v62 = vsel %vm1230_vm8, %v1221_v43, 0.0  ;;  %v1261_v52 = vsel %vm1230_vm8, %v1229_v29, 0.0  ;;  %v1478_v43 = vld [vmem:[%s13755_s5 + $0x120] sm:$0xff] }
 0x26a   :  { %v1245_v24 = vadd.f32 %v1244_v62, %v1243_v22  ;;  %v1260_v13 = vadd.f32 %v1259_v38, %v1258_v47  ;;  %v1526_v19 = vld [vmem:[%s13755_s5 + $0x2a0] sm:$0xff]  ;;  %1829 = vmatpush.msra.mxu0 %v1478_v43 }
 0x26b   :  { %v1574_v62 = vld [vmem:[%s13755_s5 + $0x420] sm:$0xff]  ;;  %1849 = vmatpush.msra.mxu1 %v1526_v19 }
 0x26c   :  { %1246 = vadd.xlane.f32.xlu0 %v1245_v24  ;;  %v1262_v9 = vadd.f32 %v1261_v52, %v1260_v13 }
 0x26e   :  { %1263 = vadd.xlane.f32.xlu1 %v1262_v9  ;;  %v1622_v9 = vld [vmem:[%s13755_s5 + $0x5a0] sm:$0xff] }
 0x280   :  { %1385 = vperm.xlu0 %6850, %v1382_v39  }
 0x287   :  { %1407 = vperm.xlu1 %6851, %v1404_v60  }
 0x2df   :  { %v1247_v6 = vpop.xlane.xlu0 %1246 }
 0x2e0   :  { %v1265_v25 = vsel %vm1230_vm8, %v1247_v6, 0.0 }
 0x2e1   :  { %v1264_v45 = vpop.xlane.xlu1 %1263 }
 0x2e2   :  { %v1266_v40 = vsel %vm1230_vm8, %v1264_v45, 0.0 }
 0x2e3   :  { %v1267_v17 = vadd.f32 %v1266_v40, %v1265_v25  ;;  %v1475_v25 = vld [vmem:[%s13755_s5 + $0x108] sm:$0xff] }
 0x2e4   :  { %1830 = vmatpush.msra.mxu0 %v1475_v25 }
 0x2e5   :  { %v8609_v21 = vmul.f32 0.0006377551, %v1267_v17 }
 0x2e7   :  { %v8628_v33 = vsub.f32 %v8352_v53, %v8609_v21  ;;  %v8632_v61 = vsub.f32 %v8349_v4, %v8609_v21  ;;  %v8636_v12 = vsub.f32 %v8430_v10, %v8609_v21  ;;  %v8640_v56 = vsub.f32 %v8434_v49, %v8609_v21  ;;  %v1580_v49 = vld [vmem:[%s13755_s5 + $0x450] sm:$0xff] }
 0x2e8   :  { %v8647_v53 = vsub.f32 %v8518_v31, %v8609_v21  ;;  %v8651_v4 = vsub.f32 %v8525_v15, %v8609_v21  ;;  %v8655_v10 = vsub.f32 %v8565_v20, %v8609_v21  ;;  %v1628_v20 = vld [vmem:[%s13755_s5 + $0x5d0] sm:$0xff]  ;;  %v8672_v54 = vsub.f32 %v1187_v58, %v8609_v21  ;;  %1867 = vmatpush.msra.mxu2 %v1580_v49  ;;  %v1577_v58 = vld [vmem:[%s13755_s5 + $0x438] sm:$0xff] }
 0x2e9   :  { %v1285_v48 = vmul.f32 %v8628_v33, %v8479_v36  ;;  %v1286_v31 = vmul.f32 %v8632_v61, %v8476_v50  ;;  %v1287_v57 = vmul.f32 %v8636_v12, %v8488_v41  ;;  %v1288_v15 = vmul.f32 %v8640_v56, %v8499_v37  ;;  %1887 = vmatpush.msra.mxu3 %v1628_v20 }
 0x2ea   :  { %v1289_v1 = vmul.f32 %v8647_v53, %v8521_v59  ;;  %v1290_v7 = vmul.f32 %v8651_v4, %v8538_v26  ;;  %v1291_v29 = vmul.f32 %v8655_v10, %v8563_v55  ;;  %v1292_v24 = vmul.f32 %v8672_v54, %v8579_v28  ;;  %1868 = vmatpush.msra.mxu2 %v1577_v58 }
 0x2eb   :  { %v1301_v23 = vmul.f32 %v1285_v48, %v1285_v48  ;;  %v1302_v14 = vmul.f32 %v1286_v31, %v1286_v31  ;;  %v1303_v34 = vmul.f32 %v1287_v57, %v1287_v57  ;;  %v1304_v22 = vmul.f32 %v1288_v15, %v1288_v15  ;;  %1888 = vmatpush.msra.mxu3 %v1625_v35 }
 0x2ec   :  { %v1305_v13 = vmul.f32 %v1289_v1, %v1289_v1  ;;  %v8711_v60 = vsub.f32 %v8381_v42, %v8609_v21  ;;  %v8715_v6 = vsub.f32 %v8378_v18, %v8609_v21  ;;  %v8719_v45 = vsub.f32 %v8401_v5, %v8609_v21  ;;  %1869 = vmatpush.msra.mxu2 %v1574_v62  ;;  %v1523_v5 = vld [vmem:[%s13755_s5 + $0x288] sm:$0xff]  ;;  %v1616_v1 = vld [vmem:[%s13755_s5 + $0x570] sm:$0xff] }
 0x2ed   :  { %v1317_v47 = vsel %vm1230_vm8, %v1301_v23, 0.0  ;;  %v1318_v38 = vsel %vm1230_vm8, %v1302_v14, 0.0  ;;  %v1320_v39 = vsel %vm1230_vm8, %v1303_v34, 0.0  ;;  %v1306_v40 = vmul.f32 %v1290_v7, %v1290_v7  ;;  %1889 = vmatpush.msra.mxu3 %v1622_v9  ;;  %1850 = vmatpush.msra.mxu1 %v1523_v5  ;;  %v1469_v14 = vld [vmem:[%s13755_s5 + $0xd8] sm:$0xff] }
 0x2ee   :  { %v1319_v52 = vadd.f32 %v1318_v38, %v1317_v47  ;;  %v8726_v42 = vsub.f32 %v8460_v63, %v8609_v21  ;;  %v8730_v18 = vsub.f32 %v8528_v44, %v8609_v21  ;;  %v1322_v46 = vsel %vm1230_vm8, %v1304_v22, 0.0  ;;  %v1571_v44 = vld [vmem:[%s13755_s5 + $0x408] sm:$0xff]  ;;  %v1517_v34 = vld [vmem:[%s13755_s5 + $0x258] sm:$0xff]  ;;  %v1514_v22 = vld [vmem:[%s13755_s5 + $0x240] sm:$0xff] }
 0x2ef   :  { %v8738_v11 = vsub.f32 %v8549_v2, %v8609_v21  ;;  %v1293_v16 = vmul.f32 %v8711_v60, %v8479_v36  ;;  %v1294_v63 = vmul.f32 %v8715_v6, %v8476_v50  ;;  %v1295_v51 = vmul.f32 %v8719_v45, %v8488_v41  ;;  %v1619_v36 = vld [vmem:[%s13755_s5 + $0x588] sm:$0xff]  ;;  %v1472_v41 = vld [vmem:[%s13755_s5 + $0xf0] sm:$0xff]  ;;  %1870 = vmatpush.msra.mxu2 %v1571_v44 }
 0x2f0   :  { %v1321_v17 = vadd.f32 %v1320_v39, %v1319_v52  ;;  %v1296_v30 = vmul.f32 %v8726_v42, %v8499_v37  ;;  %v1307_v2 = vmul.f32 %v1291_v29, %v1291_v29  ;;  %v1324_v50 = vsel %vm1230_vm8, %v1305_v13, 0.0  ;;  %v1520_v37 = vld [vmem:[%s13755_s5 + $0x270] sm:$0xff]  ;;  %1890 = vmatpush.msra.mxu3 %v1619_v36  ;;  %1831 = vmatpush.msra.mxu0 %v1472_v41  ;;  %v1466_v29 = vld [vmem:[%s13755_s5 + $0xc0] sm:$0xff] }
 0x2f1   :  { %v8757_v49 = vsub.f32 %v8588_v27, %v8609_v21  ;;  %v1309_v48 = vmul.f32 %v1293_v16, %v1293_v16  ;;  %v1297_v57 = vmul.f32 %v8730_v18, %v8521_v59  ;;  %v1310_v15 = vmul.f32 %v1294_v63, %v1294_v63  ;;  %v1568_v27 = vld [vmem:[%s13755_s5 + $0x3f0] sm:$0xff]  ;;  %1851 = vmatpush.msra.mxu1 %v1520_v37  ;;  %v1562_v13 = vld [vmem:[%s13755_s5 + $0x3c0] sm:$0xff]  ;;  %v1559_v16 = vld [vmem:[%s13755_s5 + $0x3a8] sm:$0xff] }
 0x2f2   :  { %v1323_v8 = vadd.f32 %v1322_v46, %v1321_v17  ;;  %v1311_v20 = vmul.f32 %v1295_v51, %v1295_v51  ;;  %v1308_v3 = vmul.f32 %v1292_v24, %v1292_v24  ;;  %v1326_v0 = vsel %vm1230_vm8, %v1306_v40, 0.0  ;;  %1871 = vmatpush.msra.mxu2 %v1568_v27  ;;  %1891 = vmatpush.msra.mxu3 %v1616_v1  ;;  %v1610_v52 = vld [vmem:[%s13755_s5 + $0x540] sm:$0xff]  ;;  %v1511_v46 = vld [vmem:[%s13755_s5 + $0x228] sm:$0xff]  ;;  %v1460_v44 = vld [vmem:[%s13755_s5 + $0x90] sm:$0xff] }
 0x2f3   :  { %v8776_v23 = vsub.f32 %v8590_v32, %v8609_v21  ;;  %v1298_v59 = vmul.f32 %v8738_v11, %v8538_v26  ;;  %v1312_v35 = vmul.f32 %v1296_v30, %v1296_v30  ;;  %v1334_v7 = vsel %vm1230_vm8, %v1309_v48, 0.0  ;;  %v1565_v26 = vld [vmem:[%s13755_s5 + $0x3d8] sm:$0xff]  ;;  %1832 = vmatpush.msra.mxu0 %v1469_v14  ;;  %1852 = vmatpush.msra.mxu1 %v1517_v34  ;;  %v1508_v30 = vld [vmem:[%s13755_s5 + $0x210] sm:$0xff]  ;;  %v1502_v14 = vld [vmem:[%s13755_s5 + $0x1e0] sm:$0xff] }
 0x2f4   :  { %v1325_v31 = vadd.f32 %v1324_v50, %v1323_v8  ;;  %v1335_v43 = vsel %vm1230_vm8, %v1310_v15, 0.0  ;;  %v1613_v32 = vld [vmem:[%s13755_s5 + $0x558] sm:$0xff]  ;;  %v1328_v21 = vsel %vm1230_vm8, %v1307_v2, 0.0  ;;  %v1299_v38 = vmul.f32 %v8757_v49, %v8563_v55  ;;  %1872 = vmatpush.msra.mxu2 %v1565_v26  ;;  %v1463_v55 = vld [vmem:[%s13755_s5 + $0xa8] sm:$0xff]  ;;  %v1556_v36 = vld [vmem:[%s13755_s5 + $0x390] sm:$0xff] }
 0x2f5   :  { %v1336_v19 = vadd.f32 %v1335_v43, %v1334_v7  ;;  %v1313_v62 = vmul.f32 %v1297_v57, %v1297_v57  ;;  %v1337_v24 = vsel %vm1230_vm8, %v1311_v20, 0.0  ;;  %v1330_v9 = vsel %vm1230_vm8, %v1308_v3, 0.0  ;;  %1892 = vmatpush.msra.mxu3 %v1613_v32  ;;  %1833 = vmatpush.msra.mxu0 %v1466_v29  ;;  %v1604_v50 = vld [vmem:[%s13755_s5 + $0x510] sm:$0xff]  ;;  %v1457_v48 = vld [vmem:[%s13755_s5 + $0x78] sm:$0xff]  ;;  %v1550_v34 = vld [vmem:[%s13755_s5 + $0x360] sm:$0xff] }
 0x2f6   :  { %v1327_v58 = vadd.f32 %v1326_v0, %v1325_v31  ;;  %v1300_v40 = vmul.f32 %v8776_v23, %v8579_v28  ;;  %v1314_v17 = vmul.f32 %v1298_v59, %v1298_v59  ;;  %v1339_v5 = vsel %vm1230_vm8, %v1312_v35, 0.0  ;;  %1853 = vmatpush.msra.mxu1 %v1514_v22  ;;  %1873 = vmatpush.msra.mxu2 %v1562_v13  ;;  %v1607_v28 = vld [vmem:[%s13755_s5 + $0x528] sm:$0xff]  ;;  %v1505_v31 = vld [vmem:[%s13755_s5 + $0x1f8] sm:$0xff]  ;;  %v1454_v59 = vld [vmem:[%s13755_s5 + $0x60] sm:$0xff] }
 0x2f7   :  { %v1338_v39 = vadd.f32 %v1337_v24, %v1336_v19  ;;  %1893 = vmatpush.msra.mxu3 %v1610_v52  ;;  %v1315_v8 = vmul.f32 %v1299_v38, %v1299_v38  ;;  %v1341_v51 = vsel %vm1230_vm8, %v1313_v62, 0.0  ;;  %1834 = vmatpush.msra.mxu0 %v1463_v55  ;;  %v1553_v57 = vld [vmem:[%s13755_s5 + $0x378] sm:$0xff]  ;;  %v1451_v35 = vld [vmem:[%s13755_s5 + $0x48] sm:$0xff]  ;;  %v1448_v32 = vld [vmem:[%s13755_s5 + $0x30] sm:$0xff] }
 0x2f8   :  { %v1329_v47 = vadd.f32 %v1328_v21, %v1327_v58  ;;  %1854 = vmatpush.msra.mxu1 %v1511_v46  ;;  %1874 = vmatpush.msra.mxu2 %v1559_v16  ;;  %v1316_v41 = vmul.f32 %v1300_v40, %v1300_v40  ;;  %v1343_v37 = vsel %vm1230_vm8, %v1314_v17, 0.0  ;;  %v1601_v20 = vld [vmem:[%s13755_s5 + $0x4f8] sm:$0xff]  ;;  %v1598_v58 = vld [vmem:[%s13755_s5 + $0x4e0] sm:$0xff]  ;;  %v1499_v7 = vld [vmem:[%s13755_s5 + $0x1c8] sm:$0xff] }
 0x2f9   :  { %v1340_v63 = vadd.f32 %v1339_v5, %v1338_v39  ;;  %1894 = vmatpush.msra.mxu3 %v1607_v28  ;;  %1835 = vmatpush.msra.mxu0 %v1460_v44  ;;  %v1345_v27 = vsel %vm1230_vm8, %v1315_v8, 0.0  ;;  %v1547_v43 = vld [vmem:[%s13755_s5 + $0x348] sm:$0xff]  ;;  %v1496_v21 = vld [vmem:[%s13755_s5 + $0x1b0] sm:$0xff]  ;;  %v1445_v22 = vld [vmem:[%s13755_s5 + $0x18] sm:$0xff] }
 0x2fa   :  { %v1331_v25 = vadd.f32 %v1330_v9, %v1329_v47  ;;  %1855 = vmatpush.msra.mxu1 %v1508_v30  ;;  %1875 = vmatpush.msra.mxu2 %v1556_v36  ;;  %v1347_v3 = vsel %vm1230_vm8, %v1316_v41, 0.0  ;;  %v1595_v26 = vld [vmem:[%s13755_s5 + $0x4c8] sm:$0xff]  ;;  %v1544_v19 = vld [vmem:[%s13755_s5 + $0x330] sm:$0xff]  ;;  %v1493_v47 = vld [vmem:[%s13755_s5 + $0x198] sm:$0xff] }
 0x2fb   :  { %v1342_v2 = vadd.f32 %v1341_v51, %v1340_v63  ;;  %1895 = vmatpush.msra.mxu3 %v1604_v50  ;;  %1836 = vmatpush.msra.mxu0 %v1457_v48  ;;  %v1592_v29 = vld [vmem:[%s13755_s5 + $0x4b0] sm:$0xff]  ;;  %v1541_v38 = vld [vmem:[%s13755_s5 + $0x318] sm:$0xff]  ;;  %v1442_v24 = vld [vmem:[%s13755_s5] sm:$0xff] }
 0x2fc   :  { %1332 = vadd.xlane.f32.xlu2 %v1331_v25  ;;  %1856 = vmatpush.msra.mxu1 %v1505_v31  ;;  %v1589_v62 = vld [vmem:[%s13755_s5 + $0x498] sm:$0xff]  ;;  %v1490_v13 = vld [vmem:[%s13755_s5 + $0x180] sm:$0xff]  ;;  %v1679_v39 = vld [vmem:[%s13755_s5 + $0x768] sm:$0xff] }
 0x2fd   :  { %v1344_v15 = vadd.f32 %v1343_v37, %v1342_v2  ;;  %1876 = vmatpush.msra.mxu2 %v1553_v57  ;;  %1896 = vmatpush.msra.mxu3 %v1601_v20  ;;  %v1538_v52 = vld [vmem:[%s13755_s5 + $0x300] sm:$0xff]  ;;  %v1727_v55 = vld [vmem:[%s13755_s5 + $0x8e8] sm:$0xff]  ;;  %v1676_v17 = vld [vmem:[%s13755_s5 + $0x750] sm:$0xff] }
 0x2fe   :  { %1837 = vmatpush.msra.mxu0 %v1454_v59  ;;  %1857 = vmatpush.msra.mxu1 %v1502_v14  ;;  %v1586_v9 = vld [vmem:[%s13755_s5 + $0x480] sm:$0xff]  ;;  %v1775_v25 = vld [vmem:[%s13755_s5 + $0xa68] sm:$0xff]  ;;  %v1724_v5 = vld [vmem:[%s13755_s5 + $0x8d0] sm:$0xff] }
 0x2ff   :  { %v1346_v1 = vadd.f32 %v1345_v27, %v1344_v15  ;;  %1877 = vmatpush.msra.mxu2 %v1550_v34  ;;  %1897 = vmatpush.msra.mxu3 %v1598_v58  ;;  %v1823_v40 = vld [vmem:[%s13755_s5 + $0xbe8] sm:$0xff]  ;;  %v1772_v46 = vld [vmem:[%s13755_s5 + $0xa50] sm:$0xff]  ;;  %v1673_v63 = vld [vmem:[%s13755_s5 + $0x738] sm:$0xff] }
 0x300   :  { %1838 = vmatpush.msra.mxu0 %v1451_v35  ;;  %1858 = vmatpush.msra.mxu1 %v1499_v7  ;;  %v1820_v16 = vld [vmem:[%s13755_s5 + $0xbd0] sm:$0xff]  ;;  %v1721_v28 = vld [vmem:[%s13755_s5 + $0x8b8] sm:$0xff]  ;;  %v1670_v30 = vld [vmem:[%s13755_s5 + $0x720] sm:$0xff] }
 0x301   :  { %v1348_v0 = vadd.f32 %v1347_v3, %v1346_v1  ;;  %1878 = vmatpush.msra.mxu2 %v1547_v43  ;;  %1898 = vmatpush.msra.mxu3 %v1595_v26  ;;  %v1769_v44 = vld [vmem:[%s13755_s5 + $0xa38] sm:$0xff]  ;;  %v1718_v36 = vld [vmem:[%s13755_s5 + $0x8a0] sm:$0xff]  ;;  %v1667_v48 = vld [vmem:[%s13755_s5 + $0x708] sm:$0xff] }
 0x302   :  { %1839 = vmatpush.msra.mxu0 %v1448_v32  ;;  %1859 = vmatpush.msra.mxu1 %v1496_v21  ;;  %v1817_v51 = vld [vmem:[%s13755_s5 + $0xbb8] sm:$0xff]  ;;  %v1766_v2 = vld [vmem:[%s13755_s5 + $0xa20] sm:$0xff]  ;;  %v1715_v41 = vld [vmem:[%s13755_s5 + $0x888] sm:$0xff] }
 0x303   :  { %1879 = vmatpush.msra.mxu2 %v1544_v19  ;;  %1899 = vmatpush.msra.mxu3 %v1592_v29  ;;  %v1814_v50 = vld [vmem:[%s13755_s5 + $0xba0] sm:$0xff]  ;;  %v1763_v37 = vld [vmem:[%s13755_s5 + $0xa08] sm:$0xff]  ;;  %v1664_v57 = vld [vmem:[%s13755_s5 + $0x6f0] sm:$0xff] }
 0x304   :  { %1349 = vadd.xlane.f32.xlu2 %v1348_v0  ;;  %1840 = vmatpush.msra.mxu0 %v1445_v22  ;;  %v1811_v31 = vld [vmem:[%s13755_s5 + $0xb88] sm:$0xff]  ;;  %v1712_v15 = vld [vmem:[%s13755_s5 + $0x870] sm:$0xff]  ;;  %v1661_v1 = vld [vmem:[%s13755_s5 + $0x6d8] sm:$0xff] }
 0x305   :  { %1860 = vmatpush.msra.mxu1 %v1493_v47  ;;  %1880 = vmatpush.msra.mxu2 %v1541_v38  ;;  %v1760_v20 = vld [vmem:[%s13755_s5 + $0x9f0] sm:$0xff]  ;;  %v1709_v3 = vld [vmem:[%s13755_s5 + $0x858] sm:$0xff]  ;;  %v1658_v14 = vld [vmem:[%s13755_s5 + $0x6c0] sm:$0xff] }
 0x306   :  { %1900 = vmatpush.msra.mxu3 %v1589_v62  ;;  %1841 = vmatpush.msra.mxu0 %v1442_v24  ;;  %v1808_v27 = vld [vmem:[%s13755_s5 + $0xb70] sm:$0xff]  ;;  %v1757_v0 = vld [vmem:[%s13755_s5 + $0x9d8] sm:$0xff]  ;;  %v1706_v34 = vld [vmem:[%s13755_s5 + $0x840] sm:$0xff] }
 0x307   :  { %1861 = vmatpush.msra.mxu1 %v1490_v13  ;;  %1881 = vmatpush.msra.mxu2 %v1538_v52  ;;  %v1805_v59 = vld [vmem:[%s13755_s5 + $0xb58] sm:$0xff]  ;;  %v1754_v35 = vld [vmem:[%s13755_s5 + $0x9c0] sm:$0xff]  ;;  %v1655_v32 = vld [vmem:[%s13755_s5 + $0x6a8] sm:$0xff] }
 0x308   :  { %1901 = vmatpush.msra.mxu3 %v1586_v9  ;;  %1906 = vmatpush.msrb.mxu0 %v1679_v39  ;;  %v1802_v7 = vld [vmem:[%s13755_s5 + $0xb40] sm:$0xff]  ;;  %v1703_v21 = vld [vmem:[%s13755_s5 + $0x828] sm:$0xff]  ;;  %v1652_v47 = vld [vmem:[%s13755_s5 + $0x690] sm:$0xff] }
 0x309   :  { %1926 = vmatpush.msrb.mxu1 %v1727_v55  ;;  %1946 = vmatpush.msrb.mxu2 %v1775_v25  ;;  %v1751_v29 = vld [vmem:[%s13755_s5 + $0x9a8] sm:$0xff]  ;;  %v1700_v38 = vld [vmem:[%s13755_s5 + $0x810] sm:$0xff]  ;;  %v1649_v52 = vld [vmem:[%s13755_s5 + $0x678] sm:$0xff] }
 0x30a   :  { %1966 = vmatpush.msrb.mxu3 %v1823_v40  ;;  %1907 = vmatpush.msrb.mxu0 %v1676_v17  ;;  %v1799_v22 = vld [vmem:[%s13755_s5 + $0xb28] sm:$0xff]  ;;  %v1748_v24 = vld [vmem:[%s13755_s5 + $0x990] sm:$0xff]  ;;  %v1697_v9 = vld [vmem:[%s13755_s5 + $0x7f8] sm:$0xff] }
 0x30b   :  { %1927 = vmatpush.msrb.mxu1 %v1724_v5  ;;  %1947 = vmatpush.msrb.mxu2 %v1772_v46  ;;  %v1796_v13 = vld [vmem:[%s13755_s5 + $0xb10] sm:$0xff]  ;;  %v1745_v55 = vld [vmem:[%s13755_s5 + $0x978] sm:$0xff]  ;;  %v1646_v40 = vld [vmem:[%s13755_s5 + $0x660] sm:$0xff] }
 0x30c   :  { %1967 = vmatpush.msrb.mxu3 %v1820_v16  ;;  %1908 = vmatpush.msrb.mxu0 %v1673_v63  ;;  %v1793_v25 = vld [vmem:[%s13755_s5 + $0xaf8] sm:$0xff]  ;;  %v1694_v17 = vld [vmem:[%s13755_s5 + $0x7e0] sm:$0xff]  ;;  %v1643_v16 = vld [vmem:[%s13755_s5 + $0x648] sm:$0xff] }
 0x30d   :  { %1928 = vmatpush.msrb.mxu1 %v1721_v28  ;;  %1948 = vmatpush.msrb.mxu2 %v1769_v44  ;;  %v1742_v5 = vld [vmem:[%s13755_s5 + $0x960] sm:$0xff]  ;;  %v1691_v63 = vld [vmem:[%s13755_s5 + $0x7c8] sm:$0xff] }
 0x30e   :  { %1968 = vmatpush.msrb.mxu3 %v1817_v51  ;;  %1909 = vmatpush.msrb.mxu0 %v1670_v30  ;;  %v1790_v46 = vld [vmem:[%s13755_s5 + $0xae0] sm:$0xff]  ;;  %v1739_v28 = vld [vmem:[%s13755_s5 + $0x948] sm:$0xff]  ;;  %v1688_v51 = vld [vmem:[%s13755_s5 + $0x7b0] sm:$0xff] }
 0x30f   :  { %1929 = vmatpush.msrb.mxu1 %v1718_v36  ;;  %1949 = vmatpush.msrb.mxu2 %v1766_v2  ;;  %v1787_v44 = vld [vmem:[%s13755_s5 + $0xac8] sm:$0xff]  ;;  %v1736_v30 = vld [vmem:[%s13755_s5 + $0x930] sm:$0xff]  ;;  %v1637_v2 = vld [vmem:[%s13755_s5 + $0x618] sm:$0xff] }
 0x310   :  { %1969 = vmatpush.msrb.mxu3 %v1814_v50  ;;  %1910 = vmatpush.msrb.mxu0 %v1667_v48  ;;  %v1784_v36 = vld [vmem:[%s13755_s5 + $0xab0] sm:$0xff]  ;;  %v1685_v50 = vld [vmem:[%s13755_s5 + $0x798] sm:$0xff] }
 0x311   :  { %1930 = vmatpush.msrb.mxu1 %v1715_v41  ;;  %1950 = vmatpush.msrb.mxu2 %v1763_v37  ;;  %v1733_v41 = vld [vmem:[%s13755_s5 + $0x918] sm:$0xff] }
 0x312   :  { %1970 = vmatpush.msrb.mxu3 %v1811_v31  ;;  %1911 = vmatpush.msrb.mxu0 %v1664_v57  ;;  %v1781_v37 = vld [vmem:[%s13755_s5 + $0xa98] sm:$0xff]  ;;  %v1634_v57 = vld [vmem:[%s13755_s5 + $0x600] sm:$0xff] }
 0x313   :  { %1931 = vmatpush.msrb.mxu1 %v1712_v15  ;;  %1951 = vmatpush.msrb.mxu2 %v1760_v20  ;;  %v1682_v15 = vld [vmem:[%s13755_s5 + $0x780] sm:$0xff] }
 0x314   :  { %1971 = vmatpush.msrb.mxu3 %v1808_v27  ;;  %1912 = vmatpush.msrb.mxu0 %v1661_v1  ;;  %v1730_v20 = vld [vmem:[%s13755_s5 + $0x900] sm:$0xff] }
 0x315   :  { %1932 = vmatpush.msrb.mxu1 %v1709_v3  ;;  %1952 = vmatpush.msrb.mxu2 %v1757_v0  ;;  %v1778_v27 = vld [vmem:[%s13755_s5 + $0xa80] sm:$0xff] }
 0x316   :  { %1972 = vmatpush.msrb.mxu3 %v1805_v59  ;;  %1913 = vmatpush.msrb.mxu0 %v1658_v14 }
 0x317   :  { %1933 = vmatpush.msrb.mxu1 %v1706_v34  ;;  %1953 = vmatpush.msrb.mxu2 %v1754_v35 }
 0x318   :  { %1973 = vmatpush.msrb.mxu3 %v1802_v7  ;;  %1914 = vmatpush.msrb.mxu0 %v1655_v32 }
 0x319   :  { %1934 = vmatpush.msrb.mxu1 %v1703_v21  ;;  %1954 = vmatpush.msrb.mxu2 %v1751_v29 }
 0x31a   :  { %1974 = vmatpush.msrb.mxu3 %v1799_v22  ;;  %1915 = vmatpush.msrb.mxu0 %v1652_v47 }
 0x31b   :  { %1935 = vmatpush.msrb.mxu1 %v1700_v38  ;;  %1955 = vmatpush.msrb.mxu2 %v1748_v24 }
 0x31c   :  { %1975 = vmatpush.msrb.mxu3 %v1796_v13  ;;  %1916 = vmatpush.msrb.mxu0 %v1649_v52  ;;  %v1488_v52 = vld [vmem:[%s13755_s5 + $0x170] sm:$0xff] }
 0x31d   :  { %1936 = vmatpush.msrb.mxu1 %v1697_v9  ;;  %1956 = vmatpush.msrb.mxu2 %v1745_v55  ;;  %v1536_v9 = vld [vmem:[%s13755_s5 + $0x2f0] sm:$0xff] }
 0x31e   :  { %1976 = vmatpush.msrb.mxu3 %v1793_v25  ;;  %1917 = vmatpush.msrb.mxu0 %v1646_v40  ;;  %v1485_v25 = vld [vmem:[%s13755_s5 + $0x158] sm:$0xff] }
 0x31f   :  { %1937 = vmatpush.msrb.mxu1 %v1694_v17  ;;  %1957 = vmatpush.msrb.mxu2 %v1742_v5  ;;  %v1533_v40 = vld [vmem:[%s13755_s5 + $0x2d8] sm:$0xff] }
 0x320   :  { %1977 = vmatpush.msrb.mxu3 %v1790_v46  ;;  %1918 = vmatpush.msrb.mxu0 %v1643_v16  ;;  %v1581_v46 = vld [vmem:[%s13755_s5 + $0x458] sm:$0xff] }
 0x321   :  { %1938 = vmatpush.msrb.mxu1 %v1691_v63  ;;  %1958 = vmatpush.msrb.mxu2 %v1739_v28  ;;  %v1629_v16 = vld [vmem:[%s13755_s5 + $0x5d8] sm:$0xff]  ;;  %v1482_v63 = vld [vmem:[%s13755_s5 + $0x140] sm:$0xff] }
 0x322   :  { %1978 = vmatpush.msrb.mxu3 %v1787_v44  ;;  %v1530_v28 = vld [vmem:[%s13755_s5 + $0x2c0] sm:$0xff] }
 0x323   :  { %1939 = vmatpush.msrb.mxu1 %v1688_v51  ;;  %1959 = vmatpush.msrb.mxu2 %v1736_v30  ;;  %v1578_v44 = vld [vmem:[%s13755_s5 + $0x440] sm:$0xff] }
 0x324   :  { %1979 = vmatpush.msrb.mxu3 %v1784_v36  ;;  %v1479_v36 = vld [vmem:[%s13755_s5 + $0x128] sm:$0xff] }
 0x325   :  { %1940 = vmatpush.msrb.mxu1 %v1685_v50  ;;  %1960 = vmatpush.msrb.mxu2 %v1733_v41  ;;  %v1575_v41 = vld [vmem:[%s13755_s5 + $0x428] sm:$0xff] }
 0x326   :  { %1980 = vmatpush.msrb.mxu3 %v1781_v37  ;;  %v1623_v37 = vld [vmem:[%s13755_s5 + $0x5a8] sm:$0xff] }
 0x327   :  { %1941 = vmatpush.msrb.mxu1 %v1682_v15  ;;  %1961 = vmatpush.msrb.mxu2 %v1730_v20 }
 0x328   :  { %1981 = vmatpush.msrb.mxu3 %v1778_v27  ;;  %v1476_v27 = vld [vmem:[%s13755_s5 + $0x110] sm:$0xff] }
 0x36f   :  { %v1333_v8 = vpop.xlane.xlu2 %1332 }
 0x370   :  { %v1351_v43 = vsel %vm1230_vm8, %v1333_v8, 0.0  ;;  %v1640_v8 = vld [vmem:[%s13755_s5 + $0x630] sm:$0xff] }
 0x371   :  { %1919 = vmatpush.msrb.mxu0 %v1640_v8  ;;  %v1626_v8 = vld [vmem:[%s13755_s5 + $0x5c0] sm:$0xff] }
 0x373   :  { %1920 = vmatpush.msrb.mxu0 %v1637_v2  ;;  %v1527_v2 = vld [vmem:[%s13755_s5 + $0x2a8] sm:$0xff] }
 0x375   :  { %1921 = vmatpush.msrb.mxu0 %v1634_v57 }
 0x377   :  { %v1350_v58 = vpop.xlane.xlu2 %1349 }
 0x378   :  { %v1352_v26 = vsel %vm1230_vm8, %v1350_v58, 0.0 }
 0x379   :  { %v1353_v19 = vadd.f32 %v1352_v26, %v1351_v43  ;;  %v9118_v43 = vpop.permute.xlu0 %1385 }
 0x37b   :  { %v1354_v62 = vmul.f32 0.0006377551, %v1353_v19 }
 0x37d   :  { %v1355_v39 = vadd.f32 1e-05, %v1354_v62 }
 0x37f   :  { %6855 = vrsqrt.f32 %v1355_v39  ;;  %vm1362_vm10 = vweird.f32 %v1355_v39 }
 0x385   :  { %v6856_v48 = vpop.eup %6855 }
 0x386   :  { %v1357_v31 = vmul.f32 %v6856_v48, %v1355_v39  ;;  %vm1363_vm9 = vweird.f32 %v6856_v48 }
 0x387   :  { %vm1364_vm11 = vmor %vm1362_vm10, %vm1363_vm9  ;;  %vm6196_vm9 = vcmask 73728  }
 0x388   :  { %v1358_v1 = vmul.f32 %v6856_v48, %v1357_v31 }
 0x38a   :  { %v1359_v3 = vmul.f32 0.5, %v1358_v1  ;;  %v1524_v1 = vld [vmem:[%s13755_s5 + $0x290] sm:$0xff] }
 0x38c   :  { %v1360_v0 = vsub.f32 1.5, %v1359_v3  ;;  %v1572_v3 = vld [vmem:[%s13755_s5 + $0x410] sm:$0xff] }
 0x38e   :  { %v1361_v59 = vmul.f32 %v6856_v48, %v1360_v0  ;;  %v1620_v0 = vld [vmem:[%s13755_s5 + $0x590] sm:$0xff] }
 0x390   :  { %v9108_v14 = vsel %vm1364_vm11, %v6856_v48, %v1361_v59  ;;  %v1473_v59 = vld [vmem:[%s13755_s5 + $0xf8] sm:$0xff] }
 0x391   :  { %v1366_v34 = vmul.f32 %v9108_v14, %v8628_v33  ;;  %v1367_v58 = vmul.f32 %v9108_v14, %v8632_v61  ;;  %v1368_v35 = vmul.f32 %v9108_v14, %v8636_v12  ;;  %v1369_v7 = vmul.f32 %v9108_v14, %v8640_v56  ;;  %v9124_v33 = vpop.permute.xlu1 %1407 }
 0x392   :  { %v1370_v61 = vmul.f32 %v9108_v14, %v8647_v53  ;;  %v1371_v12 = vmul.f32 %v9108_v14, %v8651_v4  ;;  %v1372_v38 = vmul.f32 %v9108_v14, %v8655_v10  ;;  %v1373_v62 = vmul.f32 %v9108_v14, %v8672_v54  ;;  %v1584_v10 = vld [vmem:[%s13755_s5 + $0x470] sm:$0xff] }
 0x393   :  { %v1388_v26 = vmul.f32 %v9118_v43, %v1366_v34  ;;  %v1389_v32 = vmul.f32 %v9118_v43, %v1367_v58  ;;  %v1390_v21 = vmul.f32 %v9118_v43, %v1368_v35  ;;  %v1391_v19 = vmul.f32 %v9118_v43, %v1369_v7  ;;  %v1632_v54 = vld [vmem:[%s13755_s5 + $0x5f0] sm:$0xff]  ;;  %v1521_v34 = vld [vmem:[%s13755_s5 + $0x278] sm:$0xff]  ;;  %v1470_v7 = vld [vmem:[%s13755_s5 + $0xe0] sm:$0xff] }
 0x394   :  { %v1392_v39 = vmul.f32 %v9118_v43, %v1370_v61  ;;  %v1393_v55 = vmul.f32 %v9118_v43, %v1371_v12  ;;  %v1394_v17 = vmul.f32 %v9118_v43, %v1372_v38  ;;  %v1395_v5 = vmul.f32 %v9118_v43, %v1373_v62  ;;  %v1569_v58 = vld [vmem:[%s13755_s5 + $0x3f8] sm:$0xff]  ;;  %v1515_v61 = vld [vmem:[%s13755_s5 + $0x248] sm:$0xff]  ;;  %v1608_v38 = vld [vmem:[%s13755_s5 + $0x530] sm:$0xff] }
 0x395   :  { %v1410_v56 = vadd.f32 %v9124_v33, %v1388_v26  ;;  %v1411_v29 = vadd.f32 %v9124_v33, %v1389_v32  ;;  %v1412_v22 = vadd.f32 %v9124_v33, %v1390_v21  ;;  %v1413_v47 = vadd.f32 %v9124_v33, %v1391_v19  ;;  %v1617_v35 = vld [vmem:[%s13755_s5 + $0x578] sm:$0xff]  ;;  %v1518_v26 = vld [vmem:[%s13755_s5 + $0x260] sm:$0xff]  ;;  %v1467_v19 = vld [vmem:[%s13755_s5 + $0xc8] sm:$0xff] }
 0x396   :  { %v1414_v51 = vadd.f32 %v9124_v33, %v1392_v39  ;;  %v1415_v30 = vadd.f32 %v9124_v33, %v1393_v55  ;;  %v1416_v50 = vadd.f32 %v9124_v33, %v1394_v17  ;;  %v1417_v48 = vadd.f32 %v9124_v33, %v1395_v5  ;;  %v1566_v32 = vld [vmem:[%s13755_s5 + $0x3e0] sm:$0xff]  ;;  %v1563_v12 = vld [vmem:[%s13755_s5 + $0x3c8] sm:$0xff]  ;;  %v1461_v62 = vld [vmem:[%s13755_s5 + $0x98] sm:$0xff] }
 0x397   :  { %v9138_v24 = vmax.f32 %v1410_v56, 0.0  ;;  %v9140_v53 = vmax.f32 %v1411_v29, 0.0  ;;  %v9142_v13 = vmax.f32 %v1412_v22, 0.0  ;;  %v9144_v4 = vmax.f32 %v1413_v47, 0.0  ;;  %v1614_v21 = vld [vmem:[%s13755_s5 + $0x560] sm:$0xff]  ;;  %v1611_v56 = vld [vmem:[%s13755_s5 + $0x548] sm:$0xff] }
 0x398   :  { %v9206_v31 = vmax.f32 %v1414_v51, 0.0  ;;  %v9208_v57 = vmax.f32 %v1415_v30, 0.0  ;;  %v9210_v15 = vmax.f32 %v1416_v50, 0.0  ;;  %v9212_v20 = vmax.f32 %v1417_v48, 0.0  ;;  %v1464_v29 = vld [vmem:[%s13755_s5 + $0xb0] sm:$0xff]  ;;  %v1506_v39 = vld [vmem:[%s13755_s5 + $0x200] sm:$0xff] }
 0x399   :  { %1842 = vmatmul.f32.vlgmr.msra.gmra.mxu0 %v9138_v24  ;;  %1862 = vmatmul.f32.vlgmr.msra.gmra.mxu1 %v9140_v53  ;;  %v1512_v22 = vld [vmem:[%s13755_s5 + $0x230] sm:$0xff]  ;;  %v1554_v55 = vld [vmem:[%s13755_s5 + $0x380] sm:$0xff]  ;;  %v1503_v17 = vld [vmem:[%s13755_s5 + $0x1e8] sm:$0xff] }
 0x39a   :  { %1882 = vmatmul.f32.vlgmr.msra.gmra.mxu2 %v9142_v13  ;;  %1902 = vmatmul.f32.vlgmr.msra.gmra.mxu3 %v9144_v4  ;;  %v1560_v47 = vld [vmem:[%s13755_s5 + $0x3b0] sm:$0xff]  ;;  %v1551_v5 = vld [vmem:[%s13755_s5 + $0x368] sm:$0xff]  ;;  %v1497_v51 = vld [vmem:[%s13755_s5 + $0x1b8] sm:$0xff] }
 0x39b   :  { %1986 = vmatpush.msra.mxu0 %v1488_v52  ;;  %2006 = vmatpush.msra.mxu1 %v1536_v9  ;;  %v1509_v52 = vld [vmem:[%s13755_s5 + $0x218] sm:$0xff]  ;;  %v1494_v50 = vld [vmem:[%s13755_s5 + $0x1a0] sm:$0xff] }
 0x39c   :  { %2026 = vmatpush.msra.mxu2 %v1584_v10  ;;  %2046 = vmatpush.msra.mxu3 %v1632_v54  ;;  %v1557_v9 = vld [vmem:[%s13755_s5 + $0x398] sm:$0xff]  ;;  %v1458_v54 = vld [vmem:[%s13755_s5 + $0x80] sm:$0xff] }
 0x39d   :  { %1987 = vmatpush.msra.mxu0 %v1485_v25  ;;  %2007 = vmatpush.msra.mxu1 %v1533_v40  ;;  %v1605_v10 = vld [vmem:[%s13755_s5 + $0x518] sm:$0xff]  ;;  %v1602_v25 = vld [vmem:[%s13755_s5 + $0x500] sm:$0xff]  ;;  %v1455_v40 = vld [vmem:[%s13755_s5 + $0x68] sm:$0xff] }
 0x39e   :  { %2027 = vmatpush.msra.mxu2 %v1581_v46  ;;  %2047 = vmatpush.msra.mxu3 %v1629_v16  ;;  %v1599_v46 = vld [vmem:[%s13755_s5 + $0x4e8] sm:$0xff]  ;;  %v1452_v16 = vld [vmem:[%s13755_s5 + $0x50] sm:$0xff]  ;;  %v1545_v30 = vld [vmem:[%s13755_s5 + $0x338] sm:$0xff] }
 0x39f   :  { %1988 = vmatpush.msra.mxu0 %v1482_v63  ;;  %2008 = vmatpush.msra.mxu1 %v1530_v28  ;;  %v1500_v63 = vld [vmem:[%s13755_s5 + $0x1d0] sm:$0xff]  ;;  %v1542_v48 = vld [vmem:[%s13755_s5 + $0x320] sm:$0xff] }
 0x3a0   :  { %2028 = vmatpush.msra.mxu2 %v1578_v44  ;;  %2048 = vmatpush.msra.mxu3 %v1626_v8  ;;  %v1548_v28 = vld [vmem:[%s13755_s5 + $0x350] sm:$0xff]  ;;  %v1449_v8 = vld [vmem:[%s13755_s5 + $0x38] sm:$0xff] }
 0x3a1   :  { %1989 = vmatpush.msra.mxu0 %v1479_v36  ;;  %2009 = vmatpush.msra.mxu1 %v1527_v2  ;;  %v1596_v44 = vld [vmem:[%s13755_s5 + $0x4d0] sm:$0xff]  ;;  %v1593_v36 = vld [vmem:[%s13755_s5 + $0x4b8] sm:$0xff]  ;;  %v1446_v2 = vld [vmem:[%s13755_s5 + $0x20] sm:$0xff] }
 0x3a2   :  { %2029 = vmatpush.msra.mxu2 %v1575_v41  ;;  %2049 = vmatpush.msra.mxu3 %v1623_v37  ;;  %v1590_v41 = vld [vmem:[%s13755_s5 + $0x4a0] sm:$0xff]  ;;  %v1443_v37 = vld [vmem:[%s13755_s5 + $0x8] sm:$0xff] }
 0x3a3   :  { %1922 = vmatmul.f32.vlgmr.msrb.gmra.mxu0 %v9206_v31  ;;  %1942 = vmatmul.f32.vlgmr.msrb.gmra.mxu1 %v9208_v57 }
 0x3a4   :  { %1962 = vmatmul.f32.vlgmr.msrb.gmra.mxu2 %v9210_v15  ;;  %1982 = vmatmul.f32.vlgmr.msrb.gmra.mxu3 %v9212_v20 }
 0x3a5   :  { %1990 = vmatpush.msra.mxu0 %v1476_v27  ;;  %2010 = vmatpush.msra.mxu1 %v1524_v1  ;;  %v1491_v27 = vld [vmem:[%s13755_s5 + $0x188] sm:$0xff] }
 0x3a6   :  { %2030 = vmatpush.msra.mxu2 %v1572_v3  ;;  %2050 = vmatpush.msra.mxu3 %v1620_v0  ;;  %v1539_v1 = vld [vmem:[%s13755_s5 + $0x308] sm:$0xff]  ;;  %v1680_v0 = vld [vmem:[%s13755_s5 + $0x770] sm:$0xff] }
 0x3a7   :  { %1991 = vmatpush.msra.mxu0 %v1473_v59  ;;  %2011 = vmatpush.msra.mxu1 %v1521_v34  ;;  %v1587_v3 = vld [vmem:[%s13755_s5 + $0x488] sm:$0xff]  ;;  %v1728_v59 = vld [vmem:[%s13755_s5 + $0x8f0] sm:$0xff] }
 0x3a8   :  { %2031 = vmatpush.msra.mxu2 %v1569_v58  ;;  %2051 = vmatpush.msra.mxu3 %v1617_v35  ;;  %v1776_v34 = vld [vmem:[%s13755_s5 + $0xa70] sm:$0xff]  ;;  %v1677_v35 = vld [vmem:[%s13755_s5 + $0x758] sm:$0xff] }
 0x3a9   :  { %1992 = vmatpush.msra.mxu0 %v1470_v7  ;;  %2012 = vmatpush.msra.mxu1 %v1518_v26  ;;  %v1824_v58 = vld [vmem:[%s13755_s5 + $0xbf0] sm:$0xff]  ;;  %v1725_v7 = vld [vmem:[%s13755_s5 + $0x8d8] sm:$0xff] }
 0x3aa   :  { %2032 = vmatpush.msra.mxu2 %v1566_v32  ;;  %2052 = vmatpush.msra.mxu3 %v1614_v21  ;;  %v1773_v26 = vld [vmem:[%s13755_s5 + $0xa58] sm:$0xff]  ;;  %v1674_v21 = vld [vmem:[%s13755_s5 + $0x740] sm:$0xff] }
 0x3ab   :  { %1993 = vmatpush.msra.mxu0 %v1467_v19  ;;  %2013 = vmatpush.msra.mxu1 %v1515_v61  ;;  %v1821_v32 = vld [vmem:[%s13755_s5 + $0xbd8] sm:$0xff]  ;;  %v1722_v19 = vld [vmem:[%s13755_s5 + $0x8c0] sm:$0xff] }
 0x3ac   :  { %2033 = vmatpush.msra.mxu2 %v1563_v12  ;;  %2053 = vmatpush.msra.mxu3 %v1611_v56  ;;  %v1770_v61 = vld [vmem:[%s13755_s5 + $0xa40] sm:$0xff]  ;;  %v1671_v56 = vld [vmem:[%s13755_s5 + $0x728] sm:$0xff] }
 0x3ad   :  { %1994 = vmatpush.msra.mxu0 %v1464_v29  ;;  %2014 = vmatpush.msra.mxu1 %v1512_v22  ;;  %v1818_v12 = vld [vmem:[%s13755_s5 + $0xbc0] sm:$0xff]  ;;  %v1719_v29 = vld [vmem:[%s13755_s5 + $0x8a8] sm:$0xff] }
 0x3ae   :  { %2034 = vmatpush.msra.mxu2 %v1560_v47  ;;  %2054 = vmatpush.msra.mxu3 %v1608_v38  ;;  %v1767_v22 = vld [vmem:[%s13755_s5 + $0xa28] sm:$0xff]  ;;  %v1668_v38 = vld [vmem:[%s13755_s5 + $0x710] sm:$0xff] }
 0x3af   :  { %1995 = vmatpush.msra.mxu0 %v1461_v62  ;;  %2015 = vmatpush.msra.mxu1 %v1509_v52  ;;  %v1815_v47 = vld [vmem:[%s13755_s5 + $0xba8] sm:$0xff]  ;;  %v1716_v62 = vld [vmem:[%s13755_s5 + $0x890] sm:$0xff] }
 0x3b0   :  { %2035 = vmatpush.msra.mxu2 %v1557_v9  ;;  %2055 = vmatpush.msra.mxu3 %v1605_v10  ;;  %v1764_v52 = vld [vmem:[%s13755_s5 + $0xa10] sm:$0xff]  ;;  %v1665_v10 = vld [vmem:[%s13755_s5 + $0x6f8] sm:$0xff] }
 0x3b1   :  { %1996 = vmatpush.msra.mxu0 %v1458_v54  ;;  %2016 = vmatpush.msra.mxu1 %v1506_v39  ;;  %v1812_v9 = vld [vmem:[%s13755_s5 + $0xb90] sm:$0xff]  ;;  %v1713_v54 = vld [vmem:[%s13755_s5 + $0x878] sm:$0xff] }
 0x3b2   :  { %2036 = vmatpush.msra.mxu2 %v1554_v55  ;;  %2056 = vmatpush.msra.mxu3 %v1602_v25  ;;  %v1761_v39 = vld [vmem:[%s13755_s5 + $0x9f8] sm:$0xff]  ;;  %v1662_v25 = vld [vmem:[%s13755_s5 + $0x6e0] sm:$0xff] }
 0x3b3   :  { %1997 = vmatpush.msra.mxu0 %v1455_v40  ;;  %2017 = vmatpush.msra.mxu1 %v1503_v17  ;;  %v1809_v55 = vld [vmem:[%s13755_s5 + $0xb78] sm:$0xff]  ;;  %v1710_v40 = vld [vmem:[%s13755_s5 + $0x860] sm:$0xff] }
 0x3b4   :  { %2037 = vmatpush.msra.mxu2 %v1551_v5  ;;  %2057 = vmatpush.msra.mxu3 %v1599_v46  ;;  %v1758_v17 = vld [vmem:[%s13755_s5 + $0x9e0] sm:$0xff]  ;;  %v1659_v46 = vld [vmem:[%s13755_s5 + $0x6c8] sm:$0xff] }
 0x3b5   :  { %1998 = vmatpush.msra.mxu0 %v1452_v16  ;;  %2018 = vmatpush.msra.mxu1 %v1500_v63  ;;  %v1806_v5 = vld [vmem:[%s13755_s5 + $0xb60] sm:$0xff]  ;;  %v1707_v16 = vld [vmem:[%s13755_s5 + $0x848] sm:$0xff] }
 0x3b6   :  { %2038 = vmatpush.msra.mxu2 %v1548_v28  ;;  %2058 = vmatpush.msra.mxu3 %v1596_v44  ;;  %v1755_v63 = vld [vmem:[%s13755_s5 + $0x9c8] sm:$0xff]  ;;  %v1656_v44 = vld [vmem:[%s13755_s5 + $0x6b0] sm:$0xff] }
 0x3b7   :  { %1999 = vmatpush.msra.mxu0 %v1449_v8  ;;  %2019 = vmatpush.msra.mxu1 %v1497_v51  ;;  %v1803_v28 = vld [vmem:[%s13755_s5 + $0xb48] sm:$0xff]  ;;  %v1704_v8 = vld [vmem:[%s13755_s5 + $0x830] sm:$0xff] }
 0x3b8   :  { %2039 = vmatpush.msra.mxu2 %v1545_v30  ;;  %2059 = vmatpush.msra.mxu3 %v1593_v36  ;;  %v1752_v51 = vld [vmem:[%s13755_s5 + $0x9b0] sm:$0xff]  ;;  %v1653_v36 = vld [vmem:[%s13755_s5 + $0x698] sm:$0xff] }
 0x3b9   :  { %2000 = vmatpush.msra.mxu0 %v1446_v2  ;;  %2020 = vmatpush.msra.mxu1 %v1494_v50  ;;  %v1800_v30 = vld [vmem:[%s13755_s5 + $0xb30] sm:$0xff]  ;;  %v1701_v2 = vld [vmem:[%s13755_s5 + $0x818] sm:$0xff] }
 0x3ba   :  { %2040 = vmatpush.msra.mxu2 %v1542_v48  ;;  %2060 = vmatpush.msra.mxu3 %v1590_v41  ;;  %v1749_v50 = vld [vmem:[%s13755_s5 + $0x998] sm:$0xff]  ;;  %v1650_v41 = vld [vmem:[%s13755_s5 + $0x680] sm:$0xff] }
 0x3bb   :  { %2001 = vmatpush.msra.mxu0 %v1443_v37  ;;  %2021 = vmatpush.msra.mxu1 %v1491_v27  ;;  %v1797_v48 = vld [vmem:[%s13755_s5 + $0xb18] sm:$0xff]  ;;  %v1698_v37 = vld [vmem:[%s13755_s5 + $0x800] sm:$0xff] }
 0x3bc   :  { %2041 = vmatpush.msra.mxu2 %v1539_v1  ;;  %2061 = vmatpush.msra.mxu3 %v1587_v3  ;;  %v1746_v27 = vld [vmem:[%s13755_s5 + $0x980] sm:$0xff]  ;;  %v1647_v3 = vld [vmem:[%s13755_s5 + $0x668] sm:$0xff] }
 0x3bd   :  { %2002 = vmatmul.f32.vlgmr.msra.gmra.mxu0 %v9138_v24  ;;  %2022 = vmatmul.f32.vlgmr.msra.gmra.mxu1 %v9140_v53  ;;  %v1794_v1 = vld [vmem:[%s13755_s5 + $0xb00] sm:$0xff] }
 0x3be   :  { %2042 = vmatmul.f32.vlgmr.msra.gmra.mxu2 %v9142_v13  ;;  %2062 = vmatmul.f32.vlgmr.msra.gmra.mxu3 %v9144_v4 }
 0x3bf   :  { %2066 = vmatpush.msrb.mxu0 %v1680_v0  ;;  %2086 = vmatpush.msrb.mxu1 %v1728_v59  ;;  %v1695_v0 = vld [vmem:[%s13755_s5 + $0x7e8] sm:$0xff] }
 0x3c0   :  { %2106 = vmatpush.msrb.mxu2 %v1776_v34  ;;  %2126 = vmatpush.msrb.mxu3 %v1824_v58  ;;  %v1743_v59 = vld [vmem:[%s13755_s5 + $0x968] sm:$0xff]  ;;  %v1644_v58 = vld [vmem:[%s13755_s5 + $0x650] sm:$0xff] }
 0x3c1   :  { %2067 = vmatpush.msrb.mxu0 %v1677_v35  ;;  %2087 = vmatpush.msrb.mxu1 %v1725_v7  ;;  %v1791_v34 = vld [vmem:[%s13755_s5 + $0xae8] sm:$0xff]  ;;  %v1692_v35 = vld [vmem:[%s13755_s5 + $0x7d0] sm:$0xff] }
 0x3c2   :  { %2107 = vmatpush.msrb.mxu2 %v1773_v26  ;;  %2127 = vmatpush.msrb.mxu3 %v1821_v32  ;;  %v1740_v7 = vld [vmem:[%s13755_s5 + $0x950] sm:$0xff]  ;;  %v1641_v32 = vld [vmem:[%s13755_s5 + $0x638] sm:$0xff] }
 0x3c3   :  { %2068 = vmatpush.msrb.mxu0 %v1674_v21  ;;  %2088 = vmatpush.msrb.mxu1 %v1722_v19  ;;  %v1788_v26 = vld [vmem:[%s13755_s5 + $0xad0] sm:$0xff]  ;;  %v1689_v21 = vld [vmem:[%s13755_s5 + $0x7b8] sm:$0xff] }
 0x3c4   :  { %2108 = vmatpush.msrb.mxu2 %v1770_v61  ;;  %2128 = vmatpush.msrb.mxu3 %v1818_v12  ;;  %v1737_v19 = vld [vmem:[%s13755_s5 + $0x938] sm:$0xff]  ;;  %v1638_v12 = vld [vmem:[%s13755_s5 + $0x620] sm:$0xff] }
 0x3c5   :  { %2069 = vmatpush.msrb.mxu0 %v1671_v56  ;;  %2089 = vmatpush.msrb.mxu1 %v1719_v29  ;;  %v1785_v61 = vld [vmem:[%s13755_s5 + $0xab8] sm:$0xff]  ;;  %v1686_v56 = vld [vmem:[%s13755_s5 + $0x7a0] sm:$0xff] }
 0x3c6   :  { %2109 = vmatpush.msrb.mxu2 %v1767_v22  ;;  %2129 = vmatpush.msrb.mxu3 %v1815_v47  ;;  %v1734_v29 = vld [vmem:[%s13755_s5 + $0x920] sm:$0xff]  ;;  %v1635_v47 = vld [vmem:[%s13755_s5 + $0x608] sm:$0xff] }
 0x3c7   :  { %2070 = vmatpush.msrb.mxu0 %v1668_v38  ;;  %2090 = vmatpush.msrb.mxu1 %v1716_v62  ;;  %v1782_v22 = vld [vmem:[%s13755_s5 + $0xaa0] sm:$0xff]  ;;  %v1683_v38 = vld [vmem:[%s13755_s5 + $0x788] sm:$0xff] }
 0x3c8   :  { %2110 = vmatpush.msrb.mxu2 %v1764_v52  ;;  %2130 = vmatpush.msrb.mxu3 %v1812_v9  ;;  %v1731_v62 = vld [vmem:[%s13755_s5 + $0x908] sm:$0xff]  ;;  %v1489_v9 = vld [vmem:[%s13755_s5 + $0x178] sm:$0xff] }
 0x3c9   :  { %2071 = vmatpush.msrb.mxu0 %v1665_v10  ;;  %2091 = vmatpush.msrb.mxu1 %v1713_v54  ;;  %v1779_v52 = vld [vmem:[%s13755_s5 + $0xa88] sm:$0xff]  ;;  %v1537_v10 = vld [vmem:[%s13755_s5 + $0x2f8] sm:$0xff] }
 0x3ca   :  { %2111 = vmatpush.msrb.mxu2 %v1761_v39  ;;  %2131 = vmatpush.msrb.mxu3 %v1809_v55  ;;  %v1585_v54 = vld [vmem:[%s13755_s5 + $0x478] sm:$0xff]  ;;  %v1486_v55 = vld [vmem:[%s13755_s5 + $0x160] sm:$0xff] }
 0x3cb   :  { %2072 = vmatpush.msrb.mxu0 %v1662_v25  ;;  %2092 = vmatpush.msrb.mxu1 %v1710_v40  ;;  %v1633_v39 = vld [vmem:[%s13755_s5 + $0x5f8] sm:$0xff]  ;;  %v1534_v25 = vld [vmem:[%s13755_s5 + $0x2e0] sm:$0xff] }
 0x3cc   :  { %2112 = vmatpush.msrb.mxu2 %v1758_v17  ;;  %2132 = vmatpush.msrb.mxu3 %v1806_v5  ;;  %v1582_v40 = vld [vmem:[%s13755_s5 + $0x460] sm:$0xff]  ;;  %v1483_v5 = vld [vmem:[%s13755_s5 + $0x148] sm:$0xff] }
 0x3cd   :  { %2073 = vmatpush.msrb.mxu0 %v1659_v46  ;;  %2093 = vmatpush.msrb.mxu1 %v1707_v16  ;;  %v1630_v17 = vld [vmem:[%s13755_s5 + $0x5e0] sm:$0xff]  ;;  %v1531_v46 = vld [vmem:[%s13755_s5 + $0x2c8] sm:$0xff] }
 0x3ce   :  { %2113 = vmatpush.msrb.mxu2 %v1755_v63  ;;  %2133 = vmatpush.msrb.mxu3 %v1803_v28  ;;  %v1579_v16 = vld [vmem:[%s13755_s5 + $0x448] sm:$0xff]  ;;  %v1480_v28 = vld [vmem:[%s13755_s5 + $0x130] sm:$0xff] }
 0x3cf   :  { %2074 = vmatpush.msrb.mxu0 %v1656_v44  ;;  %2094 = vmatpush.msrb.mxu1 %v1704_v8  ;;  %v1627_v63 = vld [vmem:[%s13755_s5 + $0x5c8] sm:$0xff]  ;;  %v1528_v44 = vld [vmem:[%s13755_s5 + $0x2b0] sm:$0xff] }
 0x3d0   :  { %2114 = vmatpush.msrb.mxu2 %v1752_v51  ;;  %2134 = vmatpush.msrb.mxu3 %v1800_v30  ;;  %v1576_v8 = vld [vmem:[%s13755_s5 + $0x430] sm:$0xff]  ;;  %v1477_v30 = vld [vmem:[%s13755_s5 + $0x118] sm:$0xff] }
 0x3d1   :  { %2075 = vmatpush.msrb.mxu0 %v1653_v36  ;;  %2095 = vmatpush.msrb.mxu1 %v1701_v2  ;;  %v1624_v51 = vld [vmem:[%s13755_s5 + $0x5b0] sm:$0xff]  ;;  %v1525_v36 = vld [vmem:[%s13755_s5 + $0x298] sm:$0xff] }
 0x3d2   :  { %2115 = vmatpush.msrb.mxu2 %v1749_v50  ;;  %2135 = vmatpush.msrb.mxu3 %v1797_v48  ;;  %v1573_v2 = vld [vmem:[%s13755_s5 + $0x418] sm:$0xff]  ;;  %v1474_v48 = vld [vmem:[%s13755_s5 + $0x100] sm:$0xff] }
 0x3d3   :  { %2076 = vmatpush.msrb.mxu0 %v1650_v41  ;;  %2096 = vmatpush.msrb.mxu1 %v1698_v37  ;;  %v1621_v50 = vld [vmem:[%s13755_s5 + $0x598] sm:$0xff]  ;;  %v1522_v41 = vld [vmem:[%s13755_s5 + $0x280] sm:$0xff] }
 0x3d4   :  { %2116 = vmatpush.msrb.mxu2 %v1746_v27  ;;  %2136 = vmatpush.msrb.mxu3 %v1794_v1  ;;  %v1570_v37 = vld [vmem:[%s13755_s5 + $0x400] sm:$0xff]  ;;  %v1471_v1 = vld [vmem:[%s13755_s5 + $0xe8] sm:$0xff] }
 0x3d5   :  { %2077 = vmatpush.msrb.mxu0 %v1647_v3  ;;  %2097 = vmatpush.msrb.mxu1 %v1695_v0  ;;  %v1618_v27 = vld [vmem:[%s13755_s5 + $0x580] sm:$0xff]  ;;  %v1519_v3 = vld [vmem:[%s13755_s5 + $0x268] sm:$0xff] }
 0x3d6   :  { %2117 = vmatpush.msrb.mxu2 %v1743_v59  ;;  %2137 = vmatpush.msrb.mxu3 %v1791_v34  ;;  %v1567_v0 = vld [vmem:[%s13755_s5 + $0x3e8] sm:$0xff]  ;;  %v1468_v34 = vld [vmem:[%s13755_s5 + $0xd0] sm:$0xff] }
 0x3d7   :  { %2078 = vmatpush.msrb.mxu0 %v1644_v58  ;;  %2098 = vmatpush.msrb.mxu1 %v1692_v35  ;;  %v1615_v59 = vld [vmem:[%s13755_s5 + $0x568] sm:$0xff]  ;;  %v1516_v58 = vld [vmem:[%s13755_s5 + $0x250] sm:$0xff] }
 0x3d8   :  { %2118 = vmatpush.msrb.mxu2 %v1740_v7  ;;  %2138 = vmatpush.msrb.mxu3 %v1788_v26  ;;  %v1564_v35 = vld [vmem:[%s13755_s5 + $0x3d0] sm:$0xff]  ;;  %v1465_v26 = vld [vmem:[%s13755_s5 + $0xb8] sm:$0xff] }
 0x3d9   :  { %2079 = vmatpush.msrb.mxu0 %v1641_v32  ;;  %2099 = vmatpush.msrb.mxu1 %v1689_v21  ;;  %v1612_v7 = vld [vmem:[%s13755_s5 + $0x550] sm:$0xff]  ;;  %v1513_v32 = vld [vmem:[%s13755_s5 + $0x238] sm:$0xff] }
 0x3da   :  { %2119 = vmatpush.msrb.mxu2 %v1737_v19  ;;  %2139 = vmatpush.msrb.mxu3 %v1785_v61  ;;  %v1561_v21 = vld [vmem:[%s13755_s5 + $0x3b8] sm:$0xff]  ;;  %v1462_v61 = vld [vmem:[%s13755_s5 + $0xa0] sm:$0xff] }
 0x3db   :  { %2080 = vmatpush.msrb.mxu0 %v1638_v12  ;;  %2100 = vmatpush.msrb.mxu1 %v1686_v56  ;;  %v1609_v19 = vld [vmem:[%s13755_s5 + $0x538] sm:$0xff]  ;;  %v1510_v12 = vld [vmem:[%s13755_s5 + $0x220] sm:$0xff] }
 0x3dc   :  { %2120 = vmatpush.msrb.mxu2 %v1734_v29  ;;  %2140 = vmatpush.msrb.mxu3 %v1782_v22  ;;  %v1558_v56 = vld [vmem:[%s13755_s5 + $0x3a0] sm:$0xff]  ;;  %v1459_v22 = vld [vmem:[%s13755_s5 + $0x88] sm:$0xff] }
 0x3dd   :  { %2081 = vmatpush.msrb.mxu0 %v1635_v47  ;;  %2101 = vmatpush.msrb.mxu1 %v1683_v38  ;;  %v1606_v29 = vld [vmem:[%s13755_s5 + $0x520] sm:$0xff]  ;;  %v1507_v47 = vld [vmem:[%s13755_s5 + $0x208] sm:$0xff] }
 0x3de   :  { %2121 = vmatpush.msrb.mxu2 %v1731_v62  ;;  %2141 = vmatpush.msrb.mxu3 %v1779_v52  ;;  %v1555_v38 = vld [vmem:[%s13755_s5 + $0x388] sm:$0xff]  ;;  %v1456_v52 = vld [vmem:[%s13755_s5 + $0x70] sm:$0xff] }
 0x3df   :  { %2082 = vmatmul.f32.vlgmr.msrb.gmra.mxu0 %v9206_v31  ;;  %2102 = vmatmul.f32.vlgmr.msrb.gmra.mxu1 %v9208_v57  ;;  %v1603_v62 = vld [vmem:[%s13755_s5 + $0x508] sm:$0xff] }
 0x3e0   :  { %2122 = vmatmul.f32.vlgmr.msrb.gmra.mxu2 %v9210_v15  ;;  %2142 = vmatmul.f32.vlgmr.msrb.gmra.mxu3 %v9212_v20 }
 0x3e1   :  { %2146 = vmatpush.msra.mxu0 %v1489_v9  ;;  %2166 = vmatpush.msra.mxu1 %v1537_v10  ;;  %v1504_v9 = vld [vmem:[%s13755_s5 + $0x1f0] sm:$0xff] }
 0x3e2   :  { %2186 = vmatpush.msra.mxu2 %v1585_v54  ;;  %2206 = vmatpush.msra.mxu3 %v1633_v39  ;;  %v1552_v10 = vld [vmem:[%s13755_s5 + $0x370] sm:$0xff]  ;;  %v1453_v39 = vld [vmem:[%s13755_s5 + $0x58] sm:$0xff] }
 0x3e3   :  { %2147 = vmatpush.msra.mxu0 %v1486_v55  ;;  %2167 = vmatpush.msra.mxu1 %v1534_v25  ;;  %v1600_v54 = vld [vmem:[%s13755_s5 + $0x4f0] sm:$0xff]  ;;  %v1501_v55 = vld [vmem:[%s13755_s5 + $0x1d8] sm:$0xff] }
 0x3e4   :  { %2187 = vmatpush.msra.mxu2 %v1582_v40  ;;  %2207 = vmatpush.msra.mxu3 %v1630_v17  ;;  %v1549_v25 = vld [vmem:[%s13755_s5 + $0x358] sm:$0xff]  ;;  %v1450_v17 = vld [vmem:[%s13755_s5 + $0x40] sm:$0xff] }
 0x3e5   :  { %2148 = vmatpush.msra.mxu0 %v1483_v5  ;;  %2168 = vmatpush.msra.mxu1 %v1531_v46  ;;  %v1597_v40 = vld [vmem:[%s13755_s5 + $0x4d8] sm:$0xff]  ;;  %v1498_v5 = vld [vmem:[%s13755_s5 + $0x1c0] sm:$0xff] }
 0x3e6   :  { %2188 = vmatpush.msra.mxu2 %v1579_v16  ;;  %2208 = vmatpush.msra.mxu3 %v1627_v63  ;;  %v1546_v46 = vld [vmem:[%s13755_s5 + $0x340] sm:$0xff]  ;;  %v1447_v63 = vld [vmem:[%s13755_s5 + $0x28] sm:$0xff] }
 0x3e7   :  { %2149 = vmatpush.msra.mxu0 %v1480_v28  ;;  %2169 = vmatpush.msra.mxu1 %v1528_v44  ;;  %v1594_v16 = vld [vmem:[%s13755_s5 + $0x4c0] sm:$0xff]  ;;  %v1495_v28 = vld [vmem:[%s13755_s5 + $0x1a8] sm:$0xff] }
 0x3e8   :  { %2189 = vmatpush.msra.mxu2 %v1576_v8  ;;  %2209 = vmatpush.msra.mxu3 %v1624_v51  ;;  %v1543_v44 = vld [vmem:[%s13755_s5 + $0x328] sm:$0xff]  ;;  %v1444_v51 = vld [vmem:[%s13755_s5 + $0x10] sm:$0xff] }
 0x3e9   :  { %2150 = vmatpush.msra.mxu0 %v1477_v30  ;;  %2170 = vmatpush.msra.mxu1 %v1525_v36  ;;  %v1591_v8 = vld [vmem:[%s13755_s5 + $0x4a8] sm:$0xff]  ;;  %v1492_v30 = vld [vmem:[%s13755_s5 + $0x190] sm:$0xff] }
 0x3ea   :  { %2190 = vmatpush.msra.mxu2 %v1573_v2  ;;  %2210 = vmatpush.msra.mxu3 %v1621_v50  ;;  %v1540_v36 = vld [vmem:[%s13755_s5 + $0x310] sm:$0xff]  ;;  %v1681_v50 = vld [vmem:[%s13755_s5 + $0x778] sm:$0xff] }
 0x3eb   :  { %2151 = vmatpush.msra.mxu0 %v1474_v48  ;;  %2171 = vmatpush.msra.mxu1 %v1522_v41  ;;  %v1588_v2 = vld [vmem:[%s13755_s5 + $0x490] sm:$0xff]  ;;  %v1729_v48 = vld [vmem:[%s13755_s5 + $0x8f8] sm:$0xff] }
 0x3ec   :  { %2191 = vmatpush.msra.mxu2 %v1570_v37  ;;  %2211 = vmatpush.msra.mxu3 %v1618_v27  ;;  %v1777_v41 = vld [vmem:[%s13755_s5 + $0xa78] sm:$0xff]  ;;  %v1678_v27 = vld [vmem:[%s13755_s5 + $0x760] sm:$0xff] }
 0x3ed   :  { %2152 = vmatpush.msra.mxu0 %v1471_v1  ;;  %2172 = vmatpush.msra.mxu1 %v1519_v3  ;;  %v1825_v37 = vld [vmem:[%s13755_s5 + $0xbf8] sm:$0xff]  ;;  %v1723_v1 = vld [vmem:[%s13755_s5 + $0x8c8] sm:$0xff] }
 0x3ee   :  { %2192 = vmatpush.msra.mxu2 %v1567_v0  ;;  %2212 = vmatpush.msra.mxu3 %v1615_v59  ;;  %v1771_v3 = vld [vmem:[%s13755_s5 + $0xa48] sm:$0xff]  ;;  %v1672_v59 = vld [vmem:[%s13755_s5 + $0x730] sm:$0xff] }
 0x3ef   :  { %2153 = vmatpush.msra.mxu0 %v1468_v34  ;;  %2173 = vmatpush.msra.mxu1 %v1516_v58  ;;  %v1819_v0 = vld [vmem:[%s13755_s5 + $0xbc8] sm:$0xff]  ;;  %v1720_v34 = vld [vmem:[%s13755_s5 + $0x8b0] sm:$0xff] }
 0x3f0   :  { %2193 = vmatpush.msra.mxu2 %v1564_v35  ;;  %2213 = vmatpush.msra.mxu3 %v1612_v7  ;;  %v1768_v58 = vld [vmem:[%s13755_s5 + $0xa30] sm:$0xff]  ;;  %v1669_v7 = vld [vmem:[%s13755_s5 + $0x718] sm:$0xff] }
 0x3f1   :  { %2154 = vmatpush.msra.mxu0 %v1465_v26  ;;  %2174 = vmatpush.msra.mxu1 %v1513_v32  ;;  %v1816_v35 = vld [vmem:[%s13755_s5 + $0xbb0] sm:$0xff]  ;;  %v1717_v26 = vld [vmem:[%s13755_s5 + $0x898] sm:$0xff] }
 0x3f2   :  { %2194 = vmatpush.msra.mxu2 %v1561_v21  ;;  %2214 = vmatpush.msra.mxu3 %v1609_v19  ;;  %v1765_v32 = vld [vmem:[%s13755_s5 + $0xa18] sm:$0xff]  ;;  %v9821_v19 = vld [vmem:[%s13755_s5 + $0x700] sm:$0xff] }
 0x3f3   :  { %2155 = vmatpush.msra.mxu0 %v1462_v61  ;;  %2175 = vmatpush.msra.mxu1 %v1510_v12  ;;  %v1813_v21 = vld [vmem:[%s13755_s5 + $0xb98] sm:$0xff]  ;;  %v9826_v61 = vld [vmem:[%s13755_s5 + $0x880] sm:$0xff] }
 0x3f4   :  { %2195 = vmatpush.msra.mxu2 %v1558_v56  ;;  %2215 = vmatpush.msra.mxu3 %v1606_v29  ;;  %v9831_v12 = vld [vmem:[%s13755_s5 + $0xa00] sm:$0xff]  ;;  %v9841_v29 = vld [vmem:[%s13755_s5 + $0x6e8] sm:$0xff] }
 0x3f5   :  { %2156 = vmatpush.msra.mxu0 %v1459_v22  ;;  %2176 = vmatpush.msra.mxu1 %v1507_v47  ;;  %v9836_v56 = vld [vmem:[%s13755_s5 + $0xb80] sm:$0xff]  ;;  %v9846_v22 = vld [vmem:[%s13755_s5 + $0x868] sm:$0xff] }
 0x3f6   :  { %2196 = vmatpush.msra.mxu2 %v1555_v38  ;;  %2216 = vmatpush.msra.mxu3 %v1603_v62  ;;  %v9853_v47 = vld [vmem:[%s13755_s5 + $0x9e8] sm:$0xff]  ;;  %v9865_v62 = vld [vmem:[%s13755_s5 + $0x6d0] sm:$0xff] }
 0x3f7   :  { %2157 = vmatpush.msra.mxu0 %v1456_v52  ;;  %2177 = vmatpush.msra.mxu1 %v1504_v9  ;;  %v9858_v38 = vld [vmem:[%s13755_s5 + $0xb68] sm:$0xff]  ;;  %v9870_v52 = vld [vmem:[%s13755_s5 + $0x850] sm:$0xff] }
 0x3f8   :  { %2197 = vmatpush.msra.mxu2 %v1552_v10  ;;  %2217 = vmatpush.msra.mxu3 %v1600_v54  ;;  %v9877_v9 = vld [vmem:[%s13755_s5 + $0x9d0] sm:$0xff]  ;;  %v9889_v54 = vld [vmem:[%s13755_s5 + $0x6b8] sm:$0xff] }
 0x3f9   :  { %2158 = vmatpush.msra.mxu0 %v1453_v39  ;;  %2178 = vmatpush.msra.mxu1 %v1501_v55  ;;  %v9882_v10 = vld [vmem:[%s13755_s5 + $0xb50] sm:$0xff]  ;;  %v9894_v39 = vld [vmem:[%s13755_s5 + $0x838] sm:$0xff] }
 0x3fa   :  { %2198 = vmatpush.msra.mxu2 %v1549_v25  ;;  %2218 = vmatpush.msra.mxu3 %v1597_v40  ;;  %v9901_v55 = vld [vmem:[%s13755_s5 + $0x9b8] sm:$0xff]  ;;  %v9913_v40 = vld [vmem:[%s13755_s5 + $0x6a0] sm:$0xff] }
 0x3fb   :  { %2159 = vmatpush.msra.mxu0 %v1450_v17  ;;  %2179 = vmatpush.msra.mxu1 %v1498_v5  ;;  %v9906_v25 = vld [vmem:[%s13755_s5 + $0xb38] sm:$0xff]  ;;  %v9918_v17 = vld [vmem:[%s13755_s5 + $0x820] sm:$0xff] }
 0x3fc   :  { %2199 = vmatpush.msra.mxu2 %v1546_v46  ;;  %2219 = vmatpush.msra.mxu3 %v1594_v16  ;;  %v9925_v5 = vld [vmem:[%s13755_s5 + $0x9a0] sm:$0xff]  ;;  %v9937_v16 = vld [vmem:[%s13755_s5 + $0x688] sm:$0xff] }
 0x3fd   :  { %2160 = vmatpush.msra.mxu0 %v1447_v63  ;;  %2180 = vmatpush.msra.mxu1 %v1495_v28  ;;  %v9930_v46 = vld [vmem:[%s13755_s5 + $0xb20] sm:$0xff]  ;;  %v9942_v63 = vld [vmem:[%s13755_s5 + $0x808] sm:$0xff] }
 0x3fe   :  { %2200 = vmatpush.msra.mxu2 %v1543_v44  ;;  %2220 = vmatpush.msra.mxu3 %v1591_v8  ;;  %v9949_v28 = vld [vmem:[%s13755_s5 + $0x988] sm:$0xff]  ;;  %v9961_v8 = vld [vmem:[%s13755_s5 + $0x670] sm:$0xff] }
 0x3ff   :  { %2161 = vmatpush.msra.mxu0 %v1444_v51  ;;  %2181 = vmatpush.msra.mxu1 %v1492_v30  ;;  %v9954_v44 = vld [vmem:[%s13755_s5 + $0xb08] sm:$0xff]  ;;  %v9966_v51 = vld [vmem:[%s13755_s5 + $0x7f0] sm:$0xff] }
 0x400   :  { %2201 = vmatpush.msra.mxu2 %v1540_v36  ;;  %2221 = vmatpush.msra.mxu3 %v1588_v2  ;;  %v9973_v30 = vld [vmem:[%s13755_s5 + $0x970] sm:$0xff]  ;;  %v9985_v2 = vld [vmem:[%s13755_s5 + $0x658] sm:$0xff] }
 0x401   :  { %2162 = vmatmul.f32.vlgmr.msra.gmra.mxu0 %v9138_v24  ;;  %2182 = vmatmul.f32.vlgmr.msra.gmra.mxu1 %v9140_v53  ;;  %v1726_v24 = vld [vmem:[%s13755_s5 + $0x8e0] sm:$0xff]  ;;  %v9978_v36 = vld [vmem:[%s13755_s5 + $0xaf0] sm:$0xff] }
 0x402   :  { %2202 = vmatmul.f32.vlgmr.msra.gmra.mxu2 %v9142_v13  ;;  %2222 = vmatmul.f32.vlgmr.msra.gmra.mxu3 %v9144_v4  ;;  %v1774_v53 = vld [vmem:[%s13755_s5 + $0xa60] sm:$0xff]  ;;  %v1675_v4 = vld [vmem:[%s13755_s5 + $0x748] sm:$0xff] }
 0x403   :  { %2226 = vmatpush.msrb.mxu0 %v1681_v50  ;;  %2246 = vmatpush.msrb.mxu1 %v1729_v48  ;;  %v1822_v13 = vld [vmem:[%s13755_s5 + $0xbe0] sm:$0xff]  ;;  %v9990_v50 = vld [vmem:[%s13755_s5 + $0x7d8] sm:$0xff] }
 0x404   :  { %2266 = vmatpush.msrb.mxu2 %v1777_v41  ;;  %2286 = vmatpush.msrb.mxu3 %v1825_v37  ;;  %v9997_v48 = vld [vmem:[%s13755_s5 + $0x958] sm:$0xff]  ;;  %v10009_v37 = vld [vmem:[%s13755_s5 + $0x640] sm:$0xff] }
 0x405   :  { %2227 = vmatpush.msrb.mxu0 %v1678_v27  ;;  %2247 = vmatpush.msrb.mxu1 %v1726_v24  ;;  %v10002_v41 = vld [vmem:[%s13755_s5 + $0xad8] sm:$0xff]  ;;  %v10014_v27 = vld [vmem:[%s13755_s5 + $0x7c0] sm:$0xff] }
 0x406   :  { %2267 = vmatpush.msrb.mxu2 %v1774_v53  ;;  %2287 = vmatpush.msrb.mxu3 %v1822_v13  ;;  %v10021_v24 = vld [vmem:[%s13755_s5 + $0x940] sm:$0xff]  ;;  %v10033_v13 = vld [vmem:[%s13755_s5 + $0x628] sm:$0xff] }
 0x407   :  { %2228 = vmatpush.msrb.mxu0 %v1675_v4  ;;  %2248 = vmatpush.msrb.mxu1 %v1723_v1  ;;  %v10026_v53 = vld [vmem:[%s13755_s5 + $0xac0] sm:$0xff]  ;;  %v10038_v4 = vld [vmem:[%s13755_s5 + $0x7a8] sm:$0xff] }
 0x408   :  { %2268 = vmatpush.msrb.mxu2 %v1771_v3  ;;  %2288 = vmatpush.msrb.mxu3 %v1819_v0  ;;  %v10045_v1 = vld [vmem:[%s13755_s5 + $0x928] sm:$0xff]  ;;  %v10057_v0 = vld [vmem:[%s13755_s5 + $0x610] sm:$0xff] }
 0x409   :  { %2229 = vmatpush.msrb.mxu0 %v1672_v59  ;;  %2249 = vmatpush.msrb.mxu1 %v1720_v34  ;;  %v10050_v3 = vld [vmem:[%s13755_s5 + $0xaa8] sm:$0xff]  ;;  %v10062_v59 = vld [vmem:[%s13755_s5 + $0x790] sm:$0xff] }
 0x40a   :  { %2269 = vmatpush.msrb.mxu2 %v1768_v58  ;;  %2289 = vmatpush.msrb.mxu3 %v1816_v35  ;;  %v10069_v34 = vld [vmem:[%s13755_s5 + $0x910] sm:$0xff]  ;;  %v6861_v35 = vld [vmem:[%s13755_s5 + $0x168] sm:$0xff] }
 0x40b   :  { %2230 = vmatpush.msrb.mxu0 %v1669_v7  ;;  %2250 = vmatpush.msrb.mxu1 %v1717_v26  ;;  %v10074_v58 = vld [vmem:[%s13755_s5 + $0xa90] sm:$0xff]  ;;  %v6862_v7 = vld [vmem:[%s13755_s5 + $0x2e8] sm:$0xff] }
 0x40c   :  { %2270 = vmatpush.msrb.mxu2 %v1765_v32  ;;  %2290 = vmatpush.msrb.mxu3 %v1813_v21  ;;  %v6867_v26 = vld [vmem:[%s13755_s5 + $0x450] sm:$0xff]  ;;  %v6869_v21 = vld [vmem:[%s13755_s5 + $0x138] sm:$0xff] }
 0x40d   :  { %2231 = vmatpush.msrb.mxu0 %v9821_v19  ;;  %2251 = vmatpush.msrb.mxu1 %v9826_v61  ;;  %v6868_v32 = vld [vmem:[%s13755_s5 + $0x5d0] sm:$0xff] }
 0x40e   :  { %2271 = vmatpush.msrb.mxu2 %v9831_v12  ;;  %2291 = vmatpush.msrb.mxu3 %v9836_v56 }
 0x40f   :  { %2232 = vmatpush.msrb.mxu0 %v9841_v29  ;;  %2252 = vmatpush.msrb.mxu1 %v9846_v22 }
 0x410   :  { %2272 = vmatpush.msrb.mxu2 %v9853_v47  ;;  %2292 = vmatpush.msrb.mxu3 %v9858_v38 }
 0x411   :  { %2233 = vmatpush.msrb.mxu0 %v9865_v62  ;;  %2253 = vmatpush.msrb.mxu1 %v9870_v52 }
 0x412   :  { %2273 = vmatpush.msrb.mxu2 %v9877_v9  ;;  %2293 = vmatpush.msrb.mxu3 %v9882_v10 }
 0x413   :  { %2234 = vmatpush.msrb.mxu0 %v9889_v54  ;;  %2254 = vmatpush.msrb.mxu1 %v9894_v39 }
 0x414   :  { %2274 = vmatpush.msrb.mxu2 %v9901_v55  ;;  %2294 = vmatpush.msrb.mxu3 %v9906_v25 }
 0x415   :  { %2235 = vmatpush.msrb.mxu0 %v9913_v40  ;;  %2255 = vmatpush.msrb.mxu1 %v9918_v17 }
 0x416   :  { %2275 = vmatpush.msrb.mxu2 %v9925_v5  ;;  %2295 = vmatpush.msrb.mxu3 %v9930_v46 }
 0x417   :  { %2236 = vmatpush.msrb.mxu0 %v9937_v16  ;;  %2256 = vmatpush.msrb.mxu1 %v9942_v63 }
 0x418   :  { %2276 = vmatpush.msrb.mxu2 %v9949_v28  ;;  %2296 = vmatpush.msrb.mxu3 %v9954_v44 }
 0x419   :  { %2237 = vmatpush.msrb.mxu0 %v9961_v8  ;;  %2257 = vmatpush.msrb.mxu1 %v9966_v51 }
 0x41a   :  { %2277 = vmatpush.msrb.mxu2 %v9973_v30  ;;  %2297 = vmatpush.msrb.mxu3 %v9978_v36 }
 0x41b   :  { %2238 = vmatpush.msrb.mxu0 %v9985_v2  ;;  %2258 = vmatpush.msrb.mxu1 %v9990_v50 }
 0x41c   :  { %2278 = vmatpush.msrb.mxu2 %v9997_v48  ;;  %2298 = vmatpush.msrb.mxu3 %v10002_v41 }
 0x41d   :  { %2239 = vmatpush.msrb.mxu0 %v10009_v37  ;;  %2259 = vmatpush.msrb.mxu1 %v10014_v27 }
 0x41e   :  { %2279 = vmatpush.msrb.mxu2 %v10021_v24  ;;  %2299 = vmatpush.msrb.mxu3 %v10026_v53 }
 0x41f   :  { %2240 = vmatpush.msrb.mxu0 %v10033_v13  ;;  %2260 = vmatpush.msrb.mxu1 %v10038_v4 }
 0x420   :  { %2280 = vmatpush.msrb.mxu2 %v10045_v1  ;;  %2300 = vmatpush.msrb.mxu3 %v10050_v3 }
 0x421   :  { %2241 = vmatpush.msrb.mxu0 %v10057_v0  ;;  %2261 = vmatpush.msrb.mxu1 %v10062_v59 }
 0x422   :  { %2281 = vmatpush.msrb.mxu2 %v10069_v34  ;;  %2301 = vmatpush.msrb.mxu3 %v10074_v58 }
 0x423   :  { %2242 = vmatmul.f32.vlgmr.msrb.gmra.mxu0 %v9206_v31  ;;  %2262 = vmatmul.f32.vlgmr.msrb.gmra.mxu1 %v9208_v57  ;;  %v6863_v31 = vld [vmem:[%s13755_s5 + $0x468] sm:$0xff] }
 0x424   :  { %2282 = vmatmul.f32.vlgmr.msrb.gmra.mxu2 %v9210_v15  ;;  %2302 = vmatmul.f32.vlgmr.msrb.gmra.mxu3 %v9212_v20  ;;  %v6864_v57 = vld [vmem:[%s13755_s5 + $0x5e8] sm:$0xff]  ;;  %v6865_v15 = vld [vmem:[%s13755_s5 + $0x150] sm:$0xff] }
 0x425   :  { %2306 = vmatpush.msra.mxu0 %v6861_v35  ;;  %2326 = vmatpush.msra.mxu1 %v6862_v7  ;;  %v6866_v20 = vld [vmem:[%s13755_s5 + $0x2d0] sm:$0xff]  ;;  %v6870_v35 = vld [vmem:[%s13755_s5 + $0x2b8] sm:$0xff] }
 0x426   :  { %2346 = vmatpush.msra.mxu2 %v6863_v31  ;;  %2366 = vmatpush.msra.mxu3 %v6864_v57  ;;  %v6871_v7 = vld [vmem:[%s13755_s5 + $0x438] sm:$0xff]  ;;  %v6873_v57 = vld [vmem:[%s13755_s5 + $0x120] sm:$0xff] }
 0x427   :  { %2307 = vmatpush.msra.mxu0 %v6865_v15  ;;  %2327 = vmatpush.msra.mxu1 %v6866_v20  ;;  %v6872_v31 = vld [vmem:[%s13755_s5 + $0x5b8] sm:$0xff]  ;;  %v6874_v15 = vld [vmem:[%s13755_s5 + $0x2a0] sm:$0xff] }
 0x428   :  { %2347 = vmatpush.msra.mxu2 %v6867_v26  ;;  %2367 = vmatpush.msra.mxu3 %v6868_v32  ;;  %v6875_v20 = vld [vmem:[%s13755_s5 + $0x420] sm:$0xff]  ;;  %v6877_v32 = vld [vmem:[%s13755_s5 + $0x108] sm:$0xff] }
 0x429   :  { %2308 = vmatpush.msra.mxu0 %v6869_v21  ;;  %2328 = vmatpush.msra.mxu1 %v6870_v35  ;;  %v6876_v26 = vld [vmem:[%s13755_s5 + $0x5a0] sm:$0xff]  ;;  %v6878_v21 = vld [vmem:[%s13755_s5 + $0x288] sm:$0xff] }
 0x42a   :  { %2348 = vmatpush.msra.mxu2 %v6871_v7  ;;  %2368 = vmatpush.msra.mxu3 %v6872_v31  ;;  %v6879_v35 = vld [vmem:[%s13755_s5 + $0x408] sm:$0xff]  ;;  %v6881_v31 = vld [vmem:[%s13755_s5 + $0xf0] sm:$0xff] }
 0x42b   :  { %2309 = vmatpush.msra.mxu0 %v6873_v57  ;;  %2329 = vmatpush.msra.mxu1 %v6874_v15  ;;  %v6880_v7 = vld [vmem:[%s13755_s5 + $0x588] sm:$0xff]  ;;  %v6882_v57 = vld [vmem:[%s13755_s5 + $0x270] sm:$0xff] }
 0x42c   :  { %2349 = vmatpush.msra.mxu2 %v6875_v20  ;;  %2369 = vmatpush.msra.mxu3 %v6876_v26  ;;  %v6883_v15 = vld [vmem:[%s13755_s5 + $0x3f0] sm:$0xff]  ;;  %v6885_v26 = vld [vmem:[%s13755_s5 + $0xd8] sm:$0xff] }
 0x42d   :  { %2310 = vmatpush.msra.mxu0 %v6877_v32  ;;  %2330 = vmatpush.msra.mxu1 %v6878_v21  ;;  %v6884_v20 = vld [vmem:[%s13755_s5 + $0x570] sm:$0xff]  ;;  %v6886_v32 = vld [vmem:[%s13755_s5 + $0x258] sm:$0xff] }
 0x42e   :  { %2350 = vmatpush.msra.mxu2 %v6879_v35  ;;  %2370 = vmatpush.msra.mxu3 %v6880_v7  ;;  %v6887_v21 = vld [vmem:[%s13755_s5 + $0x3d8] sm:$0xff]  ;;  %v6889_v7 = vld [vmem:[%s13755_s5 + $0xc0] sm:$0xff] }
 0x42f   :  { %2311 = vmatpush.msra.mxu0 %v6881_v31  ;;  %2331 = vmatpush.msra.mxu1 %v6882_v57  ;;  %v6888_v35 = vld [vmem:[%s13755_s5 + $0x558] sm:$0xff]  ;;  %v6890_v31 = vld [vmem:[%s13755_s5 + $0x240] sm:$0xff] }
 0x430   :  { %2351 = vmatpush.msra.mxu2 %v6883_v15  ;;  %2371 = vmatpush.msra.mxu3 %v6884_v20  ;;  %v6891_v57 = vld [vmem:[%s13755_s5 + $0x3c0] sm:$0xff]  ;;  %v6893_v20 = vld [vmem:[%s13755_s5 + $0xa8] sm:$0xff] }
 0x431   :  { %2312 = vmatpush.msra.mxu0 %v6885_v26  ;;  %2332 = vmatpush.msra.mxu1 %v6886_v32  ;;  %v6892_v15 = vld [vmem:[%s13755_s5 + $0x540] sm:$0xff]  ;;  %v6894_v26 = vld [vmem:[%s13755_s5 + $0x228] sm:$0xff] }
 0x432   :  { %2352 = vmatpush.msra.mxu2 %v6887_v21  ;;  %2372 = vmatpush.msra.mxu3 %v6888_v35  ;;  %v6895_v32 = vld [vmem:[%s13755_s5 + $0x3a8] sm:$0xff]  ;;  %v6897_v35 = vld [vmem:[%s13755_s5 + $0x90] sm:$0xff] }
 0x433   :  { %2313 = vmatpush.msra.mxu0 %v6889_v7  ;;  %2333 = vmatpush.msra.mxu1 %v6890_v31  ;;  %v6896_v21 = vld [vmem:[%s13755_s5 + $0x528] sm:$0xff]  ;;  %v6898_v7 = vld [vmem:[%s13755_s5 + $0x210] sm:$0xff]  ;;  %v1374_v31 = vmul.f32 %v9108_v14, %v8711_v60  ;;  %v6901_v60 = vld [vmem:[%s13755_s5 + $0x78] sm:$0xff] }
 0x434   :  { %2353 = vmatpush.msra.mxu2 %v6891_v57  ;;  %2373 = vmatpush.msra.mxu3 %v6892_v15  ;;  %v1375_v57 = vmul.f32 %v9108_v14, %v8715_v6  ;;  %v6899_v15 = vld [vmem:[%s13755_s5 + $0x390] sm:$0xff]  ;;  %v6902_v6 = vld [vmem:[%s13755_s5 + $0x1f8] sm:$0xff] }
 0x435   :  { %2314 = vmatpush.msra.mxu0 %v6893_v20  ;;  %2334 = vmatpush.msra.mxu1 %v6894_v26  ;;  %v6900_v20 = vld [vmem:[%s13755_s5 + $0x510] sm:$0xff]  ;;  %v1376_v26 = vmul.f32 %v9108_v14, %v8719_v45  ;;  %v6904_v45 = vld [vmem:[%s13755_s5 + $0x4f8] sm:$0xff] }
 0x436   :  { %2354 = vmatpush.msra.mxu2 %v6895_v32  ;;  %2374 = vmatpush.msra.mxu3 %v6896_v21  ;;  %v1377_v32 = vmul.f32 %v9108_v14, %v8726_v42  ;;  %v6903_v21 = vld [vmem:[%s13755_s5 + $0x378] sm:$0xff]  ;;  %v6905_v42 = vld [vmem:[%s13755_s5 + $0x60] sm:$0xff] }
 0x437   :  { %2315 = vmatpush.msra.mxu0 %v6897_v35  ;;  %2335 = vmatpush.msra.mxu1 %v6898_v7  ;;  %v6906_v35 = vld [vmem:[%s13755_s5 + $0x1e0] sm:$0xff]  ;;  %v1396_v7 = vmul.f32 %v9118_v43, %v1374_v31  ;;  %v6909_v31 = vld [vmem:[%s13755_s5 + $0x48] sm:$0xff] }
 0x438   :  { %2355 = vmatpush.msra.mxu2 %v6899_v15  ;;  %2375 = vmatpush.msra.mxu3 %v6900_v20  ;;  %v1397_v15 = vmul.f32 %v9118_v43, %v1375_v57  ;;  %v6907_v20 = vld [vmem:[%s13755_s5 + $0x360] sm:$0xff]  ;;  %v6910_v57 = vld [vmem:[%s13755_s5 + $0x1c8] sm:$0xff] }
 0x439   :  { %2316 = vmatpush.msra.mxu0 %v6901_v60  ;;  %2336 = vmatpush.msra.mxu1 %v6902_v6  ;;  %v6908_v60 = vld [vmem:[%s13755_s5 + $0x4e0] sm:$0xff]  ;;  %v1398_v6 = vmul.f32 %v9118_v43, %v1376_v26  ;;  %v6912_v26 = vld [vmem:[%s13755_s5 + $0x4c8] sm:$0xff] }
 0x43a   :  { %2356 = vmatpush.msra.mxu2 %v6903_v21  ;;  %2376 = vmatpush.msra.mxu3 %v6904_v45  ;;  %v1399_v21 = vmul.f32 %v9118_v43, %v1377_v32  ;;  %v6911_v45 = vld [vmem:[%s13755_s5 + $0x348] sm:$0xff]  ;;  %v6913_v32 = vld [vmem:[%s13755_s5 + $0x30] sm:$0xff] }
 0x43b   :  { %2317 = vmatpush.msra.mxu0 %v6905_v42  ;;  %2337 = vmatpush.msra.mxu1 %v6906_v35  ;;  %v6914_v42 = vld [vmem:[%s13755_s5 + $0x1b0] sm:$0xff]  ;;  %v1418_v35 = vadd.f32 %v9124_v33, %v1396_v7  ;;  %v6917_v7 = vld [vmem:[%s13755_s5 + $0x18] sm:$0xff] }
 0x43c   :  { %2357 = vmatpush.msra.mxu2 %v6907_v20  ;;  %2377 = vmatpush.msra.mxu3 %v6908_v60  ;;  %v1419_v20 = vadd.f32 %v9124_v33, %v1397_v15  ;;  %v6915_v60 = vld [vmem:[%s13755_s5 + $0x330] sm:$0xff]  ;;  %v6918_v15 = vld [vmem:[%s13755_s5 + $0x198] sm:$0xff] }
 0x43d   :  { %2318 = vmatpush.msra.mxu0 %v6909_v31  ;;  %2338 = vmatpush.msra.mxu1 %v6910_v57  ;;  %v6916_v31 = vld [vmem:[%s13755_s5 + $0x4b0] sm:$0xff]  ;;  %v1420_v57 = vadd.f32 %v9124_v33, %v1398_v6  ;;  %v6920_v6 = vld [vmem:[%s13755_s5 + $0x498] sm:$0xff] }
 0x43e   :  { %2358 = vmatpush.msra.mxu2 %v6911_v45  ;;  %2378 = vmatpush.msra.mxu3 %v6912_v26  ;;  %v1421_v45 = vadd.f32 %v9124_v33, %v1399_v21  ;;  %v6919_v26 = vld [vmem:[%s13755_s5 + $0x318] sm:$0xff]  ;;  %v6921_v21 = vld [vmem:[%s13755_s5] sm:$0xff] }
 0x43f   :  { %2319 = vmatpush.msra.mxu0 %v6913_v32  ;;  %2339 = vmatpush.msra.mxu1 %v6914_v42  ;;  %v6922_v32 = vld [vmem:[%s13755_s5 + $0x180] sm:$0xff]  ;;  %v10288_v42 = vmax.f32 %v1418_v35, 0.0  ;;  %v6925_v35 = vld [vmem:[%s13755_s5 + $0x768] sm:$0xff] }
 0x440   :  { %2359 = vmatpush.msra.mxu2 %v6915_v60  ;;  %2379 = vmatpush.msra.mxu3 %v6916_v31  ;;  %v10290_v60 = vmax.f32 %v1419_v20, 0.0  ;;  %v6923_v31 = vld [vmem:[%s13755_s5 + $0x300] sm:$0xff]  ;;  %v6926_v20 = vld [vmem:[%s13755_s5 + $0x8e8] sm:$0xff] }
 0x441   :  { %2320 = vmatpush.msra.mxu0 %v6917_v7  ;;  %2340 = vmatpush.msra.mxu1 %v6918_v15  ;;  %v6924_v7 = vld [vmem:[%s13755_s5 + $0x480] sm:$0xff]  ;;  %v10298_v15 = vmax.f32 %v1420_v57, 0.0  ;;  %v6927_v57 = vld [vmem:[%s13755_s5 + $0xa68] sm:$0xff] }
 0x442   :  { %2360 = vmatpush.msra.mxu2 %v6919_v26  ;;  %2380 = vmatpush.msra.mxu3 %v6920_v6  ;;  %v10300_v26 = vmax.f32 %v1421_v45, 0.0  ;;  %v6928_v45 = vld [vmem:[%s13755_s5 + $0xbe8] sm:$0xff]  ;;  %v6929_v6 = vld [vmem:[%s13755_s5 + $0x750] sm:$0xff] }
 0x443   :  { %2321 = vmatpush.msra.mxu0 %v6921_v21  ;;  %2341 = vmatpush.msra.mxu1 %v6922_v32  ;;  %v6930_v21 = vld [vmem:[%s13755_s5 + $0x8d0] sm:$0xff] }
 0x444   :  { %2361 = vmatpush.msra.mxu2 %v6923_v31  ;;  %2381 = vmatpush.msra.mxu3 %v6924_v7  ;;  %v6931_v32 = vld [vmem:[%s13755_s5 + $0xa50] sm:$0xff]  ;;  %v6933_v7 = vld [vmem:[%s13755_s5 + $0x738] sm:$0xff] }
 0x445   :  { %2322 = vmatmul.f32.vlgmr.msra.gmra.mxu0 %v10288_v42  ;;  %2342 = vmatmul.f32.vlgmr.msra.gmra.mxu1 %v10290_v60  ;;  %v6932_v31 = vld [vmem:[%s13755_s5 + $0xbd0] sm:$0xff] }
 0x446   :  { %2362 = vmatmul.f32.vlgmr.msra.gmra.mxu2 %v10298_v15  ;;  %2382 = vmatmul.f32.vlgmr.msra.gmra.mxu3 %v10300_v26 }
 0x447   :  { %2386 = vmatpush.msrb.mxu0 %v6925_v35  ;;  %2406 = vmatpush.msrb.mxu1 %v6926_v20  ;;  %v6934_v35 = vld [vmem:[%s13755_s5 + $0x8b8] sm:$0xff] }
 0x448   :  { %2426 = vmatpush.msrb.mxu2 %v6927_v57  ;;  %2446 = vmatpush.msrb.mxu3 %v6928_v45  ;;  %v6935_v20 = vld [vmem:[%s13755_s5 + $0xa38] sm:$0xff]  ;;  %v6937_v45 = vld [vmem:[%s13755_s5 + $0x720] sm:$0xff] }
 0x449   :  { %2387 = vmatpush.msrb.mxu0 %v6929_v6  ;;  %2407 = vmatpush.msrb.mxu1 %v6930_v21  ;;  %v6936_v57 = vld [vmem:[%s13755_s5 + $0xbb8] sm:$0xff]  ;;  %v6938_v6 = vld [vmem:[%s13755_s5 + $0x8a0] sm:$0xff] }
 0x44a   :  { %2427 = vmatpush.msrb.mxu2 %v6931_v32  ;;  %2447 = vmatpush.msrb.mxu3 %v6932_v31  ;;  %v6939_v21 = vld [vmem:[%s13755_s5 + $0xa20] sm:$0xff]  ;;  %v6941_v31 = vld [vmem:[%s13755_s5 + $0x708] sm:$0xff] }
 0x44b   :  { %2388 = vmatpush.msrb.mxu0 %v6933_v7  ;;  %2408 = vmatpush.msrb.mxu1 %v6934_v35  ;;  %v6940_v32 = vld [vmem:[%s13755_s5 + $0xba0] sm:$0xff]  ;;  %v6942_v7 = vld [vmem:[%s13755_s5 + $0x888] sm:$0xff] }
 0x44c   :  { %2428 = vmatpush.msrb.mxu2 %v6935_v20  ;;  %2448 = vmatpush.msrb.mxu3 %v6936_v57  ;;  %v6943_v35 = vld [vmem:[%s13755_s5 + $0xa08] sm:$0xff]  ;;  %v6945_v57 = vld [vmem:[%s13755_s5 + $0x6f0] sm:$0xff] }
 0x44d   :  { %2389 = vmatpush.msrb.mxu0 %v6937_v45  ;;  %2409 = vmatpush.msrb.mxu1 %v6938_v6  ;;  %v6944_v20 = vld [vmem:[%s13755_s5 + $0xb88] sm:$0xff]  ;;  %v6946_v45 = vld [vmem:[%s13755_s5 + $0x870] sm:$0xff] }
 0x44e   :  { %2429 = vmatpush.msrb.mxu2 %v6939_v21  ;;  %2449 = vmatpush.msrb.mxu3 %v6940_v32  ;;  %v6947_v6 = vld [vmem:[%s13755_s5 + $0x9f0] sm:$0xff]  ;;  %v6949_v32 = vld [vmem:[%s13755_s5 + $0x6d8] sm:$0xff] }
 0x44f   :  { %2390 = vmatpush.msrb.mxu0 %v6941_v31  ;;  %2410 = vmatpush.msrb.mxu1 %v6942_v7  ;;  %v6948_v21 = vld [vmem:[%s13755_s5 + $0xb70] sm:$0xff]  ;;  %v6950_v31 = vld [vmem:[%s13755_s5 + $0x858] sm:$0xff] }
 0x450   :  { %2430 = vmatpush.msrb.mxu2 %v6943_v35  ;;  %2450 = vmatpush.msrb.mxu3 %v6944_v20  ;;  %v6951_v7 = vld [vmem:[%s13755_s5 + $0x9d8] sm:$0xff]  ;;  %v6953_v20 = vld [vmem:[%s13755_s5 + $0x6c0] sm:$0xff] }
 0x451   :  { %2391 = vmatpush.msrb.mxu0 %v6945_v57  ;;  %2411 = vmatpush.msrb.mxu1 %v6946_v45  ;;  %v6952_v35 = vld [vmem:[%s13755_s5 + $0xb58] sm:$0xff]  ;;  %v6954_v57 = vld [vmem:[%s13755_s5 + $0x840] sm:$0xff] }
 0x452   :  { %2431 = vmatpush.msrb.mxu2 %v6947_v6  ;;  %2451 = vmatpush.msrb.mxu3 %v6948_v21  ;;  %v6955_v45 = vld [vmem:[%s13755_s5 + $0x9c0] sm:$0xff]  ;;  %v6957_v21 = vld [vmem:[%s13755_s5 + $0x6a8] sm:$0xff] }
 0x453   :  { %2392 = vmatpush.msrb.mxu0 %v6949_v32  ;;  %2412 = vmatpush.msrb.mxu1 %v6950_v31  ;;  %v6956_v6 = vld [vmem:[%s13755_s5 + $0xb40] sm:$0xff]  ;;  %v6958_v32 = vld [vmem:[%s13755_s5 + $0x828] sm:$0xff] }
 0x454   :  { %2432 = vmatpush.msrb.mxu2 %v6951_v7  ;;  %2452 = vmatpush.msrb.mxu3 %v6952_v35  ;;  %v6959_v31 = vld [vmem:[%s13755_s5 + $0x9a8] sm:$0xff]  ;;  %v6961_v35 = vld [vmem:[%s13755_s5 + $0x690] sm:$0xff] }
 0x455   :  { %2393 = vmatpush.msrb.mxu0 %v6953_v20  ;;  %2413 = vmatpush.msrb.mxu1 %v6954_v57  ;;  %v6960_v7 = vld [vmem:[%s13755_s5 + $0xb28] sm:$0xff]  ;;  %v6962_v20 = vld [vmem:[%s13755_s5 + $0x810] sm:$0xff]  ;;  %v1378_v57 = vmul.f32 %v9108_v14, %v8730_v18  ;;  %v6965_v18 = vld [vmem:[%s13755_s5 + $0x678] sm:$0xff] }
 0x456   :  { %2433 = vmatpush.msrb.mxu2 %v6955_v45  ;;  %2453 = vmatpush.msrb.mxu3 %v6956_v6  ;;  %v1379_v45 = vmul.f32 %v9108_v14, %v8738_v11  ;;  %v6963_v6 = vld [vmem:[%s13755_s5 + $0x990] sm:$0xff]  ;;  %v6966_v11 = vld [vmem:[%s13755_s5 + $0x7f8] sm:$0xff] }
 0x457   :  { %2394 = vmatpush.msrb.mxu0 %v6957_v21  ;;  %2414 = vmatpush.msrb.mxu1 %v6958_v32  ;;  %v6964_v21 = vld [vmem:[%s13755_s5 + $0xb10] sm:$0xff]  ;;  %v1380_v32 = vmul.f32 %v9108_v14, %v8757_v49  ;;  %v6968_v49 = vld [vmem:[%s13755_s5 + $0xaf8] sm:$0xff] }
 0x458   :  { %2434 = vmatpush.msrb.mxu2 %v6959_v31  ;;  %2454 = vmatpush.msrb.mxu3 %v6960_v7  ;;  %v1381_v31 = vmul.f32 %v9108_v14, %v8776_v23  ;;  %v6967_v7 = vld [vmem:[%s13755_s5 + $0x978] sm:$0xff]  ;;  %v6969_v23 = vld [vmem:[%s13755_s5 + $0x660] sm:$0xff] }
 0x459   :  { %2395 = vmatpush.msrb.mxu0 %v6961_v35  ;;  %2415 = vmatpush.msrb.mxu1 %v6962_v20  ;;  %v6970_v14 = vld [vmem:[%s13755_s5 + $0x7e0] sm:$0xff]  ;;  %v1400_v35 = vmul.f32 %v9118_v43, %v1378_v57  ;;  %v1401_v20 = vmul.f32 %v9118_v43, %v1379_v45  ;;  %v6973_v57 = vld [vmem:[%s13755_s5 + $0x648] sm:$0xff] }
 0x45a   :  { %2435 = vmatpush.msrb.mxu2 %v6963_v6  ;;  %2455 = vmatpush.msrb.mxu3 %v6964_v21  ;;  %v6971_v6 = vld [vmem:[%s13755_s5 + $0x960] sm:$0xff]  ;;  %v6974_v45 = vld [vmem:[%s13755_s5 + $0x7c8] sm:$0xff] }
 0x45b   :  { %2396 = vmatpush.msrb.mxu0 %v6965_v18  ;;  %2416 = vmatpush.msrb.mxu1 %v6966_v11  ;;  %v6972_v21 = vld [vmem:[%s13755_s5 + $0xae0] sm:$0xff]  ;;  %v1402_v18 = vmul.f32 %v9118_v43, %v1380_v32  ;;  %v1403_v11 = vmul.f32 %v9118_v43, %v1381_v31  ;;  %v6976_v32 = vld [vmem:[%s13755_s5 + $0xac8] sm:$0xff]  ;;  %v6977_v43 = vld [vmem:[%s13755_s5 + $0x630] sm:$0xff] }
 0x45c   :  { %2436 = vmatpush.msrb.mxu2 %v6967_v7  ;;  %2456 = vmatpush.msrb.mxu3 %v6968_v49  ;;  %v6975_v7 = vld [vmem:[%s13755_s5 + $0x948] sm:$0xff]  ;;  %v6978_v31 = vld [vmem:[%s13755_s5 + $0x7b0] sm:$0xff]  ;;  %v1422_v49 = vadd.f32 %v9124_v33, %v1400_v35  ;;  %v6981_v35 = vld [vmem:[%s13755_s5 + $0x618] sm:$0xff] }
 0x45d   :  { %2397 = vmatpush.msrb.mxu0 %v6969_v23  ;;  %2417 = vmatpush.msrb.mxu1 %v6970_v14  ;;  %v1423_v23 = vadd.f32 %v9124_v33, %v1401_v20  ;;  %v6979_v14 = vld [vmem:[%s13755_s5 + $0x930] sm:$0xff]  ;;  %v6982_v20 = vld [vmem:[%s13755_s5 + $0x798] sm:$0xff] }
 0x45e   :  { %2437 = vmatpush.msrb.mxu2 %v6971_v6  ;;  %2457 = vmatpush.msrb.mxu3 %v6972_v21  ;;  %v6980_v6 = vld [vmem:[%s13755_s5 + $0xab0] sm:$0xff]  ;;  %v1424_v21 = vadd.f32 %v9124_v33, %v1402_v18  ;;  %v6984_v18 = vld [vmem:[%s13755_s5 + $0xa98] sm:$0xff] }
 0x45f   :  { %2398 = vmatpush.msrb.mxu0 %v6973_v57  ;;  %2418 = vmatpush.msrb.mxu1 %v6974_v45  ;;  %v1425_v57 = vadd.f32 %v9124_v33, %v1403_v11  ;;  %v6983_v45 = vld [vmem:[%s13755_s5 + $0x918] sm:$0xff]  ;;  %v6985_v33 = vld [vmem:[%s13755_s5 + $0x600] sm:$0xff] }
 0x460   :  { %2438 = vmatpush.msrb.mxu2 %v6975_v7  ;;  %2458 = vmatpush.msrb.mxu3 %v6976_v32  ;;  %v6986_v11 = vld [vmem:[%s13755_s5 + $0x780] sm:$0xff]  ;;  %v10508_v7 = vmax.f32 %v1422_v49, 0.0  ;;  %v10510_v32 = vmax.f32 %v1423_v23, 0.0  ;;  %v6989_v49 = vld [vmem:[%s13755_s5 + $0x170] sm:$0xff] }
 0x461   :  { %2399 = vmatpush.msrb.mxu0 %v6977_v43  ;;  %2419 = vmatpush.msrb.mxu1 %v6978_v31  ;;  %v6987_v43 = vld [vmem:[%s13755_s5 + $0x900] sm:$0xff]  ;;  %v6990_v23 = vld [vmem:[%s13755_s5 + $0x2f0] sm:$0xff] }
 0x462   :  { %2439 = vmatpush.msrb.mxu2 %v6979_v14  ;;  %2459 = vmatpush.msrb.mxu3 %v6980_v6  ;;  %v6988_v31 = vld [vmem:[%s13755_s5 + $0xa80] sm:$0xff]  ;;  %v10518_v14 = vmax.f32 %v1424_v21, 0.0  ;;  %v10520_v6 = vmax.f32 %v1425_v57, 0.0  ;;  %v6991_v21 = vld [vmem:[%s13755_s5 + $0x470] sm:$0xff] }
 0x463   :  { %2400 = vmatpush.msrb.mxu0 %v6981_v35  ;;  %2420 = vmatpush.msrb.mxu1 %v6982_v20  ;;  %v6992_v57 = vld [vmem:[%s13755_s5 + $0x5f0] sm:$0xff]  ;;  %v6993_v35 = vld [vmem:[%s13755_s5 + $0x158] sm:$0xff] }
 0x464   :  { %2440 = vmatpush.msrb.mxu2 %v6983_v45  ;;  %2460 = vmatpush.msrb.mxu3 %v6984_v18  ;;  %v6994_v20 = vld [vmem:[%s13755_s5 + $0x2d8] sm:$0xff] }
 0x465   :  { %2401 = vmatpush.msrb.mxu0 %v6985_v33  ;;  %2421 = vmatpush.msrb.mxu1 %v6986_v11  ;;  %v6995_v45 = vld [vmem:[%s13755_s5 + $0x458] sm:$0xff]  ;;  %v6997_v33 = vld [vmem:[%s13755_s5 + $0x140] sm:$0xff] }
 0x466   :  { %2441 = vmatpush.msrb.mxu2 %v6987_v43  ;;  %2461 = vmatpush.msrb.mxu3 %v6988_v31  ;;  %v6996_v18 = vld [vmem:[%s13755_s5 + $0x5d8] sm:$0xff]  ;;  %v6998_v11 = vld [vmem:[%s13755_s5 + $0x2c0] sm:$0xff] }
 0x467   :  { %2402 = vmatmul.f32.vlgmr.msrb.gmra.mxu0 %v10508_v7  ;;  %2422 = vmatmul.f32.vlgmr.msrb.gmra.mxu1 %v10510_v32  ;;  %v6999_v43 = vld [vmem:[%s13755_s5 + $0x440] sm:$0xff] }
 0x468   :  { %2442 = vmatmul.f32.vlgmr.msrb.gmra.mxu2 %v10518_v14  ;;  %2462 = vmatmul.f32.vlgmr.msrb.gmra.mxu3 %v10520_v6  ;;  %v7000_v31 = vld [vmem:[%s13755_s5 + $0x5c0] sm:$0xff] }
 0x469   :  { %2466 = vmatpush.msra.mxu0 %v6989_v49  ;;  %2486 = vmatpush.msra.mxu1 %v6990_v23  ;;  %v7001_v49 = vld [vmem:[%s13755_s5 + $0x128] sm:$0xff] }
 0x46a   :  { %2506 = vmatpush.msra.mxu2 %v6991_v21  ;;  %2526 = vmatpush.msra.mxu3 %v6992_v57  ;;  %v7002_v23 = vld [vmem:[%s13755_s5 + $0x2a8] sm:$0xff] }
 0x46b   :  { %2467 = vmatpush.msra.mxu0 %v6993_v35  ;;  %2487 = vmatpush.msra.mxu1 %v6994_v20  ;;  %v7003_v21 = vld [vmem:[%s13755_s5 + $0x428] sm:$0xff]  ;;  %v7005_v35 = vld [vmem:[%s13755_s5 + $0x110] sm:$0xff] }
 0x46c   :  { %2507 = vmatpush.msra.mxu2 %v6995_v45  ;;  %2527 = vmatpush.msra.mxu3 %v6996_v18  ;;  %v7004_v57 = vld [vmem:[%s13755_s5 + $0x5a8] sm:$0xff]  ;;  %v7006_v20 = vld [vmem:[%s13755_s5 + $0x290] sm:$0xff] }
 0x46d   :  { %2468 = vmatpush.msra.mxu0 %v6997_v33  ;;  %2488 = vmatpush.msra.mxu1 %v6998_v11  ;;  %v7007_v45 = vld [vmem:[%s13755_s5 + $0x410] sm:$0xff]  ;;  %v7009_v33 = vld [vmem:[%s13755_s5 + $0xf8] sm:$0xff] }
 0x46e   :  { %2508 = vmatpush.msra.mxu2 %v6999_v43  ;;  %2528 = vmatpush.msra.mxu3 %v7000_v31  ;;  %v7008_v18 = vld [vmem:[%s13755_s5 + $0x590] sm:$0xff]  ;;  %v7010_v11 = vld [vmem:[%s13755_s5 + $0x278] sm:$0xff] }
 0x46f   :  { %2469 = vmatpush.msra.mxu0 %v7001_v49  ;;  %2489 = vmatpush.msra.mxu1 %v7002_v23  ;;  %v7011_v43 = vld [vmem:[%s13755_s5 + $0x3f8] sm:$0xff]  ;;  %v7013_v49 = vld [vmem:[%s13755_s5 + $0xe0] sm:$0xff] }
 0x470   :  { %2509 = vmatpush.msra.mxu2 %v7003_v21  ;;  %2529 = vmatpush.msra.mxu3 %v7004_v57  ;;  %v7012_v31 = vld [vmem:[%s13755_s5 + $0x578] sm:$0xff]  ;;  %v7014_v23 = vld [vmem:[%s13755_s5 + $0x260] sm:$0xff] }
 0x471   :  { %2470 = vmatpush.msra.mxu0 %v7005_v35  ;;  %2490 = vmatpush.msra.mxu1 %v7006_v20  ;;  %v7015_v21 = vld [vmem:[%s13755_s5 + $0x3e0] sm:$0xff]  ;;  %v7017_v35 = vld [vmem:[%s13755_s5 + $0xc8] sm:$0xff] }
 0x472   :  { %2510 = vmatpush.msra.mxu2 %v7007_v45  ;;  %2530 = vmatpush.msra.mxu3 %v7008_v18  ;;  %v7016_v57 = vld [vmem:[%s13755_s5 + $0x560] sm:$0xff]  ;;  %v7018_v20 = vld [vmem:[%s13755_s5 + $0x248] sm:$0xff] }
 0x473   :  { %2471 = vmatpush.msra.mxu0 %v7009_v33  ;;  %2491 = vmatpush.msra.mxu1 %v7010_v11  ;;  %v7019_v45 = vld [vmem:[%s13755_s5 + $0x3c8] sm:$0xff]  ;;  %v7021_v33 = vld [vmem:[%s13755_s5 + $0xb0] sm:$0xff] }
 0x474   :  { %2511 = vmatpush.msra.mxu2 %v7011_v43  ;;  %2531 = vmatpush.msra.mxu3 %v7012_v31  ;;  %v7020_v18 = vld [vmem:[%s13755_s5 + $0x548] sm:$0xff]  ;;  %v7022_v11 = vld [vmem:[%s13755_s5 + $0x230] sm:$0xff] }
 0x475   :  { %2472 = vmatpush.msra.mxu0 %v7013_v49  ;;  %2492 = vmatpush.msra.mxu1 %v7014_v23  ;;  %v7023_v43 = vld [vmem:[%s13755_s5 + $0x3b0] sm:$0xff]  ;;  %v7025_v49 = vld [vmem:[%s13755_s5 + $0x98] sm:$0xff] }
 0x476   :  { %2512 = vmatpush.msra.mxu2 %v7015_v21  ;;  %2532 = vmatpush.msra.mxu3 %v7016_v57  ;;  %v7024_v31 = vld [vmem:[%s13755_s5 + $0x530] sm:$0xff]  ;;  %v7026_v23 = vld [vmem:[%s13755_s5 + $0x218] sm:$0xff] }
 0x477   :  { %2473 = vmatpush.msra.mxu0 %v7017_v35  ;;  %2493 = vmatpush.msra.mxu1 %v7018_v20  ;;  %v7027_v21 = vld [vmem:[%s13755_s5 + $0x398] sm:$0xff]  ;;  %v7029_v35 = vld [vmem:[%s13755_s5 + $0x80] sm:$0xff] }
 0x478   :  { %2513 = vmatpush.msra.mxu2 %v7019_v45  ;;  %2533 = vmatpush.msra.mxu3 %v7020_v18  ;;  %v7028_v57 = vld [vmem:[%s13755_s5 + $0x518] sm:$0xff]  ;;  %v7030_v20 = vld [vmem:[%s13755_s5 + $0x200] sm:$0xff] }
 0x479   :  { %2474 = vmatpush.msra.mxu0 %v7021_v33  ;;  %2494 = vmatpush.msra.mxu1 %v7022_v11  ;;  %v7031_v45 = vld [vmem:[%s13755_s5 + $0x380] sm:$0xff]  ;;  %v7033_v33 = vld [vmem:[%s13755_s5 + $0x68] sm:$0xff] }
 0x47a   :  { %2514 = vmatpush.msra.mxu2 %v7023_v43  ;;  %2534 = vmatpush.msra.mxu3 %v7024_v31  ;;  %v7032_v18 = vld [vmem:[%s13755_s5 + $0x500] sm:$0xff]  ;;  %v7034_v11 = vld [vmem:[%s13755_s5 + $0x1e8] sm:$0xff] }
 0x47b   :  { %2475 = vmatpush.msra.mxu0 %v7025_v49  ;;  %2495 = vmatpush.msra.mxu1 %v7026_v23  ;;  %v7035_v43 = vld [vmem:[%s13755_s5 + $0x368] sm:$0xff]  ;;  %v7037_v49 = vld [vmem:[%s13755_s5 + $0x50] sm:$0xff] }
 0x47c   :  { %2515 = vmatpush.msra.mxu2 %v7027_v21  ;;  %2535 = vmatpush.msra.mxu3 %v7028_v57  ;;  %v7036_v31 = vld [vmem:[%s13755_s5 + $0x4e8] sm:$0xff]  ;;  %v7038_v23 = vld [vmem:[%s13755_s5 + $0x1d0] sm:$0xff] }
 0x47d   :  { %2476 = vmatpush.msra.mxu0 %v7029_v35  ;;  %2496 = vmatpush.msra.mxu1 %v7030_v20  ;;  %v7039_v21 = vld [vmem:[%s13755_s5 + $0x350] sm:$0xff]  ;;  %v7041_v35 = vld [vmem:[%s13755_s5 + $0x38] sm:$0xff] }
 0x47e   :  { %2516 = vmatpush.msra.mxu2 %v7031_v45  ;;  %2536 = vmatpush.msra.mxu3 %v7032_v18  ;;  %v7040_v57 = vld [vmem:[%s13755_s5 + $0x4d0] sm:$0xff]  ;;  %v7042_v20 = vld [vmem:[%s13755_s5 + $0x1b8] sm:$0xff] }
 0x47f   :  { %2477 = vmatpush.msra.mxu0 %v7033_v33  ;;  %2497 = vmatpush.msra.mxu1 %v7034_v11  ;;  %v7043_v45 = vld [vmem:[%s13755_s5 + $0x338] sm:$0xff]  ;;  %v7045_v33 = vld [vmem:[%s13755_s5 + $0x20] sm:$0xff] }
 0x480   :  { %2517 = vmatpush.msra.mxu2 %v7035_v43  ;;  %2537 = vmatpush.msra.mxu3 %v7036_v31  ;;  %v7044_v18 = vld [vmem:[%s13755_s5 + $0x4b8] sm:$0xff]  ;;  %v7046_v11 = vld [vmem:[%s13755_s5 + $0x1a0] sm:$0xff] }
 0x481   :  { %2478 = vmatpush.msra.mxu0 %v7037_v49  ;;  %2498 = vmatpush.msra.mxu1 %v7038_v23  ;;  %v7047_v43 = vld [vmem:[%s13755_s5 + $0x320] sm:$0xff]  ;;  %v7049_v49 = vld [vmem:[%s13755_s5 + $0x8] sm:$0xff] }
 0x482   :  { %2518 = vmatpush.msra.mxu2 %v7039_v21  ;;  %2538 = vmatpush.msra.mxu3 %v7040_v57  ;;  %v7048_v31 = vld [vmem:[%s13755_s5 + $0x4a0] sm:$0xff]  ;;  %v7050_v23 = vld [vmem:[%s13755_s5 + $0x188] sm:$0xff] }
 0x483   :  { %2479 = vmatpush.msra.mxu0 %v7041_v35  ;;  %2499 = vmatpush.msra.mxu1 %v7042_v20  ;;  %v7051_v21 = vld [vmem:[%s13755_s5 + $0x308] sm:$0xff]  ;;  %v7053_v35 = vld [vmem:[%s13755_s5 + $0x770] sm:$0xff] }
 0x484   :  { %2519 = vmatpush.msra.mxu2 %v7043_v45  ;;  %2539 = vmatpush.msra.mxu3 %v7044_v18  ;;  %v7052_v57 = vld [vmem:[%s13755_s5 + $0x488] sm:$0xff]  ;;  %v7054_v20 = vld [vmem:[%s13755_s5 + $0x8f0] sm:$0xff] }
 0x485   :  { %2480 = vmatpush.msra.mxu0 %v7045_v33  ;;  %2500 = vmatpush.msra.mxu1 %v7046_v11  ;;  %v7055_v45 = vld [vmem:[%s13755_s5 + $0xa70] sm:$0xff]  ;;  %v7057_v33 = vld [vmem:[%s13755_s5 + $0x758] sm:$0xff] }
 0x486   :  { %2520 = vmatpush.msra.mxu2 %v7047_v43  ;;  %2540 = vmatpush.msra.mxu3 %v7048_v31  ;;  %v7056_v18 = vld [vmem:[%s13755_s5 + $0xbf0] sm:$0xff]  ;;  %v7058_v11 = vld [vmem:[%s13755_s5 + $0x8d8] sm:$0xff] }
 0x487   :  { %2481 = vmatpush.msra.mxu0 %v7049_v49  ;;  %2501 = vmatpush.msra.mxu1 %v7050_v23  ;;  %v7059_v43 = vld [vmem:[%s13755_s5 + $0xa58] sm:$0xff]  ;;  %v7061_v49 = vld [vmem:[%s13755_s5 + $0x740] sm:$0xff] }
 0x488   :  { %2521 = vmatpush.msra.mxu2 %v7051_v21  ;;  %2541 = vmatpush.msra.mxu3 %v7052_v57  ;;  %v7060_v31 = vld [vmem:[%s13755_s5 + $0xbd8] sm:$0xff]  ;;  %v7062_v23 = vld [vmem:[%s13755_s5 + $0x8c0] sm:$0xff] }
 0x489   :  { %2482 = vmatmul.f32.vlgmr.msra.gmra.mxu0 %v10288_v42  ;;  %2502 = vmatmul.f32.vlgmr.msra.gmra.mxu1 %v10290_v60  ;;  %v7063_v21 = vld [vmem:[%s13755_s5 + $0xa40] sm:$0xff] }
 0x48a   :  { %2522 = vmatmul.f32.vlgmr.msra.gmra.mxu2 %v10298_v15  ;;  %2542 = vmatmul.f32.vlgmr.msra.gmra.mxu3 %v10300_v26  ;;  %v7064_v57 = vld [vmem:[%s13755_s5 + $0xbc0] sm:$0xff] }
 0x48b   :  { %2546 = vmatpush.msrb.mxu0 %v7053_v35  ;;  %2566 = vmatpush.msrb.mxu1 %v7054_v20  ;;  %v7065_v35 = vld [vmem:[%s13755_s5 + $0x728] sm:$0xff] }
 0x48c   :  { %2586 = vmatpush.msrb.mxu2 %v7055_v45  ;;  %2606 = vmatpush.msrb.mxu3 %v7056_v18  ;;  %v7066_v20 = vld [vmem:[%s13755_s5 + $0x8a8] sm:$0xff] }
 0x48d   :  { %2547 = vmatpush.msrb.mxu0 %v7057_v33  ;;  %2567 = vmatpush.msrb.mxu1 %v7058_v11  ;;  %v7067_v45 = vld [vmem:[%s13755_s5 + $0xa28] sm:$0xff]  ;;  %v7069_v33 = vld [vmem:[%s13755_s5 + $0x710] sm:$0xff] }
 0x48e   :  { %2587 = vmatpush.msrb.mxu2 %v7059_v43  ;;  %2607 = vmatpush.msrb.mxu3 %v7060_v31  ;;  %v7068_v18 = vld [vmem:[%s13755_s5 + $0xba8] sm:$0xff]  ;;  %v7070_v11 = vld [vmem:[%s13755_s5 + $0x890] sm:$0xff] }
 0x48f   :  { %2548 = vmatpush.msrb.mxu0 %v7061_v49  ;;  %2568 = vmatpush.msrb.mxu1 %v7062_v23  ;;  %v7071_v43 = vld [vmem:[%s13755_s5 + $0xa10] sm:$0xff]  ;;  %v7073_v49 = vld [vmem:[%s13755_s5 + $0x6f8] sm:$0xff] }
 0x490   :  { %2588 = vmatpush.msrb.mxu2 %v7063_v21  ;;  %2608 = vmatpush.msrb.mxu3 %v7064_v57  ;;  %v7072_v31 = vld [vmem:[%s13755_s5 + $0xb90] sm:$0xff]  ;;  %v7074_v23 = vld [vmem:[%s13755_s5 + $0x878] sm:$0xff] }
 0x491   :  { %2549 = vmatpush.msrb.mxu0 %v7065_v35  ;;  %2569 = vmatpush.msrb.mxu1 %v7066_v20  ;;  %v7075_v21 = vld [vmem:[%s13755_s5 + $0x9f8] sm:$0xff]  ;;  %v7077_v35 = vld [vmem:[%s13755_s5 + $0x6e0] sm:$0xff] }
 0x492   :  { %2589 = vmatpush.msrb.mxu2 %v7067_v45  ;;  %2609 = vmatpush.msrb.mxu3 %v7068_v18  ;;  %v7076_v57 = vld [vmem:[%s13755_s5 + $0xb78] sm:$0xff]  ;;  %v7078_v20 = vld [vmem:[%s13755_s5 + $0x860] sm:$0xff] }
 0x493   :  { %2550 = vmatpush.msrb.mxu0 %v7069_v33  ;;  %2570 = vmatpush.msrb.mxu1 %v7070_v11  ;;  %v7079_v45 = vld [vmem:[%s13755_s5 + $0x9e0] sm:$0xff]  ;;  %v7081_v33 = vld [vmem:[%s13755_s5 + $0x6c8] sm:$0xff] }
 0x494   :  { %2590 = vmatpush.msrb.mxu2 %v7071_v43  ;;  %2610 = vmatpush.msrb.mxu3 %v7072_v31  ;;  %v7080_v18 = vld [vmem:[%s13755_s5 + $0xb60] sm:$0xff]  ;;  %v7082_v11 = vld [vmem:[%s13755_s5 + $0x848] sm:$0xff] }
 0x495   :  { %2551 = vmatpush.msrb.mxu0 %v7073_v49  ;;  %2571 = vmatpush.msrb.mxu1 %v7074_v23  ;;  %v7083_v43 = vld [vmem:[%s13755_s5 + $0x9c8] sm:$0xff]  ;;  %v7085_v49 = vld [vmem:[%s13755_s5 + $0x6b0] sm:$0xff] }
 0x496   :  { %2591 = vmatpush.msrb.mxu2 %v7075_v21  ;;  %2611 = vmatpush.msrb.mxu3 %v7076_v57  ;;  %v7084_v31 = vld [vmem:[%s13755_s5 + $0xb48] sm:$0xff]  ;;  %v7086_v23 = vld [vmem:[%s13755_s5 + $0x830] sm:$0xff] }
 0x497   :  { %2552 = vmatpush.msrb.mxu0 %v7077_v35  ;;  %2572 = vmatpush.msrb.mxu1 %v7078_v20  ;;  %v7087_v21 = vld [vmem:[%s13755_s5 + $0x9b0] sm:$0xff]  ;;  %v7089_v35 = vld [vmem:[%s13755_s5 + $0x698] sm:$0xff] }
 0x498   :  { %2592 = vmatpush.msrb.mxu2 %v7079_v45  ;;  %2612 = vmatpush.msrb.mxu3 %v7080_v18  ;;  %v7088_v57 = vld [vmem:[%s13755_s5 + $0xb30] sm:$0xff]  ;;  %v7090_v20 = vld [vmem:[%s13755_s5 + $0x818] sm:$0xff] }
 0x499   :  { %2553 = vmatpush.msrb.mxu0 %v7081_v33  ;;  %2573 = vmatpush.msrb.mxu1 %v7082_v11  ;;  %v7091_v45 = vld [vmem:[%s13755_s5 + $0x998] sm:$0xff]  ;;  %v7093_v33 = vld [vmem:[%s13755_s5 + $0x680] sm:$0xff] }
 0x49a   :  { %2593 = vmatpush.msrb.mxu2 %v7083_v43  ;;  %2613 = vmatpush.msrb.mxu3 %v7084_v31  ;;  %v7092_v18 = vld [vmem:[%s13755_s5 + $0xb18] sm:$0xff]  ;;  %v7094_v11 = vld [vmem:[%s13755_s5 + $0x800] sm:$0xff] }
 0x49b   :  { %2554 = vmatpush.msrb.mxu0 %v7085_v49  ;;  %2574 = vmatpush.msrb.mxu1 %v7086_v23  ;;  %v7095_v43 = vld [vmem:[%s13755_s5 + $0x980] sm:$0xff]  ;;  %v7097_v49 = vld [vmem:[%s13755_s5 + $0x668] sm:$0xff] }
 0x49c   :  { %2594 = vmatpush.msrb.mxu2 %v7087_v21  ;;  %2614 = vmatpush.msrb.mxu3 %v7088_v57  ;;  %v7096_v31 = vld [vmem:[%s13755_s5 + $0xb00] sm:$0xff]  ;;  %v7098_v23 = vld [vmem:[%s13755_s5 + $0x7e8] sm:$0xff] }
 0x49d   :  { %2555 = vmatpush.msrb.mxu0 %v7089_v35  ;;  %2575 = vmatpush.msrb.mxu1 %v7090_v20  ;;  %v7099_v21 = vld [vmem:[%s13755_s5 + $0x968] sm:$0xff]  ;;  %v7101_v35 = vld [vmem:[%s13755_s5 + $0x650] sm:$0xff] }
 0x49e   :  { %2595 = vmatpush.msrb.mxu2 %v7091_v45  ;;  %2615 = vmatpush.msrb.mxu3 %v7092_v18  ;;  %v7100_v57 = vld [vmem:[%s13755_s5 + $0xae8] sm:$0xff]  ;;  %v7102_v20 = vld [vmem:[%s13755_s5 + $0x7d0] sm:$0xff] }
 0x49f   :  { %2556 = vmatpush.msrb.mxu0 %v7093_v33  ;;  %2576 = vmatpush.msrb.mxu1 %v7094_v11  ;;  %v7103_v45 = vld [vmem:[%s13755_s5 + $0x950] sm:$0xff]  ;;  %v7105_v33 = vld [vmem:[%s13755_s5 + $0x638] sm:$0xff] }
 0x4a0   :  { %2596 = vmatpush.msrb.mxu2 %v7095_v43  ;;  %2616 = vmatpush.msrb.mxu3 %v7096_v31  ;;  %v7104_v18 = vld [vmem:[%s13755_s5 + $0xad0] sm:$0xff]  ;;  %v7106_v11 = vld [vmem:[%s13755_s5 + $0x7b8] sm:$0xff] }
 0x4a1   :  { %2557 = vmatpush.msrb.mxu0 %v7097_v49  ;;  %2577 = vmatpush.msrb.mxu1 %v7098_v23  ;;  %v7107_v43 = vld [vmem:[%s13755_s5 + $0x938] sm:$0xff]  ;;  %v7109_v49 = vld [vmem:[%s13755_s5 + $0x620] sm:$0xff] }
 0x4a2   :  { %2597 = vmatpush.msrb.mxu2 %v7099_v21  ;;  %2617 = vmatpush.msrb.mxu3 %v7100_v57  ;;  %v7108_v31 = vld [vmem:[%s13755_s5 + $0xab8] sm:$0xff]  ;;  %v7110_v23 = vld [vmem:[%s13755_s5 + $0x7a0] sm:$0xff] }
 0x4a3   :  { %2558 = vmatpush.msrb.mxu0 %v7101_v35  ;;  %2578 = vmatpush.msrb.mxu1 %v7102_v20  ;;  %v7111_v21 = vld [vmem:[%s13755_s5 + $0x920] sm:$0xff]  ;;  %v10902_v35 = vpop.f32.mrf.mxu0  ;;  %v10904_v20 = vpop.f32.mrf.mxu1 }
 0x4a4   :  { %2598 = vmatpush.msrb.mxu2 %v7103_v45  ;;  %2618 = vmatpush.msrb.mxu3 %v7104_v18  ;;  %v7112_v57 = vld [vmem:[%s13755_s5 + $0xaa0] sm:$0xff]  ;;  %13950 = vst [vmem:[#allocation38_spill] sm:$0xff] %v10902_v35  ;;  %v7113_v45 = vld [vmem:[%s13755_s5 + $0x608] sm:$0xff] }
 0x4a5   :  { %2559 = vmatpush.msrb.mxu0 %v7105_v33  ;;  %2579 = vmatpush.msrb.mxu1 %v7106_v11  ;;  %13951 = vst [vmem:[#allocation41_spill] sm:$0xff] %v10904_v20  ;;  %v7114_v18 = vld [vmem:[%s13755_s5 + $0x788] sm:$0xff]  ;;  %v7169_v35 = vld [vmem:[%s13755_s5 + $0x40] sm:$0xff] }
 0x4a6   :  { %2599 = vmatpush.msrb.mxu2 %v7107_v43  ;;  %2619 = vmatpush.msrb.mxu3 %v7108_v31  ;;  %v7115_v33 = vld [vmem:[%s13755_s5 + $0x908] sm:$0xff]  ;;  %v10918_v43 = vpop.f32.mrf.mxu2  ;;  %v7117_v31 = vld [vmem:[%s13755_s5 + $0x178] sm:$0xff] }
 0x4a7   :  { %2560 = vmatpush.msrb.mxu0 %v7109_v49  ;;  %2580 = vmatpush.msrb.mxu1 %v7110_v23  ;;  %v7116_v11 = vld [vmem:[%s13755_s5 + $0xa88] sm:$0xff]  ;;  %13952 = vst [vmem:[#allocation27_spill] sm:$0xff] %v10918_v43  ;;  %v7118_v49 = vld [vmem:[%s13755_s5 + $0x2f8] sm:$0xff]  ;;  %v7162_v43 = vld [vmem:[%s13755_s5 + $0x1f0] sm:$0xff] }
 0x4a8   :  { %2600 = vmatpush.msrb.mxu2 %v7111_v21  ;;  %2620 = vmatpush.msrb.mxu3 %v7112_v57  ;;  %v7119_v23 = vld [vmem:[%s13755_s5 + $0x478] sm:$0xff]  ;;  %v7121_v57 = vld [vmem:[%s13755_s5 + $0x160] sm:$0xff] }
 0x4a9   :  { %2561 = vmatpush.msrb.mxu0 %v7113_v45  ;;  %2581 = vmatpush.msrb.mxu1 %v7114_v18  ;;  %v7120_v21 = vld [vmem:[%s13755_s5 + $0x5f8] sm:$0xff]  ;;  %v7122_v45 = vld [vmem:[%s13755_s5 + $0x2e0] sm:$0xff]  ;;  %v10942_v18 = vpop.f32.mrf.mxu3 }
 0x4aa   :  { %2601 = vmatpush.msrb.mxu2 %v7115_v33  ;;  %2621 = vmatpush.msrb.mxu3 %v7116_v11  ;;  %13953 = vst [vmem:[#allocation21_spill] sm:$0xff] %v10942_v18  ;;  %v7123_v33 = vld [vmem:[%s13755_s5 + $0x460] sm:$0xff] }
 0x4ab   :  { %2562 = vmatmul.f32.vlgmr.msrb.gmra.mxu0 %v10508_v7  ;;  %2582 = vmatmul.f32.vlgmr.msrb.gmra.mxu1 %v10510_v32  ;;  %v7124_v11 = vld [vmem:[%s13755_s5 + $0x5e0] sm:$0xff] }
 0x4ac   :  { %2602 = vmatmul.f32.vlgmr.msrb.gmra.mxu2 %v10518_v14  ;;  %2622 = vmatmul.f32.vlgmr.msrb.gmra.mxu3 %v10520_v6 }
 0x4ad   :  { %2626 = vmatpush.msra.mxu0 %v7117_v31  ;;  %2646 = vmatpush.msra.mxu1 %v7118_v49  ;;  %v7125_v31 = vld [vmem:[%s13755_s5 + $0x148] sm:$0xff] }
 0x4ae   :  { %2666 = vmatpush.msra.mxu2 %v7119_v23  ;;  %2686 = vmatpush.msra.mxu3 %v7120_v21  ;;  %v7126_v49 = vld [vmem:[%s13755_s5 + $0x2c8] sm:$0xff] }
 0x4af   :  { %2627 = vmatpush.msra.mxu0 %v7121_v57  ;;  %2647 = vmatpush.msra.mxu1 %v7122_v45  ;;  %v7127_v23 = vld [vmem:[%s13755_s5 + $0x448] sm:$0xff]  ;;  %v10962_v57 = vpop.f32.mrf.mxu0  ;;  %v10964_v45 = vpop.f32.mrf.mxu1 }
 0x4b0   :  { %2667 = vmatpush.msra.mxu2 %v7123_v33  ;;  %2687 = vmatpush.msra.mxu3 %v7124_v11  ;;  %v7128_v21 = vld [vmem:[%s13755_s5 + $0x5c8] sm:$0xff]  ;;  %13954 = vst [vmem:[#allocation37_spill] sm:$0xff] %v10962_v57  ;;  %v7129_v33 = vld [vmem:[%s13755_s5 + $0x130] sm:$0xff]  ;;  %v7153_v57 = vld [vmem:[%s13755_s5 + $0xa0] sm:$0xff] }
 0x4b1   :  { %2628 = vmatpush.msra.mxu0 %v7125_v31  ;;  %2648 = vmatpush.msra.mxu1 %v7126_v49  ;;  %13955 = vst [vmem:[#allocation24_spill] sm:$0xff] %v10964_v45  ;;  %v7130_v11 = vld [vmem:[%s13755_s5 + $0x2b0] sm:$0xff] }
 0x4b2   :  { %2668 = vmatpush.msra.mxu2 %v7127_v23  ;;  %2688 = vmatpush.msra.mxu3 %v7128_v21  ;;  %v7131_v31 = vld [vmem:[%s13755_s5 + $0x430] sm:$0xff]  ;;  %v10978_v23 = vpop.f32.mrf.mxu2  ;;  %v7133_v21 = vld [vmem:[%s13755_s5 + $0x118] sm:$0xff] }
 0x4b3   :  { %2629 = vmatpush.msra.mxu0 %v7129_v33  ;;  %2649 = vmatpush.msra.mxu1 %v7130_v11  ;;  %v7132_v49 = vld [vmem:[%s13755_s5 + $0x5b0] sm:$0xff]  ;;  %13956 = vst [vmem:[#allocation26_spill] sm:$0xff] %v10978_v23  ;;  %v7134_v33 = vld [vmem:[%s13755_s5 + $0x298] sm:$0xff] }
 0x4b4   :  { %2669 = vmatpush.msra.mxu2 %v7131_v31  ;;  %2689 = vmatpush.msra.mxu3 %v7132_v49  ;;  %v7135_v11 = vld [vmem:[%s13755_s5 + $0x418] sm:$0xff]  ;;  %v7137_v49 = vld [vmem:[%s13755_s5 + $0x100] sm:$0xff] }
 0x4b5   :  { %2630 = vmatpush.msra.mxu0 %v7133_v21  ;;  %2650 = vmatpush.msra.mxu1 %v7134_v33  ;;  %v7136_v31 = vld [vmem:[%s13755_s5 + $0x598] sm:$0xff]  ;;  %v7138_v21 = vld [vmem:[%s13755_s5 + $0x280] sm:$0xff] }
 0x4b6   :  { %2670 = vmatpush.msra.mxu2 %v7135_v11  ;;  %2690 = vmatpush.msra.mxu3 %v7136_v31  ;;  %v7139_v33 = vld [vmem:[%s13755_s5 + $0x400] sm:$0xff]  ;;  %v7141_v31 = vld [vmem:[%s13755_s5 + $0xe8] sm:$0xff] }
 0x4b7   :  { %2631 = vmatpush.msra.mxu0 %v7137_v49  ;;  %2651 = vmatpush.msra.mxu1 %v7138_v21  ;;  %v7140_v11 = vld [vmem:[%s13755_s5 + $0x580] sm:$0xff]  ;;  %v7142_v49 = vld [vmem:[%s13755_s5 + $0x268] sm:$0xff]  ;;  %v11010_v21 = vpop.f32.mrf.mxu3  ;;  %v11018_v23 = vpop.f32.mrf.mxu0 }
 0x4b8   :  { %2671 = vmatpush.msra.mxu2 %v7139_v33  ;;  %2691 = vmatpush.msra.mxu3 %v7140_v11  ;;  %13957 = vst [vmem:[#allocation51_spill] sm:$0xff] %v11010_v21  ;;  %v7143_v33 = vld [vmem:[%s13755_s5 + $0x3e8] sm:$0xff]  ;;  %v7146_v21 = vld [vmem:[%s13755_s5 + $0x250] sm:$0xff] }
 0x4b9   :  { %2632 = vmatpush.msra.mxu0 %v7141_v31  ;;  %2652 = vmatpush.msra.mxu1 %v7142_v49  ;;  %v7144_v11 = vld [vmem:[%s13755_s5 + $0x568] sm:$0xff]  ;;  %v11020_v31 = vpop.f32.mrf.mxu1  ;;  %v7145_v49 = vld [vmem:[%s13755_s5 + $0xd0] sm:$0xff] }
 0x4ba   :  { %2672 = vmatpush.msra.mxu2 %v7143_v33  ;;  %2692 = vmatpush.msra.mxu3 %v7144_v11  ;;  %v7147_v33 = vld [vmem:[%s13755_s5 + $0x3d0] sm:$0xff]  ;;  %v11034_v45 = vpop.f32.mrf.mxu2 }
 0x4bb   :  { %2633 = vmatpush.msra.mxu0 %v7145_v49  ;;  %2653 = vmatpush.msra.mxu1 %v7146_v21  ;;  %v7148_v11 = vld [vmem:[%s13755_s5 + $0x550] sm:$0xff]  ;;  %v7149_v49 = vld [vmem:[%s13755_s5 + $0xb8] sm:$0xff] }
 0x4bc   :  { %2673 = vmatpush.msra.mxu2 %v7147_v33  ;;  %2693 = vmatpush.msra.mxu3 %v7148_v11  ;;  %v7150_v21 = vld [vmem:[%s13755_s5 + $0x238] sm:$0xff] }
 0x4bd   :  { %2634 = vmatpush.msra.mxu0 %v7149_v49  ;;  %2654 = vmatpush.msra.mxu1 %v7150_v21  ;;  %v7151_v33 = vld [vmem:[%s13755_s5 + $0x3b8] sm:$0xff]  ;;  %v7154_v49 = vld [vmem:[%s13755_s5 + $0x220] sm:$0xff] }
 0x4be   :  { %2674 = vmatpush.msra.mxu2 %v7151_v33  ;;  %v7152_v11 = vld [vmem:[%s13755_s5 + $0x538] sm:$0xff]  ;;  %v7155_v21 = vld [vmem:[%s13755_s5 + $0x3a0] sm:$0xff] }
 0x4bf   :  { %2694 = vmatpush.msra.mxu3 %v7152_v11  ;;  %2635 = vmatpush.msra.mxu0 %v7153_v57  ;;  %v7156_v33 = vld [vmem:[%s13755_s5 + $0x520] sm:$0xff]  ;;  %v7157_v11 = vld [vmem:[%s13755_s5 + $0x88] sm:$0xff]  ;;  %v11074_v18 = vpop.f32.mrf.mxu0 }
 0x4c0   :  { %2655 = vmatpush.msra.mxu1 %v7154_v49  ;;  %2675 = vmatpush.msra.mxu2 %v7155_v21  ;;  %v7158_v57 = vld [vmem:[%s13755_s5 + $0x208] sm:$0xff]  ;;  %v11066_v49 = vpop.f32.mrf.mxu3 }
 0x4c1   :  { %2695 = vmatpush.msra.mxu3 %v7156_v33  ;;  %2636 = vmatpush.msra.mxu0 %v7157_v11  ;;  %v7159_v21 = vld [vmem:[%s13755_s5 + $0x388] sm:$0xff]  ;;  %v11076_v11 = vpop.f32.mrf.mxu1 }
 0x4c2   :  { %2656 = vmatpush.msra.mxu1 %v7158_v57  ;;  %2676 = vmatpush.msra.mxu2 %v7159_v21  ;;  %v7160_v33 = vld [vmem:[%s13755_s5 + $0x508] sm:$0xff]  ;;  %v7161_v57 = vld [vmem:[%s13755_s5 + $0x70] sm:$0xff]  ;;  %v11090_v20 = vpop.f32.mrf.mxu2 }
 0x4c3   :  { %2696 = vmatpush.msra.mxu3 %v7160_v33  ;;  %2637 = vmatpush.msra.mxu0 %v7161_v57  ;;  %v7163_v21 = vld [vmem:[%s13755_s5 + $0x370] sm:$0xff]  ;;  %13958 = vst [vmem:[#allocation40_spill] sm:$0xff] %v11090_v20  ;;  %v7165_v57 = vld [vmem:[%s13755_s5 + $0x58] sm:$0xff] }
 0x4c4   :  { %2657 = vmatpush.msra.mxu1 %v7162_v43  ;;  %2677 = vmatpush.msra.mxu2 %v7163_v21  ;;  %v7164_v33 = vld [vmem:[%s13755_s5 + $0x4f0] sm:$0xff]  ;;  %v7166_v43 = vld [vmem:[%s13755_s5 + $0x1d8] sm:$0xff] }
 0x4c5   :  { %2697 = vmatpush.msra.mxu3 %v7164_v33  ;;  %2638 = vmatpush.msra.mxu0 %v7165_v57  ;;  %v7167_v21 = vld [vmem:[%s13755_s5 + $0x358] sm:$0xff]  ;;  %v7170_v57 = vld [vmem:[%s13755_s5 + $0x1c0] sm:$0xff] }
 0x4c6   :  { %2658 = vmatpush.msra.mxu1 %v7166_v43  ;;  %2678 = vmatpush.msra.mxu2 %v7167_v21  ;;  %v7168_v33 = vld [vmem:[%s13755_s5 + $0x4d8] sm:$0xff]  ;;  %v7171_v43 = vld [vmem:[%s13755_s5 + $0x340] sm:$0xff] }
 0x4c7   :  { %2698 = vmatpush.msra.mxu3 %v7168_v33  ;;  %2639 = vmatpush.msra.mxu0 %v7169_v35  ;;  %v7172_v21 = vld [vmem:[%s13755_s5 + $0x4c0] sm:$0xff]  ;;  %v7173_v33 = vld [vmem:[%s13755_s5 + $0x28] sm:$0xff]  ;;  %v11130_v20 = vpop.f32.mrf.mxu0 }
 0x4c8   :  { %2659 = vmatpush.msra.mxu1 %v7170_v57  ;;  %2679 = vmatpush.msra.mxu2 %v7171_v43  ;;  %v7174_v35 = vld [vmem:[%s13755_s5 + $0x1a8] sm:$0xff]  ;;  %v11122_v57 = vpop.f32.mrf.mxu3 }
 0x4c9   :  { %2699 = vmatpush.msra.mxu3 %v7172_v21  ;;  %2640 = vmatpush.msra.mxu0 %v7173_v33  ;;  %13959 = vst [vmem:[#allocation33_spill] sm:$0xff] %v11122_v57  ;;  %v7175_v43 = vld [vmem:[%s13755_s5 + $0x328] sm:$0xff]  ;;  %v11132_v33 = vpop.f32.mrf.mxu1  ;;  %v7178_v57 = vld [vmem:[%s13755_s5 + $0x190] sm:$0xff] }
 0x4ca   :  { %2660 = vmatpush.msra.mxu1 %v7174_v35  ;;  %2680 = vmatpush.msra.mxu2 %v7175_v43  ;;  %v7176_v21 = vld [vmem:[%s13755_s5 + $0x4a8] sm:$0xff]  ;;  %13960 = vst [vmem:[#allocation5_spill] sm:$0xff] %v11132_v33  ;;  %v7177_v35 = vld [vmem:[%s13755_s5 + $0x10] sm:$0xff]  ;;  %v11146_v33 = vpop.f32.mrf.mxu2 }
 0x4cb   :  { %2700 = vmatpush.msra.mxu3 %v7176_v21  ;;  %2641 = vmatpush.msra.mxu0 %v7177_v35  ;;  %v7179_v43 = vld [vmem:[%s13755_s5 + $0x310] sm:$0xff]  ;;  %v7182_v35 = vld [vmem:[%s13755_s5 + $0x8f8] sm:$0xff] }
 0x4cc   :  { %2661 = vmatpush.msra.mxu1 %v7178_v57  ;;  %2681 = vmatpush.msra.mxu2 %v7179_v43  ;;  %v7180_v21 = vld [vmem:[%s13755_s5 + $0x490] sm:$0xff]  ;;  %v7181_v57 = vld [vmem:[%s13755_s5 + $0x778] sm:$0xff] }
 0x4cd   :  { %2701 = vmatpush.msra.mxu3 %v7180_v21  ;;  %2642 = vmatmul.f32.vlgmr.msra.gmra.mxu0 %v10288_v42  ;;  %v7183_v42 = vld [vmem:[%s13755_s5 + $0xa78] sm:$0xff]  ;;  %v7187_v21 = vld [vmem:[%s13755_s5 + $0xa60] sm:$0xff] }
 0x4ce   :  { %2662 = vmatmul.f32.vlgmr.msra.gmra.mxu1 %v10290_v60  ;;  %2682 = vmatmul.f32.vlgmr.msra.gmra.mxu2 %v10298_v15  ;;  %v7184_v60 = vld [vmem:[%s13755_s5 + $0xbf8] sm:$0xff]  ;;  %v7185_v15 = vld [vmem:[%s13755_s5 + $0x760] sm:$0xff] }
 0x4cf   :  { %2702 = vmatmul.f32.vlgmr.msra.gmra.mxu3 %v10300_v26  ;;  %2706 = vmatpush.msrb.mxu0 %v7181_v57  ;;  %v7186_v26 = vld [vmem:[%s13755_s5 + $0x8e0] sm:$0xff] }
 0x4d0   :  { %2726 = vmatpush.msrb.mxu1 %v7182_v35  ;;  %2746 = vmatpush.msrb.mxu2 %v7183_v42  ;;  %v11170_v43 = vpop.f32.mrf.mxu3  ;;  %v7188_v57 = vld [vmem:[%s13755_s5 + $0xbe0] sm:$0xff]  ;;  %v11178_v35 = vpop.f32.mrf.mxu0 }
 0x4d1   :  { %2766 = vmatpush.msrb.mxu3 %v7184_v60  ;;  %2707 = vmatpush.msrb.mxu0 %v7185_v15  ;;  %v11180_v42 = vpop.f32.mrf.mxu1  ;;  %v7189_v60 = vld [vmem:[%s13755_s5 + $0x748] sm:$0xff] }
 0x4d2   :  { %2727 = vmatpush.msrb.mxu1 %v7186_v26  ;;  %2747 = vmatpush.msrb.mxu2 %v7187_v21  ;;  %v7190_v15 = vld [vmem:[%s13755_s5 + $0x8c8] sm:$0xff] }
 0x4d3   :  { %2767 = vmatpush.msrb.mxu3 %v7188_v57  ;;  %2708 = vmatpush.msrb.mxu0 %v7189_v60  ;;  %v7191_v26 = vld [vmem:[%s13755_s5 + $0xa48] sm:$0xff]  ;;  %v11194_v57 = vpop.f32.mrf.mxu2  ;;  %v7193_v60 = vld [vmem:[%s13755_s5 + $0x730] sm:$0xff] }
 0x4d4   :  { %2728 = vmatpush.msrb.mxu1 %v7190_v15  ;;  %2748 = vmatpush.msrb.mxu2 %v7191_v26  ;;  %v7192_v21 = vld [vmem:[%s13755_s5 + $0xbc8] sm:$0xff]  ;;  %13961 = vst [vmem:[#allocation7_spill] sm:$0xff] %v11194_v57  ;;  %v7194_v15 = vld [vmem:[%s13755_s5 + $0x8b0] sm:$0xff]  ;;  %v7197_v57 = vld [vmem:[%s13755_s5 + $0x718] sm:$0xff] }
 0x4d5   :  { %2768 = vmatpush.msrb.mxu3 %v7192_v21  ;;  %2709 = vmatpush.msrb.mxu0 %v7193_v60  ;;  %v7195_v26 = vld [vmem:[%s13755_s5 + $0xa30] sm:$0xff]  ;;  %v7198_v60 = vld [vmem:[%s13755_s5 + $0x898] sm:$0xff] }
 0x4d6   :  { %2729 = vmatpush.msrb.mxu1 %v7194_v15  ;;  %2749 = vmatpush.msrb.mxu2 %v7195_v26  ;;  %v7196_v21 = vld [vmem:[%s13755_s5 + $0xbb0] sm:$0xff]  ;;  %v7199_v15 = vld [vmem:[%s13755_s5 + $0xa18] sm:$0xff] }
 0x4d7   :  { %2769 = vmatpush.msrb.mxu3 %v7196_v21  ;;  %2710 = vmatpush.msrb.mxu0 %v7197_v57  ;;  %v7200_v26 = vld [vmem:[%s13755_s5 + $0xb98] sm:$0xff]  ;;  %s7236_s5 = smov 112  }
 0x4d8   :  { %2730 = vmatpush.msrb.mxu1 %v7198_v60  ;;  %2750 = vmatpush.msrb.mxu2 %v7199_v15  ;;  %v11222_v57 = vpop.f32.mrf.mxu3  ;;  %v2323_v21 = vpop.f32.mrf.mxu0 }
 0x4d9   :  { %2770 = vmatpush.msrb.mxu3 %v7200_v26  ;;  %2711 = vmatpush.msrb.mxu0 %v9821_v19  ;;  %v2343_v60 = vpop.f32.mrf.mxu1 }
 0x4da   :  { %2731 = vmatpush.msrb.mxu1 %v9826_v61  ;;  %2751 = vmatpush.msrb.mxu2 %v9831_v12  ;;  %v2344_v19 = vadd.f32 %v2343_v60, %v2323_v21 }
 0x4db   :  { %2771 = vmatpush.msrb.mxu3 %v9836_v56  ;;  %2712 = vmatpush.msrb.mxu0 %v9841_v29  ;;  %v2363_v15 = vpop.f32.mrf.mxu2 }
 0x4dc   :  { %2732 = vmatpush.msrb.mxu1 %v9846_v22  ;;  %2752 = vmatpush.msrb.mxu2 %v9853_v47  ;;  %v2364_v61 = vadd.f32 %v2363_v15, %v2344_v19  ;;  %v2024_v22 = vadd.f32 %v11020_v31, %v11018_v23  ;;  %v13972_v15 = vld [vmem:[#allocation5_spill] sm:$0xff] }
 0x4dd   :  { %2772 = vmatpush.msrb.mxu3 %v9858_v38  ;;  %2713 = vmatpush.msrb.mxu0 %v9865_v62  ;;  %v2184_v19 = vadd.f32 %v13972_v15, %v11130_v20 }
 0x4de   :  { %2733 = vmatpush.msrb.mxu1 %v9870_v52  ;;  %2753 = vmatpush.msrb.mxu2 %v9877_v9  ;;  %v2044_v38 = vadd.f32 %v11034_v45, %v2024_v22  ;;  %v13971_v45 = vld [vmem:[#allocation51_spill] sm:$0xff] }
 0x4df   :  { %2773 = vmatpush.msrb.mxu3 %v9882_v10  ;;  %2714 = vmatpush.msrb.mxu0 %v9889_v54 }
 0x4e0   :  { %2734 = vmatpush.msrb.mxu1 %v9894_v39  ;;  %2754 = vmatpush.msrb.mxu2 %v9901_v55  ;;  %v2383_v12 = vpop.f32.mrf.mxu3  ;;  %v2064_v9 = vadd.f32 %v11066_v49, %v2044_v38 }
 0x4e1   :  { %2774 = vmatpush.msrb.mxu3 %v9906_v25  ;;  %2715 = vmatpush.msrb.mxu0 %v9913_v40  ;;  %v2384_v56 = vadd.f32 %v2383_v12, %v2364_v61 }
 0x4e2   :  { %2735 = vmatpush.msrb.mxu1 %v9918_v17  ;;  %2755 = vmatpush.msrb.mxu2 %v9925_v5  ;;  %v2084_v39 = vadd.f32 %v11074_v18, %v2064_v9  ;;  %v13962_v17 = vld [vmem:[#allocation40_spill] sm:$0xff] }
 0x4e3   :  { %2775 = vmatpush.msrb.mxu3 %v9930_v46  ;;  %2716 = vmatpush.msrb.mxu0 %v9937_v16  ;;  %v13963_v46 = vld [vmem:[#allocation33_spill] sm:$0xff] }
 0x4e4   :  { %2736 = vmatpush.msrb.mxu1 %v9942_v63  ;;  %2756 = vmatpush.msrb.mxu2 %v9949_v28  ;;  %v2403_v29 = vpop.f32.mrf.mxu0  ;;  %v2423_v62 = vpop.f32.mrf.mxu1  ;;  %v2104_v40 = vadd.f32 %v11076_v11, %v2084_v39 }
 0x4e5   :  { %2776 = vmatpush.msrb.mxu3 %v9954_v44  ;;  %2717 = vmatpush.msrb.mxu0 %v9961_v8  ;;  %v2404_v47 = vadd.f32 %v2403_v29, %v2384_v56  ;;  %v2204_v56 = vadd.f32 %v11146_v33, %v2184_v19 }
 0x4e6   :  { %2737 = vmatpush.msrb.mxu1 %v9966_v51  ;;  %2757 = vmatpush.msrb.mxu2 %v9973_v30  ;;  %v2124_v5 = vadd.f32 %v13962_v17, %v2104_v40  ;;  %v13964_v51 = vld [vmem:[#allocation38_spill] sm:$0xff]  ;;  %v13965_v30 = vld [vmem:[#allocation41_spill] sm:$0xff] }
 0x4e7   :  { %2777 = vmatpush.msrb.mxu3 %v9978_v36  ;;  %2718 = vmatpush.msrb.mxu0 %v9985_v2  ;;  %v2424_v52 = vadd.f32 %v2423_v62, %v2404_v47  ;;  %v1864_v36 = vadd.f32 %v13965_v30, %v13964_v51  ;;  %v2224_v47 = vadd.f32 %v11170_v43, %v2204_v56  ;;  %v13973_v43 = vld [vmem:[#allocation7_spill] sm:$0xff] }
 0x4e8   :  { %2738 = vmatpush.msrb.mxu1 %v9990_v50  ;;  %2758 = vmatpush.msrb.mxu2 %v9997_v48  ;;  %v11282_v16 = vadd.f32 %v13963_v46, %v2124_v5  ;;  %v13966_v50 = vld [vmem:[#allocation27_spill] sm:$0xff] }
 0x4e9   :  { %2778 = vmatpush.msrb.mxu3 %v10002_v41  ;;  %2719 = vmatpush.msrb.mxu0 %v10009_v37  ;;  %v1884_v48 = vadd.f32 %v13966_v50, %v1864_v36  ;;  %v11391_v17 = vld [vmem:[%s13756_s6 + $0x10] sm:$0xff] }
 0x4ea   :  { %2739 = vmatpush.msrb.mxu1 %v10014_v27  ;;  %2759 = vmatpush.msrb.mxu2 %v10021_v24  ;;  %v13967_v24 = vld [vmem:[#allocation21_spill] sm:$0xff] }
 0x4eb   :  { %2779 = vmatpush.msrb.mxu3 %v10026_v53  ;;  %2720 = vmatpush.msrb.mxu0 %v10033_v13  ;;  %v2443_v10 = vpop.f32.mrf.mxu2  ;;  %v2463_v55 = vpop.f32.mrf.mxu3  ;;  %v1904_v53 = vadd.f32 %v13967_v24, %v1884_v48 }
 0x4ec   :  { %2740 = vmatpush.msrb.mxu1 %v10038_v4  ;;  %2760 = vmatpush.msrb.mxu2 %v10045_v1  ;;  %v2444_v54 = vadd.f32 %v2443_v10, %v2424_v52  ;;  %v13968_v1 = vld [vmem:[#allocation37_spill] sm:$0xff]  ;;  %v2244_v52 = vadd.f32 %v11178_v35, %v2224_v47 }
 0x4ed   :  { %2780 = vmatpush.msrb.mxu3 %v10050_v3  ;;  %2721 = vmatpush.msrb.mxu0 %v10057_v0  ;;  %v1924_v3 = vadd.f32 %v13968_v1, %v1904_v53 }
 0x4ee   :  { %2741 = vmatpush.msrb.mxu1 %v10062_v59  ;;  %2761 = vmatpush.msrb.mxu2 %v10069_v34  ;;  %v11271_v25 = vadd.f32 %v2463_v55, %v2444_v54  ;;  %v2264_v33 = vadd.f32 %v11180_v42, %v2244_v52 }
 0x4ef   :  { %2781 = vmatpush.msrb.mxu3 %v10074_v58  ;;  %2722 = vmatmul.f32.vlgmr.msrb.gmra.mxu0 %v10508_v7  ;;  %v13969_v7 = vld [vmem:[#allocation24_spill] sm:$0xff] }
 0x4f0   :  { %2742 = vmatmul.f32.vlgmr.msrb.gmra.mxu1 %v10510_v32  ;;  %2762 = vmatmul.f32.vlgmr.msrb.gmra.mxu2 %v10518_v14  ;;  %v1944_v32 = vadd.f32 %v13969_v7, %v1924_v3  ;;  %v2284_v54 = vadd.f32 %v13973_v43, %v2264_v33  ;;  %v11487_v3 = vld [vmem:[%s13756_s6 + $0x30] sm:$0xff] }
 0x4f1   :  { %2782 = vmatmul.f32.vlgmr.msrb.gmra.mxu3 %v10520_v6  ;;  %2862 = vrot.lane.b32.xlu2 %v11271_v25, %s7228_s28  ;;  %v13970_v6 = vld [vmem:[#allocation26_spill] sm:$0xff] }
 0x4f2   :  { %v1964_v18 = vadd.f32 %v13970_v6, %v1944_v32  ;;  %v11350_v35 = vadd.f32 %v11222_v57, %v2284_v54 }
 0x4f4   :  { %v11300_v23 = vadd.f32 %v13971_v45, %v1964_v18  ;;  %v11519_v18 = vld [vmem:[%s13756_s6 + $0x40] sm:$0xff] }
 0x4f9   :  { %2796 = vrot.lane.b32.xlu2 %v11282_v16, %s7228_s28 }
 0x506   :  { %v2483_v63 = vpop.f32.mrf.mxu0  ;;  %v2503_v28 = vpop.f32.mrf.mxu1 }
 0x507   :  { %v2504_v8 = vadd.f32 %v2503_v28, %v2483_v63  ;;  %v11407_v63 = vld [vmem:[%s13756_s6 + $0x18] sm:$0xff] }
 0x50d   :  { %v2523_v44 = vpop.f32.mrf.mxu2  ;;  %v2543_v41 = vpop.f32.mrf.mxu3 }
 0x50e   :  { %v2524_v2 = vadd.f32 %v2523_v44, %v2504_v8  ;;  %v11425_v8 = vld [vmem:[%s13756_s6] sm:$0xff] }
 0x510   :  { %v2544_v37 = vadd.f32 %v2543_v41, %v2524_v2  ;;  %v11441_v2 = vld [vmem:[%s13756_s6 + $0x8] sm:$0xff] }
 0x528   :  { %v2563_v27 = vpop.f32.mrf.mxu0  ;;  %v2583_v4 = vpop.f32.mrf.mxu1 }
 0x529   :  { %v2564_v13 = vadd.f32 %v2563_v27, %v2544_v37  ;;  %v11457_v37 = vld [vmem:[%s13756_s6 + $0x20] sm:$0xff] }
 0x52b   :  { %v2584_v0 = vadd.f32 %v2583_v4, %v2564_v13  ;;  %v11473_v13 = vld [vmem:[%s13756_s6 + $0x28] sm:$0xff] }
 0x52f   :  { %v2603_v59 = vpop.f32.mrf.mxu2  ;;  %v2623_v58 = vpop.f32.mrf.mxu3 }
 0x530   :  { %v2604_v34 = vadd.f32 %v2603_v59, %v2584_v0 }
 0x532   :  { %v11292_v14 = vadd.f32 %v2623_v58, %v2604_v34  ;;  %v11503_v58 = vld [vmem:[%s13756_s6 + $0x38] sm:$0xff] }
 0x534   :  { %2864 = vrot.lane.b32.xlu0 %v11292_v14, %s7228_s28  ;;  %3095 = vrot.lane.b32.xlu2 %v11292_v14, %s7229_s29 }
 0x53c   :  { %3031 = vrot.lane.b32.xlu2 %v11282_v16, %s7229_s29  ;;  %2794 = vrot.lane.b32.xlu0 %v11300_v23, %s7228_s28 }
 0x544   :  { %3229 = vrot.lane.b32.xlu2 %v11292_v14, %s7236_s5  ;;  %3093 = vrot.lane.b32.xlu0 %v11271_v25, %s7229_s29 }
 0x54a   :  { %v2643_v31 = vpop.f32.mrf.mxu0 }
 0x54b   :  { %v2663_v49 = vpop.f32.mrf.mxu1  ;;  %v2863_v42 = vpop.permute.xlu2 %2862 }
 0x54c   :  { %3164 = vrot.lane.b32.xlu2 %v11282_v16, %s7236_s5  ;;  %3029 = vrot.lane.b32.xlu0 %v11300_v23, %s7229_s29  ;;  %v2664_v26 = vadd.f32 %v2663_v49, %v2643_v31 }
 0x551   :  { %v2683_v11 = vpop.f32.mrf.mxu2 }
 0x552   :  { %v2684_v21 = vadd.f32 %v2683_v11, %v2664_v26  ;;  %v2703_v60 = vpop.f32.mrf.mxu3  ;;  %v11542_v26 = vld [vmem:[%s13756_s6 + $0x48] sm:$0xff] }
 0x553   :  { %v11366_v57 = vpop.permute.xlu2 %2796 }
 0x554   :  { %3363 = vrot.lane.b32.xlu2 %v11292_v14, %s7237_s23  ;;  %3227 = vrot.lane.b32.xlu0 %v11271_v25, %s7236_s5  ;;  %v2704_v61 = vadd.f32 %v2703_v60, %v2684_v21 }
 0x55c   :  { %3298 = vrot.lane.b32.xlu2 %v11282_v16, %s7237_s23  ;;  %3162 = vrot.lane.b32.xlu0 %v11300_v23, %s7236_s5 }
 0x564   :  { %3497 = vrot.lane.b32.xlu2 %v11292_v14, %s7238_s24  ;;  %3361 = vrot.lane.b32.xlu0 %v11271_v25, %s7237_s23 }
 0x56c   :  { %v2723_v12 = vpop.f32.mrf.mxu0  ;;  %3432 = vrot.lane.b32.xlu2 %v11282_v16, %s7238_s24  ;;  %3296 = vrot.lane.b32.xlu0 %v11300_v23, %s7237_s23 }
 0x56d   :  { %v2724_v29 = vadd.f32 %v2723_v12, %v2704_v61  ;;  %v2743_v22 = vpop.f32.mrf.mxu1  ;;  %v11567_v61 = vld [vmem:[%s13756_s6 + $0x50] sm:$0xff] }
 0x56f   :  { %v2744_v38 = vadd.f32 %v2743_v22, %v2724_v29  ;;  %v11586_v22 = vld [vmem:[%s13756_s6 + $0x58] sm:$0xff] }
 0x573   :  { %v2763_v62 = vpop.f32.mrf.mxu2 }
 0x574   :  { %v2764_v9 = vadd.f32 %v2763_v62, %v2744_v38  ;;  %3630 = vrot.lane.b32.xlu2 %v11292_v14, %s7230_s30  ;;  %3495 = vrot.lane.b32.xlu0 %v11271_v25, %s7238_s24  ;;  %v2783_v20 = vpop.f32.mrf.mxu3 }
 0x576   :  { %v11339_v10 = vadd.f32 %v2783_v20, %v2764_v9  ;;  %v11607_v20 = vld [vmem:[%s13756_s6 + $0x60] sm:$0xff] }
 0x578   :  { %2866 = vrot.lane.b32.xlu1 %v11339_v10, %s7228_s28 }
 0x57c   :  { %3566 = vrot.lane.b32.xlu2 %v11282_v16, %s7230_s30  ;;  %3430 = vrot.lane.b32.xlu0 %v11300_v23, %s7238_s24 }
 0x580   :  { %2798 = vrot.lane.b32.xlu1 %v11350_v35, %s7228_s28 }
 0x584   :  { %3763 = vrot.lane.b32.xlu2 %v11292_v14, %s7231_s0  ;;  %3628 = vrot.lane.b32.xlu0 %v11271_v25, %s7230_s30 }
 0x588   :  { %3097 = vrot.lane.b32.xlu1 %v11339_v10, %s7229_s29 }
 0x58c   :  { %3699 = vrot.lane.b32.xlu2 %v11282_v16, %s7231_s0  ;;  %3564 = vrot.lane.b32.xlu0 %v11300_v23, %s7230_s30 }
 0x58e   :  { %v11374_v39 = vpop.permute.xlu2 %3095 }
 0x590   :  { %3033 = vrot.lane.b32.xlu1 %v11350_v35, %s7229_s29 }
 0x594   :  { %3896 = vrot.lane.b32.xlu2 %v11292_v14, %s7232_s17  ;;  %3761 = vrot.lane.b32.xlu0 %v11271_v25, %s7231_s0 }
 0x596   :  { %v11384_v55 = vpop.permute.xlu2 %3031 }
 0x598   :  { %3231 = vrot.lane.b32.xlu1 %v11339_v10, %s7236_s5 }
 0x59c   :  { %3832 = vrot.lane.b32.xlu2 %v11282_v16, %s7232_s17  ;;  %3697 = vrot.lane.b32.xlu0 %v11300_v23, %s7231_s0 }
 0x59e   :  { %v11411_v44 = vpop.permute.xlu2 %3229 }
 0x5a0   :  { %3166 = vrot.lane.b32.xlu1 %v11350_v35, %s7236_s5 }
 0x5a4   :  { %3894 = vrot.lane.b32.xlu0 %v11271_v25, %s7232_s17 }
 0x5a6   :  { %v11386_v40 = vpop.permute.xlu0 %2864  ;;  %v11436_v30 = vpop.permute.xlu2 %3164 }
 0x5a7   :  { %v2868_v5 = vsel %vm251_vm1, %v2863_v42, %v11386_v40  ;;  %v11628_v42 = vld [vmem:[%s13756_s6 + $0x68] sm:$0xff] }
 0x5a8   :  { %3365 = vrot.lane.b32.xlu1 %v11339_v10, %s7237_s23  ;;  %6233 = vmatpush.msk.msra.mxu2 %vm1230_vm8, %v2868_v5  ;;  %v11649_v5 = vld [vmem:[%s13756_s6 + $0x70] sm:$0xff] }
 0x5a9   :  { %6234 = vmatmul.msk.f32.vlgmr.msra.gmra.mxu2 %vm2802_vm12, %v11391_v17 }
 0x5aa   :  { %6245 = vmatpush.msk.msrb.mxu2 %vm1230_vm8, %v11271_v25 }
 0x5ac   :  { %3830 = vrot.lane.b32.xlu0 %v11300_v23, %s7232_s17 }
 0x5ae   :  { %v2795_v46 = vpop.permute.xlu0 %2794  ;;  %v11452_v48 = vpop.permute.xlu2 %3363 }
 0x5af   :  { %v2800_v28 = vsel %vm251_vm1, %v2795_v46, %v11366_v57 }
 0x5b0   :  { %3300 = vrot.lane.b32.xlu1 %v11350_v35, %s7237_s23  ;;  %6227 = vmatpush.msk.msra.mxu0 %vm1230_vm8, %v2800_v28 }
 0x5b1   :  { %6228 = vmatmul.msk.f32.vlgmr.msra.gmra.mxu0 %vm2802_vm12, %v11391_v17  ;;  %6235 = vmatmul.msk.f32.gmra.mxu2 %vm2802_vm12, %v11407_v63 }
 0x5b2   :  { %6239 = vmatpush.msk.msrb.mxu0 %vm1230_vm8, %v11300_v23 }
 0x5b6   :  { %v3094_v25 = vpop.permute.xlu0 %3093  ;;  %v11468_v24 = vpop.permute.xlu2 %3298 }
 0x5b7   :  { %v3099_v51 = vsel %vm379_vm2, %v3094_v25, %v11374_v39 }
 0x5b8   :  { %3499 = vrot.lane.b32.xlu1 %v11339_v10, %s7238_s24  ;;  %6259 = vmatpush.msk.msra.mxu2 %vm1230_vm8, %v3099_v51 }
 0x5b9   :  { %6229 = vmatmul.msk.f32.gmra.mxu0 %vm2802_vm12, %v11407_v63  ;;  %6246 = vmatmul.msk.f32.vlgmr.msrb.gmra.mxu2 %vm2802_vm12, %v11425_v8 }
 0x5be   :  { %v3030_v36 = vpop.permute.xlu0 %3029  ;;  %v11491_v59 = vpop.permute.xlu2 %3497 }
 0x5bf   :  { %v3035_v50 = vsel %vm379_vm2, %v3030_v36, %v11384_v55 }
 0x5c0   :  { %3434 = vrot.lane.b32.xlu1 %v11350_v35, %s7238_s24  ;;  %6253 = vmatpush.msk.msra.mxu0 %vm1230_vm8, %v3035_v50 }
 0x5c1   :  { %6240 = vmatmul.msk.f32.vlgmr.msrb.gmra.mxu0 %vm2802_vm12, %v11425_v8  ;;  %6247 = vmatmul.msk.f32.gmra.mxu2 %vm2802_vm12, %v11441_v2 }
 0x5c6   :  { %v3228_v41 = vpop.permute.xlu0 %3227  ;;  %v11514_v32 = vpop.permute.xlu2 %3432 }
 0x5c7   :  { %v3233_v27 = vsel %vm3168_vm13, %v3228_v41, %v11411_v44 }
 0x5c8   :  { %3632 = vrot.lane.b32.xlu1 %v11339_v10, %s7230_s30  ;;  %6273 = vmatpush.msk.msrb.mxu2 %vm1230_vm8, %v3233_v27  ;;  %v11709_v27 = vld [vmem:[%s13756_s6 + $0x88] sm:$0xff] }
 0x5c9   :  { %6241 = vmatmul.msk.f32.gmra.mxu0 %vm2802_vm12, %v11441_v2  ;;  %6260 = vmatmul.msk.f32.vlgmr.msra.gmra.mxu2 %vm2802_vm12, %v11457_v37 }
 0x5ce   :  { %v3163_v53 = vpop.permute.xlu0 %3162  ;;  %v11532_v49 = vpop.permute.xlu2 %3630 }
 0x5cf   :  { %v3169_v4 = vsel %vm3168_vm13, %v3163_v53, %v11436_v30 }
 0x5d0   :  { %3568 = vrot.lane.b32.xlu1 %v11350_v35, %s7230_s30  ;;  %6267 = vmatpush.msk.msrb.mxu0 %vm1230_vm8, %v3169_v4 }
 0x5d1   :  { %6254 = vmatmul.msk.f32.vlgmr.msra.gmra.mxu0 %vm2802_vm12, %v11457_v37  ;;  %6261 = vmatmul.msk.f32.gmra.mxu2 %vm2802_vm12, %v11473_v13 }
 0x5d6   :  { %v3362_v1 = vpop.permute.xlu0 %3361  ;;  %v11560_v15 = vpop.permute.xlu2 %3566 }
 0x5d7   :  { %v3367_v0 = vsel %vm3302_vm14, %v3362_v1, %v11452_v48 }
 0x5d8   :  { %3765 = vrot.lane.b32.xlu1 %v11339_v10, %s7231_s0  ;;  %6287 = vmatpush.msk.msra.mxu2 %vm1230_vm8, %v3367_v0 }
 0x5d9   :  { %6255 = vmatmul.msk.f32.gmra.mxu0 %vm2802_vm12, %v11473_v13  ;;  %6274 = vmatmul.msk.f32.vlgmr.msrb.gmra.mxu2 %vm2802_vm12, %v11487_v3 }
 0x5de   :  { %v3297_v34 = vpop.permute.xlu0 %3296  ;;  %v11590_v38 = vpop.permute.xlu2 %3763 }
 0x5df   :  { %v3303_v7 = vsel %vm3302_vm14, %v3297_v34, %v11468_v24 }
 0x5e0   :  { %3701 = vrot.lane.b32.xlu1 %v11350_v35, %s7231_s0  ;;  %6281 = vmatpush.msk.msra.mxu0 %vm1230_vm8, %v3303_v7 }
 0x5e1   :  { %6268 = vmatmul.msk.f32.vlgmr.msrb.gmra.mxu0 %vm2802_vm12, %v11487_v3  ;;  %6275 = vmatmul.msk.f32.gmra.mxu2 %vm2802_vm12, %v11503_v58 }
 0x5e6   :  { %v3496_v6 = vpop.permute.xlu0 %3495  ;;  %v11616_v33 = vpop.permute.xlu2 %3699 }
 0x5e7   :  { %v3501_v45 = vsel %vm3436_vm15, %v3496_v6, %v11491_v59 }
 0x5e8   :  { %3898 = vrot.lane.b32.xlu1 %v11339_v10, %s7232_s17  ;;  %6301 = vmatpush.msk.msrb.mxu2 %vm1230_vm8, %v3501_v45 }
 0x5e9   :  { %6269 = vmatmul.msk.f32.gmra.mxu0 %vm2802_vm12, %v11503_v58  ;;  %6288 = vmatmul.msk.f32.vlgmr.msra.gmra.mxu2 %vm2802_vm12, %v11519_v18 }
 0x5ea   :  { %v2867_v23 = vpop.permute.xlu1 %2866 }
 0x5eb   :  { %v2869_v31 = vsel %vm251_vm1, %v11386_v40, %v2867_v23 }
 0x5ec   :  { %6236 = vmatpush.msk.msra.mxu3 %vm1230_vm8, %v2869_v31 }
 0x5ed   :  { %6237 = vmatmul.msk.f32.vlgmr.msra.gmra.mxu3 %vm2802_vm12, %v11391_v17 }
 0x5ee   :  { %6248 = vmatpush.msk.msrb.mxu3 %vm1230_vm8, %v11292_v14  ;;  %v3431_v11 = vpop.permute.xlu0 %3430  ;;  %v11639_v40 = vpop.permute.xlu2 %3896 }
 0x5ef   :  { %v3437_v21 = vsel %vm3436_vm15, %v3431_v11, %v11514_v32 }
 0x5f0   :  { %3834 = vrot.lane.b32.xlu1 %v11350_v35, %s7232_s17  ;;  %6295 = vmatpush.msk.msrb.mxu0 %vm1230_vm8, %v3437_v21 }
 0x5f1   :  { %6282 = vmatmul.msk.f32.vlgmr.msra.gmra.mxu0 %vm2802_vm12, %v11519_v18  ;;  %6289 = vmatmul.msk.f32.gmra.mxu2 %vm2802_vm12, %v11542_v26 }
 0x5f2   :  { %v2799_v14 = vpop.permute.xlu1 %2798 }
 0x5f3   :  { %v2801_v60 = vsel %vm251_vm1, %v11366_v57, %v2799_v14 }
 0x5f4   :  { %6230 = vmatpush.msk.msra.mxu1 %vm1230_vm8, %v2801_v60 }
 0x5f5   :  { %6231 = vmatmul.msk.f32.vlgmr.msra.gmra.mxu1 %vm2802_vm12, %v11391_v17  ;;  %6238 = vmatmul.msk.f32.gmra.mxu3 %vm2802_vm12, %v11407_v63 }
 0x5f6   :  { %6242 = vmatpush.msk.msrb.mxu1 %vm1230_vm8, %v11282_v16  ;;  %v3629_v19 = vpop.permute.xlu0 %3628 }
 0x5f7   :  { %v3634_v12 = vsel %vm507_vm3, %v3629_v19, %v11532_v49 }
 0x5f8   :  { %6315 = vmatpush.msk.msra.mxu2 %vm1230_vm8, %v3634_v12 }
 0x5f9   :  { %6283 = vmatmul.msk.f32.gmra.mxu0 %vm2802_vm12, %v11542_v26  ;;  %6302 = vmatmul.msk.f32.vlgmr.msrb.gmra.mxu2 %vm2802_vm12, %v11567_v61 }
 0x5fa   :  { %v3098_v56 = vpop.permute.xlu1 %3097 }
 0x5fb   :  { %v3100_v16 = vsel %vm379_vm2, %v11374_v39, %v3098_v56 }
 0x5fc   :  { %6262 = vmatpush.msk.msra.mxu3 %vm1230_vm8, %v3100_v16 }
 0x5fd   :  { %6232 = vmatmul.msk.f32.gmra.mxu1 %vm2802_vm12, %v11407_v63  ;;  %6249 = vmatmul.msk.f32.vlgmr.msrb.gmra.mxu3 %vm2802_vm12, %v11425_v8 }
 0x5fe   :  { %v3565_v29 = vpop.permute.xlu0 %3564 }
 0x5ff   :  { %v3570_v47 = vsel %vm507_vm3, %v3565_v29, %v11560_v15 }
 0x600   :  { %6309 = vmatpush.msk.msra.mxu0 %vm1230_vm8, %v3570_v47 }
 0x601   :  { %6296 = vmatmul.msk.f32.vlgmr.msrb.gmra.mxu0 %vm2802_vm12, %v11567_v61  ;;  %6303 = vmatmul.msk.f32.gmra.mxu2 %vm2802_vm12, %v11586_v22 }
 0x602   :  { %v3034_v62 = vpop.permute.xlu1 %3033 }
 0x603   :  { %v3036_v52 = vsel %vm379_vm2, %v11384_v55, %v3034_v62 }
 0x604   :  { %6256 = vmatpush.msk.msra.mxu1 %vm1230_vm8, %v3036_v52 }
 0x605   :  { %6243 = vmatmul.msk.f32.vlgmr.msrb.gmra.mxu1 %vm2802_vm12, %v11425_v8  ;;  %6250 = vmatmul.msk.f32.gmra.mxu3 %vm2802_vm12, %v11441_v2  ;;  %v11670_v8 = vld [vmem:[%s13756_s6 + $0x78] sm:$0xff] }
 0x606   :  { %v3762_v9 = vpop.permute.xlu0 %3761 }
 0x607   :  { %v3767_v10 = vsel %vm635_vm4, %v3762_v9, %v11590_v38 }
 0x608   :  { %6329 = vmatpush.msk.msrb.mxu2 %vm1230_vm8, %v3767_v10 }
 0x609   :  { %6297 = vmatmul.msk.f32.gmra.mxu0 %vm2802_vm12, %v11586_v22  ;;  %6316 = vmatmul.msk.f32.vlgmr.msra.gmra.mxu2 %vm2802_vm12, %v11607_v20 }
 0x60a   :  { %v3232_v43 = vpop.permute.xlu1 %3231 }
 0x60b   :  { %v3234_v54 = vsel %vm3168_vm13, %v11411_v44, %v3232_v43  ;;  %v11665_v44 = vpop.permute.xlu2 %3832 }
 0x60c   :  { %6276 = vmatpush.msk.msrb.mxu3 %vm1230_vm8, %v3234_v54 }
 0x60d   :  { %6244 = vmatmul.msk.f32.gmra.mxu1 %vm2802_vm12, %v11441_v2  ;;  %6263 = vmatmul.msk.f32.vlgmr.msra.gmra.mxu3 %vm2802_vm12, %v11457_v37  ;;  %v11689_v2 = vld [vmem:[%s13756_s6 + $0x80] sm:$0xff] }
 0x60e   :  { %v3698_v35 = vpop.permute.xlu0 %3697 }
 0x60f   :  { %v3703_v57 = vsel %vm635_vm4, %v3698_v35, %v11616_v33 }
 0x610   :  { %6323 = vmatpush.msk.msrb.mxu0 %vm1230_vm8, %v3703_v57 }
 0x611   :  { %6310 = vmatmul.msk.f32.vlgmr.msra.gmra.mxu0 %vm2802_vm12, %v11607_v20  ;;  %6317 = vmatmul.msk.f32.gmra.mxu2 %vm2802_vm12, %v11628_v42 }
 0x612   :  { %v3167_v39 = vpop.permute.xlu1 %3166 }
 0x613   :  { %v3170_v55 = vsel %vm3168_vm13, %v11436_v30, %v3167_v39 }
 0x614   :  { %6270 = vmatpush.msk.msrb.mxu1 %vm1230_vm8, %v3170_v55 }
 0x615   :  { %6257 = vmatmul.msk.f32.vlgmr.msra.gmra.mxu1 %vm2802_vm12, %v11457_v37  ;;  %6264 = vmatmul.msk.f32.gmra.mxu3 %vm2802_vm12, %v11473_v13 }
 0x616   :  { %v3895_v17 = vpop.permute.xlu0 %3894 }
 0x617   :  { %v3900_v46 = vsel %vm763_vm5, %v3895_v17, %v11639_v40 }
 0x618   :  { %6343 = vmatpush.msk.msra.mxu2 %vm1230_vm8, %v3900_v46 }
 0x619   :  { %6311 = vmatmul.msk.f32.gmra.mxu0 %vm2802_vm12, %v11628_v42  ;;  %6330 = vmatmul.msk.f32.vlgmr.msrb.gmra.mxu2 %vm2802_vm12, %v11649_v5 }
 0x61a   :  { %v3366_v63 = vpop.permute.xlu1 %3365 }
 0x61b   :  { %v3368_v28 = vsel %vm3302_vm14, %v11452_v48, %v3366_v63 }
 0x61c   :  { %6290 = vmatpush.msk.msra.mxu3 %vm1230_vm8, %v3368_v28 }
 0x61d   :  { %6258 = vmatmul.msk.f32.gmra.mxu1 %vm2802_vm12, %v11473_v13  ;;  %6277 = vmatmul.msk.f32.vlgmr.msrb.gmra.mxu3 %vm2802_vm12, %v11487_v3 }
 0x61e   :  { %v3831_v25 = vpop.permute.xlu0 %3830 }
 0x61f   :  { %v3836_v51 = vsel %vm763_vm5, %v3831_v25, %v11665_v44 }
 0x620   :  { %6337 = vmatpush.msk.msra.mxu0 %vm1230_vm8, %v3836_v51 }
 0x621   :  { %6324 = vmatmul.msk.f32.vlgmr.msrb.gmra.mxu0 %vm2802_vm12, %v11649_v5  ;;  %6331 = vmatmul.msk.f32.gmra.mxu2 %vm2802_vm12, %v11670_v8 }
 0x622   :  { %v3301_v30 = vpop.permute.xlu1 %3300 }
 0x623   :  { %v3304_v36 = vsel %vm3302_vm14, %v11468_v24, %v3301_v30 }
 0x624   :  { %6284 = vmatpush.msk.msra.mxu1 %vm1230_vm8, %v3304_v36 }
 0x625   :  { %6271 = vmatmul.msk.f32.vlgmr.msrb.gmra.mxu1 %vm2802_vm12, %v11487_v3  ;;  %6278 = vmatmul.msk.f32.gmra.mxu3 %vm2802_vm12, %v11503_v58 }
 0x629   :  { %6325 = vmatmul.msk.f32.gmra.mxu0 %vm2802_vm12, %v11670_v8  ;;  %6344 = vmatmul.msk.f32.vlgmr.msra.gmra.mxu2 %vm2802_vm12, %v11689_v2 }
 0x62a   :  { %v3500_v50 = vpop.permute.xlu1 %3499 }
 0x62b   :  { %v3502_v48 = vsel %vm3436_vm15, %v11491_v59, %v3500_v50 }
 0x62c   :  { %6304 = vmatpush.msk.msrb.mxu3 %vm1230_vm8, %v3502_v48  ;;  %v11698_v41 = vpop.f32.mrf.mxu2 }
 0x62d   :  { %6272 = vmatmul.msk.f32.gmra.mxu1 %vm2802_vm12, %v11503_v58  ;;  %6291 = vmatmul.msk.f32.vlgmr.msra.gmra.mxu3 %vm2802_vm12, %v11519_v18 }
 0x62e   :  { %v11704_v37 = vpop.f32.mrf.mxu0 }
 0x631   :  { %6338 = vmatmul.msk.f32.vlgmr.msra.gmra.mxu0 %vm2802_vm12, %v11689_v2  ;;  %6345 = vmatmul.msk.f32.gmra.mxu2 %vm2802_vm12, %v11709_v27 }
 0x632   :  { %v3435_v24 = vpop.permute.xlu1 %3434 }
 0x633   :  { %v3438_v53 = vsel %vm3436_vm15, %v11514_v32, %v3435_v24 }
 0x634   :  { %6298 = vmatpush.msk.msrb.mxu1 %vm1230_vm8, %v3438_v53  ;;  %v11718_v13 = vpop.f32.mrf.mxu2 }
 0x635   :  { %6285 = vmatmul.msk.f32.vlgmr.msra.gmra.mxu1 %vm2802_vm12, %v11519_v18  ;;  %6292 = vmatmul.msk.f32.gmra.mxu3 %vm2802_vm12, %v11542_v26 }
 0x636   :  { %v11724_v4 = vpop.f32.mrf.mxu0 }
 0x639   :  { %6339 = vmatmul.msk.f32.gmra.mxu0 %vm2802_vm12, %v11709_v27 }
 0x63a   :  { %v3633_v1 = vpop.permute.xlu1 %3632 }
 0x63b   :  { %v3635_v3 = vsel %vm507_vm3, %v11532_v49, %v3633_v1 }
 0x63c   :  { %6318 = vmatpush.msk.msra.mxu3 %vm1230_vm8, %v3635_v3  ;;  %v11731_v0 = vpop.f32.mrf.mxu2 }
 0x63d   :  { %6286 = vmatmul.msk.f32.gmra.mxu1 %vm2802_vm12, %v11542_v26  ;;  %6305 = vmatmul.msk.f32.vlgmr.msrb.gmra.mxu3 %vm2802_vm12, %v11567_v61 }
 0x63e   :  { %v11737_v59 = vpop.f32.mrf.mxu0 }
 0x642   :  { %v3569_v34 = vpop.permute.xlu1 %3568 }
 0x643   :  { %v3571_v58 = vsel %vm507_vm3, %v11560_v15, %v3569_v34 }
 0x644   :  { %6312 = vmatpush.msk.msra.mxu1 %vm1230_vm8, %v3571_v58  ;;  %v3000_v7 = vpop.f32.mrf.mxu2 }
 0x645   :  { %6299 = vmatmul.msk.f32.vlgmr.msrb.gmra.mxu1 %vm2802_vm12, %v11567_v61  ;;  %6306 = vmatmul.msk.f32.gmra.mxu3 %vm2802_vm12, %v11586_v22  ;;  %v3001_v35 = vadd.f32 %v3000_v7, %v11718_v13 }
 0x646   :  { %v2950_v32 = vpop.f32.mrf.mxu0 }
 0x647   :  { %v2951_v57 = vadd.f32 %v2950_v32, %v11724_v4 }
 0x64a   :  { %v3766_v6 = vpop.permute.xlu1 %3765 }
 0x64b   :  { %v3768_v18 = vsel %vm635_vm4, %v11590_v38, %v3766_v6 }
 0x64c   :  { %6332 = vmatpush.msk.msrb.mxu3 %vm1230_vm8, %v3768_v18  ;;  %v11749_v45 = vpop.f32.mrf.mxu2 }
 0x64d   :  { %6300 = vmatmul.msk.f32.gmra.mxu1 %vm2802_vm12, %v11586_v22  ;;  %6319 = vmatmul.msk.f32.vlgmr.msra.gmra.mxu3 %vm2802_vm12, %v11607_v20 }
 0x64e   :  { %v11755_v23 = vpop.f32.mrf.mxu0 }
 0x652   :  { %v3702_v31 = vpop.permute.xlu1 %3701 }
 0x653   :  { %v3704_v49 = vsel %vm635_vm4, %v11616_v33, %v3702_v31 }
 0x654   :  { %6326 = vmatpush.msk.msrb.mxu1 %vm1230_vm8, %v3704_v49  ;;  %v3125_v11 = vpop.f32.mrf.mxu2 }
 0x655   :  { %6313 = vmatmul.msk.f32.vlgmr.msra.gmra.mxu1 %vm2802_vm12, %v11607_v20  ;;  %6320 = vmatmul.msk.f32.gmra.mxu3 %vm2802_vm12, %v11628_v42  ;;  %v3157_v55 = vadd.f32 %v3125_v11, %v3001_v35 }
 0x656   :  { %v3067_v26 = vpop.f32.mrf.mxu0 }
 0x657   :  { %v3153_v17 = vadd.f32 %v3067_v26, %v2951_v57 }
 0x65a   :  { %v3899_v21 = vpop.permute.xlu1 %3898 }
 0x65b   :  { %v3901_v14 = vsel %vm763_vm5, %v11639_v40, %v3899_v21 }
 0x65c   :  { %6346 = vmatpush.msk.msra.mxu3 %vm1230_vm8, %v3901_v14  ;;  %v11767_v60 = vpop.f32.mrf.mxu2 }
 0x65d   :  { %6314 = vmatmul.msk.f32.gmra.mxu1 %vm2802_vm12, %v11628_v42  ;;  %6333 = vmatmul.msk.f32.vlgmr.msrb.gmra.mxu3 %vm2802_vm12, %v11649_v5 }
 0x65e   :  { %v11773_v15 = vpop.f32.mrf.mxu0 }
 0x662   :  { %v3835_v19 = vpop.permute.xlu1 %3834 }
 0x663   :  { %v3837_v61 = vsel %vm763_vm5, %v11665_v44, %v3835_v19 }
 0x664   :  { %6340 = vmatpush.msk.msra.mxu1 %vm1230_vm8, %v3837_v61  ;;  %v3259_v12 = vpop.f32.mrf.mxu2  ;;  %vm6145_vm8 = vcmask 687104  }
 0x665   :  { %6327 = vmatmul.msk.f32.vlgmr.msrb.gmra.mxu1 %vm2802_vm12, %v11649_v5  ;;  %6334 = vmatmul.msk.f32.gmra.mxu3 %vm2802_vm12, %v11670_v8  ;;  %v3291_v46 = vadd.f32 %v3259_v12, %v3157_v55 }
 0x666   :  { %v3201_v56 = vpop.f32.mrf.mxu0 }
 0x667   :  { %v3287_v28 = vadd.f32 %v3201_v56, %v3153_v17 }
 0x66c   :  { %v11782_v16 = vpop.f32.mrf.mxu2 }
 0x66d   :  { %6328 = vmatmul.msk.f32.gmra.mxu1 %vm2802_vm12, %v11670_v8  ;;  %6347 = vmatmul.msk.f32.vlgmr.msra.gmra.mxu3 %vm2802_vm12, %v11689_v2 }
 0x66e   :  { %v11788_v29 = vpop.f32.mrf.mxu0 }
 0x670   :  { %v11790_v22 = vpop.f32.mrf.mxu3 }
 0x672   :  { %v11792_v47 = vpop.f32.mrf.mxu1 }
 0x674   :  { %v3393_v38 = vpop.f32.mrf.mxu2 }
 0x675   :  { %6341 = vmatmul.msk.f32.vlgmr.msra.gmra.mxu1 %vm2802_vm12, %v11689_v2  ;;  %6348 = vmatmul.msk.f32.gmra.mxu3 %vm2802_vm12, %v11709_v27  ;;  %v3425_v25 = vadd.f32 %v3393_v38, %v3291_v46 }
 0x676   :  { %v3335_v62 = vpop.f32.mrf.mxu0 }
 0x677   :  { %v3421_v51 = vadd.f32 %v3335_v62, %v3287_v28 }
 0x678   :  { %v2917_v52 = vpop.f32.mrf.mxu3 }
 0x67a   :  { %v2856_v9 = vpop.f32.mrf.mxu1 }
 0x67c   :  { %v11798_v20 = vpop.f32.mrf.mxu2 }
 0x67d   :  { %6342 = vmatmul.msk.f32.gmra.mxu1 %vm2802_vm12, %v11709_v27 }
 0x67e   :  { %v11802_v10 = vpop.f32.mrf.mxu0 }
 0x680   :  { %v11804_v33 = vpop.f32.mrf.mxu3 }
 0x682   :  { %v11806_v43 = vpop.f32.mrf.mxu1 }
 0x684   :  { %v3527_v54 = vpop.f32.mrf.mxu2 }
 0x685   :  { %v3559_v30 = vadd.f32 %v3527_v54, %v3425_v25 }
 0x686   :  { %v3469_v42 = vpop.f32.mrf.mxu0 }
 0x687   :  { %v3555_v2 = vadd.f32 %v3469_v42, %v3421_v51 }
 0x688   :  { %v3023_v39 = vpop.f32.mrf.mxu3 }
 0x689   :  { %v3024_v12 = vadd.f32 %v3023_v39, %v2917_v52  ;;  %v2948_v52 = vadd.f32 %v11737_v59, %v11704_v37 }
 0x68a   :  { %v2973_v40 = vpop.f32.mrf.mxu1 }
 0x68b   :  { %v2974_v38 = vadd.f32 %v2973_v40, %v2856_v9  ;;  %v3151_v39 = vadd.f32 %v11755_v23, %v2948_v52 }
 0x68c   :  { %v11810_v5 = vpop.f32.mrf.mxu2 }
 0x68e   :  { %v11812_v63 = vpop.f32.mrf.mxu0 }
 0x690   :  { %v3145_v44 = vpop.f32.mrf.mxu3 }
 0x692   :  { %v3087_v8 = vpop.f32.mrf.mxu1 }
 0x694   :  { %v3660_v36 = vpop.f32.mrf.mxu2 }
 0x695   :  { %v3692_v50 = vadd.f32 %v3660_v36, %v3559_v30  ;;  %v2998_v36 = vadd.f32 %v11731_v0, %v11698_v41  ;;  %v2971_v41 = vadd.f32 %v11806_v43, %v11792_v47 }
 0x696   :  { %v3602_v48 = vpop.f32.mrf.mxu0 }
 0x697   :  { %v3688_v27 = vadd.f32 %v3602_v48, %v3555_v2  ;;  %v3155_v9 = vadd.f32 %v11749_v45, %v2998_v36  ;;  %v3152_v37 = vadd.f32 %v3087_v8, %v2971_v41 }
 0x698   :  { %v3148_v24 = vpop.f32.mrf.mxu3 }
 0x699   :  { %v3158_v62 = vadd.f32 %v3148_v24, %v3024_v12  ;;  %v3289_v48 = vadd.f32 %v11767_v60, %v3155_v9  ;;  %v3285_v24 = vadd.f32 %v11773_v15, %v3151_v39 }
 0x69a   :  { %v3090_v53 = vpop.f32.mrf.mxu1 }
 0x69b   :  { %v3154_v35 = vadd.f32 %v3090_v53, %v2974_v38  ;;  %v3423_v53 = vadd.f32 %v11782_v16, %v3289_v48  ;;  %v3419_v45 = vadd.f32 %v11788_v29, %v3285_v24  ;;  %v3960_v16 = vld [vmem:[%s13759_s9] sm:$0x3] }
 0x69c   :  { %v11814_v13 = vpop.f32.mrf.mxu2 }
 0x69e   :  { %v11816_v4 = vpop.f32.mrf.mxu0 }
 0x6a0   :  { %v3279_v1 = vpop.f32.mrf.mxu3 }
 0x6a2   :  { %v3221_v3 = vpop.f32.mrf.mxu1 }
 0x6a4   :  { %v3793_v34 = vpop.f32.mrf.mxu2 }
 0x6a5   :  { %v11818_v58 = vadd.f32 %v3793_v34, %v3692_v50  ;;  %v3557_v34 = vadd.f32 %v11798_v20, %v3423_v53 }
 0x6a6   :  { %v3735_v7 = vpop.f32.mrf.mxu0 }
 0x6a7   :  { %v11820_v32 = vadd.f32 %v3735_v7, %v3688_v27  ;;  %v3021_v27 = vadd.f32 %v11804_v33, %v11790_v22  ;;  %v3286_v7 = vadd.f32 %v3221_v3, %v3152_v37  ;;  %v3553_v22 = vadd.f32 %v11802_v10, %v3419_v45  ;;  %v6364_v37 = vld [vmem:[%s13760_s10 + $0x178] sm:$0xff]  ;;  %v6363_v45 = vld [vmem:[%s13760_s10 + $0x170] sm:$0xff] }
 0x6a8   :  { %v3282_v6 = vpop.f32.mrf.mxu3  ;;  %v3690_v33 = vadd.f32 %v11810_v5, %v3557_v34  ;;  %v11847_v10 = vperm.slane %v3960_v16, 0  ;;  %4179 = vmatpush.msrb.mxu0 %v6364_v37  ;;  %4225 = vmatpush.msrb.mxu2 %v6364_v37  ;;  %v4117_v37 = vld [vmem:[%s13760_s10 + $0x48] sm:$0xff] }
 0x6a9   :  { %v3292_v42 = vadd.f32 %v3282_v6, %v3158_v62  ;;  %v3156_v0 = vadd.f32 %v3145_v44, %v3021_v27  ;;  %v3686_v29 = vadd.f32 %v11812_v63, %v3553_v22 }
 0x6aa   :  { %v3224_v18 = vpop.f32.mrf.mxu1  ;;  %v3823_v20 = vadd.f32 %v11814_v13, %v3690_v33  ;;  %4180 = vmatpush.msrb.mxu0 %v6363_v45  ;;  %4226 = vmatpush.msrb.mxu2 %v6363_v45  ;;  %v6361_v33 = vld [vmem:[%s13760_s10 + $0x160] sm:$0xff] }
 0x6ab   :  { %v3288_v57 = vadd.f32 %v3224_v18, %v3154_v35  ;;  %v3290_v59 = vadd.f32 %v3279_v1, %v3156_v0  ;;  %v3819_v18 = vadd.f32 %v11816_v4, %v3686_v29  ;;  %v4060_v35 = vld [vmem:[%s13757_s7] sm:$0xff] }
 0x6ac   :  { %v3923_v8 = vpop.f32.mrf.mxu2  ;;  %v4116_v45 = vld [vmem:[%s13760_s10 + $0x40] sm:$0xff] }
 0x6ad   :  { %v3956_v5 = vadd.f32 %v3923_v8, %v3823_v20  ;;  %v6359_v8 = vld [vmem:[%s13760_s10 + $0x150] sm:$0xff] }
 0x6af   :  { %v3970_v38 = vmul.f32 %v11847_v10, %v3956_v5 }
 0x6b0   :  { %v3413_v31 = vpop.f32.mrf.mxu3 }
 0x6b1   :  { %v3424_v60 = vadd.f32 %v3413_v31, %v3290_v59  ;;  %v3865_v31 = vpop.f32.mrf.mxu0  ;;  %v6380_v59 = vld [vmem:[%s13760_s10 + $0x1f8] sm:$0xff] }
 0x6b2   :  { %v3355_v49 = vpop.f32.mrf.mxu1  ;;  %4199 = vmatpush.msrb.mxu1 %v6380_v59  ;;  %4245 = vmatpush.msrb.mxu3 %v6380_v59  ;;  %v4133_v59 = vld [vmem:[%s13760_s10 + $0xc8] sm:$0xff] }
 0x6b3   :  { %v3420_v47 = vadd.f32 %v3355_v49, %v3286_v7  ;;  %v6362_v7 = vld [vmem:[%s13760_s10 + $0x168] sm:$0xff] }
 0x6b4   :  { %4181 = vmatpush.msrb.mxu0 %v6362_v7  ;;  %4227 = vmatpush.msrb.mxu2 %v6362_v7  ;;  %v4114_v7 = vld [vmem:[%s13760_s10 + $0x30] sm:$0xff] }
 0x6b6   :  { %4182 = vmatpush.msrb.mxu0 %v6361_v33  ;;  %4228 = vmatpush.msrb.mxu2 %v6361_v33  ;;  %v4112_v33 = vld [vmem:[%s13760_s10 + $0x20] sm:$0xff] }
 0x6b8   :  { %v3416_v11 = vpop.f32.mrf.mxu3 }
 0x6b9   :  { %v3426_v55 = vadd.f32 %v3416_v11, %v3292_v42  ;;  %v3868_v27 = vpop.f32.mrf.mxu0 }
 0x6ba   :  { %v3358_v26 = vpop.f32.mrf.mxu1  ;;  %v11877_v53 = vadd.f32 %v3868_v27, %v11820_v32  ;;  %v6379_v32 = vld [vmem:[%s13760_s10 + $0x1f0] sm:$0xff]  ;;  %v4135_v27 = vld [vmem:[%s13760_s10 + $0xd8] sm:$0xff] }
 0x6bb   :  { %v3422_v17 = vadd.f32 %v3358_v26, %v3288_v57  ;;  %v11849_v26 = vperm.slane %v3960_v16, 1  ;;  %4200 = vmatpush.msrb.mxu1 %v6379_v32  ;;  %4246 = vmatpush.msrb.mxu3 %v6379_v32  ;;  %v4115_v32 = vld [vmem:[%s13760_s10 + $0x38] sm:$0xff] }
 0x6bc   :  { %v3968_v22 = vmul.f32 %v11847_v10, %v11877_v53 }
 0x6c0   :  { %v3547_v21 = vpop.f32.mrf.mxu3 }
 0x6c1   :  { %v3558_v43 = vadd.f32 %v3547_v21, %v3424_v60  ;;  %v3952_v21 = vadd.f32 %v3865_v31, %v3819_v18  ;;  %v6378_v60 = vld [vmem:[%s13760_s10 + $0x1e8] sm:$0xff] }
 0x6c2   :  { %v3489_v14 = vpop.f32.mrf.mxu1  ;;  %4201 = vmatpush.msrb.mxu1 %v6378_v60  ;;  %4247 = vmatpush.msrb.mxu3 %v6378_v60  ;;  %v6374_v18 = vld [vmem:[%s13760_s10 + $0x1c8] sm:$0xff]  ;;  %v4130_v60 = vld [vmem:[%s13760_s10 + $0xb0] sm:$0xff] }
 0x6c3   :  { %v3554_v1 = vadd.f32 %v3489_v14, %v3420_v47  ;;  %v3966_v4 = vmul.f32 %v11847_v10, %v3952_v21 }
 0x6c8   :  { %v3550_v19 = vpop.f32.mrf.mxu3 }
 0x6c9   :  { %v3560_v46 = vadd.f32 %v3550_v19, %v3426_v55 }
 0x6ca   :  { %v3492_v61 = vpop.f32.mrf.mxu1 }
 0x6cb   :  { %v3556_v25 = vadd.f32 %v3492_v61, %v3422_v17 }
 0x6d0   :  { %v3680_v56 = vpop.f32.mrf.mxu3 }
 0x6d1   :  { %v3691_v3 = vadd.f32 %v3680_v56, %v3558_v43  ;;  %v6377_v43 = vld [vmem:[%s13760_s10 + $0x1e0] sm:$0xff] }
 0x6d2   :  { %v3622_v54 = vpop.f32.mrf.mxu1  ;;  %4202 = vmatpush.msrb.mxu1 %v6377_v43  ;;  %4248 = vmatpush.msrb.mxu3 %v6377_v43  ;;  %v4111_v43 = vld [vmem:[%s13760_s10 + $0x18] sm:$0xff] }
 0x6d3   :  { %v3687_v49 = vadd.f32 %v3622_v54, %v3554_v1  ;;  %v6358_v1 = vld [vmem:[%s13760_s10 + $0x148] sm:$0xff] }
 0x6d8   :  { %v3683_v28 = vpop.f32.mrf.mxu3 }
 0x6d9   :  { %v3693_v51 = vadd.f32 %v3683_v28, %v3560_v46 }
 0x6da   :  { %v3625_v30 = vpop.f32.mrf.mxu1 }
 0x6db   :  { %v3689_v2 = vadd.f32 %v3625_v30, %v3556_v25 }
 0x6e0   :  { %v3813_v40 = vpop.f32.mrf.mxu3 }
 0x6e1   :  { %v3824_v11 = vadd.f32 %v3813_v40, %v3691_v3 }
 0x6e2   :  { %v3755_v50 = vpop.f32.mrf.mxu1 }
 0x6e3   :  { %v3820_v61 = vadd.f32 %v3755_v50, %v3687_v49  ;;  %v6373_v49 = vld [vmem:[%s13760_s10 + $0x1c0] sm:$0xff] }
 0x6e8   :  { %v3816_v23 = vpop.f32.mrf.mxu3 }
 0x6e9   :  { %v11837_v6 = vadd.f32 %v3816_v23, %v3693_v51 }
 0x6ea   :  { %v3758_v15 = vpop.f32.mrf.mxu1 }
 0x6eb   :  { %v3822_v44 = vadd.f32 %v3758_v15, %v3689_v2  ;;  %v3926_v15 = vpop.f32.mrf.mxu2 }
 0x6ec   :  { %v11914_v29 = vadd.f32 %v3926_v15, %v11818_v58  ;;  %v6375_v58 = vld [vmem:[%s13760_s10 + $0x1d0] sm:$0xff]  ;;  %v4129_v15 = vld [vmem:[%s13760_s10 + $0xa8] sm:$0xff] }
 0x6ee   :  { %v3972_v3 = vmul.f32 %v11847_v10, %v11914_v29 }
 0x6f0   :  { %v3946_v19 = vpop.f32.mrf.mxu3 }
 0x6f1   :  { %v3957_v12 = vadd.f32 %v3946_v19, %v3824_v11  ;;  %v6356_v11 = vld [vmem:[%s13760_s10 + $0x138] sm:$0xff] }
 0x6f2   :  { %v3888_v63 = vpop.f32.mrf.mxu1  ;;  %v6372_v19 = vld [vmem:[%s13760_s10 + $0x1b8] sm:$0xff] }
 0x6f3   :  { %v3971_v13 = vmul.f32 %v11849_v26, %v3957_v12  ;;  %v3953_v14 = vadd.f32 %v3888_v63, %v3820_v61  ;;  %v6371_v61 = vld [vmem:[%s13760_s10 + $0x1b0] sm:$0xff]  ;;  %v6370_v63 = vld [vmem:[%s13760_s10 + $0x1a8] sm:$0xff] }
 0x6f5   :  { %v3967_v56 = vmul.f32 %v11849_v26, %v3953_v14  ;;  %v3980_v62 = vadd.f32 %v3971_v13, %v3970_v38  ;;  %v4080_v38 = vld [vmem:[%s13758_s8] sm:$0xff] }
 0x6f6   :  { %v6353_v13 = vld [vmem:[%s13760_s10 + $0x120] sm:$0xff] }
 0x6f7   :  { %3981 = vadd.xlane.f32.xlu2 %v3980_v62  ;;  %v3974_v54 = vadd.f32 %v3967_v56, %v3966_v4  ;;  %v6352_v4 = vld [vmem:[%s13760_s10 + $0x118] sm:$0xff]  ;;  %v6351_v62 = vld [vmem:[%s13760_s10 + $0x110] sm:$0xff] }
 0x6f8   :  { %v3949_v34 = vpop.f32.mrf.mxu3  ;;  %v6368_v56 = vld [vmem:[%s13760_s10 + $0x198] sm:$0xff] }
 0x6f9   :  { %3975 = vadd.xlane.f32.xlu0 %v3974_v54  ;;  %v11905_v47 = vadd.f32 %v3949_v34, %v11837_v6  ;;  %v6376_v6 = vld [vmem:[%s13760_s10 + $0x1d8] sm:$0xff]  ;;  %v6367_v54 = vld [vmem:[%s13760_s10 + $0x190] sm:$0xff] }
 0x6fa   :  { %v3891_v9 = vpop.f32.mrf.mxu1  ;;  %4203 = vmatpush.msrb.mxu1 %v6376_v6  ;;  %4249 = vmatpush.msrb.mxu3 %v6376_v6  ;;  %v4131_v34 = vld [vmem:[%s13760_s10 + $0xb8] sm:$0xff]  ;;  %v4110_v6 = vld [vmem:[%s13760_s10 + $0x10] sm:$0xff] }
 0x6fb   :  { %v11874_v24 = vadd.f32 %v3891_v9, %v3822_v44  ;;  %v6360_v44 = vld [vmem:[%s13760_s10 + $0x158] sm:$0xff]  ;;  %v3973_v20 = vmul.f32 %v11849_v26, %v11905_v47  ;;  %v4121_v9 = vld [vmem:[%s13760_s10 + $0x68] sm:$0xff] }
 0x6fc   :  { %4183 = vmatpush.msrb.mxu0 %v6360_v44  ;;  %4229 = vmatpush.msrb.mxu2 %v6360_v44  ;;  %v4127_v44 = vld [vmem:[%s13760_s10 + $0x98] sm:$0xff] }
 0x6fd   :  { %v3969_v23 = vmul.f32 %v11849_v26, %v11874_v24  ;;  %4204 = vmatpush.msrb.mxu1 %v6375_v58  ;;  %v3983_v31 = vadd.f32 %v3973_v20, %v3972_v3  ;;  %4250 = vmatpush.msrb.mxu3 %v6375_v58  ;;  %v4109_v20 = vld [vmem:[%s13760_s10 + $0x8] sm:$0xff] }
 0x6fe   :  { %4184 = vmatpush.msrb.mxu0 %v6359_v8  ;;  %4230 = vmatpush.msrb.mxu2 %v6359_v8  ;;  %v4126_v8 = vld [vmem:[%s13760_s10 + $0x90] sm:$0xff]  ;;  %v4125_v58 = vld [vmem:[%s13760_s10 + $0x88] sm:$0xff] }
 0x6ff   :  { %v3977_v16 = vadd.f32 %v3969_v23, %v3968_v22  ;;  %4205 = vmatpush.msrb.mxu1 %v6374_v18  ;;  %4251 = vmatpush.msrb.mxu3 %v6374_v18  ;;  %v4132_v23 = vld [vmem:[%s13760_s10 + $0xc0] sm:$0xff]  ;;  %v4113_v22 = vld [vmem:[%s13760_s10 + $0x28] sm:$0xff] }
 0x700   :  { %4185 = vmatpush.msrb.mxu0 %v6358_v1  ;;  %4231 = vmatpush.msrb.mxu2 %v6358_v1 }
 0x701   :  { %4206 = vmatpush.msrb.mxu1 %v6373_v49  ;;  %4252 = vmatpush.msrb.mxu3 %v6373_v49 }
 0x703   :  { %4207 = vmatpush.msrb.mxu1 %v6372_v19  ;;  %4253 = vmatpush.msrb.mxu3 %v6372_v19 }
 0x705   :  { %4208 = vmatpush.msrb.mxu1 %v6371_v61  ;;  %4254 = vmatpush.msrb.mxu3 %v6371_v61 }
 0x707   :  { %4209 = vmatpush.msrb.mxu1 %v6370_v63  ;;  %4255 = vmatpush.msrb.mxu3 %v6370_v63 }
 0x70f   :  { %4064 = vperm.xlu2 %6852, %v4060_v35   ;;  %v4061_v35 = vld [vmem:[%s13757_s7 + $0x8] sm:$0xff] }
 0x76a   :  { %v3982_v42 = vpop.xlane.xlu2 %3981 }
 0x76c   :  { %v3976_v57 = vpop.xlane.xlu0 %3975 }
 0x76d   :  { %v3986_v55 = vadd.f32 %v3982_v42, %v3976_v57  ;;  %v6350_v42 = vld [vmem:[%s13760_s10 + $0x108] sm:$0xff] }
 0x76e   :  { %v6366_v57 = vld [vmem:[%s13760_s10 + $0x188] sm:$0xff] }
 0x76f   :  { %v3988_v17 = vmul.f32 0.0025510204, %v3986_v55  ;;  %v6349_v55 = vld [vmem:[%s13760_s10 + $0x100] sm:$0xff] }
 0x771   :  { %v11858_v46 = vsub.f32 %v3956_v5, %v3988_v17  ;;  %v11860_v28 = vsub.f32 %v3957_v12, %v3988_v17  ;;  %v11862_v25 = vsub.f32 %v3952_v21, %v3988_v17  ;;  %v11864_v51 = vsub.f32 %v3953_v14, %v3988_v17  ;;  %v6357_v5 = vld [vmem:[%s13760_s10 + $0x140] sm:$0xff]  ;;  %v6355_v21 = vld [vmem:[%s13760_s10 + $0x130] sm:$0xff]  ;;  %v6354_v12 = vld [vmem:[%s13760_s10 + $0x128] sm:$0xff] }
 0x772   :  { %4186 = vmatpush.msrb.mxu0 %v6357_v5  ;;  %4232 = vmatpush.msrb.mxu2 %v6357_v5  ;;  %v6369_v14 = vld [vmem:[%s13760_s10 + $0x1a0] sm:$0xff] }
 0x773   :  { %v4002_v30 = vmul.f32 %v11858_v46, %v11847_v10  ;;  %v4003_v36 = vmul.f32 %v11860_v28, %v11849_v26  ;;  %v3998_v2 = vmul.f32 %v11862_v25, %v11847_v10  ;;  %v3999_v52 = vmul.f32 %v11864_v51, %v11849_v26  ;;  %4210 = vmatpush.msrb.mxu1 %v6369_v14  ;;  %v6365_v17 = vld [vmem:[%s13760_s10 + $0x180] sm:$0xff] }
 0x774   :  { %4187 = vmatpush.msrb.mxu0 %v6356_v11  ;;  %4233 = vmatpush.msrb.mxu2 %v6356_v11  ;;  %v4124_v5 = vld [vmem:[%s13760_s10 + $0x80] sm:$0xff] }
 0x775   :  { %v4010_v39 = vmul.f32 %v4002_v30, %v4002_v30  ;;  %v4011_v40 = vmul.f32 %v4003_v36, %v4003_v36  ;;  %v4006_v50 = vmul.f32 %v3998_v2, %v3998_v2  ;;  %v4007_v48 = vmul.f32 %v3999_v52, %v3999_v52  ;;  %4256 = vmatpush.msrb.mxu3 %v6369_v14  ;;  %v4123_v30 = vld [vmem:[%s13760_s10 + $0x78] sm:$0xff]  ;;  %v4122_v2 = vld [vmem:[%s13760_s10 + $0x70] sm:$0xff] }
 0x776   :  { %4188 = vmatpush.msrb.mxu0 %v6355_v21  ;;  %4234 = vmatpush.msrb.mxu2 %v6355_v21  ;;  %v4139_v36 = vld [vmem:[%s13760_s10 + $0xf8] sm:$0xff]  ;;  %v4138_v52 = vld [vmem:[%s13760_s10 + $0xf0] sm:$0xff] }
 0x777   :  { %v4020_v41 = vadd.f32 %v4011_v40, %v4010_v39  ;;  %v4014_v0 = vadd.f32 %v4007_v48, %v4006_v50  ;;  %4211 = vmatpush.msrb.mxu1 %v6368_v56  ;;  %4257 = vmatpush.msrb.mxu3 %v6368_v56  ;;  %v4137_v39 = vld [vmem:[%s13760_s10 + $0xe8] sm:$0xff]  ;;  %v4120_v40 = vld [vmem:[%s13760_s10 + $0x60] sm:$0xff]  ;;  %v4119_v48 = vld [vmem:[%s13760_s10 + $0x58] sm:$0xff] }
 0x778   :  { %4189 = vmatpush.msrb.mxu0 %v6354_v12  ;;  %4235 = vmatpush.msrb.mxu2 %v6354_v12  ;;  %v4136_v50 = vld [vmem:[%s13760_s10 + $0xe0] sm:$0xff] }
 0x779   :  { %4021 = vadd.xlane.f32.xlu0 %v4020_v41  ;;  %4015 = vadd.xlane.f32.xlu1 %v4014_v0  ;;  %v4118_v41 = vld [vmem:[%s13760_s10 + $0x50] sm:$0xff] }
 0x77a   :  { %4190 = vmatpush.msrb.mxu0 %v6353_v13  ;;  %4236 = vmatpush.msrb.mxu2 %v6353_v13  ;;  %v4134_v0 = vld [vmem:[%s13760_s10 + $0xd0] sm:$0xff] }
 0x77b   :  { %4212 = vmatpush.msrb.mxu1 %v6367_v54  ;;  %4258 = vmatpush.msrb.mxu3 %v6367_v54 }
 0x77c   :  { %4191 = vmatpush.msrb.mxu0 %v6352_v4  ;;  %4237 = vmatpush.msrb.mxu2 %v6352_v4 }
 0x77d   :  { %4213 = vmatpush.msrb.mxu1 %v6366_v57  ;;  %4259 = vmatpush.msrb.mxu3 %v6366_v57 }
 0x77e   :  { %4192 = vmatpush.msrb.mxu0 %v6351_v62  ;;  %4238 = vmatpush.msrb.mxu2 %v6351_v62 }
 0x77f   :  { %4214 = vmatpush.msrb.mxu1 %v6365_v17  ;;  %4260 = vmatpush.msrb.mxu3 %v6365_v17 }
 0x780   :  { %4193 = vmatpush.msrb.mxu0 %v6350_v42  ;;  %4239 = vmatpush.msrb.mxu2 %v6350_v42 }
 0x781   :  { %3978 = vadd.xlane.f32.xlu0 %v3977_v16  ;;  %4285 = vmatpush.msra.mxu1 %v4139_v36  ;;  %v4128_v16 = vld [vmem:[%s13760_s10 + $0xa0] sm:$0xff] }
 0x782   :  { %4194 = vmatpush.msrb.mxu0 %v6349_v55  ;;  %4240 = vmatpush.msrb.mxu2 %v6349_v55 }
 0x783   :  { %4325 = vmatpush.msra.mxu3 %v4139_v36  ;;  %4286 = vmatpush.msra.mxu1 %v4138_v52 }
 0x784   :  { %4265 = vmatpush.msra.mxu0 %v4123_v30  ;;  %4305 = vmatpush.msra.mxu2 %v4123_v30 }
 0x785   :  { %4326 = vmatpush.msra.mxu3 %v4138_v52  ;;  %4287 = vmatpush.msra.mxu1 %v4137_v39 }
 0x786   :  { %4266 = vmatpush.msra.mxu0 %v4122_v2  ;;  %4306 = vmatpush.msra.mxu2 %v4122_v2  ;;  %v4065_v2 = vpop.permute.xlu2 %4064 }
 0x787   :  { %4327 = vmatpush.msra.mxu3 %v4137_v39  ;;  %4288 = vmatpush.msra.mxu1 %v4136_v50 }
 0x788   :  { %4267 = vmatpush.msra.mxu0 %v4121_v9  ;;  %4307 = vmatpush.msra.mxu2 %v4121_v9 }
 0x789   :  { %3984 = vadd.xlane.f32.xlu0 %v3983_v31  ;;  %4328 = vmatpush.msra.mxu3 %v4136_v50  ;;  %v4108_v31 = vld [vmem:[%s13760_s10] sm:$0xff] }
 0x78a   :  { %4268 = vmatpush.msra.mxu0 %v4120_v40  ;;  %4308 = vmatpush.msra.mxu2 %v4120_v40 }
 0x78b   :  { %4289 = vmatpush.msra.mxu1 %v4135_v27  ;;  %4329 = vmatpush.msra.mxu3 %v4135_v27 }
 0x78c   :  { %4269 = vmatpush.msra.mxu0 %v4119_v48  ;;  %4309 = vmatpush.msra.mxu2 %v4119_v48 }
 0x78d   :  { %4290 = vmatpush.msra.mxu1 %v4134_v0  ;;  %4330 = vmatpush.msra.mxu3 %v4134_v0 }
 0x78e   :  { %4270 = vmatpush.msra.mxu0 %v4118_v41  ;;  %4310 = vmatpush.msra.mxu2 %v4118_v41 }
 0x78f   :  { %4291 = vmatpush.msra.mxu1 %v4133_v59  ;;  %4331 = vmatpush.msra.mxu3 %v4133_v59 }
 0x790   :  { %4271 = vmatpush.msra.mxu0 %v4117_v37  ;;  %4311 = vmatpush.msra.mxu2 %v4117_v37 }
 0x791   :  { %4292 = vmatpush.msra.mxu1 %v4132_v23  ;;  %4332 = vmatpush.msra.mxu3 %v4132_v23 }
 0x792   :  { %4084 = vperm.xlu1 %6851, %v4080_v38   ;;  %4272 = vmatpush.msra.mxu0 %v4116_v45 }
 0x793   :  { %4312 = vmatpush.msra.mxu2 %v4116_v45  ;;  %4293 = vmatpush.msra.mxu1 %v4131_v34 }
 0x794   :  { %4273 = vmatpush.msra.mxu0 %v4115_v32  ;;  %4333 = vmatpush.msra.mxu3 %v4131_v34 }
 0x795   :  { %4313 = vmatpush.msra.mxu2 %v4115_v32  ;;  %4294 = vmatpush.msra.mxu1 %v4130_v60 }
 0x796   :  { %4274 = vmatpush.msra.mxu0 %v4114_v7  ;;  %4334 = vmatpush.msra.mxu3 %v4130_v60 }
 0x797   :  { %4314 = vmatpush.msra.mxu2 %v4114_v7  ;;  %4295 = vmatpush.msra.mxu1 %v4129_v15 }
 0x798   :  { %4275 = vmatpush.msra.mxu0 %v4113_v22  ;;  %4335 = vmatpush.msra.mxu3 %v4129_v15  ;;  %v6412_v15 = vld [vmem:[%s13760_s10 + $0x2f8] sm:$0xff] }
 0x799   :  { %4315 = vmatpush.msra.mxu2 %v4113_v22  ;;  %4296 = vmatpush.msra.mxu1 %v4128_v16  ;;  %v6396_v22 = vld [vmem:[%s13760_s10 + $0x278] sm:$0xff] }
 0x79a   :  { %4069 = vperm.xlu1 %6851, %v4061_v35   ;;  %4276 = vmatpush.msra.mxu0 %v4112_v33 }
 0x79b   :  { %4316 = vmatpush.msra.mxu2 %v4112_v33  ;;  %4336 = vmatpush.msra.mxu3 %v4128_v16  ;;  %v6395_v33 = vld [vmem:[%s13760_s10 + $0x270] sm:$0xff] }
 0x79c   :  { %4277 = vmatpush.msra.mxu0 %v4111_v43  ;;  %4297 = vmatpush.msra.mxu1 %v4127_v44  ;;  %v6411_v16 = vld [vmem:[%s13760_s10 + $0x2f0] sm:$0xff] }
 0x79d   :  { %4317 = vmatpush.msra.mxu2 %v4111_v43  ;;  %4337 = vmatpush.msra.mxu3 %v4127_v44  ;;  %v6394_v43 = vld [vmem:[%s13760_s10 + $0x268] sm:$0xff] }
 0x79e   :  { %4278 = vmatpush.msra.mxu0 %v4110_v6  ;;  %4298 = vmatpush.msra.mxu1 %v4126_v8  ;;  %v6410_v44 = vld [vmem:[%s13760_s10 + $0x2e8] sm:$0xff] }
 0x79f   :  { %4318 = vmatpush.msra.mxu2 %v4110_v6  ;;  %4338 = vmatpush.msra.mxu3 %v4126_v8  ;;  %v6393_v6 = vld [vmem:[%s13760_s10 + $0x260] sm:$0xff] }
 0x7a0   :  { %4279 = vmatpush.msra.mxu0 %v4109_v20  ;;  %4299 = vmatpush.msra.mxu1 %v4125_v58  ;;  %v6409_v8 = vld [vmem:[%s13760_s10 + $0x2e0] sm:$0xff] }
 0x7a1   :  { %4319 = vmatpush.msra.mxu2 %v4109_v20  ;;  %4339 = vmatpush.msra.mxu3 %v4125_v58  ;;  %v6392_v20 = vld [vmem:[%s13760_s10 + $0x258] sm:$0xff] }
 0x7a2   :  { %4280 = vmatpush.msra.mxu0 %v4108_v31  ;;  %4300 = vmatpush.msra.mxu1 %v4124_v5  ;;  %v6408_v58 = vld [vmem:[%s13760_s10 + $0x2d8] sm:$0xff] }
 0x7a3   :  { %4320 = vmatpush.msra.mxu2 %v4108_v31  ;;  %4340 = vmatpush.msra.mxu3 %v4124_v5  ;;  %v6406_v31 = vld [vmem:[%s13760_s10 + $0x2c8] sm:$0xff]  ;;  %v6389_v5 = vld [vmem:[%s13760_s10 + $0x240] sm:$0xff] }
 0x7ec   :  { %v4022_v1 = vpop.xlane.xlu0 %4021  ;;  %v4016_v3 = vpop.xlane.xlu1 %4015 }
 0x7ed   :  { %v4026_v18 = vadd.f32 %v4022_v1, %v4016_v3  ;;  %v6391_v1 = vld [vmem:[%s13760_s10 + $0x250] sm:$0xff] }
 0x7ee   :  { %v6407_v3 = vld [vmem:[%s13760_s10 + $0x2d0] sm:$0xff] }
 0x7ef   :  { %v4028_v49 = vmul.f32 0.0025510204, %v4026_v18  ;;  %v6390_v18 = vld [vmem:[%s13760_s10 + $0x248] sm:$0xff] }
 0x7f1   :  { %v4030_v11 = vadd.f32 1e-05, %v4028_v49  ;;  %v6405_v49 = vld [vmem:[%s13760_s10 + $0x2c0] sm:$0xff] }
 0x7f3   :  { %6857 = vrsqrt.f32 %v4030_v11  ;;  %vm4038_vm1 = vweird.f32 %v4030_v11 }
 0x7f4   :  { %v3979_v19 = vpop.xlane.xlu0 %3978 }
 0x7f9   :  { %v6858_v21 = vpop.eup %6857 }
 0x7fa   :  { %v4033_v61 = vmul.f32 %v6858_v21, %v4030_v11  ;;  %vm4039_vm0 = vweird.f32 %v6858_v21  ;;  %v4081_v11 = vld [vmem:[%s13758_s8 + $0x8] sm:$0xff]  ;;  %s7240_s8 = smov 16  }
 0x7fb   :  { %vm4040_vm2 = vmor %vm4038_vm1, %vm4039_vm0 }
 0x7fc   :  { %v4034_v12 = vmul.f32 %v6858_v21, %v4033_v61  ;;  %v3985_v63 = vpop.xlane.xlu0 %3984  ;;  %v6387_v61 = vld [vmem:[%s13760_s10 + $0x230] sm:$0xff] }
 0x7fd   :  { %v3987_v38 = vadd.f32 %v3985_v63, %v3979_v19  ;;  %v6388_v19 = vld [vmem:[%s13760_s10 + $0x238] sm:$0xff]  ;;  %v6386_v63 = vld [vmem:[%s13760_s10 + $0x228] sm:$0xff] }
 0x7fe   :  { %v4035_v13 = vmul.f32 0.5, %v4034_v12  ;;  %v6403_v12 = vld [vmem:[%s13760_s10 + $0x2b0] sm:$0xff] }
 0x7ff   :  { %v3989_v14 = vmul.f32 0.0025510204, %v3987_v38  ;;  %v6402_v38 = vld [vmem:[%s13760_s10 + $0x2a8] sm:$0xff] }
 0x800   :  { %v4036_v4 = vsub.f32 1.5, %v4035_v13  ;;  %v6385_v13 = vld [vmem:[%s13760_s10 + $0x220] sm:$0xff] }
 0x801   :  { %v12092_v56 = vsub.f32 %v11914_v29, %v3989_v14  ;;  %v12095_v62 = vsub.f32 %v11905_v47, %v3989_v14  ;;  %v12098_v54 = vsub.f32 %v11877_v53, %v3989_v14  ;;  %v12101_v35 = vsub.f32 %v11874_v24, %v3989_v14  ;;  %v6401_v14 = vld [vmem:[%s13760_s10 + $0x2a0] sm:$0xff] }
 0x802   :  { %v4037_v42 = vmul.f32 %v6858_v21, %v4036_v4  ;;  %v6384_v4 = vld [vmem:[%s13760_s10 + $0x218] sm:$0xff] }
 0x803   :  { %v4004_v57 = vmul.f32 %v12092_v56, %v11847_v10  ;;  %v4005_v55 = vmul.f32 %v12095_v62, %v11849_v26  ;;  %v4000_v29 = vmul.f32 %v12098_v54, %v11847_v10  ;;  %v4001_v47 = vmul.f32 %v12101_v35, %v11849_v26 }
 0x804   :  { %v4041_v53 = vsel %vm4040_vm2, %v6858_v21, %v4037_v42  ;;  %v4085_v41 = vpop.permute.xlu1 %4084  ;;  %v6404_v21 = vld [vmem:[%s13760_s10 + $0x2b8] sm:$0xff] }
 0x805   :  { %v4052_v17 = vmul.f32 %v4041_v53, %v11862_v25  ;;  %v4053_v24 = vmul.f32 %v4041_v53, %v11864_v51  ;;  %v4056_v30 = vmul.f32 %v4041_v53, %v11858_v46  ;;  %v4057_v36 = vmul.f32 %v4041_v53, %v11860_v28  ;;  %v6400_v42 = vld [vmem:[%s13760_s10 + $0x298] sm:$0xff]  ;;  %v6381_v53 = vld [vmem:[%s13760_s10 + $0x200] sm:$0xff] }
 0x806   :  { %v4012_v52 = vmul.f32 %v4004_v57, %v4004_v57  ;;  %v4013_v9 = vmul.f32 %v4005_v55, %v4005_v55  ;;  %v4008_v39 = vmul.f32 %v4000_v29, %v4000_v29  ;;  %v4009_v40 = vmul.f32 %v4001_v47, %v4001_v47  ;;  %v6383_v57 = vld [vmem:[%s13760_s10 + $0x210] sm:$0xff]  ;;  %v6382_v29 = vld [vmem:[%s13760_s10 + $0x208] sm:$0xff] }
 0x807   :  { %v4072_v50 = vmul.f32 %v4065_v2, %v4052_v17  ;;  %v4073_v48 = vmul.f32 %v4065_v2, %v4053_v24  ;;  %v4076_v10 = vmul.f32 %v4065_v2, %v4056_v30  ;;  %v4077_v27 = vmul.f32 %v4065_v2, %v4057_v36  ;;  %v6399_v55 = vld [vmem:[%s13760_s10 + $0x290] sm:$0xff]  ;;  %v6398_v47 = vld [vmem:[%s13760_s10 + $0x288] sm:$0xff]  ;;  %v6397_v17 = vld [vmem:[%s13760_s10 + $0x280] sm:$0xff] }
 0x808   :  { %v4023_v26 = vadd.f32 %v4013_v9, %v4012_v52  ;;  %v4017_v0 = vadd.f32 %v4009_v40, %v4008_v39  ;;  %v6428_v2 = vld [vmem:[%s13760_s10 + $0x378] sm:$0xff]  ;;  %v6427_v39 = vld [vmem:[%s13760_s10 + $0x370] sm:$0xff] }
 0x809   :  { %v4092_v37 = vadd.f32 %v4085_v41, %v4072_v50  ;;  %v4093_v25 = vadd.f32 %v4085_v41, %v4073_v48  ;;  %v4096_v59 = vadd.f32 %v4085_v41, %v4076_v10  ;;  %v4097_v51 = vadd.f32 %v4085_v41, %v4077_v27  ;;  %v6444_v9 = vld [vmem:[%s13760_s10 + $0x3f8] sm:$0xff]  ;;  %v6443_v40 = vld [vmem:[%s13760_s10 + $0x3f0] sm:$0xff]  ;;  %v6426_v50 = vld [vmem:[%s13760_s10 + $0x368] sm:$0xff] }
 0x80a   :  { %4024 = vadd.xlane.f32.xlu2 %v4023_v26  ;;  %4018 = vadd.xlane.f32.xlu0 %v4017_v0  ;;  %v6442_v48 = vld [vmem:[%s13760_s10 + $0x3e8] sm:$0xff]  ;;  %v6425_v10 = vld [vmem:[%s13760_s10 + $0x360] sm:$0xff]  ;;  %v6424_v41 = vld [vmem:[%s13760_s10 + $0x358] sm:$0xff] }
 0x80b   :  { %v12115_v46 = vmax.f32 %v4092_v37, 0.0  ;;  %v12117_v28 = vmax.f32 %v4093_v25, 0.0  ;;  %v12119_v45 = vmax.f32 %v4096_v59, 0.0  ;;  %v12121_v23 = vmax.f32 %v4097_v51, 0.0  ;;  %v6441_v27 = vld [vmem:[%s13760_s10 + $0x3e0] sm:$0xff]  ;;  %v6440_v26 = vld [vmem:[%s13760_s10 + $0x3d8] sm:$0xff] }
 0x80c   :  { %v6423_v0 = vld [vmem:[%s13760_s10 + $0x350] sm:$0xff]  ;;  %v6422_v25 = vld [vmem:[%s13760_s10 + $0x348] sm:$0xff]  ;;  %v6421_v51 = vld [vmem:[%s13760_s10 + $0x340] sm:$0xff] }
 0x80d   :  { %v4175_v32 = vrot.slane %v12115_v46, 1  ;;  %v4176_v34 = vrot.slane %v12117_v28, 1  ;;  %v4221_v7 = vrot.slane %v12119_v45, 1  ;;  %v4222_v60 = vrot.slane %v12121_v23, 1  ;;  %v6439_v37 = vld [vmem:[%s13760_s10 + $0x3d0] sm:$0xff]  ;;  %v6438_v59 = vld [vmem:[%s13760_s10 + $0x3c8] sm:$0xff] }
 0x80e   :  { %v4378_v24 = vrot.slane %v12115_v46, 2  ;;  %v4379_v30 = vrot.slane %v12117_v28, 2  ;;  %v4422_v36 = vrot.slane %v12119_v45, 2  ;;  %v4423_v52 = vrot.slane %v12121_v23, 2 }
 0x80f   :  { %4195 = vmatmul.f32.vlgmr.msrb.gmra.mxu0 %v4175_v32  ;;  %4215 = vmatmul.f32.vlgmr.msrb.gmra.mxu1 %v4176_v34  ;;  %v6437_v32 = vld [vmem:[%s13760_s10 + $0x3c0] sm:$0xff]  ;;  %v6420_v34 = vld [vmem:[%s13760_s10 + $0x338] sm:$0xff] }
 0x810   :  { %4241 = vmatmul.f32.vlgmr.msrb.gmra.mxu2 %v4221_v7  ;;  %4261 = vmatmul.f32.vlgmr.msrb.gmra.mxu3 %v4222_v60  ;;  %v6436_v7 = vld [vmem:[%s13760_s10 + $0x3b8] sm:$0xff]  ;;  %v6419_v60 = vld [vmem:[%s13760_s10 + $0x330] sm:$0xff] }
 0x811   :  { %4382 = vmatpush.msrb.mxu0 %v6396_v22  ;;  %4402 = vmatpush.msrb.mxu1 %v6412_v15 }
 0x812   :  { %4426 = vmatpush.msrb.mxu2 %v6396_v22  ;;  %4446 = vmatpush.msrb.mxu3 %v6412_v15  ;;  %v6435_v22 = vld [vmem:[%s13760_s10 + $0x3b0] sm:$0xff]  ;;  %v6418_v15 = vld [vmem:[%s13760_s10 + $0x328] sm:$0xff] }
 0x813   :  { %4383 = vmatpush.msrb.mxu0 %v6395_v33  ;;  %4403 = vmatpush.msrb.mxu1 %v6411_v16 }
 0x814   :  { %4427 = vmatpush.msrb.mxu2 %v6395_v33  ;;  %4447 = vmatpush.msrb.mxu3 %v6411_v16  ;;  %v6434_v33 = vld [vmem:[%s13760_s10 + $0x3a8] sm:$0xff]  ;;  %v6417_v16 = vld [vmem:[%s13760_s10 + $0x320] sm:$0xff] }
 0x815   :  { %4384 = vmatpush.msrb.mxu0 %v6394_v43  ;;  %4404 = vmatpush.msrb.mxu1 %v6410_v44 }
 0x816   :  { %4428 = vmatpush.msrb.mxu2 %v6394_v43  ;;  %4448 = vmatpush.msrb.mxu3 %v6410_v44  ;;  %v6433_v43 = vld [vmem:[%s13760_s10 + $0x3a0] sm:$0xff]  ;;  %v6416_v44 = vld [vmem:[%s13760_s10 + $0x318] sm:$0xff] }
 0x817   :  { %4385 = vmatpush.msrb.mxu0 %v6393_v6  ;;  %4405 = vmatpush.msrb.mxu1 %v6409_v8 }
 0x818   :  { %4429 = vmatpush.msrb.mxu2 %v6393_v6  ;;  %4449 = vmatpush.msrb.mxu3 %v6409_v8  ;;  %v6432_v6 = vld [vmem:[%s13760_s10 + $0x398] sm:$0xff]  ;;  %v6415_v8 = vld [vmem:[%s13760_s10 + $0x310] sm:$0xff] }
 0x819   :  { %4281 = vmatmul.f32.vlgmr.msra.gmra.mxu0 %v12115_v46  ;;  %4301 = vmatmul.f32.vlgmr.msra.gmra.mxu1 %v12117_v28 }
 0x81a   :  { %4321 = vmatmul.f32.vlgmr.msra.gmra.mxu2 %v12119_v45  ;;  %4341 = vmatmul.f32.vlgmr.msra.gmra.mxu3 %v12121_v23 }
 0x81b   :  { %4386 = vmatpush.msrb.mxu0 %v6392_v20  ;;  %4406 = vmatpush.msrb.mxu1 %v6408_v58 }
 0x81c   :  { %4430 = vmatpush.msrb.mxu2 %v6392_v20  ;;  %4450 = vmatpush.msrb.mxu3 %v6408_v58  ;;  %v6431_v20 = vld [vmem:[%s13760_s10 + $0x390] sm:$0xff]  ;;  %v6414_v58 = vld [vmem:[%s13760_s10 + $0x308] sm:$0xff] }
 0x81d   :  { %4387 = vmatpush.msrb.mxu0 %v6391_v1  ;;  %4407 = vmatpush.msrb.mxu1 %v6407_v3 }
 0x81e   :  { %4431 = vmatpush.msrb.mxu2 %v6391_v1  ;;  %4451 = vmatpush.msrb.mxu3 %v6407_v3  ;;  %v6430_v1 = vld [vmem:[%s13760_s10 + $0x388] sm:$0xff]  ;;  %v6413_v3 = vld [vmem:[%s13760_s10 + $0x300] sm:$0xff] }
 0x81f   :  { %4388 = vmatpush.msrb.mxu0 %v6390_v18  ;;  %4408 = vmatpush.msrb.mxu1 %v6406_v31 }
 0x820   :  { %4432 = vmatpush.msrb.mxu2 %v6390_v18  ;;  %4452 = vmatpush.msrb.mxu3 %v6406_v31  ;;  %v6429_v18 = vld [vmem:[%s13760_s10 + $0x380] sm:$0xff]  ;;  %v4501_v31 = vrot.slane %v12115_v46, 3 }
 0x821   :  { %4389 = vmatpush.msrb.mxu0 %v6389_v5  ;;  %4409 = vmatpush.msrb.mxu1 %v6405_v49 }
 0x822   :  { %4433 = vmatpush.msrb.mxu2 %v6389_v5  ;;  %4453 = vmatpush.msrb.mxu3 %v6405_v49  ;;  %v4502_v5 = vrot.slane %v12117_v28, 3  ;;  %v4545_v49 = vrot.slane %v12119_v45, 3 }
 0x823   :  { %4089 = vperm.xlu0 %6850, %v4081_v11   ;;  %4390 = vmatpush.msrb.mxu0 %v6388_v19  ;;  %v6460_v11 = vld [vmem:[%s13760_s10 + $0x478] sm:$0xff] }
 0x824   :  { %4410 = vmatpush.msrb.mxu1 %v6404_v21  ;;  %4434 = vmatpush.msrb.mxu2 %v6388_v19  ;;  %v4546_v19 = vrot.slane %v12121_v23, 3 }
 0x825   :  { %4454 = vmatpush.msrb.mxu3 %v6404_v21  ;;  %4391 = vmatpush.msrb.mxu0 %v6387_v61  ;;  %v6476_v21 = vld [vmem:[%s13760_s10 + $0x4f8] sm:$0xff] }
 0x826   :  { %4411 = vmatpush.msrb.mxu1 %v6403_v12  ;;  %4435 = vmatpush.msrb.mxu2 %v6387_v61  ;;  %v6459_v61 = vld [vmem:[%s13760_s10 + $0x470] sm:$0xff] }
 0x827   :  { %4455 = vmatpush.msrb.mxu3 %v6403_v12  ;;  %4392 = vmatpush.msrb.mxu0 %v6386_v63  ;;  %v6475_v12 = vld [vmem:[%s13760_s10 + $0x4f0] sm:$0xff] }
 0x828   :  { %4412 = vmatpush.msrb.mxu1 %v6402_v38  ;;  %4436 = vmatpush.msrb.mxu2 %v6386_v63  ;;  %v6458_v63 = vld [vmem:[%s13760_s10 + $0x468] sm:$0xff] }
 0x829   :  { %4456 = vmatpush.msrb.mxu3 %v6402_v38  ;;  %4393 = vmatpush.msrb.mxu0 %v6385_v13  ;;  %v6474_v38 = vld [vmem:[%s13760_s10 + $0x4e8] sm:$0xff] }
 0x82a   :  { %4413 = vmatpush.msrb.mxu1 %v6401_v14  ;;  %4437 = vmatpush.msrb.mxu2 %v6385_v13  ;;  %v6457_v13 = vld [vmem:[%s13760_s10 + $0x460] sm:$0xff] }
 0x82b   :  { %4457 = vmatpush.msrb.mxu3 %v6401_v14  ;;  %4394 = vmatpush.msrb.mxu0 %v6384_v4  ;;  %v6473_v14 = vld [vmem:[%s13760_s10 + $0x4e0] sm:$0xff] }
 0x82c   :  { %4414 = vmatpush.msrb.mxu1 %v6400_v42  ;;  %4438 = vmatpush.msrb.mxu2 %v6384_v4  ;;  %v6456_v4 = vld [vmem:[%s13760_s10 + $0x458] sm:$0xff] }
 0x82d   :  { %4458 = vmatpush.msrb.mxu3 %v6400_v42  ;;  %4395 = vmatpush.msrb.mxu0 %v6383_v57  ;;  %v6472_v42 = vld [vmem:[%s13760_s10 + $0x4d8] sm:$0xff] }
 0x82e   :  { %4415 = vmatpush.msrb.mxu1 %v6399_v55  ;;  %4439 = vmatpush.msrb.mxu2 %v6383_v57  ;;  %v6455_v57 = vld [vmem:[%s13760_s10 + $0x450] sm:$0xff] }
 0x82f   :  { %4459 = vmatpush.msrb.mxu3 %v6399_v55  ;;  %4396 = vmatpush.msrb.mxu0 %v6382_v29  ;;  %v6471_v55 = vld [vmem:[%s13760_s10 + $0x4d0] sm:$0xff] }
 0x830   :  { %4416 = vmatpush.msrb.mxu1 %v6398_v47  ;;  %4440 = vmatpush.msrb.mxu2 %v6382_v29  ;;  %v6454_v29 = vld [vmem:[%s13760_s10 + $0x448] sm:$0xff] }
 0x831   :  { %4460 = vmatpush.msrb.mxu3 %v6398_v47  ;;  %4397 = vmatpush.msrb.mxu0 %v6381_v53  ;;  %v6470_v47 = vld [vmem:[%s13760_s10 + $0x4c8] sm:$0xff] }
 0x832   :  { %4417 = vmatpush.msrb.mxu1 %v6397_v17  ;;  %4441 = vmatpush.msrb.mxu2 %v6381_v53  ;;  %v6453_v53 = vld [vmem:[%s13760_s10 + $0x440] sm:$0xff] }
 0x833   :  { %4461 = vmatpush.msrb.mxu3 %v6397_v17  ;;  %4398 = vmatmul.f32.vlgmr.msrb.gmra.mxu0 %v4378_v24  ;;  %v6469_v17 = vld [vmem:[%s13760_s10 + $0x4c0] sm:$0xff]  ;;  %v6452_v24 = vld [vmem:[%s13760_s10 + $0x438] sm:$0xff] }
 0x834   :  { %4418 = vmatmul.f32.vlgmr.msrb.gmra.mxu1 %v4379_v30  ;;  %4442 = vmatmul.f32.vlgmr.msrb.gmra.mxu2 %v4422_v36  ;;  %v6468_v30 = vld [vmem:[%s13760_s10 + $0x4b8] sm:$0xff]  ;;  %v6451_v36 = vld [vmem:[%s13760_s10 + $0x430] sm:$0xff] }
 0x835   :  { %4462 = vmatmul.f32.vlgmr.msrb.gmra.mxu3 %v4423_v52  ;;  %4505 = vmatpush.msra.mxu0 %v6428_v2  ;;  %v6450_v52 = vld [vmem:[%s13760_s10 + $0x428] sm:$0xff] }
 0x836   :  { %4525 = vmatpush.msra.mxu1 %v6444_v9  ;;  %4549 = vmatpush.msra.mxu2 %v6428_v2  ;;  %v6467_v2 = vld [vmem:[%s13760_s10 + $0x4b0] sm:$0xff] }
 0x837   :  { %4569 = vmatpush.msra.mxu3 %v6444_v9  ;;  %4506 = vmatpush.msra.mxu0 %v6427_v39  ;;  %v6466_v9 = vld [vmem:[%s13760_s10 + $0x4a8] sm:$0xff] }
 0x838   :  { %4526 = vmatpush.msra.mxu1 %v6443_v40  ;;  %4550 = vmatpush.msra.mxu2 %v6427_v39  ;;  %v6449_v39 = vld [vmem:[%s13760_s10 + $0x420] sm:$0xff] }
 0x839   :  { %4570 = vmatpush.msra.mxu3 %v6443_v40  ;;  %4507 = vmatpush.msra.mxu0 %v6426_v50  ;;  %v6465_v40 = vld [vmem:[%s13760_s10 + $0x4a0] sm:$0xff] }
 0x83a   :  { %4527 = vmatpush.msra.mxu1 %v6442_v48  ;;  %4551 = vmatpush.msra.mxu2 %v6426_v50  ;;  %v6448_v50 = vld [vmem:[%s13760_s10 + $0x418] sm:$0xff] }
 0x83b   :  { %4571 = vmatpush.msra.mxu3 %v6442_v48  ;;  %4508 = vmatpush.msra.mxu0 %v6425_v10  ;;  %v6464_v48 = vld [vmem:[%s13760_s10 + $0x498] sm:$0xff] }
 0x83c   :  { %4528 = vmatpush.msra.mxu1 %v6441_v27  ;;  %4552 = vmatpush.msra.mxu2 %v6425_v10  ;;  %v6447_v10 = vld [vmem:[%s13760_s10 + $0x410] sm:$0xff] }
 0x83d   :  { %4572 = vmatpush.msra.mxu3 %v6441_v27  ;;  %4509 = vmatpush.msra.mxu0 %v6424_v41  ;;  %v6463_v27 = vld [vmem:[%s13760_s10 + $0x490] sm:$0xff] }
 0x83e   :  { %4529 = vmatpush.msra.mxu1 %v6440_v26  ;;  %4553 = vmatpush.msra.mxu2 %v6424_v41  ;;  %v6446_v41 = vld [vmem:[%s13760_s10 + $0x408] sm:$0xff] }
 0x83f   :  { %4573 = vmatpush.msra.mxu3 %v6440_v26  ;;  %4510 = vmatpush.msra.mxu0 %v6423_v0  ;;  %v6462_v26 = vld [vmem:[%s13760_s10 + $0x488] sm:$0xff] }
 0x840   :  { %4530 = vmatpush.msra.mxu1 %v6439_v37  ;;  %4554 = vmatpush.msra.mxu2 %v6423_v0  ;;  %v6445_v0 = vld [vmem:[%s13760_s10 + $0x400] sm:$0xff] }
 0x841   :  { %4574 = vmatpush.msra.mxu3 %v6439_v37  ;;  %4511 = vmatpush.msra.mxu0 %v6422_v25  ;;  %v6461_v37 = vld [vmem:[%s13760_s10 + $0x480] sm:$0xff] }
 0x842   :  { %4531 = vmatpush.msra.mxu1 %v6438_v59  ;;  %4555 = vmatpush.msra.mxu2 %v6422_v25  ;;  %v4624_v25 = vrot.slane %v12115_v46, 4 }
 0x843   :  { %4575 = vmatpush.msra.mxu3 %v6438_v59  ;;  %4512 = vmatpush.msra.mxu0 %v6421_v51  ;;  %v4625_v59 = vrot.slane %v12117_v28, 4 }
 0x844   :  { %4532 = vmatpush.msra.mxu1 %v6437_v32  ;;  %4556 = vmatpush.msra.mxu2 %v6421_v51  ;;  %v4668_v51 = vrot.slane %v12119_v45, 4 }
 0x845   :  { %4576 = vmatpush.msra.mxu3 %v6437_v32  ;;  %4513 = vmatpush.msra.mxu0 %v6420_v34  ;;  %v6492_v32 = vld [vmem:[%s13760_s10 + $0x578] sm:$0xff] }
 0x846   :  { %4533 = vmatpush.msra.mxu1 %v6436_v7  ;;  %4557 = vmatpush.msra.mxu2 %v6420_v34  ;;  %v4669_v34 = vrot.slane %v12121_v23, 4 }
 0x847   :  { %4577 = vmatpush.msra.mxu3 %v6436_v7  ;;  %4514 = vmatpush.msra.mxu0 %v6419_v60  ;;  %v6508_v7 = vld [vmem:[%s13760_s10 + $0x5f8] sm:$0xff] }
 0x848   :  { %4534 = vmatpush.msra.mxu1 %v6435_v22  ;;  %4558 = vmatpush.msra.mxu2 %v6419_v60  ;;  %v6491_v60 = vld [vmem:[%s13760_s10 + $0x570] sm:$0xff] }
 0x849   :  { %4578 = vmatpush.msra.mxu3 %v6435_v22  ;;  %4515 = vmatpush.msra.mxu0 %v6418_v15  ;;  %v6507_v22 = vld [vmem:[%s13760_s10 + $0x5f0] sm:$0xff] }
 0x84a   :  { %4535 = vmatpush.msra.mxu1 %v6434_v33  ;;  %4559 = vmatpush.msra.mxu2 %v6418_v15  ;;  %v6490_v15 = vld [vmem:[%s13760_s10 + $0x568] sm:$0xff] }
 0x84b   :  { %4579 = vmatpush.msra.mxu3 %v6434_v33  ;;  %4516 = vmatpush.msra.mxu0 %v6417_v16  ;;  %v6506_v33 = vld [vmem:[%s13760_s10 + $0x5e8] sm:$0xff] }
 0x84c   :  { %4536 = vmatpush.msra.mxu1 %v6433_v43  ;;  %4560 = vmatpush.msra.mxu2 %v6417_v16  ;;  %v6489_v16 = vld [vmem:[%s13760_s10 + $0x560] sm:$0xff] }
 0x84d   :  { %4580 = vmatpush.msra.mxu3 %v6433_v43  ;;  %4517 = vmatpush.msra.mxu0 %v6416_v44  ;;  %v6505_v43 = vld [vmem:[%s13760_s10 + $0x5e0] sm:$0xff] }
 0x84e   :  { %4537 = vmatpush.msra.mxu1 %v6432_v6  ;;  %4561 = vmatpush.msra.mxu2 %v6416_v44  ;;  %v6488_v44 = vld [vmem:[%s13760_s10 + $0x558] sm:$0xff] }
 0x84f   :  { %4581 = vmatpush.msra.mxu3 %v6432_v6  ;;  %4518 = vmatpush.msra.mxu0 %v6415_v8  ;;  %v6504_v6 = vld [vmem:[%s13760_s10 + $0x5d8] sm:$0xff] }
 0x850   :  { %4538 = vmatpush.msra.mxu1 %v6431_v20  ;;  %4562 = vmatpush.msra.mxu2 %v6415_v8  ;;  %v6487_v8 = vld [vmem:[%s13760_s10 + $0x550] sm:$0xff] }
 0x851   :  { %4582 = vmatpush.msra.mxu3 %v6431_v20  ;;  %4519 = vmatpush.msra.mxu0 %v6414_v58  ;;  %v6503_v20 = vld [vmem:[%s13760_s10 + $0x5d0] sm:$0xff] }
 0x852   :  { %4539 = vmatpush.msra.mxu1 %v6430_v1  ;;  %4563 = vmatpush.msra.mxu2 %v6414_v58  ;;  %v6486_v58 = vld [vmem:[%s13760_s10 + $0x548] sm:$0xff] }
 0x853   :  { %4583 = vmatpush.msra.mxu3 %v6430_v1  ;;  %4520 = vmatpush.msra.mxu0 %v6413_v3  ;;  %v6502_v1 = vld [vmem:[%s13760_s10 + $0x5c8] sm:$0xff] }
 0x854   :  { %4540 = vmatpush.msra.mxu1 %v6429_v18  ;;  %4564 = vmatpush.msra.mxu2 %v6413_v3  ;;  %v6485_v3 = vld [vmem:[%s13760_s10 + $0x540] sm:$0xff] }
 0x855   :  { %4584 = vmatpush.msra.mxu3 %v6429_v18  ;;  %4521 = vmatmul.f32.vlgmr.msra.gmra.mxu0 %v4501_v31  ;;  %v6501_v18 = vld [vmem:[%s13760_s10 + $0x5c0] sm:$0xff]  ;;  %v6484_v31 = vld [vmem:[%s13760_s10 + $0x538] sm:$0xff] }
 0x856   :  { %4541 = vmatmul.f32.vlgmr.msra.gmra.mxu1 %v4502_v5  ;;  %4565 = vmatmul.f32.vlgmr.msra.gmra.mxu2 %v4545_v49  ;;  %v6500_v5 = vld [vmem:[%s13760_s10 + $0x5b8] sm:$0xff]  ;;  %v6483_v49 = vld [vmem:[%s13760_s10 + $0x530] sm:$0xff] }
 0x857   :  { %4585 = vmatmul.f32.vlgmr.msra.gmra.mxu3 %v4546_v19  ;;  %4628 = vmatpush.msrb.mxu0 %v6460_v11  ;;  %v6482_v19 = vld [vmem:[%s13760_s10 + $0x528] sm:$0xff] }
 0x858   :  { %4648 = vmatpush.msrb.mxu1 %v6476_v21  ;;  %4672 = vmatpush.msrb.mxu2 %v6460_v11  ;;  %v6499_v11 = vld [vmem:[%s13760_s10 + $0x5b0] sm:$0xff] }
 0x859   :  { %4692 = vmatpush.msrb.mxu3 %v6476_v21  ;;  %4629 = vmatpush.msrb.mxu0 %v6459_v61  ;;  %v6498_v21 = vld [vmem:[%s13760_s10 + $0x5a8] sm:$0xff] }
 0x85a   :  { %4649 = vmatpush.msrb.mxu1 %v6475_v12  ;;  %4673 = vmatpush.msrb.mxu2 %v6459_v61  ;;  %v6481_v61 = vld [vmem:[%s13760_s10 + $0x520] sm:$0xff] }
 0x85b   :  { %4693 = vmatpush.msrb.mxu3 %v6475_v12  ;;  %4630 = vmatpush.msrb.mxu0 %v6458_v63 }
 0x85c   :  { %4650 = vmatpush.msrb.mxu1 %v6474_v38  ;;  %4674 = vmatpush.msrb.mxu2 %v6458_v63 }
 0x85d   :  { %4694 = vmatpush.msrb.mxu3 %v6474_v38  ;;  %4631 = vmatpush.msrb.mxu0 %v6457_v13  ;;  %v6497_v38 = vld [vmem:[%s13760_s10 + $0x5a0] sm:$0xff] }
 0x85e   :  { %4651 = vmatpush.msrb.mxu1 %v6473_v14  ;;  %4675 = vmatpush.msrb.mxu2 %v6457_v13 }
 0x85f   :  { %4695 = vmatpush.msrb.mxu3 %v6473_v14  ;;  %4632 = vmatpush.msrb.mxu0 %v6456_v4  ;;  %v6480_v14 = vld [vmem:[%s13760_s10 + $0x518] sm:$0xff] }
 0x860   :  { %4652 = vmatpush.msrb.mxu1 %v6472_v42  ;;  %4676 = vmatpush.msrb.mxu2 %v6456_v4  ;;  %v6496_v4 = vld [vmem:[%s13760_s10 + $0x598] sm:$0xff] }
 0x861   :  { %4696 = vmatpush.msrb.mxu3 %v6472_v42  ;;  %4633 = vmatpush.msrb.mxu0 %v6455_v57  ;;  %v6479_v42 = vld [vmem:[%s13760_s10 + $0x510] sm:$0xff] }
 0x862   :  { %4653 = vmatpush.msrb.mxu1 %v6471_v55  ;;  %4677 = vmatpush.msrb.mxu2 %v6455_v57  ;;  %v6495_v57 = vld [vmem:[%s13760_s10 + $0x590] sm:$0xff] }
 0x863   :  { %4697 = vmatpush.msrb.mxu3 %v6471_v55  ;;  %4634 = vmatpush.msrb.mxu0 %v6454_v29  ;;  %v6478_v55 = vld [vmem:[%s13760_s10 + $0x508] sm:$0xff] }
 0x864   :  { %4654 = vmatpush.msrb.mxu1 %v6470_v47  ;;  %4678 = vmatpush.msrb.mxu2 %v6454_v29  ;;  %v6494_v29 = vld [vmem:[%s13760_s10 + $0x588] sm:$0xff] }
 0x865   :  { %4698 = vmatpush.msrb.mxu3 %v6470_v47  ;;  %4635 = vmatpush.msrb.mxu0 %v6453_v53 }
 0x866   :  { %4655 = vmatpush.msrb.mxu1 %v6469_v17  ;;  %4679 = vmatpush.msrb.mxu2 %v6453_v53 }
 0x867   :  { %4699 = vmatpush.msrb.mxu3 %v6469_v17  ;;  %4636 = vmatpush.msrb.mxu0 %v6452_v24  ;;  %v6477_v17 = vld [vmem:[%s13760_s10 + $0x500] sm:$0xff] }
 0x868   :  { %4656 = vmatpush.msrb.mxu1 %v6468_v30  ;;  %4680 = vmatpush.msrb.mxu2 %v6452_v24 }
 0x869   :  { %4700 = vmatpush.msrb.mxu3 %v6468_v30  ;;  %4637 = vmatpush.msrb.mxu0 %v6451_v36  ;;  %v6493_v30 = vld [vmem:[%s13760_s10 + $0x580] sm:$0xff] }
 0x86a   :  { %4657 = vmatpush.msrb.mxu1 %v6467_v2  ;;  %4681 = vmatpush.msrb.mxu2 %v6451_v36 }
 0x86b   :  { %4701 = vmatpush.msrb.mxu3 %v6467_v2  ;;  %4638 = vmatpush.msrb.mxu0 %v6450_v52  ;;  %v4747_v2 = vrot.slane %v12115_v46, 5 }
 0x86c   :  { %4658 = vmatpush.msrb.mxu1 %v6466_v9  ;;  %4682 = vmatpush.msrb.mxu2 %v6450_v52 }
 0x86d   :  { %4702 = vmatpush.msrb.mxu3 %v6466_v9  ;;  %4639 = vmatpush.msrb.mxu0 %v6449_v39  ;;  %v4748_v9 = vrot.slane %v12117_v28, 5 }
 0x86e   :  { %4659 = vmatpush.msrb.mxu1 %v6465_v40  ;;  %4683 = vmatpush.msrb.mxu2 %v6449_v39  ;;  %v4791_v39 = vrot.slane %v12119_v45, 5 }
 0x86f   :  { %4703 = vmatpush.msrb.mxu3 %v6465_v40  ;;  %4640 = vmatpush.msrb.mxu0 %v6448_v50  ;;  %v6524_v40 = vld [vmem:[%s13760_s10 + $0x678] sm:$0xff] }
 0x870   :  { %4660 = vmatpush.msrb.mxu1 %v6464_v48  ;;  %4684 = vmatpush.msrb.mxu2 %v6448_v50 }
 0x871   :  { %4704 = vmatpush.msrb.mxu3 %v6464_v48  ;;  %4641 = vmatpush.msrb.mxu0 %v6447_v10  ;;  %v4792_v48 = vrot.slane %v12121_v23, 5 }
 0x872   :  { %4661 = vmatpush.msrb.mxu1 %v6463_v27  ;;  %4685 = vmatpush.msrb.mxu2 %v6447_v10  ;;  %v6540_v10 = vld [vmem:[%s13760_s10 + $0x6f8] sm:$0xff] }
 0x873   :  { %4705 = vmatpush.msrb.mxu3 %v6463_v27  ;;  %4642 = vmatpush.msrb.mxu0 %v6446_v41 }
 0x874   :  { %4662 = vmatpush.msrb.mxu1 %v6462_v26  ;;  %4686 = vmatpush.msrb.mxu2 %v6446_v41  ;;  %v6523_v41 = vld [vmem:[%s13760_s10 + $0x670] sm:$0xff] }
 0x875   :  { %4706 = vmatpush.msrb.mxu3 %v6462_v26  ;;  %4643 = vmatpush.msrb.mxu0 %v6445_v0  ;;  %v6539_v26 = vld [vmem:[%s13760_s10 + $0x6f0] sm:$0xff] }
 0x876   :  { %4663 = vmatpush.msrb.mxu1 %v6461_v37  ;;  %4687 = vmatpush.msrb.mxu2 %v6445_v0  ;;  %v6522_v0 = vld [vmem:[%s13760_s10 + $0x668] sm:$0xff] }
 0x877   :  { %4707 = vmatpush.msrb.mxu3 %v6461_v37  ;;  %4644 = vmatmul.f32.vlgmr.msrb.gmra.mxu0 %v4624_v25  ;;  %v6538_v37 = vld [vmem:[%s13760_s10 + $0x6e8] sm:$0xff] }
 0x878   :  { %4664 = vmatmul.f32.vlgmr.msrb.gmra.mxu1 %v4625_v59  ;;  %4688 = vmatmul.f32.vlgmr.msrb.gmra.mxu2 %v4668_v51  ;;  %v6521_v59 = vld [vmem:[%s13760_s10 + $0x660] sm:$0xff] }
 0x879   :  { %4708 = vmatmul.f32.vlgmr.msrb.gmra.mxu3 %v4669_v34  ;;  %4751 = vmatpush.msra.mxu0 %v6492_v32 }
 0x87a   :  { %4771 = vmatpush.msra.mxu1 %v6508_v7  ;;  %4795 = vmatpush.msra.mxu2 %v6492_v32  ;;  %v6537_v32 = vld [vmem:[%s13760_s10 + $0x6e0] sm:$0xff] }
 0x87b   :  { %4815 = vmatpush.msra.mxu3 %v6508_v7  ;;  %4752 = vmatpush.msra.mxu0 %v6491_v60  ;;  %v6520_v7 = vld [vmem:[%s13760_s10 + $0x658] sm:$0xff] }
 0x87c   :  { %4772 = vmatpush.msra.mxu1 %v6507_v22  ;;  %4796 = vmatpush.msra.mxu2 %v6491_v60 }
 0x87d   :  { %4816 = vmatpush.msra.mxu3 %v6507_v22  ;;  %4753 = vmatpush.msra.mxu0 %v6490_v15  ;;  %v6536_v22 = vld [vmem:[%s13760_s10 + $0x6d8] sm:$0xff] }
 0x87e   :  { %4773 = vmatpush.msra.mxu1 %v6506_v33  ;;  %4797 = vmatpush.msra.mxu2 %v6490_v15  ;;  %v6519_v15 = vld [vmem:[%s13760_s10 + $0x650] sm:$0xff] }
 0x87f   :  { %4817 = vmatpush.msra.mxu3 %v6506_v33  ;;  %4754 = vmatpush.msra.mxu0 %v6489_v16  ;;  %v6535_v33 = vld [vmem:[%s13760_s10 + $0x6d0] sm:$0xff] }
 0x880   :  { %4774 = vmatpush.msra.mxu1 %v6505_v43  ;;  %4798 = vmatpush.msra.mxu2 %v6489_v16  ;;  %v6518_v16 = vld [vmem:[%s13760_s10 + $0x648] sm:$0xff] }
 0x881   :  { %4818 = vmatpush.msra.mxu3 %v6505_v43  ;;  %4755 = vmatpush.msra.mxu0 %v6488_v44  ;;  %v6534_v43 = vld [vmem:[%s13760_s10 + $0x6c8] sm:$0xff] }
 0x882   :  { %4775 = vmatpush.msra.mxu1 %v6504_v6  ;;  %4799 = vmatpush.msra.mxu2 %v6488_v44  ;;  %v6517_v44 = vld [vmem:[%s13760_s10 + $0x640] sm:$0xff] }
 0x883   :  { %4819 = vmatpush.msra.mxu3 %v6504_v6  ;;  %4756 = vmatpush.msra.mxu0 %v6487_v8  ;;  %v6533_v6 = vld [vmem:[%s13760_s10 + $0x6c0] sm:$0xff] }
 0x884   :  { %4776 = vmatpush.msra.mxu1 %v6503_v20  ;;  %4800 = vmatpush.msra.mxu2 %v6487_v8  ;;  %v6516_v8 = vld [vmem:[%s13760_s10 + $0x638] sm:$0xff] }
 0x885   :  { %4820 = vmatpush.msra.mxu3 %v6503_v20  ;;  %4757 = vmatpush.msra.mxu0 %v6486_v58  ;;  %v6532_v20 = vld [vmem:[%s13760_s10 + $0x6b8] sm:$0xff] }
 0x886   :  { %4777 = vmatpush.msra.mxu1 %v6502_v1  ;;  %4801 = vmatpush.msra.mxu2 %v6486_v58  ;;  %v6515_v58 = vld [vmem:[%s13760_s10 + $0x630] sm:$0xff] }
 0x887   :  { %4821 = vmatpush.msra.mxu3 %v6502_v1  ;;  %4758 = vmatpush.msra.mxu0 %v6485_v3  ;;  %v6531_v1 = vld [vmem:[%s13760_s10 + $0x6b0] sm:$0xff] }
 0x888   :  { %4778 = vmatpush.msra.mxu1 %v6501_v18  ;;  %4802 = vmatpush.msra.mxu2 %v6485_v3  ;;  %v6514_v3 = vld [vmem:[%s13760_s10 + $0x628] sm:$0xff] }
 0x889   :  { %4822 = vmatpush.msra.mxu3 %v6501_v18  ;;  %4759 = vmatpush.msra.mxu0 %v6484_v31  ;;  %v6530_v18 = vld [vmem:[%s13760_s10 + $0x6a8] sm:$0xff] }
 0x88a   :  { %4779 = vmatpush.msra.mxu1 %v6500_v5  ;;  %4803 = vmatpush.msra.mxu2 %v6484_v31  ;;  %v6513_v31 = vld [vmem:[%s13760_s10 + $0x620] sm:$0xff] }
 0x88b   :  { %4823 = vmatpush.msra.mxu3 %v6500_v5  ;;  %4760 = vmatpush.msra.mxu0 %v6483_v49  ;;  %v6529_v5 = vld [vmem:[%s13760_s10 + $0x6a0] sm:$0xff] }
 0x88c   :  { %4780 = vmatpush.msra.mxu1 %v6499_v11  ;;  %4804 = vmatpush.msra.mxu2 %v6483_v49  ;;  %v4196_v12 = vpop.f32.mrf.mxu0  ;;  %v4216_v63 = vpop.f32.mrf.mxu1  ;;  %v6512_v49 = vld [vmem:[%s13760_s10 + $0x618] sm:$0xff] }
 0x88d   :  { %4824 = vmatpush.msra.mxu3 %v6499_v11  ;;  %4761 = vmatpush.msra.mxu0 %v6482_v19  ;;  %v4217_v13 = vadd.f32 %v4216_v63, %v4196_v12  ;;  %v6527_v63 = vld [vmem:[%s13760_s10 + $0x690] sm:$0xff] }
 0x88e   :  { %4781 = vmatpush.msra.mxu1 %v6498_v21  ;;  %4805 = vmatpush.msra.mxu2 %v6482_v19  ;;  %v6528_v19 = vld [vmem:[%s13760_s10 + $0x698] sm:$0xff] }
 0x88f   :  { %4825 = vmatpush.msra.mxu3 %v6498_v21  ;;  %4762 = vmatpush.msra.mxu0 %v6481_v61 }
 0x890   :  { %4782 = vmatpush.msra.mxu1 %v6497_v38  ;;  %4806 = vmatpush.msra.mxu2 %v6481_v61  ;;  %v6511_v61 = vld [vmem:[%s13760_s10 + $0x610] sm:$0xff] }
 0x891   :  { %4826 = vmatpush.msra.mxu3 %v6497_v38  ;;  %4763 = vmatpush.msra.mxu0 %v6480_v14  ;;  %v6510_v38 = vld [vmem:[%s13760_s10 + $0x608] sm:$0xff] }
 0x892   :  { %4783 = vmatpush.msra.mxu1 %v6496_v4  ;;  %4807 = vmatpush.msra.mxu2 %v6480_v14  ;;  %v6526_v14 = vld [vmem:[%s13760_s10 + $0x688] sm:$0xff] }
 0x893   :  { %4827 = vmatpush.msra.mxu3 %v6496_v4  ;;  %4764 = vmatpush.msra.mxu0 %v6479_v42  ;;  %v4242_v47 = vpop.f32.mrf.mxu2  ;;  %v4262_v53 = vpop.f32.mrf.mxu3  ;;  %v6509_v4 = vld [vmem:[%s13760_s10 + $0x600] sm:$0xff] }
 0x894   :  { %4784 = vmatpush.msra.mxu1 %v6495_v57  ;;  %4808 = vmatpush.msra.mxu2 %v6479_v42  ;;  %v4263_v24 = vadd.f32 %v4262_v53, %v4242_v47  ;;  %v6525_v42 = vld [vmem:[%s13760_s10 + $0x680] sm:$0xff]  ;;  %v4871_v53 = vrot.slane %v12117_v28, 6 }
 0x895   :  { %4828 = vmatpush.msra.mxu3 %v6495_v57  ;;  %4765 = vmatpush.msra.mxu0 %v6478_v55 }
 0x896   :  { %4785 = vmatpush.msra.mxu1 %v6494_v29  ;;  %4809 = vmatpush.msra.mxu2 %v6478_v55  ;;  %v4282_v36 = vpop.f32.mrf.mxu0  ;;  %v4302_v50 = vpop.f32.mrf.mxu1 }
 0x897   :  { %4829 = vmatpush.msra.mxu3 %v6494_v29  ;;  %4766 = vmatpush.msra.mxu0 %v6477_v17  ;;  %v4283_v52 = vadd.f32 %v4282_v36, %v4217_v13  ;;  %v4870_v29 = vrot.slane %v12115_v46, 6  ;;  %v6572_v36 = vld [vmem:[%s13760_s10 + $0x7f8] sm:$0xff] }
 0x898   :  { %4786 = vmatpush.msra.mxu1 %v6493_v30  ;;  %4810 = vmatpush.msra.mxu2 %v6477_v17  ;;  %v4914_v17 = vrot.slane %v12119_v45, 6 }
 0x899   :  { %4830 = vmatpush.msra.mxu3 %v6493_v30  ;;  %4767 = vmatmul.f32.vlgmr.msra.gmra.mxu0 %v4747_v2  ;;  %v12540_v27 = vadd.f32 %v4302_v50, %v4283_v52  ;;  %v4915_v30 = vrot.slane %v12121_v23, 6  ;;  %v6555_v52 = vld [vmem:[%s13760_s10 + $0x770] sm:$0xff]  ;;  %v6553_v50 = vld [vmem:[%s13760_s10 + $0x760] sm:$0xff] }
 0x89a   :  { %4787 = vmatmul.f32.vlgmr.msra.gmra.mxu1 %v4748_v9  ;;  %4811 = vmatmul.f32.vlgmr.msra.gmra.mxu2 %v4791_v39  ;;  %v6571_v9 = vld [vmem:[%s13760_s10 + $0x7f0] sm:$0xff]  ;;  %v6554_v39 = vld [vmem:[%s13760_s10 + $0x768] sm:$0xff] }
 0x89b   :  { %4831 = vmatmul.f32.vlgmr.msra.gmra.mxu3 %v4792_v48  ;;  %4874 = vmatpush.msrb.mxu0 %v6524_v40  ;;  %v6569_v48 = vld [vmem:[%s13760_s10 + $0x7e0] sm:$0xff] }
 0x89c   :  { %4894 = vmatpush.msrb.mxu1 %v6540_v10  ;;  %4918 = vmatpush.msrb.mxu2 %v6524_v40  ;;  %v6570_v40 = vld [vmem:[%s13760_s10 + $0x7e8] sm:$0xff] }
 0x89d   :  { %4938 = vmatpush.msrb.mxu3 %v6540_v10  ;;  %4875 = vmatpush.msrb.mxu0 %v6523_v41  ;;  %v4322_v25 = vpop.f32.mrf.mxu2  ;;  %v4342_v34 = vpop.f32.mrf.mxu3 }
 0x89e   :  { %4895 = vmatpush.msrb.mxu1 %v6539_v26  ;;  %4919 = vmatpush.msrb.mxu2 %v6523_v41  ;;  %v4323_v51 = vadd.f32 %v4322_v25, %v4263_v24  ;;  %v6556_v24 = vld [vmem:[%s13760_s10 + $0x778] sm:$0xff]  ;;  %v4025_v10 = vpop.xlane.xlu2 %4024  ;;  %v6567_v25 = vld [vmem:[%s13760_s10 + $0x7d0] sm:$0xff] }
 0x89f   :  { %4939 = vmatpush.msrb.mxu3 %v6539_v26  ;;  %4876 = vmatpush.msrb.mxu0 %v6522_v0  ;;  %v6552_v41 = vld [vmem:[%s13760_s10 + $0x758] sm:$0xff] }
 0x8a0   :  { %4896 = vmatpush.msrb.mxu1 %v6538_v37  ;;  %4920 = vmatpush.msrb.mxu2 %v6522_v0  ;;  %v12563_v60 = vadd.f32 %v4342_v34, %v4323_v51  ;;  %v6568_v26 = vld [vmem:[%s13760_s10 + $0x7d8] sm:$0xff]  ;;  %v6551_v0 = vld [vmem:[%s13760_s10 + $0x750] sm:$0xff]  ;;  %v6566_v51 = vld [vmem:[%s13760_s10 + $0x7c8] sm:$0xff] }
 0x8a1   :  { %4940 = vmatpush.msrb.mxu3 %v6538_v37  ;;  %4877 = vmatpush.msrb.mxu0 %v6521_v59 }
 0x8a2   :  { %4897 = vmatpush.msrb.mxu1 %v6537_v32  ;;  %4921 = vmatpush.msrb.mxu2 %v6521_v59  ;;  %v6550_v59 = vld [vmem:[%s13760_s10 + $0x748] sm:$0xff] }
 0x8a3   :  { %4941 = vmatpush.msrb.mxu3 %v6537_v32  ;;  %4878 = vmatpush.msrb.mxu0 %v6520_v7  ;;  %v6549_v32 = vld [vmem:[%s13760_s10 + $0x740] sm:$0xff] }
 0x8a4   :  { %4898 = vmatpush.msrb.mxu1 %v6536_v22  ;;  %4922 = vmatpush.msrb.mxu2 %v6520_v7  ;;  %v6565_v7 = vld [vmem:[%s13760_s10 + $0x7c0] sm:$0xff] }
 0x8a5   :  { %4942 = vmatpush.msrb.mxu3 %v6536_v22  ;;  %4879 = vmatpush.msrb.mxu0 %v6519_v15  ;;  %v6564_v22 = vld [vmem:[%s13760_s10 + $0x7b8] sm:$0xff] }
 0x8a6   :  { %4899 = vmatpush.msrb.mxu1 %v6535_v33  ;;  %4923 = vmatpush.msrb.mxu2 %v6519_v15  ;;  %v6547_v15 = vld [vmem:[%s13760_s10 + $0x730] sm:$0xff] }
 0x8a7   :  { %4943 = vmatpush.msrb.mxu3 %v6535_v33  ;;  %4880 = vmatpush.msrb.mxu0 %v6518_v16 }
 0x8a8   :  { %4900 = vmatpush.msrb.mxu1 %v6534_v43  ;;  %4924 = vmatpush.msrb.mxu2 %v6518_v16  ;;  %v6563_v16 = vld [vmem:[%s13760_s10 + $0x7b0] sm:$0xff] }
 0x8a9   :  { %4944 = vmatpush.msrb.mxu3 %v6534_v43  ;;  %4881 = vmatpush.msrb.mxu0 %v6517_v44  ;;  %v6546_v43 = vld [vmem:[%s13760_s10 + $0x728] sm:$0xff] }
 0x8aa   :  { %4901 = vmatpush.msrb.mxu1 %v6533_v6  ;;  %4925 = vmatpush.msrb.mxu2 %v6517_v44  ;;  %v6562_v44 = vld [vmem:[%s13760_s10 + $0x7a8] sm:$0xff] }
 0x8ab   :  { %4945 = vmatpush.msrb.mxu3 %v6533_v6  ;;  %4882 = vmatpush.msrb.mxu0 %v6516_v8  ;;  %v6545_v6 = vld [vmem:[%s13760_s10 + $0x720] sm:$0xff] }
 0x8ac   :  { %4902 = vmatpush.msrb.mxu1 %v6532_v20  ;;  %4926 = vmatpush.msrb.mxu2 %v6516_v8  ;;  %v6561_v8 = vld [vmem:[%s13760_s10 + $0x7a0] sm:$0xff] }
 0x8ad   :  { %4946 = vmatpush.msrb.mxu3 %v6532_v20  ;;  %4883 = vmatpush.msrb.mxu0 %v6515_v58  ;;  %v6544_v20 = vld [vmem:[%s13760_s10 + $0x718] sm:$0xff] }
 0x8ae   :  { %4903 = vmatpush.msrb.mxu1 %v6531_v1  ;;  %4927 = vmatpush.msrb.mxu2 %v6515_v58 }
 0x8af   :  { %4947 = vmatpush.msrb.mxu3 %v6531_v1  ;;  %4884 = vmatpush.msrb.mxu0 %v6514_v3  ;;  %v6560_v1 = vld [vmem:[%s13760_s10 + $0x798] sm:$0xff] }
 0x8b0   :  { %4904 = vmatpush.msrb.mxu1 %v6530_v18  ;;  %4928 = vmatpush.msrb.mxu2 %v6514_v3  ;;  %v4399_v11 = vpop.f32.mrf.mxu0 }
 0x8b1   :  { %4948 = vmatpush.msrb.mxu3 %v6530_v18  ;;  %4885 = vmatpush.msrb.mxu0 %v6513_v31  ;;  %v4419_v21 = vpop.f32.mrf.mxu1  ;;  %v6543_v18 = vld [vmem:[%s13760_s10 + $0x710] sm:$0xff] }
 0x8b2   :  { %4905 = vmatpush.msrb.mxu1 %v6529_v5  ;;  %4929 = vmatpush.msrb.mxu2 %v6513_v31  ;;  %v4420_v12 = vadd.f32 %v4419_v21, %v4399_v11  ;;  %v6558_v21 = vld [vmem:[%s13760_s10 + $0x788] sm:$0xff] }
 0x8b3   :  { %4949 = vmatpush.msrb.mxu3 %v6529_v5  ;;  %4886 = vmatpush.msrb.mxu0 %v6512_v49  ;;  %v6559_v5 = vld [vmem:[%s13760_s10 + $0x790] sm:$0xff] }
 0x8b4   :  { %4906 = vmatpush.msrb.mxu1 %v6528_v19  ;;  %4930 = vmatpush.msrb.mxu2 %v6512_v49  ;;  %v12626_v13 = vadd.f32 %v4420_v12, %v12540_v27  ;;  %v4019_v27 = vpop.xlane.xlu0 %4018  ;;  %v6542_v49 = vld [vmem:[%s13760_s10 + $0x708] sm:$0xff]  ;;  %v6557_v12 = vld [vmem:[%s13760_s10 + $0x780] sm:$0xff] }
 0x8b5   :  { %4950 = vmatpush.msrb.mxu3 %v6528_v19  ;;  %4887 = vmatpush.msrb.mxu0 %v6511_v61  ;;  %v4027_v37 = vadd.f32 %v4025_v10, %v4019_v27  ;;  %v6581_v27 = vld [vmem:[%s13760_s10 + $0x840] sm:$0xff] }
 0x8b6   :  { %4907 = vmatpush.msrb.mxu1 %v6527_v63  ;;  %4931 = vmatpush.msrb.mxu2 %v6511_v61  ;;  %v6541_v61 = vld [vmem:[%s13760_s10 + $0x700] sm:$0xff] }
 0x8b7   :  { %4951 = vmatpush.msrb.mxu3 %v6527_v63  ;;  %4888 = vmatpush.msrb.mxu0 %v6510_v38  ;;  %v4443_v57 = vpop.f32.mrf.mxu2  ;;  %v4029_v34 = vmul.f32 0.0025510204, %v4027_v37 }
 0x8b8   :  { %4908 = vmatpush.msrb.mxu1 %v6526_v14  ;;  %4932 = vmatpush.msrb.mxu2 %v6510_v38  ;;  %v4463_v55 = vpop.f32.mrf.mxu3 }
 0x8b9   :  { %4952 = vmatpush.msrb.mxu3 %v6526_v14  ;;  %4889 = vmatpush.msrb.mxu0 %v6509_v4  ;;  %v4464_v47 = vadd.f32 %v4463_v55, %v4443_v57  ;;  %v12701_v33 = vadd.f32 1e-05, %v4029_v34  ;;  %v4993_v14 = vrot.slane %v12115_v46, 7  ;;  %v5037_v57 = vrot.slane %v12119_v45, 7  ;;  %v6588_v55 = vld [vmem:[%s13760_s10 + $0x878] sm:$0xff]  ;;  %v6603_v45 = vld [vmem:[%s13760_s10 + $0x8f0] sm:$0xff] }
 0x8ba   :  { %4909 = vmatpush.msrb.mxu1 %v6525_v42  ;;  %4933 = vmatpush.msrb.mxu2 %v6509_v4  ;;  %v6594_v34 = vld [vmem:[%s13760_s10 + $0x8a8] sm:$0xff] }
 0x8bb   :  { %4953 = vmatpush.msrb.mxu3 %v6525_v42  ;;  %4890 = vmatmul.f32.vlgmr.msrb.gmra.mxu0 %v4870_v29  ;;  %v12648_v2 = vadd.f32 %v4464_v47, %v12563_v60  ;;  %v6548_v60 = vld [vmem:[%s13760_s10 + $0x738] sm:$0xff]  ;;  %6859 = vrsqrt.f32 %v12701_v33  ;;  %v4994_v42 = vrot.slane %v12117_v28, 7  ;;  %v5038_v29 = vrot.slane %v12121_v23, 7  ;;  %v6587_v28 = vld [vmem:[%s13760_s10 + $0x870] sm:$0xff]  ;;  %v6586_v23 = vld [vmem:[%s13760_s10 + $0x868] sm:$0xff] }
 0x8bc   :  { %4910 = vmatmul.f32.vlgmr.msrb.gmra.mxu1 %v4871_v53  ;;  %4934 = vmatmul.f32.vlgmr.msrb.gmra.mxu2 %v4914_v17  ;;  %v6604_v47 = vld [vmem:[%s13760_s10 + $0x8f8] sm:$0xff]  ;;  %v6602_v17 = vld [vmem:[%s13760_s10 + $0x8e8] sm:$0xff]  ;;  %vm4048_vm4 = vweird.f32 %v12701_v33 }
 0x8bd   :  { %4954 = vmatmul.f32.vlgmr.msrb.gmra.mxu3 %v4915_v30  ;;  %4997 = vmatpush.msra.mxu0 %v6556_v24  ;;  %v6585_v30 = vld [vmem:[%s13760_s10 + $0x860] sm:$0xff] }
 0x8be   :  { %5017 = vmatpush.msra.mxu1 %v6572_v36  ;;  %5041 = vmatpush.msra.mxu2 %v6556_v24 }
 0x8bf   :  { %5061 = vmatpush.msra.mxu3 %v6572_v36  ;;  %4998 = vmatpush.msra.mxu0 %v6555_v52  ;;  %v6601_v36 = vld [vmem:[%s13760_s10 + $0x8e0] sm:$0xff] }
 0x8c0   :  { %5018 = vmatpush.msra.mxu1 %v6571_v9  ;;  %5042 = vmatpush.msra.mxu2 %v6555_v52  ;;  %v6600_v52 = vld [vmem:[%s13760_s10 + $0x8d8] sm:$0xff] }
 0x8c1   :  { %5062 = vmatpush.msra.mxu3 %v6571_v9  ;;  %4999 = vmatpush.msra.mxu0 %v6554_v39  ;;  %v12737_v19 = vpop.eup %6859 }
 0x8c2   :  { %5019 = vmatpush.msra.mxu1 %v6570_v40  ;;  %5043 = vmatpush.msra.mxu2 %v6554_v39  ;;  %v4043_v38 = vmul.f32 %v12737_v19, %v12701_v33  ;;  %v6583_v39 = vld [vmem:[%s13760_s10 + $0x850] sm:$0xff]  ;;  %vm4049_vm3 = vweird.f32 %v12737_v19  ;;  %v4070_v33 = vpop.permute.xlu1 %4069 }
 0x8c3   :  { %5063 = vmatpush.msra.mxu3 %v6570_v40  ;;  %5000 = vmatpush.msra.mxu0 %v6553_v50  ;;  %v6599_v40 = vld [vmem:[%s13760_s10 + $0x8d0] sm:$0xff]  ;;  %vm4050_vm5 = vmor %vm4048_vm4, %vm4049_vm3 }
 0x8c4   :  { %5020 = vmatpush.msra.mxu1 %v6569_v48  ;;  %5044 = vmatpush.msra.mxu2 %v6553_v50  ;;  %v4044_v53 = vmul.f32 %v12737_v19, %v4043_v38  ;;  %v6582_v50 = vld [vmem:[%s13760_s10 + $0x848] sm:$0xff] }
 0x8c5   :  { %5064 = vmatpush.msra.mxu3 %v6569_v48  ;;  %5001 = vmatpush.msra.mxu0 %v6552_v41  ;;  %v6598_v48 = vld [vmem:[%s13760_s10 + $0x8c8] sm:$0xff] }
 0x8c6   :  { %5021 = vmatpush.msra.mxu1 %v6568_v26  ;;  %5045 = vmatpush.msra.mxu2 %v6552_v41  ;;  %v4045_v24 = vmul.f32 0.5, %v4044_v53  ;;  %v6597_v41 = vld [vmem:[%s13760_s10 + $0x8c0] sm:$0xff]  ;;  %v6619_v53 = vld [vmem:[%s13760_s10 + $0x970] sm:$0xff] }
 0x8c7   :  { %5065 = vmatpush.msra.mxu3 %v6568_v26  ;;  %5002 = vmatpush.msra.mxu0 %v6551_v0  ;;  %v6580_v26 = vld [vmem:[%s13760_s10 + $0x838] sm:$0xff] }
 0x8c8   :  { %5022 = vmatpush.msra.mxu1 %v6567_v25  ;;  %5046 = vmatpush.msra.mxu2 %v6551_v0  ;;  %v4046_v9 = vsub.f32 1.5, %v4045_v24  ;;  %v6596_v0 = vld [vmem:[%s13760_s10 + $0x8b8] sm:$0xff] }
 0x8c9   :  { %5066 = vmatpush.msra.mxu3 %v6567_v25  ;;  %5003 = vmatpush.msra.mxu0 %v6550_v59  ;;  %v6579_v25 = vld [vmem:[%s13760_s10 + $0x830] sm:$0xff]  ;;  %v6616_v24 = vld [vmem:[%s13760_s10 + $0x958] sm:$0xff] }
 0x8ca   :  { %5023 = vmatpush.msra.mxu1 %v6566_v51  ;;  %5047 = vmatpush.msra.mxu2 %v6550_v59  ;;  %v4047_v10 = vmul.f32 %v12737_v19, %v4046_v9  ;;  %v6595_v59 = vld [vmem:[%s13760_s10 + $0x8b0] sm:$0xff]  ;;  %v6630_v9 = vld [vmem:[%s13760_s10 + $0x9c8] sm:$0xff] }
 0x8cb   :  { %5067 = vmatpush.msra.mxu3 %v6566_v51  ;;  %5004 = vmatpush.msra.mxu0 %v6549_v32  ;;  %v6578_v51 = vld [vmem:[%s13760_s10 + $0x828] sm:$0xff] }
 0x8cc   :  { %5024 = vmatpush.msra.mxu1 %v6565_v7  ;;  %5048 = vmatpush.msra.mxu2 %v6549_v32  ;;  %v4051_v37 = vsel %vm4050_vm5, %v12737_v19, %v4047_v10  ;;  %v6611_v10 = vld [vmem:[%s13760_s10 + $0x930] sm:$0xff] }
 0x8cd   :  { %5068 = vmatpush.msra.mxu3 %v6565_v7  ;;  %5005 = vmatpush.msra.mxu0 %v6548_v60  ;;  %v4054_v32 = vmul.f32 %v4051_v37, %v12098_v54  ;;  %v4055_v7 = vmul.f32 %v4051_v37, %v12101_v35  ;;  %v6593_v54 = vld [vmem:[%s13760_s10 + $0x8a0] sm:$0xff] }
 0x8ce   :  { %5025 = vmatpush.msra.mxu1 %v6564_v22  ;;  %5049 = vmatpush.msra.mxu2 %v6548_v60  ;;  %v4058_v60 = vmul.f32 %v4051_v37, %v12092_v56  ;;  %v6576_v56 = vld [vmem:[%s13760_s10 + $0x818] sm:$0xff] }
 0x8cf   :  { %5069 = vmatpush.msra.mxu3 %v6564_v22  ;;  %5006 = vmatpush.msra.mxu0 %v6547_v15  ;;  %v6577_v22 = vld [vmem:[%s13760_s10 + $0x820] sm:$0xff] }
 0x8d0   :  { %5026 = vmatpush.msra.mxu1 %v6563_v16  ;;  %5050 = vmatpush.msra.mxu2 %v6547_v15  ;;  %v4059_v15 = vmul.f32 %v4051_v37, %v12095_v62  ;;  %v6592_v62 = vld [vmem:[%s13760_s10 + $0x898] sm:$0xff]  ;;  %v6625_v37 = vld [vmem:[%s13760_s10 + $0x9a0] sm:$0xff] }
 0x8d1   :  { %5070 = vmatpush.msra.mxu3 %v6563_v16  ;;  %5007 = vmatpush.msra.mxu0 %v6546_v43  ;;  %v4074_v16 = vmul.f32 %v4070_v33, %v4054_v32  ;;  %v6623_v32 = vld [vmem:[%s13760_s10 + $0x990] sm:$0xff] }
 0x8d2   :  { %5027 = vmatpush.msra.mxu1 %v6562_v44  ;;  %5051 = vmatpush.msra.mxu2 %v6546_v43  ;;  %v4522_v58 = vpop.f32.mrf.mxu0 }
 0x8d3   :  { %5071 = vmatpush.msra.mxu3 %v6562_v44  ;;  %5008 = vmatpush.msra.mxu0 %v6545_v6  ;;  %v4542_v3 = vpop.f32.mrf.mxu1  ;;  %v4075_v44 = vmul.f32 %v4070_v33, %v4055_v7  ;;  %v6622_v7 = vld [vmem:[%s13760_s10 + $0x988] sm:$0xff] }
 0x8d4   :  { %5028 = vmatpush.msra.mxu1 %v6561_v8  ;;  %5052 = vmatpush.msra.mxu2 %v6545_v6  ;;  %v4543_v31 = vadd.f32 %v4542_v3, %v4522_v58  ;;  %v4078_v6 = vmul.f32 %v4070_v33, %v4058_v60  ;;  %v4079_v58 = vmul.f32 %v4070_v33, %v4059_v15  ;;  %v4090_v3 = vpop.permute.xlu0 %4089  ;;  %v6605_v60 = vld [vmem:[%s13760_s10 + $0x900] sm:$0xff] }
 0x8d5   :  { %5072 = vmatpush.msra.mxu3 %v6561_v8  ;;  %5009 = vmatpush.msra.mxu0 %v6544_v20  ;;  %v6575_v8 = vld [vmem:[%s13760_s10 + $0x810] sm:$0xff]  ;;  %v4095_v19 = vadd.f32 %v4090_v3, %v4075_v44  ;;  %v6650_v44 = vld [vmem:[%s13760_s10 + $0xa68] sm:$0xff] }
 0x8d6   :  { %5029 = vmatpush.msra.mxu1 %v6560_v1  ;;  %5053 = vmatpush.msra.mxu2 %v6544_v20  ;;  %v12735_v11 = vadd.f32 %v4543_v31, %v12626_v13 }
 0x8d7   :  { %5073 = vmatpush.msra.mxu3 %v6560_v1  ;;  %5010 = vmatpush.msra.mxu0 %v6543_v18  ;;  %v6591_v1 = vld [vmem:[%s13760_s10 + $0x890] sm:$0xff] }
 0x8d8   :  { %5030 = vmatpush.msra.mxu1 %v6559_v5  ;;  %5054 = vmatpush.msra.mxu2 %v6543_v18  ;;  %v6574_v18 = vld [vmem:[%s13760_s10 + $0x808] sm:$0xff] }
 0x8d9   :  { %5074 = vmatpush.msra.mxu3 %v6559_v5  ;;  %5011 = vmatpush.msra.mxu0 %v6542_v49  ;;  %v4566_v63 = vpop.f32.mrf.mxu2  ;;  %v4094_v5 = vadd.f32 %v4090_v3, %v4074_v16  ;;  %v6668_v16 = vld [vmem:[%s13760_s10 + $0xaf8] sm:$0xff] }
 0x8da   :  { %5031 = vmatpush.msra.mxu1 %v6558_v21  ;;  %5055 = vmatpush.msra.mxu2 %v6542_v49  ;;  %v4586_v13 = vpop.f32.mrf.mxu3  ;;  %v6590_v49 = vld [vmem:[%s13760_s10 + $0x888] sm:$0xff] }
 0x8db   :  { %5075 = vmatpush.msra.mxu3 %v6558_v21  ;;  %5012 = vmatpush.msra.mxu0 %v6541_v61  ;;  %v4587_v4 = vadd.f32 %v4586_v13, %v4566_v63  ;;  %v4098_v21 = vadd.f32 %v4090_v3, %v4078_v6  ;;  %v12865_v13 = vmax.f32 %v4094_v5, 0.0  ;;  %v6666_v6 = vld [vmem:[%s13760_s10 + $0xae8] sm:$0xff] }
 0x8dc   :  { %5032 = vmatpush.msra.mxu1 %v6557_v12  ;;  %5056 = vmatpush.msra.mxu2 %v6541_v61  ;;  %v6573_v61 = vld [vmem:[%s13760_s10 + $0x800] sm:$0xff]  ;;  %v6646_v5 = vld [vmem:[%s13760_s10 + $0xa48] sm:$0xff] }
 0x8dd   :  { %5076 = vmatpush.msra.mxu3 %v6557_v12  ;;  %5013 = vmatmul.f32.vlgmr.msra.gmra.mxu0 %v4993_v14  ;;  %v12761_v46 = vadd.f32 %v4587_v4, %v12648_v2  ;;  %v6584_v2 = vld [vmem:[%s13760_s10 + $0x858] sm:$0xff]  ;;  %v4099_v12 = vadd.f32 %v4090_v3, %v4079_v58  ;;  %v12867_v4 = vmax.f32 %v4095_v19, 0.0  ;;  %v5233_v15 = vrot.slane %v12865_v13, 1  ;;  %v6647_v3 = vld [vmem:[%s13760_s10 + $0xa50] sm:$0xff]  ;;  %v6645_v19 = vld [vmem:[%s13760_s10 + $0xa40] sm:$0xff] }
 0x8de   :  { %5033 = vmatmul.f32.vlgmr.msra.gmra.mxu1 %v4994_v42  ;;  %5057 = vmatmul.f32.vlgmr.msra.gmra.mxu2 %v5037_v57  ;;  %v12869_v42 = vmax.f32 %v4098_v21, 0.0  ;;  %v6620_v57 = vld [vmem:[%s13760_s10 + $0x978] sm:$0xff]  ;;  %v6661_v21 = vld [vmem:[%s13760_s10 + $0xac0] sm:$0xff] }
 0x8df   :  { %5077 = vmatmul.f32.vlgmr.msra.gmra.mxu3 %v5038_v29  ;;  %5116 = vmatpush.msrb.mxu0 %v6588_v55  ;;  %v6636_v29 = vld [vmem:[%s13760_s10 + $0x9f8] sm:$0xff] }
 0x8e0   :  { %5136 = vmatpush.msrb.mxu1 %v6604_v47  ;;  %5156 = vmatpush.msrb.mxu2 %v6588_v55  ;;  %v12874_v55 = vmax.f32 %v4099_v12, 0.0  ;;  %v5279_v33 = vrot.slane %v12869_v42, 1  ;;  %v6648_v58 = vld [vmem:[%s13760_s10 + $0xa58] sm:$0xff] }
 0x8e1   :  { %5176 = vmatpush.msrb.mxu3 %v6604_v47  ;;  %5117 = vmatpush.msrb.mxu0 %v6587_v28  ;;  %v6660_v12 = vld [vmem:[%s13760_s10 + $0xab8] sm:$0xff] }
 0x8e2   :  { %5137 = vmatpush.msrb.mxu1 %v6603_v45  ;;  %5157 = vmatpush.msrb.mxu2 %v6587_v28  ;;  %v6635_v28 = vld [vmem:[%s13760_s10 + $0x9f0] sm:$0xff] }
 0x8e3   :  { %5177 = vmatpush.msrb.mxu3 %v6603_v45  ;;  %5118 = vmatpush.msrb.mxu0 %v6586_v23  ;;  %v6634_v45 = vld [vmem:[%s13760_s10 + $0x9e8] sm:$0xff] }
 0x8e4   :  { %5138 = vmatpush.msrb.mxu1 %v6602_v17  ;;  %5158 = vmatpush.msrb.mxu2 %v6586_v23  ;;  %v6617_v23 = vld [vmem:[%s13760_s10 + $0x960] sm:$0xff] }
 0x8e5   :  { %5178 = vmatpush.msrb.mxu3 %v6602_v17  ;;  %5119 = vmatpush.msrb.mxu0 %v6585_v30  ;;  %v6633_v17 = vld [vmem:[%s13760_s10 + $0x9e0] sm:$0xff] }
 0x8e6   :  { %5139 = vmatpush.msrb.mxu1 %v6601_v36  ;;  %5159 = vmatpush.msrb.mxu2 %v6585_v30  ;;  %v6632_v30 = vld [vmem:[%s13760_s10 + $0x9d8] sm:$0xff] }
 0x8e7   :  { %5179 = vmatpush.msrb.mxu3 %v6601_v36  ;;  %5120 = vmatpush.msrb.mxu0 %v6584_v2  ;;  %v6615_v36 = vld [vmem:[%s13760_s10 + $0x950] sm:$0xff] }
 0x8e8   :  { %5140 = vmatpush.msrb.mxu1 %v6600_v52  ;;  %5160 = vmatpush.msrb.mxu2 %v6584_v2  ;;  %v6631_v2 = vld [vmem:[%s13760_s10 + $0x9d0] sm:$0xff] }
 0x8e9   :  { %5180 = vmatpush.msrb.mxu3 %v6600_v52  ;;  %5121 = vmatpush.msrb.mxu0 %v6583_v39  ;;  %v6614_v52 = vld [vmem:[%s13760_s10 + $0x948] sm:$0xff] }
 0x8ea   :  { %5141 = vmatpush.msrb.mxu1 %v6599_v40  ;;  %5161 = vmatpush.msrb.mxu2 %v6583_v39  ;;  %v6613_v39 = vld [vmem:[%s13760_s10 + $0x940] sm:$0xff] }
 0x8eb   :  { %5181 = vmatpush.msrb.mxu3 %v6599_v40  ;;  %5122 = vmatpush.msrb.mxu0 %v6582_v50  ;;  %v6629_v40 = vld [vmem:[%s13760_s10 + $0x9c0] sm:$0xff] }
 0x8ec   :  { %5142 = vmatpush.msrb.mxu1 %v6598_v48  ;;  %5162 = vmatpush.msrb.mxu2 %v6582_v50  ;;  %v6612_v50 = vld [vmem:[%s13760_s10 + $0x938] sm:$0xff] }
 0x8ed   :  { %5182 = vmatpush.msrb.mxu3 %v6598_v48  ;;  %5123 = vmatpush.msrb.mxu0 %v6581_v27  ;;  %v6628_v48 = vld [vmem:[%s13760_s10 + $0x9b8] sm:$0xff] }
 0x8ee   :  { %5143 = vmatpush.msrb.mxu1 %v6597_v41  ;;  %5163 = vmatpush.msrb.mxu2 %v6581_v27  ;;  %v6627_v27 = vld [vmem:[%s13760_s10 + $0x9b0] sm:$0xff] }
 0x8ef   :  { %5183 = vmatpush.msrb.mxu3 %v6597_v41  ;;  %5124 = vmatpush.msrb.mxu0 %v6580_v26  ;;  %v6610_v41 = vld [vmem:[%s13760_s10 + $0x928] sm:$0xff] }
 0x8f0   :  { %5144 = vmatpush.msrb.mxu1 %v6596_v0  ;;  %5164 = vmatpush.msrb.mxu2 %v6580_v26  ;;  %v6626_v26 = vld [vmem:[%s13760_s10 + $0x9a8] sm:$0xff] }
 0x8f1   :  { %5184 = vmatpush.msrb.mxu3 %v6596_v0  ;;  %5125 = vmatpush.msrb.mxu0 %v6579_v25  ;;  %v6609_v0 = vld [vmem:[%s13760_s10 + $0x920] sm:$0xff] }
 0x8f2   :  { %5145 = vmatpush.msrb.mxu1 %v6595_v59  ;;  %5165 = vmatpush.msrb.mxu2 %v6579_v25  ;;  %v6608_v25 = vld [vmem:[%s13760_s10 + $0x918] sm:$0xff] }
 0x8f3   :  { %5185 = vmatpush.msrb.mxu3 %v6595_v59  ;;  %5126 = vmatpush.msrb.mxu0 %v6578_v51  ;;  %v6624_v59 = vld [vmem:[%s13760_s10 + $0x998] sm:$0xff] }
 0x8f4   :  { %5146 = vmatpush.msrb.mxu1 %v6594_v34  ;;  %5166 = vmatpush.msrb.mxu2 %v6578_v51  ;;  %v4645_v35 = vpop.f32.mrf.mxu0  ;;  %v6607_v51 = vld [vmem:[%s13760_s10 + $0x910] sm:$0xff] }
 0x8f5   :  { %5186 = vmatpush.msrb.mxu3 %v6594_v34  ;;  %5127 = vmatpush.msrb.mxu0 %v6577_v22  ;;  %v4665_v43 = vpop.f32.mrf.mxu1  ;;  %v6606_v34 = vld [vmem:[%s13760_s10 + $0x908] sm:$0xff] }
 0x8f6   :  { %5147 = vmatpush.msrb.mxu1 %v6593_v54  ;;  %5167 = vmatpush.msrb.mxu2 %v6577_v22  ;;  %v4666_v20 = vadd.f32 %v4665_v43, %v4645_v35  ;;  %v6621_v22 = vld [vmem:[%s13760_s10 + $0x980] sm:$0xff]  ;;  %v5280_v35 = vrot.slane %v12874_v55, 1  ;;  %v6667_v43 = vld [vmem:[%s13760_s10 + $0xaf0] sm:$0xff] }
 0x8f7   :  { %5187 = vmatpush.msrb.mxu3 %v6593_v54  ;;  %5128 = vmatpush.msrb.mxu0 %v6576_v56  ;;  %v5234_v54 = vrot.slane %v12867_v4, 1 }
 0x8f8   :  { %5148 = vmatpush.msrb.mxu1 %v6592_v62  ;;  %5168 = vmatpush.msrb.mxu2 %v6576_v56  ;;  %v12854_v31 = vadd.f32 %v4666_v20, %v12735_v11  ;;  %v6589_v11 = vld [vmem:[%s13760_s10 + $0x880] sm:$0xff]  ;;  %v6652_v56 = vld [vmem:[%s13760_s10 + $0xa78] sm:$0xff] }
 0x8f9   :  { %5188 = vmatpush.msrb.mxu3 %v6592_v62  ;;  %5129 = vmatpush.msrb.mxu0 %v6575_v8  ;;  %v6651_v62 = vld [vmem:[%s13760_s10 + $0xa70] sm:$0xff]  ;;  %v6665_v20 = vld [vmem:[%s13760_s10 + $0xae0] sm:$0xff] }
 0x8fa   :  { %5149 = vmatpush.msrb.mxu1 %v6591_v1  ;;  %5169 = vmatpush.msrb.mxu2 %v6575_v8  ;;  %v6649_v8 = vld [vmem:[%s13760_s10 + $0xa60] sm:$0xff] }
 0x8fb   :  { %5189 = vmatpush.msrb.mxu3 %v6591_v1  ;;  %5130 = vmatpush.msrb.mxu0 %v6574_v18  ;;  %v4689_v63 = vpop.f32.mrf.mxu2  ;;  %v6664_v1 = vld [vmem:[%s13760_s10 + $0xad8] sm:$0xff] }
 0x8fc   :  { %5150 = vmatpush.msrb.mxu1 %v6590_v49  ;;  %5170 = vmatpush.msrb.mxu2 %v6574_v18  ;;  %v4709_v38 = vpop.f32.mrf.mxu3  ;;  %v6663_v18 = vld [vmem:[%s13760_s10 + $0xad0] sm:$0xff] }
 0x8fd   :  { %5190 = vmatpush.msrb.mxu3 %v6590_v49  ;;  %5131 = vmatpush.msrb.mxu0 %v6573_v61  ;;  %v4710_v14 = vadd.f32 %v4709_v38, %v4689_v63  ;;  %v6662_v49 = vld [vmem:[%s13760_s10 + $0xac8] sm:$0xff]  ;;  %v6659_v63 = vld [vmem:[%s13760_s10 + $0xab0] sm:$0xff] }
 0x8fe   :  { %5151 = vmatpush.msrb.mxu1 %v6589_v11  ;;  %5171 = vmatpush.msrb.mxu2 %v6573_v61  ;;  %v6644_v61 = vld [vmem:[%s13760_s10 + $0xa38] sm:$0xff]  ;;  %v6642_v38 = vld [vmem:[%s13760_s10 + $0xa28] sm:$0xff] }
 0x8ff   :  { %5191 = vmatpush.msrb.mxu3 %v6589_v11  ;;  %5132 = vmatmul.f32.vlgmr.msrb.gmra.mxu0 %v12865_v13  ;;  %v12881_v47 = vadd.f32 %v4710_v14, %v12761_v46  ;;  %v6618_v46 = vld [vmem:[%s13760_s10 + $0x968] sm:$0xff]  ;;  %v6643_v11 = vld [vmem:[%s13760_s10 + $0xa30] sm:$0xff] }
 0x900   :  { %5152 = vmatmul.f32.vlgmr.msrb.gmra.mxu1 %v12867_v4  ;;  %5172 = vmatmul.f32.vlgmr.msrb.gmra.mxu2 %v12869_v42  ;;  %v6658_v14 = vld [vmem:[%s13760_s10 + $0xaa8] sm:$0xff] }
 0x901   :  { %5192 = vmatmul.f32.vlgmr.msrb.gmra.mxu3 %v12874_v55  ;;  %5237 = vmatpush.msra.mxu0 %v6620_v57 }
 0x902   :  { %5257 = vmatpush.msra.mxu1 %v6636_v29  ;;  %5283 = vmatpush.msra.mxu2 %v6620_v57  ;;  %v6641_v57 = vld [vmem:[%s13760_s10 + $0xa20] sm:$0xff] }
 0x903   :  { %5303 = vmatpush.msra.mxu3 %v6636_v29  ;;  %5238 = vmatpush.msra.mxu0 %v6619_v53  ;;  %v6657_v29 = vld [vmem:[%s13760_s10 + $0xaa0] sm:$0xff] }
 0x904   :  { %5258 = vmatpush.msra.mxu1 %v6635_v28  ;;  %5284 = vmatpush.msra.mxu2 %v6619_v53  ;;  %v6640_v53 = vld [vmem:[%s13760_s10 + $0xa18] sm:$0xff] }
 0x905   :  { %5304 = vmatpush.msra.mxu3 %v6635_v28  ;;  %5239 = vmatpush.msra.mxu0 %v6618_v46  ;;  %v6656_v28 = vld [vmem:[%s13760_s10 + $0xa98] sm:$0xff] }
 0x906   :  { %5259 = vmatpush.msra.mxu1 %v6634_v45  ;;  %5285 = vmatpush.msra.mxu2 %v6618_v46  ;;  %v6639_v46 = vld [vmem:[%s13760_s10 + $0xa10] sm:$0xff] }
 0x907   :  { %5305 = vmatpush.msra.mxu3 %v6634_v45  ;;  %5240 = vmatpush.msra.mxu0 %v6617_v23  ;;  %v6655_v45 = vld [vmem:[%s13760_s10 + $0xa90] sm:$0xff] }
 0x908   :  { %5260 = vmatpush.msra.mxu1 %v6633_v17  ;;  %5286 = vmatpush.msra.mxu2 %v6617_v23  ;;  %v6638_v23 = vld [vmem:[%s13760_s10 + $0xa08] sm:$0xff] }
 0x909   :  { %5306 = vmatpush.msra.mxu3 %v6633_v17  ;;  %5241 = vmatpush.msra.mxu0 %v6616_v24  ;;  %v6654_v17 = vld [vmem:[%s13760_s10 + $0xa88] sm:$0xff] }
 0x90a   :  { %5261 = vmatpush.msra.mxu1 %v6632_v30  ;;  %5287 = vmatpush.msra.mxu2 %v6616_v24  ;;  %v6637_v24 = vld [vmem:[%s13760_s10 + $0xa00] sm:$0xff] }
 0x90b   :  { %5307 = vmatpush.msra.mxu3 %v6632_v30  ;;  %5242 = vmatpush.msra.mxu0 %v6615_v36  ;;  %v6653_v30 = vld [vmem:[%s13760_s10 + $0xa80] sm:$0xff] }
 0x90c   :  { %5262 = vmatpush.msra.mxu1 %v6631_v2  ;;  %5288 = vmatpush.msra.mxu2 %v6615_v36  ;;  %v5358_v36 = vrot.slane %v12865_v13, 2 }
 0x90d   :  { %5308 = vmatpush.msra.mxu3 %v6631_v2  ;;  %5243 = vmatpush.msra.mxu0 %v6614_v52  ;;  %v5359_v2 = vrot.slane %v12867_v4, 2 }
 0x90e   :  { %5263 = vmatpush.msra.mxu1 %v6630_v9  ;;  %5289 = vmatpush.msra.mxu2 %v6614_v52  ;;  %v5402_v52 = vrot.slane %v12869_v42, 2 }
 0x90f   :  { %5309 = vmatpush.msra.mxu3 %v6630_v9  ;;  %5244 = vmatpush.msra.mxu0 %v6613_v39  ;;  %v6684_v9 = vld [vmem:[%s13760_s10 + $0xb78] sm:$0xff] }
 0x910   :  { %5264 = vmatpush.msra.mxu1 %v6629_v40  ;;  %5290 = vmatpush.msra.mxu2 %v6613_v39  ;;  %v5403_v39 = vrot.slane %v12874_v55, 2 }
 0x911   :  { %5310 = vmatpush.msra.mxu3 %v6629_v40  ;;  %5245 = vmatpush.msra.mxu0 %v6612_v50  ;;  %v6700_v40 = vld [vmem:[%s13760_s10 + $0xbf8] sm:$0xff] }
 0x912   :  { %5265 = vmatpush.msra.mxu1 %v6628_v48  ;;  %5291 = vmatpush.msra.mxu2 %v6612_v50  ;;  %v6683_v50 = vld [vmem:[%s13760_s10 + $0xb70] sm:$0xff] }
 0x913   :  { %5311 = vmatpush.msra.mxu3 %v6628_v48  ;;  %5246 = vmatpush.msra.mxu0 %v6611_v10  ;;  %v6699_v48 = vld [vmem:[%s13760_s10 + $0xbf0] sm:$0xff] }
 0x914   :  { %5266 = vmatpush.msra.mxu1 %v6627_v27  ;;  %5292 = vmatpush.msra.mxu2 %v6611_v10  ;;  %v6682_v10 = vld [vmem:[%s13760_s10 + $0xb68] sm:$0xff] }
 0x915   :  { %5312 = vmatpush.msra.mxu3 %v6627_v27  ;;  %5247 = vmatpush.msra.mxu0 %v6610_v41  ;;  %v6698_v27 = vld [vmem:[%s13760_s10 + $0xbe8] sm:$0xff] }
 0x916   :  { %5267 = vmatpush.msra.mxu1 %v6626_v26  ;;  %5293 = vmatpush.msra.mxu2 %v6610_v41  ;;  %v6681_v41 = vld [vmem:[%s13760_s10 + $0xb60] sm:$0xff] }
 0x917   :  { %5313 = vmatpush.msra.mxu3 %v6626_v26  ;;  %5248 = vmatpush.msra.mxu0 %v6609_v0  ;;  %v6697_v26 = vld [vmem:[%s13760_s10 + $0xbe0] sm:$0xff] }
 0x918   :  { %5268 = vmatpush.msra.mxu1 %v6625_v37  ;;  %5294 = vmatpush.msra.mxu2 %v6609_v0  ;;  %v6680_v0 = vld [vmem:[%s13760_s10 + $0xb58] sm:$0xff] }
 0x919   :  { %5314 = vmatpush.msra.mxu3 %v6625_v37  ;;  %5249 = vmatpush.msra.mxu0 %v6608_v25  ;;  %v6696_v37 = vld [vmem:[%s13760_s10 + $0xbd8] sm:$0xff] }
 0x91a   :  { %5269 = vmatpush.msra.mxu1 %v6624_v59  ;;  %5295 = vmatpush.msra.mxu2 %v6608_v25  ;;  %v6679_v25 = vld [vmem:[%s13760_s10 + $0xb50] sm:$0xff] }
 0x91b   :  { %5315 = vmatpush.msra.mxu3 %v6624_v59  ;;  %5250 = vmatpush.msra.mxu0 %v6607_v51  ;;  %v6695_v59 = vld [vmem:[%s13760_s10 + $0xbd0] sm:$0xff] }
 0x91c   :  { %5270 = vmatpush.msra.mxu1 %v6623_v32  ;;  %5296 = vmatpush.msra.mxu2 %v6607_v51  ;;  %v6678_v51 = vld [vmem:[%s13760_s10 + $0xb48] sm:$0xff] }
 0x91d   :  { %5316 = vmatpush.msra.mxu3 %v6623_v32  ;;  %5251 = vmatpush.msra.mxu0 %v6606_v34  ;;  %v6694_v32 = vld [vmem:[%s13760_s10 + $0xbc8] sm:$0xff] }
 0x91e   :  { %5271 = vmatpush.msra.mxu1 %v6622_v7  ;;  %5297 = vmatpush.msra.mxu2 %v6606_v34  ;;  %v6677_v34 = vld [vmem:[%s13760_s10 + $0xb40] sm:$0xff] }
 0x91f   :  { %5317 = vmatpush.msra.mxu3 %v6622_v7  ;;  %5252 = vmatpush.msra.mxu0 %v6605_v60  ;;  %v6693_v7 = vld [vmem:[%s13760_s10 + $0xbc0] sm:$0xff] }
 0x920   :  { %5272 = vmatpush.msra.mxu1 %v6621_v22  ;;  %5298 = vmatpush.msra.mxu2 %v6605_v60  ;;  %v6676_v60 = vld [vmem:[%s13760_s10 + $0xb38] sm:$0xff] }
 0x921   :  { %5318 = vmatpush.msra.mxu3 %v6621_v22  ;;  %5253 = vmatmul.f32.vlgmr.msra.gmra.mxu0 %v5233_v15  ;;  %v6692_v22 = vld [vmem:[%s13760_s10 + $0xbb8] sm:$0xff]  ;;  %v6675_v15 = vld [vmem:[%s13760_s10 + $0xb30] sm:$0xff] }
 0x922   :  { %5273 = vmatmul.f32.vlgmr.msra.gmra.mxu1 %v5234_v54  ;;  %5299 = vmatmul.f32.vlgmr.msra.gmra.mxu2 %v5279_v33  ;;  %v6691_v54 = vld [vmem:[%s13760_s10 + $0xbb0] sm:$0xff]  ;;  %v6674_v33 = vld [vmem:[%s13760_s10 + $0xb28] sm:$0xff] }
 0x923   :  { %5319 = vmatmul.f32.vlgmr.msra.gmra.mxu3 %v5280_v35  ;;  %5362 = vmatpush.msrb.mxu0 %v6652_v56  ;;  %v6673_v35 = vld [vmem:[%s13760_s10 + $0xb20] sm:$0xff] }
 0x924   :  { %5382 = vmatpush.msrb.mxu1 %v6668_v16  ;;  %5406 = vmatpush.msrb.mxu2 %v6652_v56  ;;  %v6690_v56 = vld [vmem:[%s13760_s10 + $0xba8] sm:$0xff] }
 0x925   :  { %5426 = vmatpush.msrb.mxu3 %v6668_v16  ;;  %5363 = vmatpush.msrb.mxu0 %v6651_v62  ;;  %v6689_v16 = vld [vmem:[%s13760_s10 + $0xba0] sm:$0xff] }
 0x926   :  { %5383 = vmatpush.msrb.mxu1 %v6667_v43  ;;  %5407 = vmatpush.msrb.mxu2 %v6651_v62  ;;  %v6672_v62 = vld [vmem:[%s13760_s10 + $0xb18] sm:$0xff] }
 0x927   :  { %5427 = vmatpush.msrb.mxu3 %v6667_v43  ;;  %5364 = vmatpush.msrb.mxu0 %v6650_v44  ;;  %v6688_v43 = vld [vmem:[%s13760_s10 + $0xb98] sm:$0xff] }
 0x928   :  { %5384 = vmatpush.msrb.mxu1 %v6666_v6  ;;  %5408 = vmatpush.msrb.mxu2 %v6650_v44  ;;  %v6671_v44 = vld [vmem:[%s13760_s10 + $0xb10] sm:$0xff] }
 0x929   :  { %5428 = vmatpush.msrb.mxu3 %v6666_v6  ;;  %5365 = vmatpush.msrb.mxu0 %v6649_v8  ;;  %v6687_v6 = vld [vmem:[%s13760_s10 + $0xb90] sm:$0xff] }
 0x92a   :  { %5385 = vmatpush.msrb.mxu1 %v6665_v20  ;;  %5409 = vmatpush.msrb.mxu2 %v6649_v8  ;;  %v6670_v8 = vld [vmem:[%s13760_s10 + $0xb08] sm:$0xff] }
 0x92b   :  { %5429 = vmatpush.msrb.mxu3 %v6665_v20  ;;  %5366 = vmatpush.msrb.mxu0 %v6648_v58  ;;  %v6686_v20 = vld [vmem:[%s13760_s10 + $0xb88] sm:$0xff] }
 0x92c   :  { %5386 = vmatpush.msrb.mxu1 %v6664_v1  ;;  %5410 = vmatpush.msrb.mxu2 %v6648_v58  ;;  %v6669_v58 = vld [vmem:[%s13760_s10 + $0xb00] sm:$0xff] }
 0x92d   :  { %5430 = vmatpush.msrb.mxu3 %v6664_v1  ;;  %5367 = vmatpush.msrb.mxu0 %v6647_v3  ;;  %v6685_v1 = vld [vmem:[%s13760_s10 + $0xb80] sm:$0xff] }
 0x92e   :  { %5387 = vmatpush.msrb.mxu1 %v6663_v18  ;;  %5411 = vmatpush.msrb.mxu2 %v6647_v3  ;;  %v5481_v3 = vrot.slane %v12865_v13, 3 }
 0x92f   :  { %5431 = vmatpush.msrb.mxu3 %v6663_v18  ;;  %5368 = vmatpush.msrb.mxu0 %v6646_v5  ;;  %v5482_v18 = vrot.slane %v12867_v4, 3 }
 0x930   :  { %5388 = vmatpush.msrb.mxu1 %v6662_v49  ;;  %5412 = vmatpush.msrb.mxu2 %v6646_v5  ;;  %v5525_v5 = vrot.slane %v12869_v42, 3 }
 0x931   :  { %5432 = vmatpush.msrb.mxu3 %v6662_v49  ;;  %5369 = vmatpush.msrb.mxu0 %v6645_v19  ;;  %v6716_v49 = vld [vmem:[%s13760_s10 + $0xc78] sm:$0xff] }
 0x932   :  { %5389 = vmatpush.msrb.mxu1 %v6661_v21  ;;  %5413 = vmatpush.msrb.mxu2 %v6645_v19  ;;  %v5526_v19 = vrot.slane %v12874_v55, 3 }
 0x933   :  { %5433 = vmatpush.msrb.mxu3 %v6661_v21  ;;  %5370 = vmatpush.msrb.mxu0 %v6644_v61  ;;  %v6732_v21 = vld [vmem:[%s13760_s10 + $0xcf8] sm:$0xff] }
 0x934   :  { %5390 = vmatpush.msrb.mxu1 %v6660_v12  ;;  %5414 = vmatpush.msrb.mxu2 %v6644_v61  ;;  %v6715_v61 = vld [vmem:[%s13760_s10 + $0xc70] sm:$0xff] }
 0x935   :  { %5434 = vmatpush.msrb.mxu3 %v6660_v12  ;;  %5371 = vmatpush.msrb.mxu0 %v6643_v11  ;;  %v6731_v12 = vld [vmem:[%s13760_s10 + $0xcf0] sm:$0xff] }
 0x936   :  { %5391 = vmatpush.msrb.mxu1 %v6659_v63  ;;  %5415 = vmatpush.msrb.mxu2 %v6643_v11  ;;  %v6714_v11 = vld [vmem:[%s13760_s10 + $0xc68] sm:$0xff] }
 0x937   :  { %5435 = vmatpush.msrb.mxu3 %v6659_v63  ;;  %5372 = vmatpush.msrb.mxu0 %v6642_v38  ;;  %v6730_v63 = vld [vmem:[%s13760_s10 + $0xce8] sm:$0xff] }
 0x938   :  { %5392 = vmatpush.msrb.mxu1 %v6658_v14  ;;  %5416 = vmatpush.msrb.mxu2 %v6642_v38  ;;  %v6713_v38 = vld [vmem:[%s13760_s10 + $0xc60] sm:$0xff] }
 0x939   :  { %5436 = vmatpush.msrb.mxu3 %v6658_v14  ;;  %5373 = vmatpush.msrb.mxu0 %v6641_v57  ;;  %v6729_v14 = vld [vmem:[%s13760_s10 + $0xce0] sm:$0xff] }
 0x93a   :  { %5393 = vmatpush.msrb.mxu1 %v6657_v29  ;;  %5417 = vmatpush.msrb.mxu2 %v6641_v57  ;;  %v6712_v57 = vld [vmem:[%s13760_s10 + $0xc58] sm:$0xff] }
 0x93b   :  { %5437 = vmatpush.msrb.mxu3 %v6657_v29  ;;  %5374 = vmatpush.msrb.mxu0 %v6640_v53  ;;  %v6728_v29 = vld [vmem:[%s13760_s10 + $0xcd8] sm:$0xff] }
 0x93c   :  { %5394 = vmatpush.msrb.mxu1 %v6656_v28  ;;  %5418 = vmatpush.msrb.mxu2 %v6640_v53  ;;  %v6711_v53 = vld [vmem:[%s13760_s10 + $0xc50] sm:$0xff] }
 0x93d   :  { %5438 = vmatpush.msrb.mxu3 %v6656_v28  ;;  %5375 = vmatpush.msrb.mxu0 %v6639_v46  ;;  %v6727_v28 = vld [vmem:[%s13760_s10 + $0xcd0] sm:$0xff] }
 0x93e   :  { %5395 = vmatpush.msrb.mxu1 %v6655_v45  ;;  %5419 = vmatpush.msrb.mxu2 %v6639_v46  ;;  %v6710_v46 = vld [vmem:[%s13760_s10 + $0xc48] sm:$0xff] }
 0x93f   :  { %5439 = vmatpush.msrb.mxu3 %v6655_v45  ;;  %5376 = vmatpush.msrb.mxu0 %v6638_v23  ;;  %v6726_v45 = vld [vmem:[%s13760_s10 + $0xcc8] sm:$0xff] }
 0x940   :  { %5396 = vmatpush.msrb.mxu1 %v6654_v17  ;;  %5420 = vmatpush.msrb.mxu2 %v6638_v23  ;;  %v6709_v23 = vld [vmem:[%s13760_s10 + $0xc40] sm:$0xff] }
 0x941   :  { %5440 = vmatpush.msrb.mxu3 %v6654_v17  ;;  %5377 = vmatpush.msrb.mxu0 %v6637_v24  ;;  %v6725_v17 = vld [vmem:[%s13760_s10 + $0xcc0] sm:$0xff] }
 0x942   :  { %5397 = vmatpush.msrb.mxu1 %v6653_v30  ;;  %5421 = vmatpush.msrb.mxu2 %v6637_v24  ;;  %v6708_v24 = vld [vmem:[%s13760_s10 + $0xc38] sm:$0xff] }
 0x943   :  { %5441 = vmatpush.msrb.mxu3 %v6653_v30  ;;  %5378 = vmatmul.f32.vlgmr.msrb.gmra.mxu0 %v5358_v36  ;;  %v6724_v30 = vld [vmem:[%s13760_s10 + $0xcb8] sm:$0xff]  ;;  %v6707_v36 = vld [vmem:[%s13760_s10 + $0xc30] sm:$0xff] }
 0x944   :  { %5398 = vmatmul.f32.vlgmr.msrb.gmra.mxu1 %v5359_v2  ;;  %5422 = vmatmul.f32.vlgmr.msrb.gmra.mxu2 %v5402_v52  ;;  %v6723_v2 = vld [vmem:[%s13760_s10 + $0xcb0] sm:$0xff]  ;;  %v6706_v52 = vld [vmem:[%s13760_s10 + $0xc28] sm:$0xff] }
 0x945   :  { %5442 = vmatmul.f32.vlgmr.msrb.gmra.mxu3 %v5403_v39  ;;  %5485 = vmatpush.msra.mxu0 %v6684_v9  ;;  %v6705_v39 = vld [vmem:[%s13760_s10 + $0xc20] sm:$0xff] }
 0x946   :  { %5505 = vmatpush.msra.mxu1 %v6700_v40  ;;  %5529 = vmatpush.msra.mxu2 %v6684_v9  ;;  %v6722_v9 = vld [vmem:[%s13760_s10 + $0xca8] sm:$0xff] }
 0x947   :  { %5549 = vmatpush.msra.mxu3 %v6700_v40  ;;  %5486 = vmatpush.msra.mxu0 %v6683_v50  ;;  %v6721_v40 = vld [vmem:[%s13760_s10 + $0xca0] sm:$0xff] }
 0x948   :  { %5506 = vmatpush.msra.mxu1 %v6699_v48  ;;  %5530 = vmatpush.msra.mxu2 %v6683_v50  ;;  %v6704_v50 = vld [vmem:[%s13760_s10 + $0xc18] sm:$0xff] }
 0x949   :  { %5550 = vmatpush.msra.mxu3 %v6699_v48  ;;  %5487 = vmatpush.msra.mxu0 %v6682_v10  ;;  %v6720_v48 = vld [vmem:[%s13760_s10 + $0xc98] sm:$0xff] }
 0x94a   :  { %5507 = vmatpush.msra.mxu1 %v6698_v27  ;;  %5531 = vmatpush.msra.mxu2 %v6682_v10  ;;  %v6703_v10 = vld [vmem:[%s13760_s10 + $0xc10] sm:$0xff] }
 0x94b   :  { %5551 = vmatpush.msra.mxu3 %v6698_v27  ;;  %5488 = vmatpush.msra.mxu0 %v6681_v41  ;;  %v6719_v27 = vld [vmem:[%s13760_s10 + $0xc90] sm:$0xff] }
 0x94c   :  { %5508 = vmatpush.msra.mxu1 %v6697_v26  ;;  %5532 = vmatpush.msra.mxu2 %v6681_v41  ;;  %v6702_v41 = vld [vmem:[%s13760_s10 + $0xc08] sm:$0xff] }
 0x94d   :  { %5552 = vmatpush.msra.mxu3 %v6697_v26  ;;  %5489 = vmatpush.msra.mxu0 %v6680_v0  ;;  %v6718_v26 = vld [vmem:[%s13760_s10 + $0xc88] sm:$0xff] }
 0x94e   :  { %5509 = vmatpush.msra.mxu1 %v6696_v37  ;;  %5533 = vmatpush.msra.mxu2 %v6680_v0  ;;  %v6701_v0 = vld [vmem:[%s13760_s10 + $0xc00] sm:$0xff] }
 0x94f   :  { %5553 = vmatpush.msra.mxu3 %v6696_v37  ;;  %5490 = vmatpush.msra.mxu0 %v6679_v25  ;;  %v6717_v37 = vld [vmem:[%s13760_s10 + $0xc80] sm:$0xff] }
 0x950   :  { %5510 = vmatpush.msra.mxu1 %v6695_v59  ;;  %5534 = vmatpush.msra.mxu2 %v6679_v25  ;;  %v5604_v25 = vrot.slane %v12865_v13, 4 }
 0x951   :  { %5554 = vmatpush.msra.mxu3 %v6695_v59  ;;  %5491 = vmatpush.msra.mxu0 %v6678_v51  ;;  %v5605_v59 = vrot.slane %v12867_v4, 4 }
 0x952   :  { %5511 = vmatpush.msra.mxu1 %v6694_v32  ;;  %5535 = vmatpush.msra.mxu2 %v6678_v51  ;;  %v5648_v51 = vrot.slane %v12869_v42, 4 }
 0x953   :  { %5555 = vmatpush.msra.mxu3 %v6694_v32  ;;  %5492 = vmatpush.msra.mxu0 %v6677_v34  ;;  %v6748_v32 = vld [vmem:[%s13760_s10 + $0xd78] sm:$0xff] }
 0x954   :  { %5512 = vmatpush.msra.mxu1 %v6693_v7  ;;  %5536 = vmatpush.msra.mxu2 %v6677_v34  ;;  %v5649_v34 = vrot.slane %v12874_v55, 4 }
 0x955   :  { %5556 = vmatpush.msra.mxu3 %v6693_v7  ;;  %5493 = vmatpush.msra.mxu0 %v6676_v60  ;;  %v6764_v7 = vld [vmem:[%s13760_s10 + $0xdf8] sm:$0xff] }
 0x956   :  { %5513 = vmatpush.msra.mxu1 %v6692_v22  ;;  %5537 = vmatpush.msra.mxu2 %v6676_v60  ;;  %v6747_v60 = vld [vmem:[%s13760_s10 + $0xd70] sm:$0xff] }
 0x957   :  { %5557 = vmatpush.msra.mxu3 %v6692_v22  ;;  %5494 = vmatpush.msra.mxu0 %v6675_v15  ;;  %v6763_v22 = vld [vmem:[%s13760_s10 + $0xdf0] sm:$0xff] }
 0x958   :  { %5514 = vmatpush.msra.mxu1 %v6691_v54  ;;  %5538 = vmatpush.msra.mxu2 %v6675_v15  ;;  %v6746_v15 = vld [vmem:[%s13760_s10 + $0xd68] sm:$0xff] }
 0x959   :  { %5558 = vmatpush.msra.mxu3 %v6691_v54  ;;  %5495 = vmatpush.msra.mxu0 %v6674_v33  ;;  %v6762_v54 = vld [vmem:[%s13760_s10 + $0xde8] sm:$0xff] }
 0x95a   :  { %5515 = vmatpush.msra.mxu1 %v6690_v56  ;;  %5539 = vmatpush.msra.mxu2 %v6674_v33  ;;  %v6745_v33 = vld [vmem:[%s13760_s10 + $0xd60] sm:$0xff] }
 0x95b   :  { %5559 = vmatpush.msra.mxu3 %v6690_v56  ;;  %5496 = vmatpush.msra.mxu0 %v6673_v35  ;;  %v6761_v56 = vld [vmem:[%s13760_s10 + $0xde0] sm:$0xff] }
 0x95c   :  { %5516 = vmatpush.msra.mxu1 %v6689_v16  ;;  %5540 = vmatpush.msra.mxu2 %v6673_v35  ;;  %v6744_v35 = vld [vmem:[%s13760_s10 + $0xd58] sm:$0xff] }
 0x95d   :  { %5560 = vmatpush.msra.mxu3 %v6689_v16  ;;  %5497 = vmatpush.msra.mxu0 %v6672_v62  ;;  %v6760_v16 = vld [vmem:[%s13760_s10 + $0xdd8] sm:$0xff] }
 0x95e   :  { %5517 = vmatpush.msra.mxu1 %v6688_v43  ;;  %5541 = vmatpush.msra.mxu2 %v6672_v62  ;;  %v6743_v62 = vld [vmem:[%s13760_s10 + $0xd50] sm:$0xff] }
 0x95f   :  { %5561 = vmatpush.msra.mxu3 %v6688_v43  ;;  %5498 = vmatpush.msra.mxu0 %v6671_v44  ;;  %v6759_v43 = vld [vmem:[%s13760_s10 + $0xdd0] sm:$0xff] }
 0x960   :  { %5518 = vmatpush.msra.mxu1 %v6687_v6  ;;  %5542 = vmatpush.msra.mxu2 %v6671_v44  ;;  %v6742_v44 = vld [vmem:[%s13760_s10 + $0xd48] sm:$0xff] }
 0x961   :  { %5562 = vmatpush.msra.mxu3 %v6687_v6  ;;  %5499 = vmatpush.msra.mxu0 %v6670_v8  ;;  %v6758_v6 = vld [vmem:[%s13760_s10 + $0xdc8] sm:$0xff] }
 0x962   :  { %5519 = vmatpush.msra.mxu1 %v6686_v20  ;;  %5543 = vmatpush.msra.mxu2 %v6670_v8  ;;  %v6741_v8 = vld [vmem:[%s13760_s10 + $0xd40] sm:$0xff] }
 0x963   :  { %5563 = vmatpush.msra.mxu3 %v6686_v20  ;;  %5500 = vmatpush.msra.mxu0 %v6669_v58  ;;  %v6757_v20 = vld [vmem:[%s13760_s10 + $0xdc0] sm:$0xff] }
 0x964   :  { %5520 = vmatpush.msra.mxu1 %v6685_v1  ;;  %5544 = vmatpush.msra.mxu2 %v6669_v58  ;;  %v6740_v58 = vld [vmem:[%s13760_s10 + $0xd38] sm:$0xff] }
 0x965   :  { %5564 = vmatpush.msra.mxu3 %v6685_v1  ;;  %5501 = vmatmul.f32.vlgmr.msra.gmra.mxu0 %v5481_v3  ;;  %v6756_v1 = vld [vmem:[%s13760_s10 + $0xdb8] sm:$0xff]  ;;  %v6739_v3 = vld [vmem:[%s13760_s10 + $0xd30] sm:$0xff] }
 0x966   :  { %5521 = vmatmul.f32.vlgmr.msra.gmra.mxu1 %v5482_v18  ;;  %5545 = vmatmul.f32.vlgmr.msra.gmra.mxu2 %v5525_v5  ;;  %v6755_v18 = vld [vmem:[%s13760_s10 + $0xdb0] sm:$0xff]  ;;  %v6738_v5 = vld [vmem:[%s13760_s10 + $0xd28] sm:$0xff] }
 0x967   :  { %5565 = vmatmul.f32.vlgmr.msra.gmra.mxu3 %v5526_v19  ;;  %5608 = vmatpush.msrb.mxu0 %v6716_v49  ;;  %v6737_v19 = vld [vmem:[%s13760_s10 + $0xd20] sm:$0xff] }
 0x968   :  { %5628 = vmatpush.msrb.mxu1 %v6732_v21  ;;  %5652 = vmatpush.msrb.mxu2 %v6716_v49  ;;  %v6754_v49 = vld [vmem:[%s13760_s10 + $0xda8] sm:$0xff] }
 0x969   :  { %5672 = vmatpush.msrb.mxu3 %v6732_v21  ;;  %5609 = vmatpush.msrb.mxu0 %v6715_v61  ;;  %v6753_v21 = vld [vmem:[%s13760_s10 + $0xda0] sm:$0xff] }
 0x96a   :  { %5629 = vmatpush.msrb.mxu1 %v6731_v12  ;;  %5653 = vmatpush.msrb.mxu2 %v6715_v61  ;;  %v6736_v61 = vld [vmem:[%s13760_s10 + $0xd18] sm:$0xff] }
 0x96b   :  { %5673 = vmatpush.msrb.mxu3 %v6731_v12  ;;  %5610 = vmatpush.msrb.mxu0 %v6714_v11  ;;  %v6752_v12 = vld [vmem:[%s13760_s10 + $0xd98] sm:$0xff] }
 0x96c   :  { %5630 = vmatpush.msrb.mxu1 %v6730_v63  ;;  %5654 = vmatpush.msrb.mxu2 %v6714_v11  ;;  %v6735_v11 = vld [vmem:[%s13760_s10 + $0xd10] sm:$0xff] }
 0x96d   :  { %5674 = vmatpush.msrb.mxu3 %v6730_v63  ;;  %5611 = vmatpush.msrb.mxu0 %v6713_v38  ;;  %v6751_v63 = vld [vmem:[%s13760_s10 + $0xd90] sm:$0xff] }
 0x96e   :  { %5631 = vmatpush.msrb.mxu1 %v6729_v14  ;;  %5655 = vmatpush.msrb.mxu2 %v6713_v38  ;;  %v6734_v38 = vld [vmem:[%s13760_s10 + $0xd08] sm:$0xff] }
 0x96f   :  { %5675 = vmatpush.msrb.mxu3 %v6729_v14  ;;  %5612 = vmatpush.msrb.mxu0 %v6712_v57  ;;  %v6750_v14 = vld [vmem:[%s13760_s10 + $0xd88] sm:$0xff] }
 0x970   :  { %5632 = vmatpush.msrb.mxu1 %v6728_v29  ;;  %5656 = vmatpush.msrb.mxu2 %v6712_v57  ;;  %v6733_v57 = vld [vmem:[%s13760_s10 + $0xd00] sm:$0xff] }
 0x971   :  { %5676 = vmatpush.msrb.mxu3 %v6728_v29  ;;  %5613 = vmatpush.msrb.mxu0 %v6711_v53  ;;  %v6749_v29 = vld [vmem:[%s13760_s10 + $0xd80] sm:$0xff] }
 0x972   :  { %5633 = vmatpush.msrb.mxu1 %v6727_v28  ;;  %5657 = vmatpush.msrb.mxu2 %v6711_v53  ;;  %v5727_v53 = vrot.slane %v12865_v13, 5 }
 0x973   :  { %5677 = vmatpush.msrb.mxu3 %v6727_v28  ;;  %5614 = vmatpush.msrb.mxu0 %v6710_v46  ;;  %v5728_v28 = vrot.slane %v12867_v4, 5 }
 0x974   :  { %5634 = vmatpush.msrb.mxu1 %v6726_v45  ;;  %5658 = vmatpush.msrb.mxu2 %v6710_v46  ;;  %v5771_v46 = vrot.slane %v12869_v42, 5 }
 0x975   :  { %5678 = vmatpush.msrb.mxu3 %v6726_v45  ;;  %5615 = vmatpush.msrb.mxu0 %v6709_v23  ;;  %v6780_v45 = vld [vmem:[%s13760_s10 + $0xe78] sm:$0xff] }
 0x976   :  { %5635 = vmatpush.msrb.mxu1 %v6725_v17  ;;  %5659 = vmatpush.msrb.mxu2 %v6709_v23  ;;  %v5772_v23 = vrot.slane %v12874_v55, 5 }
 0x977   :  { %5679 = vmatpush.msrb.mxu3 %v6725_v17  ;;  %5616 = vmatpush.msrb.mxu0 %v6708_v24  ;;  %v6796_v17 = vld [vmem:[%s13760_s10 + $0xef8] sm:$0xff] }
 0x978   :  { %5636 = vmatpush.msrb.mxu1 %v6724_v30  ;;  %5660 = vmatpush.msrb.mxu2 %v6708_v24  ;;  %v6779_v24 = vld [vmem:[%s13760_s10 + $0xe70] sm:$0xff] }
 0x979   :  { %5680 = vmatpush.msrb.mxu3 %v6724_v30  ;;  %5617 = vmatpush.msrb.mxu0 %v6707_v36  ;;  %v6795_v30 = vld [vmem:[%s13760_s10 + $0xef0] sm:$0xff] }
 0x97a   :  { %5637 = vmatpush.msrb.mxu1 %v6723_v2  ;;  %5661 = vmatpush.msrb.mxu2 %v6707_v36  ;;  %v6778_v36 = vld [vmem:[%s13760_s10 + $0xe68] sm:$0xff] }
 0x97b   :  { %5681 = vmatpush.msrb.mxu3 %v6723_v2  ;;  %5618 = vmatpush.msrb.mxu0 %v6706_v52  ;;  %v6794_v2 = vld [vmem:[%s13760_s10 + $0xee8] sm:$0xff] }
 0x97c   :  { %5638 = vmatpush.msrb.mxu1 %v6722_v9  ;;  %5662 = vmatpush.msrb.mxu2 %v6706_v52  ;;  %v6777_v52 = vld [vmem:[%s13760_s10 + $0xe60] sm:$0xff] }
 0x97d   :  { %5682 = vmatpush.msrb.mxu3 %v6722_v9  ;;  %5619 = vmatpush.msrb.mxu0 %v6705_v39  ;;  %v6793_v9 = vld [vmem:[%s13760_s10 + $0xee0] sm:$0xff] }
 0x97e   :  { %5639 = vmatpush.msrb.mxu1 %v6721_v40  ;;  %5663 = vmatpush.msrb.mxu2 %v6705_v39  ;;  %v6776_v39 = vld [vmem:[%s13760_s10 + $0xe58] sm:$0xff] }
 0x97f   :  { %5683 = vmatpush.msrb.mxu3 %v6721_v40  ;;  %5620 = vmatpush.msrb.mxu0 %v6704_v50  ;;  %v6792_v40 = vld [vmem:[%s13760_s10 + $0xed8] sm:$0xff] }
 0x980   :  { %5640 = vmatpush.msrb.mxu1 %v6720_v48  ;;  %5664 = vmatpush.msrb.mxu2 %v6704_v50  ;;  %v6775_v50 = vld [vmem:[%s13760_s10 + $0xe50] sm:$0xff] }
 0x981   :  { %5684 = vmatpush.msrb.mxu3 %v6720_v48  ;;  %5621 = vmatpush.msrb.mxu0 %v6703_v10  ;;  %v6791_v48 = vld [vmem:[%s13760_s10 + $0xed0] sm:$0xff] }
 0x982   :  { %5641 = vmatpush.msrb.mxu1 %v6719_v27  ;;  %5665 = vmatpush.msrb.mxu2 %v6703_v10  ;;  %v6774_v10 = vld [vmem:[%s13760_s10 + $0xe48] sm:$0xff] }
 0x983   :  { %5685 = vmatpush.msrb.mxu3 %v6719_v27  ;;  %5622 = vmatpush.msrb.mxu0 %v6702_v41  ;;  %v6790_v27 = vld [vmem:[%s13760_s10 + $0xec8] sm:$0xff] }
 0x984   :  { %5642 = vmatpush.msrb.mxu1 %v6718_v26  ;;  %5666 = vmatpush.msrb.mxu2 %v6702_v41  ;;  %v6773_v41 = vld [vmem:[%s13760_s10 + $0xe40] sm:$0xff] }
 0x985   :  { %5686 = vmatpush.msrb.mxu3 %v6718_v26  ;;  %5623 = vmatpush.msrb.mxu0 %v6701_v0  ;;  %v6789_v26 = vld [vmem:[%s13760_s10 + $0xec0] sm:$0xff] }
 0x986   :  { %5643 = vmatpush.msrb.mxu1 %v6717_v37  ;;  %5667 = vmatpush.msrb.mxu2 %v6701_v0  ;;  %v6772_v0 = vld [vmem:[%s13760_s10 + $0xe38] sm:$0xff] }
 0x987   :  { %5687 = vmatpush.msrb.mxu3 %v6717_v37  ;;  %5624 = vmatmul.f32.vlgmr.msrb.gmra.mxu0 %v5604_v25  ;;  %v6788_v37 = vld [vmem:[%s13760_s10 + $0xeb8] sm:$0xff]  ;;  %v6771_v25 = vld [vmem:[%s13760_s10 + $0xe30] sm:$0xff] }
 0x988   :  { %5644 = vmatmul.f32.vlgmr.msrb.gmra.mxu1 %v5605_v59  ;;  %5668 = vmatmul.f32.vlgmr.msrb.gmra.mxu2 %v5648_v51  ;;  %v6787_v59 = vld [vmem:[%s13760_s10 + $0xeb0] sm:$0xff]  ;;  %v6770_v51 = vld [vmem:[%s13760_s10 + $0xe28] sm:$0xff] }
 0x989   :  { %5688 = vmatmul.f32.vlgmr.msrb.gmra.mxu3 %v5649_v34  ;;  %5731 = vmatpush.msra.mxu0 %v6748_v32  ;;  %v6769_v34 = vld [vmem:[%s13760_s10 + $0xe20] sm:$0xff] }
 0x98a   :  { %5751 = vmatpush.msra.mxu1 %v6764_v7  ;;  %5775 = vmatpush.msra.mxu2 %v6748_v32  ;;  %v6786_v32 = vld [vmem:[%s13760_s10 + $0xea8] sm:$0xff] }
 0x98b   :  { %5795 = vmatpush.msra.mxu3 %v6764_v7  ;;  %5732 = vmatpush.msra.mxu0 %v6747_v60  ;;  %v6785_v7 = vld [vmem:[%s13760_s10 + $0xea0] sm:$0xff] }
 0x98c   :  { %5752 = vmatpush.msra.mxu1 %v6763_v22  ;;  %5776 = vmatpush.msra.mxu2 %v6747_v60  ;;  %v6768_v60 = vld [vmem:[%s13760_s10 + $0xe18] sm:$0xff] }
 0x98d   :  { %5796 = vmatpush.msra.mxu3 %v6763_v22  ;;  %5733 = vmatpush.msra.mxu0 %v6746_v15  ;;  %v6784_v22 = vld [vmem:[%s13760_s10 + $0xe98] sm:$0xff] }
 0x98e   :  { %5753 = vmatpush.msra.mxu1 %v6762_v54  ;;  %5777 = vmatpush.msra.mxu2 %v6746_v15  ;;  %v6767_v15 = vld [vmem:[%s13760_s10 + $0xe10] sm:$0xff] }
 0x98f   :  { %5797 = vmatpush.msra.mxu3 %v6762_v54  ;;  %5734 = vmatpush.msra.mxu0 %v6745_v33  ;;  %v6783_v54 = vld [vmem:[%s13760_s10 + $0xe90] sm:$0xff] }
 0x990   :  { %5754 = vmatpush.msra.mxu1 %v6761_v56  ;;  %5778 = vmatpush.msra.mxu2 %v6745_v33  ;;  %v6766_v33 = vld [vmem:[%s13760_s10 + $0xe08] sm:$0xff] }
 0x991   :  { %5798 = vmatpush.msra.mxu3 %v6761_v56  ;;  %5735 = vmatpush.msra.mxu0 %v6744_v35  ;;  %v6782_v56 = vld [vmem:[%s13760_s10 + $0xe88] sm:$0xff] }
 0x992   :  { %5755 = vmatpush.msra.mxu1 %v6760_v16  ;;  %5779 = vmatpush.msra.mxu2 %v6744_v35  ;;  %v6765_v35 = vld [vmem:[%s13760_s10 + $0xe00] sm:$0xff] }
 0x993   :  { %5799 = vmatpush.msra.mxu3 %v6760_v16  ;;  %5736 = vmatpush.msra.mxu0 %v6743_v62  ;;  %v6781_v16 = vld [vmem:[%s13760_s10 + $0xe80] sm:$0xff] }
 0x994   :  { %5756 = vmatpush.msra.mxu1 %v6759_v43  ;;  %5780 = vmatpush.msra.mxu2 %v6743_v62  ;;  %v5850_v62 = vrot.slane %v12865_v13, 6 }
 0x995   :  { %5800 = vmatpush.msra.mxu3 %v6759_v43  ;;  %5737 = vmatpush.msra.mxu0 %v6742_v44  ;;  %v5851_v43 = vrot.slane %v12867_v4, 6 }
 0x996   :  { %5757 = vmatpush.msra.mxu1 %v6758_v6  ;;  %5781 = vmatpush.msra.mxu2 %v6742_v44  ;;  %v5894_v44 = vrot.slane %v12869_v42, 6 }
 0x997   :  { %5801 = vmatpush.msra.mxu3 %v6758_v6  ;;  %5738 = vmatpush.msra.mxu0 %v6741_v8  ;;  %v6812_v6 = vld [vmem:[%s13760_s10 + $0xf78] sm:$0xff] }
 0x998   :  { %5758 = vmatpush.msra.mxu1 %v6757_v20  ;;  %5782 = vmatpush.msra.mxu2 %v6741_v8  ;;  %v5895_v8 = vrot.slane %v12874_v55, 6 }
 0x999   :  { %5802 = vmatpush.msra.mxu3 %v6757_v20  ;;  %5739 = vmatpush.msra.mxu0 %v6740_v58  ;;  %v6828_v20 = vld [vmem:[%s13760_s10 + $0xff8] sm:$0xff] }
 0x99a   :  { %5759 = vmatpush.msra.mxu1 %v6756_v1  ;;  %5783 = vmatpush.msra.mxu2 %v6740_v58  ;;  %v6811_v58 = vld [vmem:[%s13760_s10 + $0xf70] sm:$0xff] }
 0x99b   :  { %5803 = vmatpush.msra.mxu3 %v6756_v1  ;;  %5740 = vmatpush.msra.mxu0 %v6739_v3  ;;  %v6827_v1 = vld [vmem:[%s13760_s10 + $0xff0] sm:$0xff] }
 0x99c   :  { %5760 = vmatpush.msra.mxu1 %v6755_v18  ;;  %5784 = vmatpush.msra.mxu2 %v6739_v3  ;;  %v6810_v3 = vld [vmem:[%s13760_s10 + $0xf68] sm:$0xff] }
 0x99d   :  { %5804 = vmatpush.msra.mxu3 %v6755_v18  ;;  %5741 = vmatpush.msra.mxu0 %v6738_v5  ;;  %v6826_v18 = vld [vmem:[%s13760_s10 + $0xfe8] sm:$0xff] }
 0x99e   :  { %5761 = vmatpush.msra.mxu1 %v6754_v49  ;;  %5785 = vmatpush.msra.mxu2 %v6738_v5  ;;  %v6809_v5 = vld [vmem:[%s13760_s10 + $0xf60] sm:$0xff] }
 0x99f   :  { %5805 = vmatpush.msra.mxu3 %v6754_v49  ;;  %5742 = vmatpush.msra.mxu0 %v6737_v19  ;;  %v6825_v49 = vld [vmem:[%s13760_s10 + $0xfe0] sm:$0xff] }
 0x9a0   :  { %5762 = vmatpush.msra.mxu1 %v6753_v21  ;;  %5786 = vmatpush.msra.mxu2 %v6737_v19  ;;  %v6808_v19 = vld [vmem:[%s13760_s10 + $0xf58] sm:$0xff] }
 0x9a1   :  { %5806 = vmatpush.msra.mxu3 %v6753_v21  ;;  %5743 = vmatpush.msra.mxu0 %v6736_v61  ;;  %v6824_v21 = vld [vmem:[%s13760_s10 + $0xfd8] sm:$0xff] }
 0x9a2   :  { %5763 = vmatpush.msra.mxu1 %v6752_v12  ;;  %5787 = vmatpush.msra.mxu2 %v6736_v61  ;;  %v6807_v61 = vld [vmem:[%s13760_s10 + $0xf50] sm:$0xff] }
 0x9a3   :  { %5807 = vmatpush.msra.mxu3 %v6752_v12  ;;  %5744 = vmatpush.msra.mxu0 %v6735_v11  ;;  %v6823_v12 = vld [vmem:[%s13760_s10 + $0xfd0] sm:$0xff] }
 0x9a4   :  { %5764 = vmatpush.msra.mxu1 %v6751_v63  ;;  %5788 = vmatpush.msra.mxu2 %v6735_v11  ;;  %v6806_v11 = vld [vmem:[%s13760_s10 + $0xf48] sm:$0xff] }
 0x9a5   :  { %5808 = vmatpush.msra.mxu3 %v6751_v63  ;;  %5745 = vmatpush.msra.mxu0 %v6734_v38  ;;  %v6822_v63 = vld [vmem:[%s13760_s10 + $0xfc8] sm:$0xff] }
 0x9a6   :  { %5765 = vmatpush.msra.mxu1 %v6750_v14  ;;  %5789 = vmatpush.msra.mxu2 %v6734_v38  ;;  %v6805_v38 = vld [vmem:[%s13760_s10 + $0xf40] sm:$0xff] }
 0x9a7   :  { %5809 = vmatpush.msra.mxu3 %v6750_v14  ;;  %5746 = vmatpush.msra.mxu0 %v6733_v57  ;;  %v6821_v14 = vld [vmem:[%s13760_s10 + $0xfc0] sm:$0xff] }
 0x9a8   :  { %5766 = vmatpush.msra.mxu1 %v6749_v29  ;;  %5790 = vmatpush.msra.mxu2 %v6733_v57  ;;  %v6804_v57 = vld [vmem:[%s13760_s10 + $0xf38] sm:$0xff] }
 0x9a9   :  { %5810 = vmatpush.msra.mxu3 %v6749_v29  ;;  %5747 = vmatmul.f32.vlgmr.msra.gmra.mxu0 %v5727_v53  ;;  %v6820_v29 = vld [vmem:[%s13760_s10 + $0xfb8] sm:$0xff]  ;;  %v6803_v53 = vld [vmem:[%s13760_s10 + $0xf30] sm:$0xff] }
 0x9aa   :  { %5767 = vmatmul.f32.vlgmr.msra.gmra.mxu1 %v5728_v28  ;;  %5791 = vmatmul.f32.vlgmr.msra.gmra.mxu2 %v5771_v46  ;;  %v6819_v28 = vld [vmem:[%s13760_s10 + $0xfb0] sm:$0xff]  ;;  %v6802_v46 = vld [vmem:[%s13760_s10 + $0xf28] sm:$0xff] }
 0x9ab   :  { %5811 = vmatmul.f32.vlgmr.msra.gmra.mxu3 %v5772_v23  ;;  %5854 = vmatpush.msrb.mxu0 %v6780_v45  ;;  %v6801_v23 = vld [vmem:[%s13760_s10 + $0xf20] sm:$0xff] }
 0x9ac   :  { %5874 = vmatpush.msrb.mxu1 %v6796_v17  ;;  %5898 = vmatpush.msrb.mxu2 %v6780_v45  ;;  %v6818_v45 = vld [vmem:[%s13760_s10 + $0xfa8] sm:$0xff] }
 0x9ad   :  { %5918 = vmatpush.msrb.mxu3 %v6796_v17  ;;  %5855 = vmatpush.msrb.mxu0 %v6779_v24  ;;  %v6817_v17 = vld [vmem:[%s13760_s10 + $0xfa0] sm:$0xff] }
 0x9ae   :  { %5875 = vmatpush.msrb.mxu1 %v6795_v30  ;;  %5899 = vmatpush.msrb.mxu2 %v6779_v24  ;;  %v6800_v24 = vld [vmem:[%s13760_s10 + $0xf18] sm:$0xff] }
 0x9af   :  { %5919 = vmatpush.msrb.mxu3 %v6795_v30  ;;  %5856 = vmatpush.msrb.mxu0 %v6778_v36  ;;  %v6816_v30 = vld [vmem:[%s13760_s10 + $0xf98] sm:$0xff] }
 0x9b0   :  { %5876 = vmatpush.msrb.mxu1 %v6794_v2  ;;  %5900 = vmatpush.msrb.mxu2 %v6778_v36  ;;  %v6799_v36 = vld [vmem:[%s13760_s10 + $0xf10] sm:$0xff] }
 0x9b1   :  { %5920 = vmatpush.msrb.mxu3 %v6794_v2  ;;  %5857 = vmatpush.msrb.mxu0 %v6777_v52  ;;  %v6815_v2 = vld [vmem:[%s13760_s10 + $0xf90] sm:$0xff] }
 0x9b2   :  { %5877 = vmatpush.msrb.mxu1 %v6793_v9  ;;  %5901 = vmatpush.msrb.mxu2 %v6777_v52  ;;  %v6798_v52 = vld [vmem:[%s13760_s10 + $0xf08] sm:$0xff] }
 0x9b3   :  { %5921 = vmatpush.msrb.mxu3 %v6793_v9  ;;  %5858 = vmatpush.msrb.mxu0 %v6776_v39  ;;  %v6814_v9 = vld [vmem:[%s13760_s10 + $0xf88] sm:$0xff] }
 0x9b4   :  { %5878 = vmatpush.msrb.mxu1 %v6792_v40  ;;  %5902 = vmatpush.msrb.mxu2 %v6776_v39  ;;  %v6797_v39 = vld [vmem:[%s13760_s10 + $0xf00] sm:$0xff] }
 0x9b5   :  { %5922 = vmatpush.msrb.mxu3 %v6792_v40  ;;  %5859 = vmatpush.msrb.mxu0 %v6775_v50  ;;  %v6813_v40 = vld [vmem:[%s13760_s10 + $0xf80] sm:$0xff] }
 0x9b6   :  { %5879 = vmatpush.msrb.mxu1 %v6791_v48  ;;  %5903 = vmatpush.msrb.mxu2 %v6775_v50  ;;  %v5973_v50 = vrot.slane %v12865_v13, 7  ;;  %v13586_v13 = vpop.f32.mrf.mxu3 }
 0x9b7   :  { %5923 = vmatpush.msrb.mxu3 %v6791_v48  ;;  %5860 = vmatpush.msrb.mxu0 %v6774_v10  ;;  %v5974_v48 = vrot.slane %v12867_v4, 7 }
 0x9b8   :  { %5880 = vmatpush.msrb.mxu1 %v6790_v27  ;;  %5904 = vmatpush.msrb.mxu2 %v6774_v10  ;;  %v6017_v10 = vrot.slane %v12869_v42, 7 }
 0x9b9   :  { %5924 = vmatpush.msrb.mxu3 %v6790_v27  ;;  %5861 = vmatpush.msrb.mxu0 %v6773_v41  ;;  %v6018_v27 = vrot.slane %v12874_v55, 7 }
 0x9ba   :  { %5881 = vmatpush.msrb.mxu1 %v6789_v26  ;;  %5905 = vmatpush.msrb.mxu2 %v6773_v41  ;;  %v13580_v41 = vpop.f32.mrf.mxu0 }
 0x9bb   :  { %5925 = vmatpush.msrb.mxu3 %v6789_v26  ;;  %5862 = vmatpush.msrb.mxu0 %v6772_v0  ;;  %v13582_v26 = vpop.f32.mrf.mxu1 }
 0x9bc   :  { %5882 = vmatpush.msrb.mxu1 %v6788_v37  ;;  %5906 = vmatpush.msrb.mxu2 %v6772_v0  ;;  %v13584_v0 = vpop.f32.mrf.mxu2 }
 0x9bd   :  { %5926 = vmatpush.msrb.mxu3 %v6788_v37  ;;  %5863 = vmatpush.msrb.mxu0 %v6771_v25 }
 0x9be   :  { %5883 = vmatpush.msrb.mxu1 %v6787_v59  ;;  %5907 = vmatpush.msrb.mxu2 %v6771_v25  ;;  %v13594_v25 = vpop.f32.mrf.mxu3 }
 0x9bf   :  { %5927 = vmatpush.msrb.mxu3 %v6787_v59  ;;  %5864 = vmatpush.msrb.mxu0 %v6770_v51 }
 0x9c0   :  { %5884 = vmatpush.msrb.mxu1 %v6786_v32  ;;  %5908 = vmatpush.msrb.mxu2 %v6770_v51 }
 0x9c1   :  { %5928 = vmatpush.msrb.mxu3 %v6786_v32  ;;  %5865 = vmatpush.msrb.mxu0 %v6769_v34 }
 0x9c2   :  { %5885 = vmatpush.msrb.mxu1 %v6785_v7  ;;  %5909 = vmatpush.msrb.mxu2 %v6769_v34  ;;  %v13588_v37 = vpop.f32.mrf.mxu0 }
 0x9c3   :  { %5929 = vmatpush.msrb.mxu3 %v6785_v7  ;;  %5866 = vmatpush.msrb.mxu0 %v6768_v60  ;;  %v13590_v4 = vpop.f32.mrf.mxu1 }
 0x9c4   :  { %5886 = vmatpush.msrb.mxu1 %v6784_v22  ;;  %5910 = vmatpush.msrb.mxu2 %v6768_v60  ;;  %v13592_v42 = vpop.f32.mrf.mxu2  ;;  %v6082_v60 = vld [vmem:[%s13762_s12 + $0x70] sm:$0xff] }
 0x9c5   :  { %5930 = vmatpush.msrb.mxu3 %v6784_v22  ;;  %5867 = vmatpush.msrb.mxu0 %v6767_v15  ;;  %v6081_v22 = vld [vmem:[%s13762_s12 + $0x68] sm:$0xff] }
 0x9c6   :  { %5887 = vmatpush.msrb.mxu1 %v6783_v54  ;;  %5911 = vmatpush.msrb.mxu2 %v6767_v15  ;;  %v13602_v32 = vpop.f32.mrf.mxu3  ;;  %v6080_v15 = vld [vmem:[%s13762_s12 + $0x60] sm:$0xff] }
 0x9c7   :  { %5931 = vmatpush.msrb.mxu3 %v6783_v54  ;;  %5868 = vmatpush.msrb.mxu0 %v6766_v33  ;;  %v6079_v54 = vld [vmem:[%s13762_s12 + $0x58] sm:$0xff] }
 0x9c8   :  { %5888 = vmatpush.msrb.mxu1 %v6782_v56  ;;  %5912 = vmatpush.msrb.mxu2 %v6766_v33 }
 0x9c9   :  { %5932 = vmatpush.msrb.mxu3 %v6782_v56  ;;  %5869 = vmatpush.msrb.mxu0 %v6765_v35  ;;  %v6078_v56 = vld [vmem:[%s13762_s12 + $0x50] sm:$0xff] }
 0x9ca   :  { %5889 = vmatpush.msrb.mxu1 %v6781_v16  ;;  %5913 = vmatpush.msrb.mxu2 %v6765_v35  ;;  %v13596_v55 = vpop.f32.mrf.mxu0 }
 0x9cb   :  { %5933 = vmatpush.msrb.mxu3 %v6781_v16  ;;  %5870 = vmatmul.f32.vlgmr.msrb.gmra.mxu0 %v5850_v62  ;;  %v13598_v59 = vpop.f32.mrf.mxu1 }
 0x9cc   :  { %5890 = vmatmul.f32.vlgmr.msrb.gmra.mxu1 %v5851_v43  ;;  %5914 = vmatmul.f32.vlgmr.msrb.gmra.mxu2 %v5894_v44  ;;  %v13600_v51 = vpop.f32.mrf.mxu2  ;;  %v6077_v43 = vld [vmem:[%s13762_s12 + $0x48] sm:$0xff]  ;;  %v6076_v44 = vld [vmem:[%s13762_s12 + $0x40] sm:$0xff] }
 0x9cd   :  { %5934 = vmatmul.f32.vlgmr.msrb.gmra.mxu3 %v5895_v8  ;;  %5977 = vmatpush.msra.mxu0 %v6812_v6 }
 0x9ce   :  { %5997 = vmatpush.msra.mxu1 %v6828_v20  ;;  %6021 = vmatpush.msra.mxu2 %v6812_v6  ;;  %v13625_v35 = vpop.f32.mrf.mxu3  ;;  %v6075_v6 = vld [vmem:[%s13762_s12 + $0x38] sm:$0xff] }
 0x9cf   :  { %6041 = vmatpush.msra.mxu3 %v6828_v20  ;;  %5978 = vmatpush.msra.mxu0 %v6811_v58  ;;  %v6074_v20 = vld [vmem:[%s13762_s12 + $0x30] sm:$0xff] }
 0x9d0   :  { %5998 = vmatpush.msra.mxu1 %v6827_v1  ;;  %6022 = vmatpush.msra.mxu2 %v6811_v58 }
 0x9d1   :  { %6042 = vmatpush.msra.mxu3 %v6827_v1  ;;  %5979 = vmatpush.msra.mxu0 %v6810_v3 }
 0x9d2   :  { %5999 = vmatpush.msra.mxu1 %v6826_v18  ;;  %6023 = vmatpush.msra.mxu2 %v6810_v3  ;;  %v13604_v34 = vpop.f32.mrf.mxu0 }
 0x9d3   :  { %6043 = vmatpush.msra.mxu3 %v6826_v18  ;;  %5980 = vmatpush.msra.mxu0 %v6809_v5  ;;  %v13606_v7 = vpop.f32.mrf.mxu1  ;;  %v6073_v18 = vld [vmem:[%s13762_s12 + $0x28] sm:$0xff] }
 0x9d4   :  { %6000 = vmatpush.msra.mxu1 %v6825_v49  ;;  %6024 = vmatpush.msra.mxu2 %v6809_v5  ;;  %v13620_v33 = vpop.f32.mrf.mxu2 }
 0x9d5   :  { %6044 = vmatpush.msra.mxu3 %v6825_v49  ;;  %5981 = vmatpush.msra.mxu0 %v6808_v19 }
 0x9d6   :  { %6001 = vmatpush.msra.mxu1 %v6824_v21  ;;  %6025 = vmatpush.msra.mxu2 %v6808_v19  ;;  %v13645_v58 = vpop.f32.mrf.mxu3 }
 0x9d7   :  { %6045 = vmatpush.msra.mxu3 %v6824_v21  ;;  %5982 = vmatpush.msra.mxu0 %v6807_v61 }
 0x9d8   :  { %6002 = vmatpush.msra.mxu1 %v6823_v12  ;;  %6026 = vmatpush.msra.mxu2 %v6807_v61  ;;  %v6072_v61 = vld [vmem:[%s13762_s12 + $0x20] sm:$0xff] }
 0x9d9   :  { %6046 = vmatpush.msra.mxu3 %v6823_v12  ;;  %5983 = vmatpush.msra.mxu0 %v6806_v11  ;;  %v6071_v12 = vld [vmem:[%s13762_s12 + $0x18] sm:$0xff] }
 0x9da   :  { %6003 = vmatpush.msra.mxu1 %v6822_v63  ;;  %6027 = vmatpush.msra.mxu2 %v6806_v11  ;;  %v13627_v16 = vpop.f32.mrf.mxu0  ;;  %v6070_v11 = vld [vmem:[%s13762_s12 + $0x10] sm:$0xff] }
 0x9db   :  { %6047 = vmatpush.msra.mxu3 %v6822_v63  ;;  %5984 = vmatpush.msra.mxu0 %v6805_v38  ;;  %v13629_v62 = vpop.f32.mrf.mxu1 }
 0x9dc   :  { %6004 = vmatpush.msra.mxu1 %v6821_v14  ;;  %6028 = vmatpush.msra.mxu2 %v6805_v38  ;;  %v13640_v8 = vpop.f32.mrf.mxu2  ;;  %v6069_v38 = vld [vmem:[%s13762_s12 + $0x8] sm:$0xff] }
 0x9dd   :  { %6048 = vmatpush.msra.mxu3 %v6821_v14  ;;  %5985 = vmatpush.msra.mxu0 %v6804_v57 }
 0x9de   :  { %6005 = vmatpush.msra.mxu1 %v6820_v29  ;;  %6029 = vmatpush.msra.mxu2 %v6804_v57  ;;  %v13652_v49 = vpop.f32.mrf.mxu3 }
 0x9df   :  { %6049 = vmatpush.msra.mxu3 %v6820_v29  ;;  %5986 = vmatpush.msra.mxu0 %v6803_v53 }
 0x9e0   :  { %6006 = vmatpush.msra.mxu1 %v6819_v28  ;;  %6030 = vmatpush.msra.mxu2 %v6803_v53  ;;  %v6068_v53 = vld [vmem:[%s13762_s12] sm:$0xff] }
 0x9e1   :  { %6050 = vmatpush.msra.mxu3 %v6819_v28  ;;  %5987 = vmatpush.msra.mxu0 %v6802_v46  ;;  %v4789_v28 = vadd.f32 %v13582_v26, %v13580_v41 }
 0x9e2   :  { %6007 = vmatpush.msra.mxu1 %v6818_v45  ;;  %6031 = vmatpush.msra.mxu2 %v6802_v46  ;;  %v5379_v1 = vpop.f32.mrf.mxu0  ;;  %v4912_v46 = vadd.f32 %v13590_v4, %v13588_v37  ;;  %v6139_v4 = vld [vmem:[%s13764_s14 + $0x30] sm:$0xff] }
 0x9e3   :  { %6051 = vmatpush.msra.mxu3 %v6818_v45  ;;  %5988 = vmatpush.msra.mxu0 %v6801_v23  ;;  %v5399_v3 = vpop.f32.mrf.mxu1 }
 0x9e4   :  { %6008 = vmatpush.msra.mxu1 %v6817_v17  ;;  %6032 = vmatpush.msra.mxu2 %v6801_v23  ;;  %v13650_v5 = vpop.f32.mrf.mxu2  ;;  %v4835_v23 = vadd.f32 %v4789_v28, %v12854_v31  ;;  %v5154_v31 = vadd.f32 %v13606_v7, %v13604_v34  ;;  %v5400_v26 = vadd.f32 %v5399_v3, %v5379_v1 }
 0x9e5   :  { %6052 = vmatpush.msra.mxu3 %v6817_v17  ;;  %5989 = vmatpush.msra.mxu0 %v6800_v24  ;;  %v5035_v17 = vadd.f32 %v13598_v59, %v13596_v55  ;;  %v5194_v7 = vadd.f32 %v13625_v35, %v13620_v33  ;;  %v5444_v35 = vadd.f32 %v13652_v49, %v13650_v5 }
 0x9e6   :  { %6009 = vmatpush.msra.mxu1 %v6816_v30  ;;  %6033 = vmatpush.msra.mxu2 %v6800_v24 }
 0x9e7   :  { %6053 = vmatpush.msra.mxu3 %v6816_v30  ;;  %5990 = vmatpush.msra.mxu0 %v6799_v36 }
 0x9e8   :  { %6010 = vmatpush.msra.mxu1 %v6815_v2  ;;  %6034 = vmatpush.msra.mxu2 %v6799_v36 }
 0x9e9   :  { %6054 = vmatpush.msra.mxu3 %v6815_v2  ;;  %5991 = vmatpush.msra.mxu0 %v6798_v52  ;;  %v6143_v2 = vld [vmem:[%s13764_s14 + $0x50] sm:$0xf] }
 0x9ea   :  { %6011 = vmatpush.msra.mxu1 %v6814_v9  ;;  %6035 = vmatpush.msra.mxu2 %v6798_v52  ;;  %v5502_v19 = vpop.f32.mrf.mxu0  ;;  %v13668_v14 = vpop.f32.mrf.mxu3  ;;  %v6142_v52 = vld [vmem:[%s13764_s14 + $0x48] sm:$0xff] }
 0x9eb   :  { %6055 = vmatpush.msra.mxu3 %v6814_v9  ;;  %5992 = vmatpush.msra.mxu0 %v6797_v39  ;;  %v5522_v21 = vpop.f32.mrf.mxu1  ;;  %v4958_v9 = vadd.f32 %v4912_v46, %v4835_v23 }
 0x9ec   :  { %6012 = vmatpush.msra.mxu1 %v6813_v40  ;;  %6036 = vmatpush.msra.mxu2 %v6797_v39  ;;  %v13663_v63 = vpop.f32.mrf.mxu2  ;;  %v4833_v39 = vadd.f32 %v13586_v13, %v13584_v0  ;;  %v5079_v13 = vadd.f32 %v13602_v32, %v13600_v51 }
 0x9ed   :  { %6056 = vmatpush.msra.mxu3 %v6813_v40  ;;  %5993 = vmatmul.f32.vlgmr.msra.gmra.mxu0 %v5973_v50  ;;  %v6141_v40 = vld [vmem:[%s13764_s14 + $0x40] sm:$0xff]  ;;  %v5081_v50 = vadd.f32 %v5035_v17, %v4958_v9 }
 0x9ee   :  { %6013 = vmatmul.f32.vlgmr.msra.gmra.mxu1 %v5974_v48  ;;  %6037 = vmatmul.f32.vlgmr.msra.gmra.mxu2 %v6017_v10  ;;  %v5275_v48 = vadd.f32 %v13629_v62, %v13627_v16  ;;  %v4956_v10 = vadd.f32 %v13594_v25, %v13592_v42  ;;  %v4836_v0 = vadd.f32 %v4833_v39, %v12881_v47  ;;  %v6138_v47 = vld [vmem:[%s13764_s14 + $0x28] sm:$0xff]  ;;  %v6136_v62 = vld [vmem:[%s13764_s14 + $0x18] sm:$0xff]  ;;  %v6083_v9 = vld [vmem:[%s13763_s13] sm:$0x1] }
 0x9ef   :  { %6057 = vmatmul.f32.vlgmr.msra.gmra.mxu3 %v6018_v27  ;;  %6089 = vmatpush.msrb.mxu0 %v6082_v60  ;;  %v6140_v27 = vld [vmem:[%s13764_s14 + $0x38] sm:$0xff]  ;;  %v5196_v41 = vadd.f32 %v5154_v31, %v5081_v50  ;;  %v5523_v42 = vadd.f32 %v5522_v21, %v5502_v19 }
 0x9f0   :  { %6112 = vmatpush.msrb.mxu1 %v6082_v60  ;;  %6831 = vmatpush.msk.msrb.mxu2 %vm6149_vm6, %v6143_v2  ;;  %v4959_v34 = vadd.f32 %v4956_v10, %v4836_v0 }
 0x9f1   :  { %6090 = vmatpush.msrb.mxu0 %v6081_v22  ;;  %6833 = vmatpush.msk.msrb.mxu3 %vm6149_vm6, %v6143_v2  ;;  %v5323_v55 = vadd.f32 %v5275_v48, %v5196_v41  ;;  %v6134_v2 = vld [vmem:[%s13764_s14 + $0x8] sm:$0xff] }
 0x9f2   :  { %6113 = vmatpush.msrb.mxu1 %v6081_v22  ;;  %6159 = vmatpush.msrb.mxu2 %v6142_v52  ;;  %v5082_v22 = vadd.f32 %v5079_v13, %v4959_v34 }
 0x9f3   :  { %6091 = vmatpush.msrb.mxu0 %v6080_v15  ;;  %6182 = vmatpush.msrb.mxu3 %v6142_v52  ;;  %v5446_v51 = vadd.f32 %v5400_v26, %v5323_v55  ;;  %v6133_v52 = vld [vmem:[%s13764_s14] sm:$0xff] }
 0x9f4   :  { %6114 = vmatpush.msrb.mxu1 %v6080_v15  ;;  %6160 = vmatpush.msrb.mxu2 %v6141_v40  ;;  %v5321_v15 = vadd.f32 %v13645_v58, %v13640_v8  ;;  %v5197_v33 = vadd.f32 %v5194_v7, %v5082_v22  ;;  %v5567_v8 = vadd.f32 %v13668_v14, %v13663_v63 }
 0x9f5   :  { %6092 = vmatpush.msrb.mxu0 %v6079_v54  ;;  %6183 = vmatpush.msrb.mxu3 %v6141_v40 }
 0x9f6   :  { %6115 = vmatpush.msrb.mxu1 %v6079_v54  ;;  %6161 = vmatpush.msrb.mxu2 %v6140_v27  ;;  %v6137_v54 = vld [vmem:[%s13764_s14 + $0x20] sm:$0xff] }
 0x9f7   :  { %6093 = vmatpush.msrb.mxu0 %v6078_v56  ;;  %6184 = vmatpush.msrb.mxu3 %v6140_v27  ;;  %v6144_v27 = vld [vmem:[%s13765_s15] sm:$0x1] }
 0x9f8   :  { %6116 = vmatpush.msrb.mxu1 %v6078_v56  ;;  %6162 = vmatpush.msrb.mxu2 %v6139_v4  ;;  %v5569_v56 = vadd.f32 %v5523_v42, %v5446_v51 }
 0x9f9   :  { %6094 = vmatpush.msrb.mxu0 %v6077_v43  ;;  %6185 = vmatpush.msrb.mxu3 %v6139_v4 }
 0x9fa   :  { %6117 = vmatpush.msrb.mxu1 %v6077_v43  ;;  %6163 = vmatpush.msrb.mxu2 %v6138_v47 }
 0x9fb   :  { %6095 = vmatpush.msrb.mxu0 %v6076_v44  ;;  %6186 = vmatpush.msrb.mxu3 %v6138_v47 }
 0x9fc   :  { %6118 = vmatpush.msrb.mxu1 %v6076_v44  ;;  %6164 = vmatpush.msrb.mxu2 %v6137_v54 }
 0x9fd   :  { %6096 = vmatpush.msrb.mxu0 %v6075_v6  ;;  %6187 = vmatpush.msrb.mxu3 %v6137_v54 }
 0x9fe   :  { %6119 = vmatpush.msrb.mxu1 %v6075_v6  ;;  %v5324_v6 = vadd.f32 %v5321_v15, %v5197_v33  ;;  %6165 = vmatpush.msrb.mxu2 %v6136_v62 }
 0x9ff   :  { %6097 = vmatpush.msrb.mxu0 %v6074_v20  ;;  %6188 = vmatpush.msrb.mxu3 %v6136_v62 }
 0xa00   :  { %6120 = vmatpush.msrb.mxu1 %v6074_v20 }
 0xa01   :  { %6098 = vmatpush.msrb.mxu0 %v6073_v18 }
 0xa02   :  { %6121 = vmatpush.msrb.mxu1 %v6073_v18  ;;  %v5447_v18 = vadd.f32 %v5444_v35, %v5324_v6 }
 0xa03   :  { %6099 = vmatpush.msrb.mxu0 %v6072_v61 }
 0xa04   :  { %6122 = vmatpush.msrb.mxu1 %v6072_v61  ;;  %v5625_v57 = vpop.f32.mrf.mxu0  ;;  %v5570_v61 = vadd.f32 %v5567_v8, %v5447_v18 }
 0xa05   :  { %6100 = vmatpush.msrb.mxu0 %v6071_v12  ;;  %v5645_v29 = vpop.f32.mrf.mxu1 }
 0xa06   :  { %6123 = vmatpush.msrb.mxu1 %v6071_v12  ;;  %v5646_v32 = vadd.f32 %v5645_v29, %v5625_v57 }
 0xa07   :  { %6101 = vmatpush.msrb.mxu0 %v6070_v11 }
 0xa08   :  { %6124 = vmatpush.msrb.mxu1 %v6070_v11  ;;  %v5692_v43 = vadd.f32 %v5646_v32, %v5569_v56  ;;  %v6063_v11 = vld [vmem:[%s13761_s11] sm:$0x1] }
 0xa09   :  { %6102 = vmatpush.msrb.mxu0 %v6069_v38 }
 0xa0a   :  { %6125 = vmatpush.msrb.mxu1 %v6069_v38 }
 0xa0b   :  { %6103 = vmatpush.msrb.mxu0 %v6068_v53  ;;  %v13677_v45 = vpop.f32.mrf.mxu2 }
 0xa0c   :  { %6126 = vmatpush.msrb.mxu1 %v6068_v53  ;;  %v13682_v24 = vpop.f32.mrf.mxu3 }
 0xa0d   :  { %v5690_v5 = vadd.f32 %v13682_v24, %v13677_v45 }
 0xa0f   :  { %v5693_v38 = vadd.f32 %v5690_v5, %v5570_v61 }
 0xa26   :  { %v5748_v30 = vpop.f32.mrf.mxu0 }
 0xa27   :  { %v5768_v36 = vpop.f32.mrf.mxu1 }
 0xa28   :  { %v5769_v16 = vadd.f32 %v5768_v36, %v5748_v30  ;;  %v6135_v36 = vld [vmem:[%s13764_s14 + $0x10] sm:$0xff]  ;;  %s7239_s14 = smov [#allocation2]  }
 0xa29   :  { %6166 = vmatpush.msrb.mxu2 %v6135_v36  ;;  %6189 = vmatpush.msrb.mxu3 %v6135_v36  ;;  %s6203_s20 = sshll.u32 %s7239_s14, 4  ;;  %s6204_s20 = int_to_ptr.vmem [resolvable:$true] %s6203_s20 }
 0xa2a   :  { %v5815_v58 = vadd.f32 %v5769_v16, %v5692_v43 }
 0xa2b   :  { %6167 = vmatpush.msrb.mxu2 %v6134_v2  ;;  %6190 = vmatpush.msrb.mxu3 %v6134_v2 }
 0xa2d   :  { %v5792_v37 = vpop.f32.mrf.mxu2  ;;  %6168 = vmatpush.msrb.mxu2 %v6133_v52  ;;  %6191 = vmatpush.msrb.mxu3 %v6133_v52 }
 0xa2e   :  { %v5812_v25 = vpop.f32.mrf.mxu3 }
 0xa2f   :  { %v5813_v12 = vadd.f32 %v5812_v25, %v5792_v37 }
 0xa31   :  { %v5816_v29 = vadd.f32 %v5813_v12, %v5693_v38 }
 0xa48   :  { %v5871_v59 = vpop.f32.mrf.mxu0 }
 0xa49   :  { %v5891_v60 = vpop.f32.mrf.mxu1 }
 0xa4a   :  { %v5892_v44 = vadd.f32 %v5891_v60, %v5871_v59 }
 0xa4c   :  { %v5938_v19 = vadd.f32 %v5892_v44, %v5815_v58 }
 0xa4f   :  { %v5915_v20 = vpop.f32.mrf.mxu2 }
 0xa50   :  { %v5935_v1 = vpop.f32.mrf.mxu3 }
 0xa51   :  { %v5936_v14 = vadd.f32 %v5935_v1, %v5915_v20 }
 0xa53   :  { %v5939_v23 = vadd.f32 %v5936_v14, %v5816_v29 }
 0xa6a   :  { %v5994_v3 = vpop.f32.mrf.mxu0 }
 0xa6b   :  { %v6014_v49 = vpop.f32.mrf.mxu1 }
 0xa6c   :  { %v6015_v21 = vadd.f32 %v6014_v49, %v5994_v3 }
 0xa6e   :  { %v6061_v63 = vadd.f32 %v6015_v21, %v5938_v19 }
 0xa70   :  { %v6064_v57 = vadd.f32 %v6063_v11, %v6061_v63 }
 0xa71   :  { %v6038_v53 = vpop.f32.mrf.mxu2 }
 0xa72   :  { %v6066_v28 = vmax.f32 %v6064_v57, 0.0  ;;  %v6058_v46 = vpop.f32.mrf.mxu3 }
 0xa73   :  { %v6059_v45 = vadd.f32 %v6058_v46, %v6038_v53 }
 0xa74   :  { %6829 = vmatmul.msk.f32.vlgmr.msrb.gmra.mxu0 %vm6084_vm7, %v6066_v28 }
 0xa75   :  { %v6062_v17 = vadd.f32 %v6059_v45, %v5939_v23 }
 0xa77   :  { %v6065_v24 = vadd.f32 %v6063_v11, %v6062_v17 }
 0xa79   :  { %v6067_v30 = vmax.f32 %v6065_v24, 0.0 }
 0xa7b   :  { %6830 = vmatmul.msk.f32.vlgmr.msrb.gmra.mxu1 %vm6084_vm7, %v6067_v30 }
 0xaf1   :  { %v6105_v31 = vpop.f32.mrf.mxu0 }
 0xaf2   :  { %v6106_v39 = vadd.f32 %v6105_v31, %v6083_v9 }
 0xaf4   :  { %v6131_v40 = vmax.f32 %v6106_v39, 0.0 }
 0xaf6   :  { %6832 = vmatmul.msk.f32.vlgmr.msrb.gmra.mxu2 %vm6145_vm8, %v6131_v40 }
 0xaf8   :  { %v6128_v50 = vpop.f32.mrf.mxu1 }
 0xaf9   :  { %v6129_v48 = vadd.f32 %v6128_v50, %v6083_v9 }
 0xafb   :  { %v6132_v10 = vmax.f32 %v6129_v48, 0.0 }
 0xafd   :  { %6834 = vmatmul.msk.f32.vlgmr.msrb.gmra.mxu3 %vm6145_vm8, %v6132_v10 }
 0xb79   :  { %v6170_v41 = vpop.f32.mrf.mxu2 }
 0xb7a   :  { %v6171_v26 = vadd.f32 %v6170_v41, %v6144_v27 }
 0xb7c   :  { %6197 = vst.msk [vmem:[#allocation2] sm:$0x1] %vm6196_vm9, %v6171_v26 }
 0xb80   :  { %v6193_v0 = vpop.f32.mrf.mxu3 }
 0xb81   :  { %v6194_v13 = vadd.f32 %v6193_v0, %v6144_v27 }
 0xb83   :  { %6198 = vst.msk [vmem:[#allocation2 + $0x1] sm:$0x1] %vm6196_vm9, %v6194_v13 }
 0xb84   :  { %6211 = dma.vmem_to_hbm [thread:$0]  %s6204_s20, 32, %s6206_s21, [#allocation3], %s7240_s8, %s7240_s8, %s7241_s22  }
 0xb85   :  { %7225 = dma.done.wait [#allocation3], 32  }
 0xb86   :  { %7226 = vsyncadd [#allocation3], 4294967264 }
 0xb87   :  { %6216 = vsyncpa [#allocation3], 1 }

</bundles_post_ra>
